<compile_context>
chip_gen: v6e
topology: v6e:2x2x1
jax: 0.10.0
libtpu: 0.0.40
codegen_flags: <defaults>
</compile_context>

<pallas_src>
import functools

import jax
import jax.numpy as jnp
from jax.experimental import pallas as pl
from jax.experimental.pallas import tpu as pltpu

_BN_EPS = 1e-5


def _round_up(a, m):
    return (a + m - 1) // m * m


def _vmem_bytes(shape, dtype):
    """Rough VMEM footprint of an array in native (8,128)/(16,128) tiled layout."""
    itemsize = jnp.dtype(dtype).itemsize
    sub = 8 * (4 // itemsize)
    dims = list(shape)
    if len(dims) >= 1:
        dims[-1] = _round_up(dims[-1], 128)
    if len(dims) >= 2:
        dims[-2] = _round_up(dims[-2], sub)
    total = 1
    for d in dims:
        total *= d
    return total * itemsize


# ------------------------------ Pallas kernels ------------------------------

def _fused_conv_bn_pool_kernel(xk_ref, wk_ref, g_ref, b_ref, out_ref,
                               y_scr, stat_scr, *,
                               kh_taps, ow, ph_out, pw_out, tn, n_images,
                               n_valid, eps):
    """Fused Conv(3x3 as kh-shifted matmuls) + BatchNorm(batch stats) + ReLU + MaxPool2.

    xk_ref:  (TN, H*OW, KW*Cin) bf16 -- kw/cin-expanded input for TN images.
    wk_ref:  (KH, KW*Cin, C)    bf16 -- per-kh weight slabs.
    g_ref/b_ref: (1, C) f32          -- BN gamma / beta.
    out_ref: (Np, PH*PW, C) bf16     -- pooled activation (resident; written last step).
    y_scr:   (Np, OH*OW, C) f32      -- whole-batch raw conv output, VMEM resident.
    stat_scr:(2, C) f32              -- [sum(y); sum(y*y)] accumulated across steps.
    """
    i = pl.program_id(0)
    npos = y_scr.shape[1]            # OH*OW
    c = y_scr.shape[2]

    @pl.when(i == 0)
    def _init():
        stat_scr[...] = jnp.zeros_like(stat_scr)

    # ---- Phase 1: conv for this step's TN images + BN partial statistics ----
    for n in range(tn):                                   # static unroll
        acc = jnp.zeros((npos, c), jnp.float32)
        for kh in range(kh_taps):                         # 3 shifted MXU matmuls
            xs = xk_ref[n, pl.ds(kh * ow, npos), :]       # contiguous static slice
            acc += jnp.dot(xs, wk_ref[kh], preferred_element_type=jnp.float32)
        y_scr[i * tn + n] = acc
        # Zero-padded images contribute nothing; true count is the denominator.
        stat_scr[0:1, :] += jnp.sum(acc, axis=0, keepdims=True)
        stat_scr[1:2, :] += jnp.sum(acc * acc, axis=0, keepdims=True)

    # ---- Phase 2 (last step): finalize BN, then ReLU + MaxPool2 from VMEM ----
    @pl.when(i == pl.num_programs(0) - 1)
    def _finalize():
        inv_m = 1.0 / n_valid
        mean = stat_scr[0:1, :] * inv_m                       # (1, C)
        var = jnp.maximum(stat_scr[1:2, :] * inv_m - mean * mean, 0.0)
        scale = g_ref[...] * jax.lax.rsqrt(var + eps)         # (1, C)
        shift = b_ref[...] - mean * scale                     # (1, C)

        def pool_image(n, carry):
            for ph in range(ph_out):                          # static unroll
                r0 = (2 * ph) * ow
                r1 = r0 + ow
                # BN affine per tap (scale may be negative), then max over the
                # 2x2 window, then ReLU (monotone, commutes with max).
                t00 = y_scr[n, pl.ds(r0, pw_out, stride=2), :] * scale + shift
                t01 = y_scr[n, pl.ds(r0 + 1, pw_out, stride=2), :] * scale + shift
                t10 = y_scr[n, pl.ds(r1, pw_out, stride=2), :] * scale + shift
                t11 = y_scr[n, pl.ds(r1 + 1, pw_out, stride=2), :] * scale + shift
                m = jnp.maximum(jnp.maximum(t00, t01), jnp.maximum(t10, t11))
                m = jnp.maximum(m, 0.0)
                out_ref[n, pl.ds(ph * pw_out, pw_out), :] = m.astype(out_ref.dtype)
            return carry

        jax.lax.fori_loop(0, n_images, pool_image, 0)


def _linear_kernel(x_ref, w_ref, b_ref, o_ref):
    o_ref[...] = (jnp.dot(x_ref[...], w_ref[...],
                          preferred_element_type=jnp.float32) + b_ref[...])


# ------------------------------ wrappers (glue) ------------------------------

def conv_bn_relu_pool(x_nhwc, w_hwio, gamma, beta, *, tn=8, eps=_BN_EPS):
    """Conv2d(3x3, stride 1, valid) + BatchNorm2d(batch stats) + ReLU + MaxPool2d(2).

    x_nhwc: (N, H, W, Cin) bf16.  Returns (N, PH, PW, C) bf16.
    """
    n, h, w, cin = x_nhwc.shape
    kh_taps, kw_taps, _, c = w_hwio.shape
    oh, ow = h - kh_taps + 1, w - kw_taps + 1
    ph, pw = oh // 2, ow // 2
    k = kw_taps * cin

    # kw/cin expansion only (<=3x of the small un-pooled input); kh shifts are
    # handled in-kernel.  Column index = kw*Cin + cin matches wk below.
    xk = jnp.concatenate(
        [x_nhwc[:, :, kw:kw + ow, :] for kw in range(kw_taps)], axis=-1)
    xk = xk.reshape(n, h * ow, k).astype(jnp.bfloat16)
    wk = w_hwio.astype(jnp.bfloat16).reshape(kh_taps, k, c)
    g2 = gamma.reshape(1, c).astype(jnp.float32)
    b2 = beta.reshape(1, c).astype(jnp.float32)

    tn = max(1, min(tn, n))
    n_pad = _round_up(n, tn)
    if n_pad != n:
        xk = jnp.pad(xk, ((0, n_pad - n), (0, 0), (0, 0)))
    grid = (n_pad // tn,)

    est = (2 * _vmem_bytes((tn, h * ow, k), jnp.bfloat16)       # double-buffered x
           + _vmem_bytes((kh_taps, k, c), jnp.bfloat16)
           + 2 * _vmem_bytes((1, c), jnp.float32)
           + _vmem_bytes((n_pad, ph * pw, c), jnp.bfloat16)     # resident output
           + _vmem_bytes((n_pad, oh * ow, c), jnp.float32)      # resident conv out
           + _vmem_bytes((2, c), jnp.float32))
    vmem_limit = int(min(128 * 2 ** 20, max(32 * 2 ** 20, est * 3 // 2)))

    kernel = functools.partial(
        _fused_conv_bn_pool_kernel,
        kh_taps=kh_taps, ow=ow, ph_out=ph, pw_out=pw, tn=tn,
        n_images=n, n_valid=float(n * oh * ow), eps=eps)

    out = pl.pallas_call(
        kernel,
        grid=grid,
        in_specs=[
            pl.BlockSpec((tn, h * ow, k), lambda i: (i, 0, 0)),   # streaming images
            pl.BlockSpec((kh_taps, k, c), lambda i: (0, 0, 0)),   # resident weights
            pl.BlockSpec((1, c), lambda i: (0, 0)),
            pl.BlockSpec((1, c), lambda i: (0, 0)),
        ],
        out_specs=pl.BlockSpec((n_pad, ph * pw, c), lambda i: (0, 0, 0)),
        out_shape=jax.ShapeDtypeStruct((n_pad, ph * pw, c), jnp.bfloat16),
        scratch_shapes=[
            pltpu.VMEM((n_pad, oh * ow, c), jnp.float32),
            pltpu.VMEM((2, c), jnp.float32),
        ],
        compiler_params=pltpu.CompilerParams(
            # Batch-stat accumulation + whole-batch epilogue => sequential axis.
            dimension_semantics=("arbitrary",),
            vmem_limit_bytes=vmem_limit,
        ),
    )(xk, wk, g2, b2)
    return out[:n].reshape(n, ph, pw, c)


def linear(x_bf16, w_bf16, bias_f32, *, tm=512):
    m, kdim = x_bf16.shape
    n_out = w_bf16.shape[1]
    tm = min(tm, _round_up(m, 8))
    m_pad = _round_up(m, tm)
    xp = jnp.pad(x_bf16, ((0, m_pad - m), (0, 0))) if m_pad != m else x_bf16
    out = pl.pallas_call(
        _linear_kernel,
        grid=(m_pad // tm,),
        in_specs=[
            pl.BlockSpec((tm, kdim), lambda i: (i, 0)),
            pl.BlockSpec((kdim, n_out), lambda i: (0, 0)),   # Nout=10 left unpadded
            pl.BlockSpec((1, n_out), lambda i: (0, 0)),
        ],
        out_specs=pl.BlockSpec((tm, n_out), lambda i: (i, 0)),
        out_shape=jax.ShapeDtypeStruct((m_pad, n_out), jnp.float32),
        compiler_params=pltpu.CompilerParams(
            dimension_semantics=("parallel",)),
    )(xp, w_bf16, bias_f32.reshape(1, n_out))
    return out[:m]


def model_bn_forward(x_nchw, params):
    n = x_nchw.shape[0]
    # NCHW -> NHWC (Cin == 1, so this is effectively a free reshape under XLA).
    x = jnp.transpose(x_nchw, (0, 2, 3, 1)).astype(jnp.bfloat16)
    y = conv_bn_relu_pool(x, params["w1"], params["g1"], params["b1"])   # (N,13,13,32)
    y = conv_bn_relu_pool(y, params["w2"], params["g2"], params["b2"])   # (N,5,5,64)
    feat = y.reshape(n, -1)                                              # NHWC flatten
    # wfc is stored pre-permuted to NHWC-flatten order (one-time, at init), so
    # no per-forward activation transpose is needed.
    return linear(feat, params["wfc"].astype(jnp.bfloat16), params["bfc"])


def init_params(key):
    ks = jax.random.split(key, 8)
    return {
        "w1": 0.1 * jax.random.normal(ks[0], (3, 3, 1, 32), jnp.float32),   # HWIO
        "g1": 1.0 + 0.1 * jax.random.normal(ks[1], (32,), jnp.float32),
        "b1": 0.1 * jax.random.normal(ks[2], (32,), jnp.float32),
        "w2": 0.1 * jax.random.normal(ks[3], (3, 3, 32, 64), jnp.float32),  # HWIO
        "g2": 1.0 + 0.1 * jax.random.normal(ks[4], (64,), jnp.float32),
        "b2": 0.1 * jax.random.normal(ks[5], (64,), jnp.float32),
        # Stored directly in NHWC-flatten order (from PyTorch weights this is
        # fc.weight.reshape(10,64,5,5).transpose(2,3,1,0).reshape(1600,10)).
        "wfc": 0.05 * jax.random.normal(ks[6], (5 * 5 * 64, 10), jnp.float32),
        "bfc": 0.05 * jax.random.normal(ks[7], (10,), jnp.float32),
    }


if __name__ == "__main__":
    key = jax.random.PRNGKey(0)
    pkey, xkey = jax.random.split(key)
    params = init_params(pkey)
    # ModelBN's fc expects 5*5*64 features -> 28x28 single-channel input.
    x = jax.random.normal(xkey, (2, 1, 28, 28), jnp.float32)

    fwd = jax.jit(model_bn_forward)
    out = jax.block_until_ready(fwd(x, params))

    assert out.shape == (2, 10), out.shape
    assert bool(jnp.all(jnp.isfinite(out)))
    print("KERNEL_OK")
</pallas_src>

<mosaic_0001>
module attributes {stable_mosaic.version = 11 : i64} {
  func.func @_fused_conv_bn_pool_kernel(%arg0: i32, %arg1: memref<2x728x3xbf16, #tpu.memory_space<vmem>>, %arg2: memref<3x3x32xbf16, #tpu.memory_space<vmem>>, %arg3: memref<1x32xf32, #tpu.memory_space<vmem>>, %arg4: memref<1x32xf32, #tpu.memory_space<vmem>>, %arg5: memref<2x169x32xbf16, #tpu.memory_space<vmem>>, %arg6: memref<2x676x32xf32, #tpu.memory_space<vmem>>, %arg7: memref<2x32xf32, #tpu.memory_space<vmem>>) attributes {dimension_semantics = [#tpu.dimension_semantics<arbitrary>], iteration_bounds = array<i64: 1>, scalar_prefetch = 0 : i64, scratch_operands = 2 : i64, tpu.core_type = #tpu.core_type<tc>, window_params = [{transform_indices = @transform_0, window_bounds = array<i64: 2, 728, 3>}, {pipeline_mode = #tpu.pipeline_mode<synchronous>, transform_indices = @transform_1, window_bounds = array<i64: 3, 3, 32>}, {pipeline_mode = #tpu.pipeline_mode<synchronous>, transform_indices = @transform_2, window_bounds = array<i64: 1, 32>}, {pipeline_mode = #tpu.pipeline_mode<synchronous>, transform_indices = @transform_3, window_bounds = array<i64: 1, 32>}, {pipeline_mode = #tpu.pipeline_mode<synchronous>, transform_indices = @transform_4, window_bounds = array<i64: 2, 169, 32>}]} {
    %c0_i32 = arith.constant 0 : i32
    %0 = arith.cmpi eq, %arg0, %c0_i32 : i32
    %1 = arith.extui %0 : i1 to i32
    %c0_i32_0 = arith.constant 0 : i32
    %2 = arith.cmpi ne, %1, %c0_i32_0 : i32
    scf.if %2 {
      %cst_67 = arith.constant 0.000000e+00 : f32
      %78 = vector.broadcast %cst_67 : f32 to vector<2x32xf32>
      %c0_68 = arith.constant 0 : index
      %c0_69 = arith.constant 0 : index
      %79 = vector.load %arg7[%c0_68, %c0_69] : memref<2x32xf32, #tpu.memory_space<vmem>>, vector<2x32xf32>
      tpu.vector_store %arg7[%c0_68, %c0_69], %78 {strides = array<i32>} : memref<2x32xf32, #tpu.memory_space<vmem>>, vector<2x32xf32>,
    } else {
    }
    %cst = arith.constant 0.000000e+00 : f32
    %3 = vector.broadcast %cst : f32 to vector<676x32xf32>
    %c0 = arith.constant 0 : index
    %c0_1 = arith.constant 0 : index
    %c0_2 = arith.constant 0 : index
    %4 = vector.load %arg1[%c0, %c0_1, %c0_2] : memref<2x728x3xbf16, #tpu.memory_space<vmem>>, vector<1x676x3xbf16>
    %5 = vector.shape_cast %4 : vector<1x676x3xbf16> to vector<676x3xbf16>
    %c0_3 = arith.constant 0 : index
    %c0_4 = arith.constant 0 : index
    %c0_5 = arith.constant 0 : index
    %6 = vector.load %arg2[%c0_3, %c0_4, %c0_5] : memref<3x3x32xbf16, #tpu.memory_space<vmem>>, vector<1x3x32xbf16>
    %7 = vector.shape_cast %6 : vector<1x3x32xbf16> to vector<3x32xbf16>
    %cst_6 = arith.constant dense<0.000000e+00> : vector<676x32xf32>
    %8 = tpu.matmul %5, %7, %cst_6 {dimension_numbers = #tpu.dot_dimension_numbers<[1], [0], [0], [1], [0, 0, 1, 1], [], []>} : vector<676x3xbf16>, vector<3x32xbf16>, vector<676x32xf32> -> vector<676x32xf32>
    %9 = arith.addf %3, %8 : vector<676x32xf32>
    %c0_7 = arith.constant 0 : index
    %c26 = arith.constant 26 : index
    %c0_8 = arith.constant 0 : index
    %10 = vector.load %arg1[%c0_7, %c26, %c0_8] : memref<2x728x3xbf16, #tpu.memory_space<vmem>>, vector<1x676x3xbf16>
    %11 = vector.shape_cast %10 : vector<1x676x3xbf16> to vector<676x3xbf16>
    %c1 = arith.constant 1 : index
    %c0_9 = arith.constant 0 : index
    %c0_10 = arith.constant 0 : index
    %12 = vector.load %arg2[%c1, %c0_9, %c0_10] : memref<3x3x32xbf16, #tpu.memory_space<vmem>>, vector<1x3x32xbf16>
    %13 = vector.shape_cast %12 : vector<1x3x32xbf16> to vector<3x32xbf16>
    %cst_11 = arith.constant dense<0.000000e+00> : vector<676x32xf32>
    %14 = tpu.matmul %11, %13, %cst_11 {dimension_numbers = #tpu.dot_dimension_numbers<[1], [0], [0], [1], [0, 0, 1, 1], [], []>} : vector<676x3xbf16>, vector<3x32xbf16>, vector<676x32xf32> -> vector<676x32xf32>
    %15 = arith.addf %9, %14 : vector<676x32xf32>
    %c0_12 = arith.constant 0 : index
    %c52 = arith.constant 52 : index
    %c0_13 = arith.constant 0 : index
    %16 = vector.load %arg1[%c0_12, %c52, %c0_13] : memref<2x728x3xbf16, #tpu.memory_space<vmem>>, vector<1x676x3xbf16>
    %17 = vector.shape_cast %16 : vector<1x676x3xbf16> to vector<676x3xbf16>
    %c2 = arith.constant 2 : index
    %c0_14 = arith.constant 0 : index
    %c0_15 = arith.constant 0 : index
    %18 = vector.load %arg2[%c2, %c0_14, %c0_15] : memref<3x3x32xbf16, #tpu.memory_space<vmem>>, vector<1x3x32xbf16>
    %19 = vector.shape_cast %18 : vector<1x3x32xbf16> to vector<3x32xbf16>
    %cst_16 = arith.constant dense<0.000000e+00> : vector<676x32xf32>
    %20 = tpu.matmul %17, %19, %cst_16 {dimension_numbers = #tpu.dot_dimension_numbers<[1], [0], [0], [1], [0, 0, 1, 1], [], []>} : vector<676x3xbf16>, vector<3x32xbf16>, vector<676x32xf32> -> vector<676x32xf32>
    %21 = arith.addf %15, %20 : vector<676x32xf32>
    %c2_i32 = arith.constant 2 : i32
    %22 = arith.muli %arg0, %c2_i32 : i32
    %c0_i32_17 = arith.constant 0 : i32
    %23 = arith.addi %22, %c0_i32_17 : i32
    %24 = arith.index_cast %23 : i32 to index
    %c0_18 = arith.constant 0 : index
    %c0_19 = arith.constant 0 : index
    %25 = vector.load %arg6[%24, %c0_18, %c0_19] : memref<2x676x32xf32, #tpu.memory_space<vmem>>, vector<1x676x32xf32>
    %26 = vector.shape_cast %25 : vector<1x676x32xf32> to vector<676x32xf32>
    %27 = vector.shape_cast %21 : vector<676x32xf32> to vector<1x676x32xf32>
    tpu.vector_store %arg6[%24, %c0_18, %c0_19], %27 {strides = array<i32>} : memref<2x676x32xf32, #tpu.memory_space<vmem>>, vector<1x676x32xf32>,
    %c0_20 = arith.constant 0 : index
    %c0_21 = arith.constant 0 : index
    %28 = vector.load %arg7[%c0_20, %c0_21] : memref<2x32xf32, #tpu.memory_space<vmem>>, vector<1x32xf32>
    %cst_22 = arith.constant dense<0.000000e+00> : vector<32xf32>
    %29 = vector.multi_reduction <add>, %21, %cst_22 [0] : vector<676x32xf32> to vector<32xf32>
    %30 = vector.shape_cast %29 : vector<32xf32> to vector<1x32xf32>
    %31 = arith.addf %28, %30 : vector<1x32xf32>
    %c0_23 = arith.constant 0 : index
    %c0_24 = arith.constant 0 : index
    %32 = vector.load %arg7[%c0_23, %c0_24] : memref<2x32xf32, #tpu.memory_space<vmem>>, vector<1x32xf32>
    tpu.vector_store %arg7[%c0_23, %c0_24], %31 {strides = array<i32>} : memref<2x32xf32, #tpu.memory_space<vmem>>, vector<1x32xf32>,
    %c1_25 = arith.constant 1 : index
    %c0_26 = arith.constant 0 : index
    %33 = vector.load %arg7[%c1_25, %c0_26] : memref<2x32xf32, #tpu.memory_space<vmem>>, vector<1x32xf32>
    %34 = arith.mulf %21, %21 : vector<676x32xf32>
    %cst_27 = arith.constant dense<0.000000e+00> : vector<32xf32>
    %35 = vector.multi_reduction <add>, %34, %cst_27 [0] : vector<676x32xf32> to vector<32xf32>
    %36 = vector.shape_cast %35 : vector<32xf32> to vector<1x32xf32>
    %37 = arith.addf %33, %36 : vector<1x32xf32>
    %c1_28 = arith.constant 1 : index
    %c0_29 = arith.constant 0 : index
    %38 = vector.load %arg7[%c1_28, %c0_29] : memref<2x32xf32, #tpu.memory_space<vmem>>, vector<1x32xf32>
    tpu.vector_store %arg7[%c1_28, %c0_29], %37 {strides = array<i32>} : memref<2x32xf32, #tpu.memory_space<vmem>>, vector<1x32xf32>,
    %cst_30 = arith.constant 0.000000e+00 : f32
    %39 = vector.broadcast %cst_30 : f32 to vector<676x32xf32>
    %c1_31 = arith.constant 1 : index
    %c0_32 = arith.constant 0 : index
    %c0_33 = arith.constant 0 : index
    %40 = vector.load %arg1[%c1_31, %c0_32, %c0_33] : memref<2x728x3xbf16, #tpu.memory_space<vmem>>, vector<1x676x3xbf16>
    %41 = vector.shape_cast %40 : vector<1x676x3xbf16> to vector<676x3xbf16>
    %c0_34 = arith.constant 0 : index
    %c0_35 = arith.constant 0 : index
    %c0_36 = arith.constant 0 : index
    %42 = vector.load %arg2[%c0_34, %c0_35, %c0_36] : memref<3x3x32xbf16, #tpu.memory_space<vmem>>, vector<1x3x32xbf16>
    %43 = vector.shape_cast %42 : vector<1x3x32xbf16> to vector<3x32xbf16>
    %cst_37 = arith.constant dense<0.000000e+00> : vector<676x32xf32>
    %44 = tpu.matmul %41, %43, %cst_37 {dimension_numbers = #tpu.dot_dimension_numbers<[1], [0], [0], [1], [0, 0, 1, 1], [], []>} : vector<676x3xbf16>, vector<3x32xbf16>, vector<676x32xf32> -> vector<676x32xf32>
    %45 = arith.addf %39, %44 : vector<676x32xf32>
    %c1_38 = arith.constant 1 : index
    %c26_39 = arith.constant 26 : index
    %c0_40 = arith.constant 0 : index
    %46 = vector.load %arg1[%c1_38, %c26_39, %c0_40] : memref<2x728x3xbf16, #tpu.memory_space<vmem>>, vector<1x676x3xbf16>
    %47 = vector.shape_cast %46 : vector<1x676x3xbf16> to vector<676x3xbf16>
    %c1_41 = arith.constant 1 : index
    %c0_42 = arith.constant 0 : index
    %c0_43 = arith.constant 0 : index
    %48 = vector.load %arg2[%c1_41, %c0_42, %c0_43] : memref<3x3x32xbf16, #tpu.memory_space<vmem>>, vector<1x3x32xbf16>
    %49 = vector.shape_cast %48 : vector<1x3x32xbf16> to vector<3x32xbf16>
    %cst_44 = arith.constant dense<0.000000e+00> : vector<676x32xf32>
    %50 = tpu.matmul %47, %49, %cst_44 {dimension_numbers = #tpu.dot_dimension_numbers<[1], [0], [0], [1], [0, 0, 1, 1], [], []>} : vector<676x3xbf16>, vector<3x32xbf16>, vector<676x32xf32> -> vector<676x32xf32>
    %51 = arith.addf %45, %50 : vector<676x32xf32>
    %c1_45 = arith.constant 1 : index
    %c52_46 = arith.constant 52 : index
    %c0_47 = arith.constant 0 : index
    %52 = vector.load %arg1[%c1_45, %c52_46, %c0_47] : memref<2x728x3xbf16, #tpu.memory_space<vmem>>, vector<1x676x3xbf16>
    %53 = vector.shape_cast %52 : vector<1x676x3xbf16> to vector<676x3xbf16>
    %c2_48 = arith.constant 2 : index
    %c0_49 = arith.constant 0 : index
    %c0_50 = arith.constant 0 : index
    %54 = vector.load %arg2[%c2_48, %c0_49, %c0_50] : memref<3x3x32xbf16, #tpu.memory_space<vmem>>, vector<1x3x32xbf16>
    %55 = vector.shape_cast %54 : vector<1x3x32xbf16> to vector<3x32xbf16>
    %cst_51 = arith.constant dense<0.000000e+00> : vector<676x32xf32>
    %56 = tpu.matmul %53, %55, %cst_51 {dimension_numbers = #tpu.dot_dimension_numbers<[1], [0], [0], [1], [0, 0, 1, 1], [], []>} : vector<676x3xbf16>, vector<3x32xbf16>, vector<676x32xf32> -> vector<676x32xf32>
    %57 = arith.addf %51, %56 : vector<676x32xf32>
    %c2_i32_52 = arith.constant 2 : i32
    %58 = arith.muli %arg0, %c2_i32_52 : i32
    %c1_i32 = arith.constant 1 : i32
    %59 = arith.addi %58, %c1_i32 : i32
    %60 = arith.index_cast %59 : i32 to index
    %c0_53 = arith.constant 0 : index
    %c0_54 = arith.constant 0 : index
    %61 = vector.load %arg6[%60, %c0_53, %c0_54] : memref<2x676x32xf32, #tpu.memory_space<vmem>>, vector<1x676x32xf32>
    %62 = vector.shape_cast %61 : vector<1x676x32xf32> to vector<676x32xf32>
    %63 = vector.shape_cast %57 : vector<676x32xf32> to vector<1x676x32xf32>
    tpu.vector_store %arg6[%60, %c0_53, %c0_54], %63 {strides = array<i32>} : memref<2x676x32xf32, #tpu.memory_space<vmem>>, vector<1x676x32xf32>,
    %c0_55 = arith.constant 0 : index
    %c0_56 = arith.constant 0 : index
    %64 = vector.load %arg7[%c0_55, %c0_56] : memref<2x32xf32, #tpu.memory_space<vmem>>, vector<1x32xf32>
    %cst_57 = arith.constant dense<0.000000e+00> : vector<32xf32>
    %65 = vector.multi_reduction <add>, %57, %cst_57 [0] : vector<676x32xf32> to vector<32xf32>
    %66 = vector.shape_cast %65 : vector<32xf32> to vector<1x32xf32>
    %67 = arith.addf %64, %66 : vector<1x32xf32>
    %c0_58 = arith.constant 0 : index
    %c0_59 = arith.constant 0 : index
    %68 = vector.load %arg7[%c0_58, %c0_59] : memref<2x32xf32, #tpu.memory_space<vmem>>, vector<1x32xf32>
    tpu.vector_store %arg7[%c0_58, %c0_59], %67 {strides = array<i32>} : memref<2x32xf32, #tpu.memory_space<vmem>>, vector<1x32xf32>,
    %c1_60 = arith.constant 1 : index
    %c0_61 = arith.constant 0 : index
    %69 = vector.load %arg7[%c1_60, %c0_61] : memref<2x32xf32, #tpu.memory_space<vmem>>, vector<1x32xf32>
    %70 = arith.mulf %57, %57 : vector<676x32xf32>
    %cst_62 = arith.constant dense<0.000000e+00> : vector<32xf32>
    %71 = vector.multi_reduction <add>, %70, %cst_62 [0] : vector<676x32xf32> to vector<32xf32>
    %72 = vector.shape_cast %71 : vector<32xf32> to vector<1x32xf32>
    %73 = arith.addf %69, %72 : vector<1x32xf32>
    %c1_63 = arith.constant 1 : index
    %c0_64 = arith.constant 0 : index
    %74 = vector.load %arg7[%c1_63, %c0_64] : memref<2x32xf32, #tpu.memory_space<vmem>>, vector<1x32xf32>
    tpu.vector_store %arg7[%c1_63, %c0_64], %73 {strides = array<i32>} : memref<2x32xf32, #tpu.memory_space<vmem>>, vector<1x32xf32>,
    %c0_i32_65 = arith.constant 0 : i32
    %75 = arith.cmpi eq, %arg0, %c0_i32_65 : i32
    %76 = arith.extui %75 : i1 to i32
    %c0_i32_66 = arith.constant 0 : i32
    %77 = arith.cmpi ne, %76, %c0_i32_66 : i32
    scf.if %77 {
      %c0_67 = arith.constant 0 : index
      %c0_68 = arith.constant 0 : index
      %78 = vector.load %arg7[%c0_67, %c0_68] : memref<2x32xf32, #tpu.memory_space<vmem>>, vector<1x32xf32>
      %cst_69 = arith.constant 7.396450e-04 : f32
      %79 = vector.broadcast %cst_69 : f32 to vector<1x32xf32>
      %80 = arith.mulf %78, %79 : vector<1x32xf32>
      %c1_70 = arith.constant 1 : index
      %c0_71 = arith.constant 0 : index
      %81 = vector.load %arg7[%c1_70, %c0_71] : memref<2x32xf32, #tpu.memory_space<vmem>>, vector<1x32xf32>
      %cst_72 = arith.constant 7.396450e-04 : f32
      %82 = vector.broadcast %cst_72 : f32 to vector<1x32xf32>
      %83 = arith.mulf %81, %82 : vector<1x32xf32>
      %84 = arith.mulf %80, %80 : vector<1x32xf32>
      %85 = arith.subf %83, %84 : vector<1x32xf32>
      %cst_73 = arith.constant 0.000000e+00 : f32
      %86 = vector.broadcast %cst_73 : f32 to vector<1x32xf32>
      %87 = arith.maximumf %85, %86 : vector<1x32xf32>
      %c0_74 = arith.constant 0 : index
      %c0_75 = arith.constant 0 : index
      %88 = vector.load %arg3[%c0_74, %c0_75] : memref<1x32xf32, #tpu.memory_space<vmem>>, vector<1x32xf32>
      %cst_76 = arith.constant 9.99999974E-6 : f32
      %89 = vector.broadcast %cst_76 : f32 to vector<1x32xf32>
      %90 = arith.addf %87, %89 : vector<1x32xf32>
      %91 = math.rsqrt %90 : vector<1x32xf32>
      %92 = arith.mulf %88, %91 : vector<1x32xf32>
      %c0_77 = arith.constant 0 : index
      %c0_78 = arith.constant 0 : index
      %93 = vector.load %arg4[%c0_77, %c0_78] : memref<1x32xf32, #tpu.memory_space<vmem>>, vector<1x32xf32>
      %94 = arith.mulf %80, %92 : vector<1x32xf32>
      %95 = arith.subf %93, %94 : vector<1x32xf32>
      %c0_i32_79 = arith.constant 0 : i32
      %c2_i32_80 = arith.constant 2 : i32
      %96 = arith.addi %c0_i32_79, %c2_i32_80 : i32
      %c1_i32_81 = arith.constant 1 : i32
      scf.for %arg8 = %c0_i32_79 to %96 step %c1_i32_81  : i32 {
        %97 = arith.index_cast %arg8 : i32 to index
        %c0_83 = arith.constant 0 : index
        %c0_84 = arith.constant 0 : index
        %98 = tpu.strided_load %arg6[%97, %c0_83, %c0_84] {strides = array<i32: 1, 2, 1>} : memref<2x676x32xf32, #tpu.memory_space<vmem>>, vector<1x13x32xf32>
        %99 = vector.shape_cast %98 : vector<1x13x32xf32> to vector<13x32xf32>
        %100 = vector.broadcast %92 : vector<1x32xf32> to vector<13x32xf32>
        %101 = arith.mulf %99, %100 : vector<13x32xf32>
        %102 = vector.broadcast %95 : vector<1x32xf32> to vector<13x32xf32>
        %103 = arith.addf %101, %102 : vector<13x32xf32>
        %104 = arith.index_cast %arg8 : i32 to index
        %c1_85 = arith.constant 1 : index
        %c0_86 = arith.constant 0 : index
        %105 = tpu.strided_load %arg6[%104, %c1_85, %c0_86] {strides = array<i32: 1, 2, 1>} : memref<2x676x32xf32, #tpu.memory_space<vmem>>, vector<1x13x32xf32>
        %106 = vector.shape_cast %105 : vector<1x13x32xf32> to vector<13x32xf32>
        %107 = vector.broadcast %92 : vector<1x32xf32> to vector<13x32xf32>
        %108 = arith.mulf %106, %107 : vector<13x32xf32>
        %109 = vector.broadcast %95 : vector<1x32xf32> to vector<13x32xf32>
        %110 = arith.addf %108, %109 : vector<13x32xf32>
        %111 = arith.index_cast %arg8 : i32 to index
        %c26_87 = arith.constant 26 : index
        %c0_88 = arith.constant 0 : index
        %112 = tpu.strided_load %arg6[%111, %c26_87, %c0_88] {strides = array<i32: 1, 2, 1>} : memref<2x676x32xf32, #tpu.memory_space<vmem>>, vector<1x13x32xf32>
        %113 = vector.shape_cast %112 : vector<1x13x32xf32> to vector<13x32xf32>
        %114 = vector.broadcast %92 : vector<1x32xf32> to vector<13x32xf32>
        %115 = arith.mulf %113, %114 : vector<13x32xf32>
        %116 = vector.broadcast %95 : vector<1x32xf32> to vector<13x32xf32>
        %117 = arith.addf %115, %116 : vector<13x32xf32>
        %118 = arith.index_cast %arg8 : i32 to index
        %c27 = arith.constant 27 : index
        %c0_89 = arith.constant 0 : index
        %119 = tpu.strided_load %arg6[%118, %c27, %c0_89] {strides = array<i32: 1, 2, 1>} : memref<2x676x32xf32, #tpu.memory_space<vmem>>, vector<1x13x32xf32>
        %120 = vector.shape_cast %119 : vector<1x13x32xf32> to vector<13x32xf32>
        %121 = vector.broadcast %92 : vector<1x32xf32> to vector<13x32xf32>
        %122 = arith.mulf %120, %121 : vector<13x32xf32>
        %123 = vector.broadcast %95 : vector<1x32xf32> to vector<13x32xf32>
        %124 = arith.addf %122, %123 : vector<13x32xf32>
        %125 = arith.maximumf %103, %110 : vector<13x32xf32>
        %126 = arith.maximumf %117, %124 : vector<13x32xf32>
        %127 = arith.maximumf %125, %126 : vector<13x32xf32>
        %cst_90 = arith.constant 0.000000e+00 : f32
        %128 = vector.broadcast %cst_90 : f32 to vector<13x32xf32>
        %129 = arith.maximumf %127, %128 : vector<13x32xf32>
        %130 = arith.truncf %129 : vector<13x32xf32> to vector<13x32xbf16>
        %131 = arith.index_cast %arg8 : i32 to index
        %c0_91 = arith.constant 0 : index
        %c0_92 = arith.constant 0 : index
        %132 = vector.load %arg5[%131, %c0_91, %c0_92] : memref<2x169x32xbf16, #tpu.memory_space<vmem>>, vector<1x13x32xbf16>
        %133 = vector.shape_cast %132 : vector<1x13x32xbf16> to vector<13x32xbf16>
        %134 = vector.shape_cast %130 : vector<13x32xbf16> to vector<1x13x32xbf16>
        tpu.vector_store %arg5[%131, %c0_91, %c0_92], %134 {strides = array<i32>} : memref<2x169x32xbf16, #tpu.memory_space<vmem>>, vector<1x13x32xbf16>,
        %135 = arith.index_cast %arg8 : i32 to index
        %c52_93 = arith.constant 52 : index
        %c0_94 = arith.constant 0 : index
        %136 = tpu.strided_load %arg6[%135, %c52_93, %c0_94] {strides = array<i32: 1, 2, 1>} : memref<2x676x32xf32, #tpu.memory_space<vmem>>, vector<1x13x32xf32>
        %137 = vector.shape_cast %136 : vector<1x13x32xf32> to vector<13x32xf32>
        %138 = vector.broadcast %92 : vector<1x32xf32> to vector<13x32xf32>
        %139 = arith.mulf %137, %138 : vector<13x32xf32>
        %140 = vector.broadcast %95 : vector<1x32xf32> to vector<13x32xf32>
        %141 = arith.addf %139, %140 : vector<13x32xf32>
        %142 = arith.index_cast %arg8 : i32 to index
        %c53 = arith.constant 53 : index
        %c0_95 = arith.constant 0 : index
        %143 = tpu.strided_load %arg6[%142, %c53, %c0_95] {strides = array<i32: 1, 2, 1>} : memref<2x676x32xf32, #tpu.memory_space<vmem>>, vector<1x13x32xf32>
        %144 = vector.shape_cast %143 : vector<1x13x32xf32> to vector<13x32xf32>
        %145 = vector.broadcast %92 : vector<1x32xf32> to vector<13x32xf32>
        %146 = arith.mulf %144, %145 : vector<13x32xf32>
        %147 = vector.broadcast %95 : vector<1x32xf32> to vector<13x32xf32>
        %148 = arith.addf %146, %147 : vector<13x32xf32>
        %149 = arith.index_cast %arg8 : i32 to index
        %c78 = arith.constant 78 : index
        %c0_96 = arith.constant 0 : index
        %150 = tpu.strided_load %arg6[%149, %c78, %c0_96] {strides = array<i32: 1, 2, 1>} : memref<2x676x32xf32, #tpu.memory_space<vmem>>, vector<1x13x32xf32>
        %151 = vector.shape_cast %150 : vector<1x13x32xf32> to vector<13x32xf32>
        %152 = vector.broadcast %92 : vector<1x32xf32> to vector<13x32xf32>
        %153 = arith.mulf %151, %152 : vector<13x32xf32>
        %154 = vector.broadcast %95 : vector<1x32xf32> to vector<13x32xf32>
        %155 = arith.addf %153, %154 : vector<13x32xf32>
        %156 = arith.index_cast %arg8 : i32 to index
        %c79 = arith.constant 79 : index
        %c0_97 = arith.constant 0 : index
        %157 = tpu.strided_load %arg6[%156, %c79, %c0_97] {strides = array<i32: 1, 2, 1>} : memref<2x676x32xf32, #tpu.memory_space<vmem>>, vector<1x13x32xf32>
        %158 = vector.shape_cast %157 : vector<1x13x32xf32> to vector<13x32xf32>
        %159 = vector.broadcast %92 : vector<1x32xf32> to vector<13x32xf32>
        %160 = arith.mulf %158, %159 : vector<13x32xf32>
        %161 = vector.broadcast %95 : vector<1x32xf32> to vector<13x32xf32>
        %162 = arith.addf %160, %161 : vector<13x32xf32>
        %163 = arith.maximumf %141, %148 : vector<13x32xf32>
        %164 = arith.maximumf %155, %162 : vector<13x32xf32>
        %165 = arith.maximumf %163, %164 : vector<13x32xf32>
        %cst_98 = arith.constant 0.000000e+00 : f32
        %166 = vector.broadcast %cst_98 : f32 to vector<13x32xf32>
        %167 = arith.maximumf %165, %166 : vector<13x32xf32>
        %168 = arith.truncf %167 : vector<13x32xf32> to vector<13x32xbf16>
        %169 = arith.index_cast %arg8 : i32 to index
        %c13 = arith.constant 13 : index
        %c0_99 = arith.constant 0 : index
        %170 = vector.load %arg5[%169, %c13, %c0_99] : memref<2x169x32xbf16, #tpu.memory_space<vmem>>, vector<1x13x32xbf16>
        %171 = vector.shape_cast %170 : vector<1x13x32xbf16> to vector<13x32xbf16>
        %172 = vector.shape_cast %168 : vector<13x32xbf16> to vector<1x13x32xbf16>
        tpu.vector_store %arg5[%169, %c13, %c0_99], %172 {strides = array<i32>} : memref<2x169x32xbf16, #tpu.memory_space<vmem>>, vector<1x13x32xbf16>,
        %173 = arith.index_cast %arg8 : i32 to index
        %c104 = arith.constant 104 : index
        %c0_100 = arith.constant 0 : index
        %174 = tpu.strided_load %arg6[%173, %c104, %c0_100] {strides = array<i32: 1, 2, 1>} : memref<2x676x32xf32, #tpu.memory_space<vmem>>, vector<1x13x32xf32>
        %175 = vector.shape_cast %174 : vector<1x13x32xf32> to vector<13x32xf32>
        %176 = vector.broadcast %92 : vector<1x32xf32> to vector<13x32xf32>
        %177 = arith.mulf %175, %176 : vector<13x32xf32>
        %178 = vector.broadcast %95 : vector<1x32xf32> to vector<13x32xf32>
        %179 = arith.addf %177, %178 : vector<13x32xf32>
        %180 = arith.index_cast %arg8 : i32 to index
        %c105 = arith.constant 105 : index
        %c0_101 = arith.constant 0 : index
        %181 = tpu.strided_load %arg6[%180, %c105, %c0_101] {strides = array<i32: 1, 2, 1>} : memref<2x676x32xf32, #tpu.memory_space<vmem>>, vector<1x13x32xf32>
        %182 = vector.shape_cast %181 : vector<1x13x32xf32> to vector<13x32xf32>
        %183 = vector.broadcast %92 : vector<1x32xf32> to vector<13x32xf32>
        %184 = arith.mulf %182, %183 : vector<13x32xf32>
        %185 = vector.broadcast %95 : vector<1x32xf32> to vector<13x32xf32>
        %186 = arith.addf %184, %185 : vector<13x32xf32>
        %187 = arith.index_cast %arg8 : i32 to index
        %c130 = arith.constant 130 : index
        %c0_102 = arith.constant 0 : index
        %188 = tpu.strided_load %arg6[%187, %c130, %c0_102] {strides = array<i32: 1, 2, 1>} : memref<2x676x32xf32, #tpu.memory_space<vmem>>, vector<1x13x32xf32>
        %189 = vector.shape_cast %188 : vector<1x13x32xf32> to vector<13x32xf32>
        %190 = vector.broadcast %92 : vector<1x32xf32> to vector<13x32xf32>
        %191 = arith.mulf %189, %190 : vector<13x32xf32>
        %192 = vector.broadcast %95 : vector<1x32xf32> to vector<13x32xf32>
        %193 = arith.addf %191, %192 : vector<13x32xf32>
        %194 = arith.index_cast %arg8 : i32 to index
        %c131 = arith.constant 131 : index
        %c0_103 = arith.constant 0 : index
        %195 = tpu.strided_load %arg6[%194, %c131, %c0_103] {strides = array<i32: 1, 2, 1>} : memref<2x676x32xf32, #tpu.memory_space<vmem>>, vector<1x13x32xf32>
        %196 = vector.shape_cast %195 : vector<1x13x32xf32> to vector<13x32xf32>
        %197 = vector.broadcast %92 : vector<1x32xf32> to vector<13x32xf32>
        %198 = arith.mulf %196, %197 : vector<13x32xf32>
        %199 = vector.broadcast %95 : vector<1x32xf32> to vector<13x32xf32>
        %200 = arith.addf %198, %199 : vector<13x32xf32>
        %201 = arith.maximumf %179, %186 : vector<13x32xf32>
        %202 = arith.maximumf %193, %200 : vector<13x32xf32>
        %203 = arith.maximumf %201, %202 : vector<13x32xf32>
        %cst_104 = arith.constant 0.000000e+00 : f32
        %204 = vector.broadcast %cst_104 : f32 to vector<13x32xf32>
        %205 = arith.maximumf %203, %204 : vector<13x32xf32>
        %206 = arith.truncf %205 : vector<13x32xf32> to vector<13x32xbf16>
        %207 = arith.index_cast %arg8 : i32 to index
        %c26_105 = arith.constant 26 : index
        %c0_106 = arith.constant 0 : index
        %208 = vector.load %arg5[%207, %c26_105, %c0_106] : memref<2x169x32xbf16, #tpu.memory_space<vmem>>, vector<1x13x32xbf16>
        %209 = vector.shape_cast %208 : vector<1x13x32xbf16> to vector<13x32xbf16>
        %210 = vector.shape_cast %206 : vector<13x32xbf16> to vector<1x13x32xbf16>
        tpu.vector_store %arg5[%207, %c26_105, %c0_106], %210 {strides = array<i32>} : memref<2x169x32xbf16, #tpu.memory_space<vmem>>, vector<1x13x32xbf16>,
        %211 = arith.index_cast %arg8 : i32 to index
        %c156 = arith.constant 156 : index
        %c0_107 = arith.constant 0 : index
        %212 = tpu.strided_load %arg6[%211, %c156, %c0_107] {strides = array<i32: 1, 2, 1>} : memref<2x676x32xf32, #tpu.memory_space<vmem>>, vector<1x13x32xf32>
        %213 = vector.shape_cast %212 : vector<1x13x32xf32> to vector<13x32xf32>
        %214 = vector.broadcast %92 : vector<1x32xf32> to vector<13x32xf32>
        %215 = arith.mulf %213, %214 : vector<13x32xf32>
        %216 = vector.broadcast %95 : vector<1x32xf32> to vector<13x32xf32>
        %217 = arith.addf %215, %216 : vector<13x32xf32>
        %218 = arith.index_cast %arg8 : i32 to index
        %c157 = arith.constant 157 : index
        %c0_108 = arith.constant 0 : index
        %219 = tpu.strided_load %arg6[%218, %c157, %c0_108] {strides = array<i32: 1, 2, 1>} : memref<2x676x32xf32, #tpu.memory_space<vmem>>, vector<1x13x32xf32>
        %220 = vector.shape_cast %219 : vector<1x13x32xf32> to vector<13x32xf32>
        %221 = vector.broadcast %92 : vector<1x32xf32> to vector<13x32xf32>
        %222 = arith.mulf %220, %221 : vector<13x32xf32>
        %223 = vector.broadcast %95 : vector<1x32xf32> to vector<13x32xf32>
        %224 = arith.addf %222, %223 : vector<13x32xf32>
        %225 = arith.index_cast %arg8 : i32 to index
        %c182 = arith.constant 182 : index
        %c0_109 = arith.constant 0 : index
        %226 = tpu.strided_load %arg6[%225, %c182, %c0_109] {strides = array<i32: 1, 2, 1>} : memref<2x676x32xf32, #tpu.memory_space<vmem>>, vector<1x13x32xf32>
        %227 = vector.shape_cast %226 : vector<1x13x32xf32> to vector<13x32xf32>
        %228 = vector.broadcast %92 : vector<1x32xf32> to vector<13x32xf32>
        %229 = arith.mulf %227, %228 : vector<13x32xf32>
        %230 = vector.broadcast %95 : vector<1x32xf32> to vector<13x32xf32>
        %231 = arith.addf %229, %230 : vector<13x32xf32>
        %232 = arith.index_cast %arg8 : i32 to index
        %c183 = arith.constant 183 : index
        %c0_110 = arith.constant 0 : index
        %233 = tpu.strided_load %arg6[%232, %c183, %c0_110] {strides = array<i32: 1, 2, 1>} : memref<2x676x32xf32, #tpu.memory_space<vmem>>, vector<1x13x32xf32>
        %234 = vector.shape_cast %233 : vector<1x13x32xf32> to vector<13x32xf32>
        %235 = vector.broadcast %92 : vector<1x32xf32> to vector<13x32xf32>
        %236 = arith.mulf %234, %235 : vector<13x32xf32>
        %237 = vector.broadcast %95 : vector<1x32xf32> to vector<13x32xf32>
        %238 = arith.addf %236, %237 : vector<13x32xf32>
        %239 = arith.maximumf %217, %224 : vector<13x32xf32>
        %240 = arith.maximumf %231, %238 : vector<13x32xf32>
        %241 = arith.maximumf %239, %240 : vector<13x32xf32>
        %cst_111 = arith.constant 0.000000e+00 : f32
        %242 = vector.broadcast %cst_111 : f32 to vector<13x32xf32>
        %243 = arith.maximumf %241, %242 : vector<13x32xf32>
        %244 = arith.truncf %243 : vector<13x32xf32> to vector<13x32xbf16>
        %245 = arith.index_cast %arg8 : i32 to index
        %c39 = arith.constant 39 : index
        %c0_112 = arith.constant 0 : index
        %246 = vector.load %arg5[%245, %c39, %c0_112] : memref<2x169x32xbf16, #tpu.memory_space<vmem>>, vector<1x13x32xbf16>
        %247 = vector.shape_cast %246 : vector<1x13x32xbf16> to vector<13x32xbf16>
        %248 = vector.shape_cast %244 : vector<13x32xbf16> to vector<1x13x32xbf16>
        tpu.vector_store %arg5[%245, %c39, %c0_112], %248 {strides = array<i32>} : memref<2x169x32xbf16, #tpu.memory_space<vmem>>, vector<1x13x32xbf16>,
        %249 = arith.index_cast %arg8 : i32 to index
        %c208 = arith.constant 208 : index
        %c0_113 = arith.constant 0 : index
        %250 = tpu.strided_load %arg6[%249, %c208, %c0_113] {strides = array<i32: 1, 2, 1>} : memref<2x676x32xf32, #tpu.memory_space<vmem>>, vector<1x13x32xf32>
        %251 = vector.shape_cast %250 : vector<1x13x32xf32> to vector<13x32xf32>
        %252 = vector.broadcast %92 : vector<1x32xf32> to vector<13x32xf32>
        %253 = arith.mulf %251, %252 : vector<13x32xf32>
        %254 = vector.broadcast %95 : vector<1x32xf32> to vector<13x32xf32>
        %255 = arith.addf %253, %254 : vector<13x32xf32>
        %256 = arith.index_cast %arg8 : i32 to index
        %c209 = arith.constant 209 : index
        %c0_114 = arith.constant 0 : index
        %257 = tpu.strided_load %arg6[%256, %c209, %c0_114] {strides = array<i32: 1, 2, 1>} : memref<2x676x32xf32, #tpu.memory_space<vmem>>, vector<1x13x32xf32>
        %258 = vector.shape_cast %257 : vector<1x13x32xf32> to vector<13x32xf32>
        %259 = vector.broadcast %92 : vector<1x32xf32> to vector<13x32xf32>
        %260 = arith.mulf %258, %259 : vector<13x32xf32>
        %261 = vector.broadcast %95 : vector<1x32xf32> to vector<13x32xf32>
        %262 = arith.addf %260, %261 : vector<13x32xf32>
        %263 = arith.index_cast %arg8 : i32 to index
        %c234 = arith.constant 234 : index
        %c0_115 = arith.constant 0 : index
        %264 = tpu.strided_load %arg6[%263, %c234, %c0_115] {strides = array<i32: 1, 2, 1>} : memref<2x676x32xf32, #tpu.memory_space<vmem>>, vector<1x13x32xf32>
        %265 = vector.shape_cast %264 : vector<1x13x32xf32> to vector<13x32xf32>
        %266 = vector.broadcast %92 : vector<1x32xf32> to vector<13x32xf32>
        %267 = arith.mulf %265, %266 : vector<13x32xf32>
        %268 = vector.broadcast %95 : vector<1x32xf32> to vector<13x32xf32>
        %269 = arith.addf %267, %268 : vector<13x32xf32>
        %270 = arith.index_cast %arg8 : i32 to index
        %c235 = arith.constant 235 : index
        %c0_116 = arith.constant 0 : index
        %271 = tpu.strided_load %arg6[%270, %c235, %c0_116] {strides = array<i32: 1, 2, 1>} : memref<2x676x32xf32, #tpu.memory_space<vmem>>, vector<1x13x32xf32>
        %272 = vector.shape_cast %271 : vector<1x13x32xf32> to vector<13x32xf32>
        %273 = vector.broadcast %92 : vector<1x32xf32> to vector<13x32xf32>
        %274 = arith.mulf %272, %273 : vector<13x32xf32>
        %275 = vector.broadcast %95 : vector<1x32xf32> to vector<13x32xf32>
        %276 = arith.addf %274, %275 : vector<13x32xf32>
        %277 = arith.maximumf %255, %262 : vector<13x32xf32>
        %278 = arith.maximumf %269, %276 : vector<13x32xf32>
        %279 = arith.maximumf %277, %278 : vector<13x32xf32>
        %cst_117 = arith.constant 0.000000e+00 : f32
        %280 = vector.broadcast %cst_117 : f32 to vector<13x32xf32>
        %281 = arith.maximumf %279, %280 : vector<13x32xf32>
        %282 = arith.truncf %281 : vector<13x32xf32> to vector<13x32xbf16>
        %283 = arith.index_cast %arg8 : i32 to index
        %c52_118 = arith.constant 52 : index
        %c0_119 = arith.constant 0 : index
        %284 = vector.load %arg5[%283, %c52_118, %c0_119] : memref<2x169x32xbf16, #tpu.memory_space<vmem>>, vector<1x13x32xbf16>
        %285 = vector.shape_cast %284 : vector<1x13x32xbf16> to vector<13x32xbf16>
        %286 = vector.shape_cast %282 : vector<13x32xbf16> to vector<1x13x32xbf16>
        tpu.vector_store %arg5[%283, %c52_118, %c0_119], %286 {strides = array<i32>} : memref<2x169x32xbf16, #tpu.memory_space<vmem>>, vector<1x13x32xbf16>,
        %287 = arith.index_cast %arg8 : i32 to index
        %c260 = arith.constant 260 : index
        %c0_120 = arith.constant 0 : index
        %288 = tpu.strided_load %arg6[%287, %c260, %c0_120] {strides = array<i32: 1, 2, 1>} : memref<2x676x32xf32, #tpu.memory_space<vmem>>, vector<1x13x32xf32>
        %289 = vector.shape_cast %288 : vector<1x13x32xf32> to vector<13x32xf32>
        %290 = vector.broadcast %92 : vector<1x32xf32> to vector<13x32xf32>
        %291 = arith.mulf %289, %290 : vector<13x32xf32>
        %292 = vector.broadcast %95 : vector<1x32xf32> to vector<13x32xf32>
        %293 = arith.addf %291, %292 : vector<13x32xf32>
        %294 = arith.index_cast %arg8 : i32 to index
        %c261 = arith.constant 261 : index
        %c0_121 = arith.constant 0 : index
        %295 = tpu.strided_load %arg6[%294, %c261, %c0_121] {strides = array<i32: 1, 2, 1>} : memref<2x676x32xf32, #tpu.memory_space<vmem>>, vector<1x13x32xf32>
        %296 = vector.shape_cast %295 : vector<1x13x32xf32> to vector<13x32xf32>
        %297 = vector.broadcast %92 : vector<1x32xf32> to vector<13x32xf32>
        %298 = arith.mulf %296, %297 : vector<13x32xf32>
        %299 = vector.broadcast %95 : vector<1x32xf32> to vector<13x32xf32>
        %300 = arith.addf %298, %299 : vector<13x32xf32>
        %301 = arith.index_cast %arg8 : i32 to index
        %c286 = arith.constant 286 : index
        %c0_122 = arith.constant 0 : index
        %302 = tpu.strided_load %arg6[%301, %c286, %c0_122] {strides = array<i32: 1, 2, 1>} : memref<2x676x32xf32, #tpu.memory_space<vmem>>, vector<1x13x32xf32>
        %303 = vector.shape_cast %302 : vector<1x13x32xf32> to vector<13x32xf32>
        %304 = vector.broadcast %92 : vector<1x32xf32> to vector<13x32xf32>
        %305 = arith.mulf %303, %304 : vector<13x32xf32>
        %306 = vector.broadcast %95 : vector<1x32xf32> to vector<13x32xf32>
        %307 = arith.addf %305, %306 : vector<13x32xf32>
        %308 = arith.index_cast %arg8 : i32 to index
        %c287 = arith.constant 287 : index
        %c0_123 = arith.constant 0 : index
        %309 = tpu.strided_load %arg6[%308, %c287, %c0_123] {strides = array<i32: 1, 2, 1>} : memref<2x676x32xf32, #tpu.memory_space<vmem>>, vector<1x13x32xf32>
        %310 = vector.shape_cast %309 : vector<1x13x32xf32> to vector<13x32xf32>
        %311 = vector.broadcast %92 : vector<1x32xf32> to vector<13x32xf32>
        %312 = arith.mulf %310, %311 : vector<13x32xf32>
        %313 = vector.broadcast %95 : vector<1x32xf32> to vector<13x32xf32>
        %314 = arith.addf %312, %313 : vector<13x32xf32>
        %315 = arith.maximumf %293, %300 : vector<13x32xf32>
        %316 = arith.maximumf %307, %314 : vector<13x32xf32>
        %317 = arith.maximumf %315, %316 : vector<13x32xf32>
        %cst_124 = arith.constant 0.000000e+00 : f32
        %318 = vector.broadcast %cst_124 : f32 to vector<13x32xf32>
        %319 = arith.maximumf %317, %318 : vector<13x32xf32>
        %320 = arith.truncf %319 : vector<13x32xf32> to vector<13x32xbf16>
        %321 = arith.index_cast %arg8 : i32 to index
        %c65 = arith.constant 65 : index
        %c0_125 = arith.constant 0 : index
        %322 = vector.load %arg5[%321, %c65, %c0_125] : memref<2x169x32xbf16, #tpu.memory_space<vmem>>, vector<1x13x32xbf16>
        %323 = vector.shape_cast %322 : vector<1x13x32xbf16> to vector<13x32xbf16>
        %324 = vector.shape_cast %320 : vector<13x32xbf16> to vector<1x13x32xbf16>
        tpu.vector_store %arg5[%321, %c65, %c0_125], %324 {strides = array<i32>} : memref<2x169x32xbf16, #tpu.memory_space<vmem>>, vector<1x13x32xbf16>,
        %325 = arith.index_cast %arg8 : i32 to index
        %c312 = arith.constant 312 : index
        %c0_126 = arith.constant 0 : index
        %326 = tpu.strided_load %arg6[%325, %c312, %c0_126] {strides = array<i32: 1, 2, 1>} : memref<2x676x32xf32, #tpu.memory_space<vmem>>, vector<1x13x32xf32>
        %327 = vector.shape_cast %326 : vector<1x13x32xf32> to vector<13x32xf32>
        %328 = vector.broadcast %92 : vector<1x32xf32> to vector<13x32xf32>
        %329 = arith.mulf %327, %328 : vector<13x32xf32>
        %330 = vector.broadcast %95 : vector<1x32xf32> to vector<13x32xf32>
        %331 = arith.addf %329, %330 : vector<13x32xf32>
        %332 = arith.index_cast %arg8 : i32 to index
        %c313 = arith.constant 313 : index
        %c0_127 = arith.constant 0 : index
        %333 = tpu.strided_load %arg6[%332, %c313, %c0_127] {strides = array<i32: 1, 2, 1>} : memref<2x676x32xf32, #tpu.memory_space<vmem>>, vector<1x13x32xf32>
        %334 = vector.shape_cast %333 : vector<1x13x32xf32> to vector<13x32xf32>
        %335 = vector.broadcast %92 : vector<1x32xf32> to vector<13x32xf32>
        %336 = arith.mulf %334, %335 : vector<13x32xf32>
        %337 = vector.broadcast %95 : vector<1x32xf32> to vector<13x32xf32>
        %338 = arith.addf %336, %337 : vector<13x32xf32>
        %339 = arith.index_cast %arg8 : i32 to index
        %c338 = arith.constant 338 : index
        %c0_128 = arith.constant 0 : index
        %340 = tpu.strided_load %arg6[%339, %c338, %c0_128] {strides = array<i32: 1, 2, 1>} : memref<2x676x32xf32, #tpu.memory_space<vmem>>, vector<1x13x32xf32>
        %341 = vector.shape_cast %340 : vector<1x13x32xf32> to vector<13x32xf32>
        %342 = vector.broadcast %92 : vector<1x32xf32> to vector<13x32xf32>
        %343 = arith.mulf %341, %342 : vector<13x32xf32>
        %344 = vector.broadcast %95 : vector<1x32xf32> to vector<13x32xf32>
        %345 = arith.addf %343, %344 : vector<13x32xf32>
        %346 = arith.index_cast %arg8 : i32 to index
        %c339 = arith.constant 339 : index
        %c0_129 = arith.constant 0 : index
        %347 = tpu.strided_load %arg6[%346, %c339, %c0_129] {strides = array<i32: 1, 2, 1>} : memref<2x676x32xf32, #tpu.memory_space<vmem>>, vector<1x13x32xf32>
        %348 = vector.shape_cast %347 : vector<1x13x32xf32> to vector<13x32xf32>
        %349 = vector.broadcast %92 : vector<1x32xf32> to vector<13x32xf32>
        %350 = arith.mulf %348, %349 : vector<13x32xf32>
        %351 = vector.broadcast %95 : vector<1x32xf32> to vector<13x32xf32>
        %352 = arith.addf %350, %351 : vector<13x32xf32>
        %353 = arith.maximumf %331, %338 : vector<13x32xf32>
        %354 = arith.maximumf %345, %352 : vector<13x32xf32>
        %355 = arith.maximumf %353, %354 : vector<13x32xf32>
        %cst_130 = arith.constant 0.000000e+00 : f32
        %356 = vector.broadcast %cst_130 : f32 to vector<13x32xf32>
        %357 = arith.maximumf %355, %356 : vector<13x32xf32>
        %358 = arith.truncf %357 : vector<13x32xf32> to vector<13x32xbf16>
        %359 = arith.index_cast %arg8 : i32 to index
        %c78_131 = arith.constant 78 : index
        %c0_132 = arith.constant 0 : index
        %360 = vector.load %arg5[%359, %c78_131, %c0_132] : memref<2x169x32xbf16, #tpu.memory_space<vmem>>, vector<1x13x32xbf16>
        %361 = vector.shape_cast %360 : vector<1x13x32xbf16> to vector<13x32xbf16>
        %362 = vector.shape_cast %358 : vector<13x32xbf16> to vector<1x13x32xbf16>
        tpu.vector_store %arg5[%359, %c78_131, %c0_132], %362 {strides = array<i32>} : memref<2x169x32xbf16, #tpu.memory_space<vmem>>, vector<1x13x32xbf16>,
        %363 = arith.index_cast %arg8 : i32 to index
        %c364 = arith.constant 364 : index
        %c0_133 = arith.constant 0 : index
        %364 = tpu.strided_load %arg6[%363, %c364, %c0_133] {strides = array<i32: 1, 2, 1>} : memref<2x676x32xf32, #tpu.memory_space<vmem>>, vector<1x13x32xf32>
        %365 = vector.shape_cast %364 : vector<1x13x32xf32> to vector<13x32xf32>
        %366 = vector.broadcast %92 : vector<1x32xf32> to vector<13x32xf32>
        %367 = arith.mulf %365, %366 : vector<13x32xf32>
        %368 = vector.broadcast %95 : vector<1x32xf32> to vector<13x32xf32>
        %369 = arith.addf %367, %368 : vector<13x32xf32>
        %370 = arith.index_cast %arg8 : i32 to index
        %c365 = arith.constant 365 : index
        %c0_134 = arith.constant 0 : index
        %371 = tpu.strided_load %arg6[%370, %c365, %c0_134] {strides = array<i32: 1, 2, 1>} : memref<2x676x32xf32, #tpu.memory_space<vmem>>, vector<1x13x32xf32>
        %372 = vector.shape_cast %371 : vector<1x13x32xf32> to vector<13x32xf32>
        %373 = vector.broadcast %92 : vector<1x32xf32> to vector<13x32xf32>
        %374 = arith.mulf %372, %373 : vector<13x32xf32>
        %375 = vector.broadcast %95 : vector<1x32xf32> to vector<13x32xf32>
        %376 = arith.addf %374, %375 : vector<13x32xf32>
        %377 = arith.index_cast %arg8 : i32 to index
        %c390 = arith.constant 390 : index
        %c0_135 = arith.constant 0 : index
        %378 = tpu.strided_load %arg6[%377, %c390, %c0_135] {strides = array<i32: 1, 2, 1>} : memref<2x676x32xf32, #tpu.memory_space<vmem>>, vector<1x13x32xf32>
        %379 = vector.shape_cast %378 : vector<1x13x32xf32> to vector<13x32xf32>
        %380 = vector.broadcast %92 : vector<1x32xf32> to vector<13x32xf32>
        %381 = arith.mulf %379, %380 : vector<13x32xf32>
        %382 = vector.broadcast %95 : vector<1x32xf32> to vector<13x32xf32>
        %383 = arith.addf %381, %382 : vector<13x32xf32>
        %384 = arith.index_cast %arg8 : i32 to index
        %c391 = arith.constant 391 : index
        %c0_136 = arith.constant 0 : index
        %385 = tpu.strided_load %arg6[%384, %c391, %c0_136] {strides = array<i32: 1, 2, 1>} : memref<2x676x32xf32, #tpu.memory_space<vmem>>, vector<1x13x32xf32>
        %386 = vector.shape_cast %385 : vector<1x13x32xf32> to vector<13x32xf32>
        %387 = vector.broadcast %92 : vector<1x32xf32> to vector<13x32xf32>
        %388 = arith.mulf %386, %387 : vector<13x32xf32>
        %389 = vector.broadcast %95 : vector<1x32xf32> to vector<13x32xf32>
        %390 = arith.addf %388, %389 : vector<13x32xf32>
        %391 = arith.maximumf %369, %376 : vector<13x32xf32>
        %392 = arith.maximumf %383, %390 : vector<13x32xf32>
        %393 = arith.maximumf %391, %392 : vector<13x32xf32>
        %cst_137 = arith.constant 0.000000e+00 : f32
        %394 = vector.broadcast %cst_137 : f32 to vector<13x32xf32>
        %395 = arith.maximumf %393, %394 : vector<13x32xf32>
        %396 = arith.truncf %395 : vector<13x32xf32> to vector<13x32xbf16>
        %397 = arith.index_cast %arg8 : i32 to index
        %c91 = arith.constant 91 : index
        %c0_138 = arith.constant 0 : index
        %398 = vector.load %arg5[%397, %c91, %c0_138] : memref<2x169x32xbf16, #tpu.memory_space<vmem>>, vector<1x13x32xbf16>
        %399 = vector.shape_cast %398 : vector<1x13x32xbf16> to vector<13x32xbf16>
        %400 = vector.shape_cast %396 : vector<13x32xbf16> to vector<1x13x32xbf16>
        tpu.vector_store %arg5[%397, %c91, %c0_138], %400 {strides = array<i32>} : memref<2x169x32xbf16, #tpu.memory_space<vmem>>, vector<1x13x32xbf16>,
        %401 = arith.index_cast %arg8 : i32 to index
        %c416 = arith.constant 416 : index
        %c0_139 = arith.constant 0 : index
        %402 = tpu.strided_load %arg6[%401, %c416, %c0_139] {strides = array<i32: 1, 2, 1>} : memref<2x676x32xf32, #tpu.memory_space<vmem>>, vector<1x13x32xf32>
        %403 = vector.shape_cast %402 : vector<1x13x32xf32> to vector<13x32xf32>
        %404 = vector.broadcast %92 : vector<1x32xf32> to vector<13x32xf32>
        %405 = arith.mulf %403, %404 : vector<13x32xf32>
        %406 = vector.broadcast %95 : vector<1x32xf32> to vector<13x32xf32>
        %407 = arith.addf %405, %406 : vector<13x32xf32>
        %408 = arith.index_cast %arg8 : i32 to index
        %c417 = arith.constant 417 : index
        %c0_140 = arith.constant 0 : index
        %409 = tpu.strided_load %arg6[%408, %c417, %c0_140] {strides = array<i32: 1, 2, 1>} : memref<2x676x32xf32, #tpu.memory_space<vmem>>, vector<1x13x32xf32>
        %410 = vector.shape_cast %409 : vector<1x13x32xf32> to vector<13x32xf32>
        %411 = vector.broadcast %92 : vector<1x32xf32> to vector<13x32xf32>
        %412 = arith.mulf %410, %411 : vector<13x32xf32>
        %413 = vector.broadcast %95 : vector<1x32xf32> to vector<13x32xf32>
        %414 = arith.addf %412, %413 : vector<13x32xf32>
        %415 = arith.index_cast %arg8 : i32 to index
        %c442 = arith.constant 442 : index
        %c0_141 = arith.constant 0 : index
        %416 = tpu.strided_load %arg6[%415, %c442, %c0_141] {strides = array<i32: 1, 2, 1>} : memref<2x676x32xf32, #tpu.memory_space<vmem>>, vector<1x13x32xf32>
        %417 = vector.shape_cast %416 : vector<1x13x32xf32> to vector<13x32xf32>
        %418 = vector.broadcast %92 : vector<1x32xf32> to vector<13x32xf32>
        %419 = arith.mulf %417, %418 : vector<13x32xf32>
        %420 = vector.broadcast %95 : vector<1x32xf32> to vector<13x32xf32>
        %421 = arith.addf %419, %420 : vector<13x32xf32>
        %422 = arith.index_cast %arg8 : i32 to index
        %c443 = arith.constant 443 : index
        %c0_142 = arith.constant 0 : index
        %423 = tpu.strided_load %arg6[%422, %c443, %c0_142] {strides = array<i32: 1, 2, 1>} : memref<2x676x32xf32, #tpu.memory_space<vmem>>, vector<1x13x32xf32>
        %424 = vector.shape_cast %423 : vector<1x13x32xf32> to vector<13x32xf32>
        %425 = vector.broadcast %92 : vector<1x32xf32> to vector<13x32xf32>
        %426 = arith.mulf %424, %425 : vector<13x32xf32>
        %427 = vector.broadcast %95 : vector<1x32xf32> to vector<13x32xf32>
        %428 = arith.addf %426, %427 : vector<13x32xf32>
        %429 = arith.maximumf %407, %414 : vector<13x32xf32>
        %430 = arith.maximumf %421, %428 : vector<13x32xf32>
        %431 = arith.maximumf %429, %430 : vector<13x32xf32>
        %cst_143 = arith.constant 0.000000e+00 : f32
        %432 = vector.broadcast %cst_143 : f32 to vector<13x32xf32>
        %433 = arith.maximumf %431, %432 : vector<13x32xf32>
        %434 = arith.truncf %433 : vector<13x32xf32> to vector<13x32xbf16>
        %435 = arith.index_cast %arg8 : i32 to index
        %c104_144 = arith.constant 104 : index
        %c0_145 = arith.constant 0 : index
        %436 = vector.load %arg5[%435, %c104_144, %c0_145] : memref<2x169x32xbf16, #tpu.memory_space<vmem>>, vector<1x13x32xbf16>
        %437 = vector.shape_cast %436 : vector<1x13x32xbf16> to vector<13x32xbf16>
        %438 = vector.shape_cast %434 : vector<13x32xbf16> to vector<1x13x32xbf16>
        tpu.vector_store %arg5[%435, %c104_144, %c0_145], %438 {strides = array<i32>} : memref<2x169x32xbf16, #tpu.memory_space<vmem>>, vector<1x13x32xbf16>,
        %439 = arith.index_cast %arg8 : i32 to index
        %c468 = arith.constant 468 : index
        %c0_146 = arith.constant 0 : index
        %440 = tpu.strided_load %arg6[%439, %c468, %c0_146] {strides = array<i32: 1, 2, 1>} : memref<2x676x32xf32, #tpu.memory_space<vmem>>, vector<1x13x32xf32>
        %441 = vector.shape_cast %440 : vector<1x13x32xf32> to vector<13x32xf32>
        %442 = vector.broadcast %92 : vector<1x32xf32> to vector<13x32xf32>
        %443 = arith.mulf %441, %442 : vector<13x32xf32>
        %444 = vector.broadcast %95 : vector<1x32xf32> to vector<13x32xf32>
        %445 = arith.addf %443, %444 : vector<13x32xf32>
        %446 = arith.index_cast %arg8 : i32 to index
        %c469 = arith.constant 469 : index
        %c0_147 = arith.constant 0 : index
        %447 = tpu.strided_load %arg6[%446, %c469, %c0_147] {strides = array<i32: 1, 2, 1>} : memref<2x676x32xf32, #tpu.memory_space<vmem>>, vector<1x13x32xf32>
        %448 = vector.shape_cast %447 : vector<1x13x32xf32> to vector<13x32xf32>
        %449 = vector.broadcast %92 : vector<1x32xf32> to vector<13x32xf32>
        %450 = arith.mulf %448, %449 : vector<13x32xf32>
        %451 = vector.broadcast %95 : vector<1x32xf32> to vector<13x32xf32>
        %452 = arith.addf %450, %451 : vector<13x32xf32>
        %453 = arith.index_cast %arg8 : i32 to index
        %c494 = arith.constant 494 : index
        %c0_148 = arith.constant 0 : index
        %454 = tpu.strided_load %arg6[%453, %c494, %c0_148] {strides = array<i32: 1, 2, 1>} : memref<2x676x32xf32, #tpu.memory_space<vmem>>, vector<1x13x32xf32>
        %455 = vector.shape_cast %454 : vector<1x13x32xf32> to vector<13x32xf32>
        %456 = vector.broadcast %92 : vector<1x32xf32> to vector<13x32xf32>
        %457 = arith.mulf %455, %456 : vector<13x32xf32>
        %458 = vector.broadcast %95 : vector<1x32xf32> to vector<13x32xf32>
        %459 = arith.addf %457, %458 : vector<13x32xf32>
        %460 = arith.index_cast %arg8 : i32 to index
        %c495 = arith.constant 495 : index
        %c0_149 = arith.constant 0 : index
        %461 = tpu.strided_load %arg6[%460, %c495, %c0_149] {strides = array<i32: 1, 2, 1>} : memref<2x676x32xf32, #tpu.memory_space<vmem>>, vector<1x13x32xf32>
        %462 = vector.shape_cast %461 : vector<1x13x32xf32> to vector<13x32xf32>
        %463 = vector.broadcast %92 : vector<1x32xf32> to vector<13x32xf32>
        %464 = arith.mulf %462, %463 : vector<13x32xf32>
        %465 = vector.broadcast %95 : vector<1x32xf32> to vector<13x32xf32>
        %466 = arith.addf %464, %465 : vector<13x32xf32>
        %467 = arith.maximumf %445, %452 : vector<13x32xf32>
        %468 = arith.maximumf %459, %466 : vector<13x32xf32>
        %469 = arith.maximumf %467, %468 : vector<13x32xf32>
        %cst_150 = arith.constant 0.000000e+00 : f32
        %470 = vector.broadcast %cst_150 : f32 to vector<13x32xf32>
        %471 = arith.maximumf %469, %470 : vector<13x32xf32>
        %472 = arith.truncf %471 : vector<13x32xf32> to vector<13x32xbf16>
        %473 = arith.index_cast %arg8 : i32 to index
        %c117 = arith.constant 117 : index
        %c0_151 = arith.constant 0 : index
        %474 = vector.load %arg5[%473, %c117, %c0_151] : memref<2x169x32xbf16, #tpu.memory_space<vmem>>, vector<1x13x32xbf16>
        %475 = vector.shape_cast %474 : vector<1x13x32xbf16> to vector<13x32xbf16>
        %476 = vector.shape_cast %472 : vector<13x32xbf16> to vector<1x13x32xbf16>
        tpu.vector_store %arg5[%473, %c117, %c0_151], %476 {strides = array<i32>} : memref<2x169x32xbf16, #tpu.memory_space<vmem>>, vector<1x13x32xbf16>,
        %477 = arith.index_cast %arg8 : i32 to index
        %c520 = arith.constant 520 : index
        %c0_152 = arith.constant 0 : index
        %478 = tpu.strided_load %arg6[%477, %c520, %c0_152] {strides = array<i32: 1, 2, 1>} : memref<2x676x32xf32, #tpu.memory_space<vmem>>, vector<1x13x32xf32>
        %479 = vector.shape_cast %478 : vector<1x13x32xf32> to vector<13x32xf32>
        %480 = vector.broadcast %92 : vector<1x32xf32> to vector<13x32xf32>
        %481 = arith.mulf %479, %480 : vector<13x32xf32>
        %482 = vector.broadcast %95 : vector<1x32xf32> to vector<13x32xf32>
        %483 = arith.addf %481, %482 : vector<13x32xf32>
        %484 = arith.index_cast %arg8 : i32 to index
        %c521 = arith.constant 521 : index
        %c0_153 = arith.constant 0 : index
        %485 = tpu.strided_load %arg6[%484, %c521, %c0_153] {strides = array<i32: 1, 2, 1>} : memref<2x676x32xf32, #tpu.memory_space<vmem>>, vector<1x13x32xf32>
        %486 = vector.shape_cast %485 : vector<1x13x32xf32> to vector<13x32xf32>
        %487 = vector.broadcast %92 : vector<1x32xf32> to vector<13x32xf32>
        %488 = arith.mulf %486, %487 : vector<13x32xf32>
        %489 = vector.broadcast %95 : vector<1x32xf32> to vector<13x32xf32>
        %490 = arith.addf %488, %489 : vector<13x32xf32>
        %491 = arith.index_cast %arg8 : i32 to index
        %c546 = arith.constant 546 : index
        %c0_154 = arith.constant 0 : index
        %492 = tpu.strided_load %arg6[%491, %c546, %c0_154] {strides = array<i32: 1, 2, 1>} : memref<2x676x32xf32, #tpu.memory_space<vmem>>, vector<1x13x32xf32>
        %493 = vector.shape_cast %492 : vector<1x13x32xf32> to vector<13x32xf32>
        %494 = vector.broadcast %92 : vector<1x32xf32> to vector<13x32xf32>
        %495 = arith.mulf %493, %494 : vector<13x32xf32>
        %496 = vector.broadcast %95 : vector<1x32xf32> to vector<13x32xf32>
        %497 = arith.addf %495, %496 : vector<13x32xf32>
        %498 = arith.index_cast %arg8 : i32 to index
        %c547 = arith.constant 547 : index
        %c0_155 = arith.constant 0 : index
        %499 = tpu.strided_load %arg6[%498, %c547, %c0_155] {strides = array<i32: 1, 2, 1>} : memref<2x676x32xf32, #tpu.memory_space<vmem>>, vector<1x13x32xf32>
        %500 = vector.shape_cast %499 : vector<1x13x32xf32> to vector<13x32xf32>
        %501 = vector.broadcast %92 : vector<1x32xf32> to vector<13x32xf32>
        %502 = arith.mulf %500, %501 : vector<13x32xf32>
        %503 = vector.broadcast %95 : vector<1x32xf32> to vector<13x32xf32>
        %504 = arith.addf %502, %503 : vector<13x32xf32>
        %505 = arith.maximumf %483, %490 : vector<13x32xf32>
        %506 = arith.maximumf %497, %504 : vector<13x32xf32>
        %507 = arith.maximumf %505, %506 : vector<13x32xf32>
        %cst_156 = arith.constant 0.000000e+00 : f32
        %508 = vector.broadcast %cst_156 : f32 to vector<13x32xf32>
        %509 = arith.maximumf %507, %508 : vector<13x32xf32>
        %510 = arith.truncf %509 : vector<13x32xf32> to vector<13x32xbf16>
        %511 = arith.index_cast %arg8 : i32 to index
        %c130_157 = arith.constant 130 : index
        %c0_158 = arith.constant 0 : index
        %512 = vector.load %arg5[%511, %c130_157, %c0_158] : memref<2x169x32xbf16, #tpu.memory_space<vmem>>, vector<1x13x32xbf16>
        %513 = vector.shape_cast %512 : vector<1x13x32xbf16> to vector<13x32xbf16>
        %514 = vector.shape_cast %510 : vector<13x32xbf16> to vector<1x13x32xbf16>
        tpu.vector_store %arg5[%511, %c130_157, %c0_158], %514 {strides = array<i32>} : memref<2x169x32xbf16, #tpu.memory_space<vmem>>, vector<1x13x32xbf16>,
        %515 = arith.index_cast %arg8 : i32 to index
        %c572 = arith.constant 572 : index
        %c0_159 = arith.constant 0 : index
        %516 = tpu.strided_load %arg6[%515, %c572, %c0_159] {strides = array<i32: 1, 2, 1>} : memref<2x676x32xf32, #tpu.memory_space<vmem>>, vector<1x13x32xf32>
        %517 = vector.shape_cast %516 : vector<1x13x32xf32> to vector<13x32xf32>
        %518 = vector.broadcast %92 : vector<1x32xf32> to vector<13x32xf32>
        %519 = arith.mulf %517, %518 : vector<13x32xf32>
        %520 = vector.broadcast %95 : vector<1x32xf32> to vector<13x32xf32>
        %521 = arith.addf %519, %520 : vector<13x32xf32>
        %522 = arith.index_cast %arg8 : i32 to index
        %c573 = arith.constant 573 : index
        %c0_160 = arith.constant 0 : index
        %523 = tpu.strided_load %arg6[%522, %c573, %c0_160] {strides = array<i32: 1, 2, 1>} : memref<2x676x32xf32, #tpu.memory_space<vmem>>, vector<1x13x32xf32>
        %524 = vector.shape_cast %523 : vector<1x13x32xf32> to vector<13x32xf32>
        %525 = vector.broadcast %92 : vector<1x32xf32> to vector<13x32xf32>
        %526 = arith.mulf %524, %525 : vector<13x32xf32>
        %527 = vector.broadcast %95 : vector<1x32xf32> to vector<13x32xf32>
        %528 = arith.addf %526, %527 : vector<13x32xf32>
        %529 = arith.index_cast %arg8 : i32 to index
        %c598 = arith.constant 598 : index
        %c0_161 = arith.constant 0 : index
        %530 = tpu.strided_load %arg6[%529, %c598, %c0_161] {strides = array<i32: 1, 2, 1>} : memref<2x676x32xf32, #tpu.memory_space<vmem>>, vector<1x13x32xf32>
        %531 = vector.shape_cast %530 : vector<1x13x32xf32> to vector<13x32xf32>
        %532 = vector.broadcast %92 : vector<1x32xf32> to vector<13x32xf32>
        %533 = arith.mulf %531, %532 : vector<13x32xf32>
        %534 = vector.broadcast %95 : vector<1x32xf32> to vector<13x32xf32>
        %535 = arith.addf %533, %534 : vector<13x32xf32>
        %536 = arith.index_cast %arg8 : i32 to index
        %c599 = arith.constant 599 : index
        %c0_162 = arith.constant 0 : index
        %537 = tpu.strided_load %arg6[%536, %c599, %c0_162] {strides = array<i32: 1, 2, 1>} : memref<2x676x32xf32, #tpu.memory_space<vmem>>, vector<1x13x32xf32>
        %538 = vector.shape_cast %537 : vector<1x13x32xf32> to vector<13x32xf32>
        %539 = vector.broadcast %92 : vector<1x32xf32> to vector<13x32xf32>
        %540 = arith.mulf %538, %539 : vector<13x32xf32>
        %541 = vector.broadcast %95 : vector<1x32xf32> to vector<13x32xf32>
        %542 = arith.addf %540, %541 : vector<13x32xf32>
        %543 = arith.maximumf %521, %528 : vector<13x32xf32>
        %544 = arith.maximumf %535, %542 : vector<13x32xf32>
        %545 = arith.maximumf %543, %544 : vector<13x32xf32>
        %cst_163 = arith.constant 0.000000e+00 : f32
        %546 = vector.broadcast %cst_163 : f32 to vector<13x32xf32>
        %547 = arith.maximumf %545, %546 : vector<13x32xf32>
        %548 = arith.truncf %547 : vector<13x32xf32> to vector<13x32xbf16>
        %549 = arith.index_cast %arg8 : i32 to index
        %c143 = arith.constant 143 : index
        %c0_164 = arith.constant 0 : index
        %550 = vector.load %arg5[%549, %c143, %c0_164] : memref<2x169x32xbf16, #tpu.memory_space<vmem>>, vector<1x13x32xbf16>
        %551 = vector.shape_cast %550 : vector<1x13x32xbf16> to vector<13x32xbf16>
        %552 = vector.shape_cast %548 : vector<13x32xbf16> to vector<1x13x32xbf16>
        tpu.vector_store %arg5[%549, %c143, %c0_164], %552 {strides = array<i32>} : memref<2x169x32xbf16, #tpu.memory_space<vmem>>, vector<1x13x32xbf16>,
        %553 = arith.index_cast %arg8 : i32 to index
        %c624 = arith.constant 624 : index
        %c0_165 = arith.constant 0 : index
        %554 = tpu.strided_load %arg6[%553, %c624, %c0_165] {strides = array<i32: 1, 2, 1>} : memref<2x676x32xf32, #tpu.memory_space<vmem>>, vector<1x13x32xf32>
        %555 = vector.shape_cast %554 : vector<1x13x32xf32> to vector<13x32xf32>
        %556 = vector.broadcast %92 : vector<1x32xf32> to vector<13x32xf32>
        %557 = arith.mulf %555, %556 : vector<13x32xf32>
        %558 = vector.broadcast %95 : vector<1x32xf32> to vector<13x32xf32>
        %559 = arith.addf %557, %558 : vector<13x32xf32>
        %560 = arith.index_cast %arg8 : i32 to index
        %c625 = arith.constant 625 : index
        %c0_166 = arith.constant 0 : index
        %561 = tpu.strided_load %arg6[%560, %c625, %c0_166] {strides = array<i32: 1, 2, 1>} : memref<2x676x32xf32, #tpu.memory_space<vmem>>, vector<1x13x32xf32>
        %562 = vector.shape_cast %561 : vector<1x13x32xf32> to vector<13x32xf32>
        %563 = vector.broadcast %92 : vector<1x32xf32> to vector<13x32xf32>
        %564 = arith.mulf %562, %563 : vector<13x32xf32>
        %565 = vector.broadcast %95 : vector<1x32xf32> to vector<13x32xf32>
        %566 = arith.addf %564, %565 : vector<13x32xf32>
        %567 = arith.index_cast %arg8 : i32 to index
        %c650 = arith.constant 650 : index
        %c0_167 = arith.constant 0 : index
        %568 = tpu.strided_load %arg6[%567, %c650, %c0_167] {strides = array<i32: 1, 2, 1>} : memref<2x676x32xf32, #tpu.memory_space<vmem>>, vector<1x13x32xf32>
        %569 = vector.shape_cast %568 : vector<1x13x32xf32> to vector<13x32xf32>
        %570 = vector.broadcast %92 : vector<1x32xf32> to vector<13x32xf32>
        %571 = arith.mulf %569, %570 : vector<13x32xf32>
        %572 = vector.broadcast %95 : vector<1x32xf32> to vector<13x32xf32>
        %573 = arith.addf %571, %572 : vector<13x32xf32>
        %574 = arith.index_cast %arg8 : i32 to index
        %c651 = arith.constant 651 : index
        %c0_168 = arith.constant 0 : index
        %575 = tpu.strided_load %arg6[%574, %c651, %c0_168] {strides = array<i32: 1, 2, 1>} : memref<2x676x32xf32, #tpu.memory_space<vmem>>, vector<1x13x32xf32>
        %576 = vector.shape_cast %575 : vector<1x13x32xf32> to vector<13x32xf32>
        %577 = vector.broadcast %92 : vector<1x32xf32> to vector<13x32xf32>
        %578 = arith.mulf %576, %577 : vector<13x32xf32>
        %579 = vector.broadcast %95 : vector<1x32xf32> to vector<13x32xf32>
        %580 = arith.addf %578, %579 : vector<13x32xf32>
        %581 = arith.maximumf %559, %566 : vector<13x32xf32>
        %582 = arith.maximumf %573, %580 : vector<13x32xf32>
        %583 = arith.maximumf %581, %582 : vector<13x32xf32>
        %cst_169 = arith.constant 0.000000e+00 : f32
        %584 = vector.broadcast %cst_169 : f32 to vector<13x32xf32>
        %585 = arith.maximumf %583, %584 : vector<13x32xf32>
        %586 = arith.truncf %585 : vector<13x32xf32> to vector<13x32xbf16>
        %587 = arith.index_cast %arg8 : i32 to index
        %c156_170 = arith.constant 156 : index
        %c0_171 = arith.constant 0 : index
        %588 = vector.load %arg5[%587, %c156_170, %c0_171] : memref<2x169x32xbf16, #tpu.memory_space<vmem>>, vector<1x13x32xbf16>
        %589 = vector.shape_cast %588 : vector<1x13x32xbf16> to vector<13x32xbf16>
        %590 = vector.shape_cast %586 : vector<13x32xbf16> to vector<1x13x32xbf16>
        tpu.vector_store %arg5[%587, %c156_170, %c0_171], %590 {strides = array<i32>} : memref<2x169x32xbf16, #tpu.memory_space<vmem>>, vector<1x13x32xbf16>,
      }
      %c2_i32_82 = arith.constant 2 : i32
    } else {
    }
    return
  }
  func.func @transform_0(%arg0: i32) -> (i32, i32, i32) {
    %c0_i32 = arith.constant 0 : i32
    %c0_i32_0 = arith.constant 0 : i32
    %c0_i32_1 = arith.constant 0 : i32
    return %arg0, %c0_i32, %c0_i32_0 : i32, i32, i32
  }
  func.func @transform_1(%arg0: i32) -> (i32, i32, i32) {
    %c0_i32 = arith.constant 0 : i32
    %c0_i32_0 = arith.constant 0 : i32
    %c0_i32_1 = arith.constant 0 : i32
    %c0_i32_2 = arith.constant 0 : i32
    return %c0_i32, %c0_i32_0, %c0_i32_1 : i32, i32, i32
  }
  func.func @transform_2(%arg0: i32) -> (i32, i32) {
    %c0_i32 = arith.constant 0 : i32
    %c0_i32_0 = arith.constant 0 : i32
    %c0_i32_1 = arith.constant 0 : i32
    return %c0_i32, %c0_i32_0 : i32, i32
  }
  func.func @transform_3(%arg0: i32) -> (i32, i32) {
    %c0_i32 = arith.constant 0 : i32
    %c0_i32_0 = arith.constant 0 : i32
    %c0_i32_1 = arith.constant 0 : i32
    return %c0_i32, %c0_i32_0 : i32, i32
  }
  func.func @transform_4(%arg0: i32) -> (i32, i32, i32) {
    %c0_i32 = arith.constant 0 : i32
    %c0_i32_0 = arith.constant 0 : i32
    %c0_i32_1 = arith.constant 0 : i32
    %c0_i32_2 = arith.constant 0 : i32
    return %c0_i32, %c0_i32_0, %c0_i32_1 : i32, i32, i32
  }
}

module attributes {stable_mosaic.version = 11 : i64} {
  func.func @_fused_conv_bn_pool_kernel(%arg0: i32, %arg1: memref<2x143x96xbf16, #tpu.memory_space<vmem>>, %arg2: memref<3x96x64xbf16, #tpu.memory_space<vmem>>, %arg3: memref<1x64xf32, #tpu.memory_space<vmem>>, %arg4: memref<1x64xf32, #tpu.memory_space<vmem>>, %arg5: memref<2x25x64xbf16, #tpu.memory_space<vmem>>, %arg6: memref<2x121x64xf32, #tpu.memory_space<vmem>>, %arg7: memref<2x64xf32, #tpu.memory_space<vmem>>) attributes {dimension_semantics = [#tpu.dimension_semantics<arbitrary>], iteration_bounds = array<i64: 1>, scalar_prefetch = 0 : i64, scratch_operands = 2 : i64, tpu.core_type = #tpu.core_type<tc>, window_params = [{transform_indices = @transform_0, window_bounds = array<i64: 2, 143, 96>}, {pipeline_mode = #tpu.pipeline_mode<synchronous>, transform_indices = @transform_1, window_bounds = array<i64: 3, 96, 64>}, {pipeline_mode = #tpu.pipeline_mode<synchronous>, transform_indices = @transform_2, window_bounds = array<i64: 1, 64>}, {pipeline_mode = #tpu.pipeline_mode<synchronous>, transform_indices = @transform_3, window_bounds = array<i64: 1, 64>}, {pipeline_mode = #tpu.pipeline_mode<synchronous>, transform_indices = @transform_4, window_bounds = array<i64: 2, 25, 64>}]} {
    %c0_i32 = arith.constant 0 : i32
    %0 = arith.cmpi eq, %arg0, %c0_i32 : i32
    %1 = arith.extui %0 : i1 to i32
    %c0_i32_0 = arith.constant 0 : i32
    %2 = arith.cmpi ne, %1, %c0_i32_0 : i32
    scf.if %2 {
      %cst_67 = arith.constant 0.000000e+00 : f32
      %78 = vector.broadcast %cst_67 : f32 to vector<2x64xf32>
      %c0_68 = arith.constant 0 : index
      %c0_69 = arith.constant 0 : index
      %79 = vector.load %arg7[%c0_68, %c0_69] : memref<2x64xf32, #tpu.memory_space<vmem>>, vector<2x64xf32>
      tpu.vector_store %arg7[%c0_68, %c0_69], %78 {strides = array<i32>} : memref<2x64xf32, #tpu.memory_space<vmem>>, vector<2x64xf32>,
    } else {
    }
    %cst = arith.constant 0.000000e+00 : f32
    %3 = vector.broadcast %cst : f32 to vector<121x64xf32>
    %c0 = arith.constant 0 : index
    %c0_1 = arith.constant 0 : index
    %c0_2 = arith.constant 0 : index
    %4 = vector.load %arg1[%c0, %c0_1, %c0_2] : memref<2x143x96xbf16, #tpu.memory_space<vmem>>, vector<1x121x96xbf16>
    %5 = vector.shape_cast %4 : vector<1x121x96xbf16> to vector<121x96xbf16>
    %c0_3 = arith.constant 0 : index
    %c0_4 = arith.constant 0 : index
    %c0_5 = arith.constant 0 : index
    %6 = vector.load %arg2[%c0_3, %c0_4, %c0_5] : memref<3x96x64xbf16, #tpu.memory_space<vmem>>, vector<1x96x64xbf16>
    %7 = vector.shape_cast %6 : vector<1x96x64xbf16> to vector<96x64xbf16>
    %cst_6 = arith.constant dense<0.000000e+00> : vector<121x64xf32>
    %8 = tpu.matmul %5, %7, %cst_6 {dimension_numbers = #tpu.dot_dimension_numbers<[1], [0], [0], [1], [0, 0, 1, 1], [], []>} : vector<121x96xbf16>, vector<96x64xbf16>, vector<121x64xf32> -> vector<121x64xf32>
    %9 = arith.addf %3, %8 : vector<121x64xf32>
    %c0_7 = arith.constant 0 : index
    %c11 = arith.constant 11 : index
    %c0_8 = arith.constant 0 : index
    %10 = vector.load %arg1[%c0_7, %c11, %c0_8] : memref<2x143x96xbf16, #tpu.memory_space<vmem>>, vector<1x121x96xbf16>
    %11 = vector.shape_cast %10 : vector<1x121x96xbf16> to vector<121x96xbf16>
    %c1 = arith.constant 1 : index
    %c0_9 = arith.constant 0 : index
    %c0_10 = arith.constant 0 : index
    %12 = vector.load %arg2[%c1, %c0_9, %c0_10] : memref<3x96x64xbf16, #tpu.memory_space<vmem>>, vector<1x96x64xbf16>
    %13 = vector.shape_cast %12 : vector<1x96x64xbf16> to vector<96x64xbf16>
    %cst_11 = arith.constant dense<0.000000e+00> : vector<121x64xf32>
    %14 = tpu.matmul %11, %13, %cst_11 {dimension_numbers = #tpu.dot_dimension_numbers<[1], [0], [0], [1], [0, 0, 1, 1], [], []>} : vector<121x96xbf16>, vector<96x64xbf16>, vector<121x64xf32> -> vector<121x64xf32>
    %15 = arith.addf %9, %14 : vector<121x64xf32>
    %c0_12 = arith.constant 0 : index
    %c22 = arith.constant 22 : index
    %c0_13 = arith.constant 0 : index
    %16 = vector.load %arg1[%c0_12, %c22, %c0_13] : memref<2x143x96xbf16, #tpu.memory_space<vmem>>, vector<1x121x96xbf16>
    %17 = vector.shape_cast %16 : vector<1x121x96xbf16> to vector<121x96xbf16>
    %c2 = arith.constant 2 : index
    %c0_14 = arith.constant 0 : index
    %c0_15 = arith.constant 0 : index
    %18 = vector.load %arg2[%c2, %c0_14, %c0_15] : memref<3x96x64xbf16, #tpu.memory_space<vmem>>, vector<1x96x64xbf16>
    %19 = vector.shape_cast %18 : vector<1x96x64xbf16> to vector<96x64xbf16>
    %cst_16 = arith.constant dense<0.000000e+00> : vector<121x64xf32>
    %20 = tpu.matmul %17, %19, %cst_16 {dimension_numbers = #tpu.dot_dimension_numbers<[1], [0], [0], [1], [0, 0, 1, 1], [], []>} : vector<121x96xbf16>, vector<96x64xbf16>, vector<121x64xf32> -> vector<121x64xf32>
    %21 = arith.addf %15, %20 : vector<121x64xf32>
    %c2_i32 = arith.constant 2 : i32
    %22 = arith.muli %arg0, %c2_i32 : i32
    %c0_i32_17 = arith.constant 0 : i32
    %23 = arith.addi %22, %c0_i32_17 : i32
    %24 = arith.index_cast %23 : i32 to index
    %c0_18 = arith.constant 0 : index
    %c0_19 = arith.constant 0 : index
    %25 = vector.load %arg6[%24, %c0_18, %c0_19] : memref<2x121x64xf32, #tpu.memory_space<vmem>>, vector<1x121x64xf32>
    %26 = vector.shape_cast %25 : vector<1x121x64xf32> to vector<121x64xf32>
    %27 = vector.shape_cast %21 : vector<121x64xf32> to vector<1x121x64xf32>
    tpu.vector_store %arg6[%24, %c0_18, %c0_19], %27 {strides = array<i32>} : memref<2x121x64xf32, #tpu.memory_space<vmem>>, vector<1x121x64xf32>,
    %c0_20 = arith.constant 0 : index
    %c0_21 = arith.constant 0 : index
    %28 = vector.load %arg7[%c0_20, %c0_21] : memref<2x64xf32, #tpu.memory_space<vmem>>, vector<1x64xf32>
    %cst_22 = arith.constant dense<0.000000e+00> : vector<64xf32>
    %29 = vector.multi_reduction <add>, %21, %cst_22 [0] : vector<121x64xf32> to vector<64xf32>
    %30 = vector.shape_cast %29 : vector<64xf32> to vector<1x64xf32>
    %31 = arith.addf %28, %30 : vector<1x64xf32>
    %c0_23 = arith.constant 0 : index
    %c0_24 = arith.constant 0 : index
    %32 = vector.load %arg7[%c0_23, %c0_24] : memref<2x64xf32, #tpu.memory_space<vmem>>, vector<1x64xf32>
    tpu.vector_store %arg7[%c0_23, %c0_24], %31 {strides = array<i32>} : memref<2x64xf32, #tpu.memory_space<vmem>>, vector<1x64xf32>,
    %c1_25 = arith.constant 1 : index
    %c0_26 = arith.constant 0 : index
    %33 = vector.load %arg7[%c1_25, %c0_26] : memref<2x64xf32, #tpu.memory_space<vmem>>, vector<1x64xf32>
    %34 = arith.mulf %21, %21 : vector<121x64xf32>
    %cst_27 = arith.constant dense<0.000000e+00> : vector<64xf32>
    %35 = vector.multi_reduction <add>, %34, %cst_27 [0] : vector<121x64xf32> to vector<64xf32>
    %36 = vector.shape_cast %35 : vector<64xf32> to vector<1x64xf32>
    %37 = arith.addf %33, %36 : vector<1x64xf32>
    %c1_28 = arith.constant 1 : index
    %c0_29 = arith.constant 0 : index
    %38 = vector.load %arg7[%c1_28, %c0_29] : memref<2x64xf32, #tpu.memory_space<vmem>>, vector<1x64xf32>
    tpu.vector_store %arg7[%c1_28, %c0_29], %37 {strides = array<i32>} : memref<2x64xf32, #tpu.memory_space<vmem>>, vector<1x64xf32>,
    %cst_30 = arith.constant 0.000000e+00 : f32
    %39 = vector.broadcast %cst_30 : f32 to vector<121x64xf32>
    %c1_31 = arith.constant 1 : index
    %c0_32 = arith.constant 0 : index
    %c0_33 = arith.constant 0 : index
    %40 = vector.load %arg1[%c1_31, %c0_32, %c0_33] : memref<2x143x96xbf16, #tpu.memory_space<vmem>>, vector<1x121x96xbf16>
    %41 = vector.shape_cast %40 : vector<1x121x96xbf16> to vector<121x96xbf16>
    %c0_34 = arith.constant 0 : index
    %c0_35 = arith.constant 0 : index
    %c0_36 = arith.constant 0 : index
    %42 = vector.load %arg2[%c0_34, %c0_35, %c0_36] : memref<3x96x64xbf16, #tpu.memory_space<vmem>>, vector<1x96x64xbf16>
    %43 = vector.shape_cast %42 : vector<1x96x64xbf16> to vector<96x64xbf16>
    %cst_37 = arith.constant dense<0.000000e+00> : vector<121x64xf32>
    %44 = tpu.matmul %41, %43, %cst_37 {dimension_numbers = #tpu.dot_dimension_numbers<[1], [0], [0], [1], [0, 0, 1, 1], [], []>} : vector<121x96xbf16>, vector<96x64xbf16>, vector<121x64xf32> -> vector<121x64xf32>
    %45 = arith.addf %39, %44 : vector<121x64xf32>
    %c1_38 = arith.constant 1 : index
    %c11_39 = arith.constant 11 : index
    %c0_40 = arith.constant 0 : index
    %46 = vector.load %arg1[%c1_38, %c11_39, %c0_40] : memref<2x143x96xbf16, #tpu.memory_space<vmem>>, vector<1x121x96xbf16>
    %47 = vector.shape_cast %46 : vector<1x121x96xbf16> to vector<121x96xbf16>
    %c1_41 = arith.constant 1 : index
    %c0_42 = arith.constant 0 : index
    %c0_43 = arith.constant 0 : index
    %48 = vector.load %arg2[%c1_41, %c0_42, %c0_43] : memref<3x96x64xbf16, #tpu.memory_space<vmem>>, vector<1x96x64xbf16>
    %49 = vector.shape_cast %48 : vector<1x96x64xbf16> to vector<96x64xbf16>
    %cst_44 = arith.constant dense<0.000000e+00> : vector<121x64xf32>
    %50 = tpu.matmul %47, %49, %cst_44 {dimension_numbers = #tpu.dot_dimension_numbers<[1], [0], [0], [1], [0, 0, 1, 1], [], []>} : vector<121x96xbf16>, vector<96x64xbf16>, vector<121x64xf32> -> vector<121x64xf32>
    %51 = arith.addf %45, %50 : vector<121x64xf32>
    %c1_45 = arith.constant 1 : index
    %c22_46 = arith.constant 22 : index
    %c0_47 = arith.constant 0 : index
    %52 = vector.load %arg1[%c1_45, %c22_46, %c0_47] : memref<2x143x96xbf16, #tpu.memory_space<vmem>>, vector<1x121x96xbf16>
    %53 = vector.shape_cast %52 : vector<1x121x96xbf16> to vector<121x96xbf16>
    %c2_48 = arith.constant 2 : index
    %c0_49 = arith.constant 0 : index
    %c0_50 = arith.constant 0 : index
    %54 = vector.load %arg2[%c2_48, %c0_49, %c0_50] : memref<3x96x64xbf16, #tpu.memory_space<vmem>>, vector<1x96x64xbf16>
    %55 = vector.shape_cast %54 : vector<1x96x64xbf16> to vector<96x64xbf16>
    %cst_51 = arith.constant dense<0.000000e+00> : vector<121x64xf32>
    %56 = tpu.matmul %53, %55, %cst_51 {dimension_numbers = #tpu.dot_dimension_numbers<[1], [0], [0], [1], [0, 0, 1, 1], [], []>} : vector<121x96xbf16>, vector<96x64xbf16>, vector<121x64xf32> -> vector<121x64xf32>
    %57 = arith.addf %51, %56 : vector<121x64xf32>
    %c2_i32_52 = arith.constant 2 : i32
    %58 = arith.muli %arg0, %c2_i32_52 : i32
    %c1_i32 = arith.constant 1 : i32
    %59 = arith.addi %58, %c1_i32 : i32
    %60 = arith.index_cast %59 : i32 to index
    %c0_53 = arith.constant 0 : index
    %c0_54 = arith.constant 0 : index
    %61 = vector.load %arg6[%60, %c0_53, %c0_54] : memref<2x121x64xf32, #tpu.memory_space<vmem>>, vector<1x121x64xf32>
    %62 = vector.shape_cast %61 : vector<1x121x64xf32> to vector<121x64xf32>
    %63 = vector.shape_cast %57 : vector<121x64xf32> to vector<1x121x64xf32>
    tpu.vector_store %arg6[%60, %c0_53, %c0_54], %63 {strides = array<i32>} : memref<2x121x64xf32, #tpu.memory_space<vmem>>, vector<1x121x64xf32>,
    %c0_55 = arith.constant 0 : index
    %c0_56 = arith.constant 0 : index
    %64 = vector.load %arg7[%c0_55, %c0_56] : memref<2x64xf32, #tpu.memory_space<vmem>>, vector<1x64xf32>
    %cst_57 = arith.constant dense<0.000000e+00> : vector<64xf32>
    %65 = vector.multi_reduction <add>, %57, %cst_57 [0] : vector<121x64xf32> to vector<64xf32>
    %66 = vector.shape_cast %65 : vector<64xf32> to vector<1x64xf32>
    %67 = arith.addf %64, %66 : vector<1x64xf32>
    %c0_58 = arith.constant 0 : index
    %c0_59 = arith.constant 0 : index
    %68 = vector.load %arg7[%c0_58, %c0_59] : memref<2x64xf32, #tpu.memory_space<vmem>>, vector<1x64xf32>
    tpu.vector_store %arg7[%c0_58, %c0_59], %67 {strides = array<i32>} : memref<2x64xf32, #tpu.memory_space<vmem>>, vector<1x64xf32>,
    %c1_60 = arith.constant 1 : index
    %c0_61 = arith.constant 0 : index
    %69 = vector.load %arg7[%c1_60, %c0_61] : memref<2x64xf32, #tpu.memory_space<vmem>>, vector<1x64xf32>
    %70 = arith.mulf %57, %57 : vector<121x64xf32>
    %cst_62 = arith.constant dense<0.000000e+00> : vector<64xf32>
    %71 = vector.multi_reduction <add>, %70, %cst_62 [0] : vector<121x64xf32> to vector<64xf32>
    %72 = vector.shape_cast %71 : vector<64xf32> to vector<1x64xf32>
    %73 = arith.addf %69, %72 : vector<1x64xf32>
    %c1_63 = arith.constant 1 : index
    %c0_64 = arith.constant 0 : index
    %74 = vector.load %arg7[%c1_63, %c0_64] : memref<2x64xf32, #tpu.memory_space<vmem>>, vector<1x64xf32>
    tpu.vector_store %arg7[%c1_63, %c0_64], %73 {strides = array<i32>} : memref<2x64xf32, #tpu.memory_space<vmem>>, vector<1x64xf32>,
    %c0_i32_65 = arith.constant 0 : i32
    %75 = arith.cmpi eq, %arg0, %c0_i32_65 : i32
    %76 = arith.extui %75 : i1 to i32
    %c0_i32_66 = arith.constant 0 : i32
    %77 = arith.cmpi ne, %76, %c0_i32_66 : i32
    scf.if %77 {
      %c0_67 = arith.constant 0 : index
      %c0_68 = arith.constant 0 : index
      %78 = vector.load %arg7[%c0_67, %c0_68] : memref<2x64xf32, #tpu.memory_space<vmem>>, vector<1x64xf32>
      %cst_69 = arith.constant 0.00413223123 : f32
      %79 = vector.broadcast %cst_69 : f32 to vector<1x64xf32>
      %80 = arith.mulf %78, %79 : vector<1x64xf32>
      %c1_70 = arith.constant 1 : index
      %c0_71 = arith.constant 0 : index
      %81 = vector.load %arg7[%c1_70, %c0_71] : memref<2x64xf32, #tpu.memory_space<vmem>>, vector<1x64xf32>
      %cst_72 = arith.constant 0.00413223123 : f32
      %82 = vector.broadcast %cst_72 : f32 to vector<1x64xf32>
      %83 = arith.mulf %81, %82 : vector<1x64xf32>
      %84 = arith.mulf %80, %80 : vector<1x64xf32>
      %85 = arith.subf %83, %84 : vector<1x64xf32>
      %cst_73 = arith.constant 0.000000e+00 : f32
      %86 = vector.broadcast %cst_73 : f32 to vector<1x64xf32>
      %87 = arith.maximumf %85, %86 : vector<1x64xf32>
      %c0_74 = arith.constant 0 : index
      %c0_75 = arith.constant 0 : index
      %88 = vector.load %arg3[%c0_74, %c0_75] : memref<1x64xf32, #tpu.memory_space<vmem>>, vector<1x64xf32>
      %cst_76 = arith.constant 9.99999974E-6 : f32
      %89 = vector.broadcast %cst_76 : f32 to vector<1x64xf32>
      %90 = arith.addf %87, %89 : vector<1x64xf32>
      %91 = math.rsqrt %90 : vector<1x64xf32>
      %92 = arith.mulf %88, %91 : vector<1x64xf32>
      %c0_77 = arith.constant 0 : index
      %c0_78 = arith.constant 0 : index
      %93 = vector.load %arg4[%c0_77, %c0_78] : memref<1x64xf32, #tpu.memory_space<vmem>>, vector<1x64xf32>
      %94 = arith.mulf %80, %92 : vector<1x64xf32>
      %95 = arith.subf %93, %94 : vector<1x64xf32>
      %c0_i32_79 = arith.constant 0 : i32
      %c2_i32_80 = arith.constant 2 : i32
      %96 = arith.addi %c0_i32_79, %c2_i32_80 : i32
      %c1_i32_81 = arith.constant 1 : i32
      scf.for %arg8 = %c0_i32_79 to %96 step %c1_i32_81  : i32 {
        %97 = arith.index_cast %arg8 : i32 to index
        %c0_83 = arith.constant 0 : index
        %c0_84 = arith.constant 0 : index
        %98 = tpu.strided_load %arg6[%97, %c0_83, %c0_84] {strides = array<i32: 1, 2, 1>} : memref<2x121x64xf32, #tpu.memory_space<vmem>>, vector<1x5x64xf32>
        %99 = vector.shape_cast %98 : vector<1x5x64xf32> to vector<5x64xf32>
        %100 = vector.broadcast %92 : vector<1x64xf32> to vector<5x64xf32>
        %101 = arith.mulf %99, %100 : vector<5x64xf32>
        %102 = vector.broadcast %95 : vector<1x64xf32> to vector<5x64xf32>
        %103 = arith.addf %101, %102 : vector<5x64xf32>
        %104 = arith.index_cast %arg8 : i32 to index
        %c1_85 = arith.constant 1 : index
        %c0_86 = arith.constant 0 : index
        %105 = tpu.strided_load %arg6[%104, %c1_85, %c0_86] {strides = array<i32: 1, 2, 1>} : memref<2x121x64xf32, #tpu.memory_space<vmem>>, vector<1x5x64xf32>
        %106 = vector.shape_cast %105 : vector<1x5x64xf32> to vector<5x64xf32>
        %107 = vector.broadcast %92 : vector<1x64xf32> to vector<5x64xf32>
        %108 = arith.mulf %106, %107 : vector<5x64xf32>
        %109 = vector.broadcast %95 : vector<1x64xf32> to vector<5x64xf32>
        %110 = arith.addf %108, %109 : vector<5x64xf32>
        %111 = arith.index_cast %arg8 : i32 to index
        %c11_87 = arith.constant 11 : index
        %c0_88 = arith.constant 0 : index
        %112 = tpu.strided_load %arg6[%111, %c11_87, %c0_88] {strides = array<i32: 1, 2, 1>} : memref<2x121x64xf32, #tpu.memory_space<vmem>>, vector<1x5x64xf32>
        %113 = vector.shape_cast %112 : vector<1x5x64xf32> to vector<5x64xf32>
        %114 = vector.broadcast %92 : vector<1x64xf32> to vector<5x64xf32>
        %115 = arith.mulf %113, %114 : vector<5x64xf32>
        %116 = vector.broadcast %95 : vector<1x64xf32> to vector<5x64xf32>
        %117 = arith.addf %115, %116 : vector<5x64xf32>
        %118 = arith.index_cast %arg8 : i32 to index
        %c12 = arith.constant 12 : index
        %c0_89 = arith.constant 0 : index
        %119 = tpu.strided_load %arg6[%118, %c12, %c0_89] {strides = array<i32: 1, 2, 1>} : memref<2x121x64xf32, #tpu.memory_space<vmem>>, vector<1x5x64xf32>
        %120 = vector.shape_cast %119 : vector<1x5x64xf32> to vector<5x64xf32>
        %121 = vector.broadcast %92 : vector<1x64xf32> to vector<5x64xf32>
        %122 = arith.mulf %120, %121 : vector<5x64xf32>
        %123 = vector.broadcast %95 : vector<1x64xf32> to vector<5x64xf32>
        %124 = arith.addf %122, %123 : vector<5x64xf32>
        %125 = arith.maximumf %103, %110 : vector<5x64xf32>
        %126 = arith.maximumf %117, %124 : vector<5x64xf32>
        %127 = arith.maximumf %125, %126 : vector<5x64xf32>
        %cst_90 = arith.constant 0.000000e+00 : f32
        %128 = vector.broadcast %cst_90 : f32 to vector<5x64xf32>
        %129 = arith.maximumf %127, %128 : vector<5x64xf32>
        %130 = arith.truncf %129 : vector<5x64xf32> to vector<5x64xbf16>
        %131 = arith.index_cast %arg8 : i32 to index
        %c0_91 = arith.constant 0 : index
        %c0_92 = arith.constant 0 : index
        %132 = vector.load %arg5[%131, %c0_91, %c0_92] : memref<2x25x64xbf16, #tpu.memory_space<vmem>>, vector<1x5x64xbf16>
        %133 = vector.shape_cast %132 : vector<1x5x64xbf16> to vector<5x64xbf16>
        %134 = vector.shape_cast %130 : vector<5x64xbf16> to vector<1x5x64xbf16>
        tpu.vector_store %arg5[%131, %c0_91, %c0_92], %134 {strides = array<i32>} : memref<2x25x64xbf16, #tpu.memory_space<vmem>>, vector<1x5x64xbf16>,
        %135 = arith.index_cast %arg8 : i32 to index
        %c22_93 = arith.constant 22 : index
        %c0_94 = arith.constant 0 : index
        %136 = tpu.strided_load %arg6[%135, %c22_93, %c0_94] {strides = array<i32: 1, 2, 1>} : memref<2x121x64xf32, #tpu.memory_space<vmem>>, vector<1x5x64xf32>
        %137 = vector.shape_cast %136 : vector<1x5x64xf32> to vector<5x64xf32>
        %138 = vector.broadcast %92 : vector<1x64xf32> to vector<5x64xf32>
        %139 = arith.mulf %137, %138 : vector<5x64xf32>
        %140 = vector.broadcast %95 : vector<1x64xf32> to vector<5x64xf32>
        %141 = arith.addf %139, %140 : vector<5x64xf32>
        %142 = arith.index_cast %arg8 : i32 to index
        %c23 = arith.constant 23 : index
        %c0_95 = arith.constant 0 : index
        %143 = tpu.strided_load %arg6[%142, %c23, %c0_95] {strides = array<i32: 1, 2, 1>} : memref<2x121x64xf32, #tpu.memory_space<vmem>>, vector<1x5x64xf32>
        %144 = vector.shape_cast %143 : vector<1x5x64xf32> to vector<5x64xf32>
        %145 = vector.broadcast %92 : vector<1x64xf32> to vector<5x64xf32>
        %146 = arith.mulf %144, %145 : vector<5x64xf32>
        %147 = vector.broadcast %95 : vector<1x64xf32> to vector<5x64xf32>
        %148 = arith.addf %146, %147 : vector<5x64xf32>
        %149 = arith.index_cast %arg8 : i32 to index
        %c33 = arith.constant 33 : index
        %c0_96 = arith.constant 0 : index
        %150 = tpu.strided_load %arg6[%149, %c33, %c0_96] {strides = array<i32: 1, 2, 1>} : memref<2x121x64xf32, #tpu.memory_space<vmem>>, vector<1x5x64xf32>
        %151 = vector.shape_cast %150 : vector<1x5x64xf32> to vector<5x64xf32>
        %152 = vector.broadcast %92 : vector<1x64xf32> to vector<5x64xf32>
        %153 = arith.mulf %151, %152 : vector<5x64xf32>
        %154 = vector.broadcast %95 : vector<1x64xf32> to vector<5x64xf32>
        %155 = arith.addf %153, %154 : vector<5x64xf32>
        %156 = arith.index_cast %arg8 : i32 to index
        %c34 = arith.constant 34 : index
        %c0_97 = arith.constant 0 : index
        %157 = tpu.strided_load %arg6[%156, %c34, %c0_97] {strides = array<i32: 1, 2, 1>} : memref<2x121x64xf32, #tpu.memory_space<vmem>>, vector<1x5x64xf32>
        %158 = vector.shape_cast %157 : vector<1x5x64xf32> to vector<5x64xf32>
        %159 = vector.broadcast %92 : vector<1x64xf32> to vector<5x64xf32>
        %160 = arith.mulf %158, %159 : vector<5x64xf32>
        %161 = vector.broadcast %95 : vector<1x64xf32> to vector<5x64xf32>
        %162 = arith.addf %160, %161 : vector<5x64xf32>
        %163 = arith.maximumf %141, %148 : vector<5x64xf32>
        %164 = arith.maximumf %155, %162 : vector<5x64xf32>
        %165 = arith.maximumf %163, %164 : vector<5x64xf32>
        %cst_98 = arith.constant 0.000000e+00 : f32
        %166 = vector.broadcast %cst_98 : f32 to vector<5x64xf32>
        %167 = arith.maximumf %165, %166 : vector<5x64xf32>
        %168 = arith.truncf %167 : vector<5x64xf32> to vector<5x64xbf16>
        %169 = arith.index_cast %arg8 : i32 to index
        %c5 = arith.constant 5 : index
        %c0_99 = arith.constant 0 : index
        %170 = vector.load %arg5[%169, %c5, %c0_99] : memref<2x25x64xbf16, #tpu.memory_space<vmem>>, vector<1x5x64xbf16>
        %171 = vector.shape_cast %170 : vector<1x5x64xbf16> to vector<5x64xbf16>
        %172 = vector.shape_cast %168 : vector<5x64xbf16> to vector<1x5x64xbf16>
        tpu.vector_store %arg5[%169, %c5, %c0_99], %172 {strides = array<i32>} : memref<2x25x64xbf16, #tpu.memory_space<vmem>>, vector<1x5x64xbf16>,
        %173 = arith.index_cast %arg8 : i32 to index
        %c44 = arith.constant 44 : index
        %c0_100 = arith.constant 0 : index
        %174 = tpu.strided_load %arg6[%173, %c44, %c0_100] {strides = array<i32: 1, 2, 1>} : memref<2x121x64xf32, #tpu.memory_space<vmem>>, vector<1x5x64xf32>
        %175 = vector.shape_cast %174 : vector<1x5x64xf32> to vector<5x64xf32>
        %176 = vector.broadcast %92 : vector<1x64xf32> to vector<5x64xf32>
        %177 = arith.mulf %175, %176 : vector<5x64xf32>
        %178 = vector.broadcast %95 : vector<1x64xf32> to vector<5x64xf32>
        %179 = arith.addf %177, %178 : vector<5x64xf32>
        %180 = arith.index_cast %arg8 : i32 to index
        %c45 = arith.constant 45 : index
        %c0_101 = arith.constant 0 : index
        %181 = tpu.strided_load %arg6[%180, %c45, %c0_101] {strides = array<i32: 1, 2, 1>} : memref<2x121x64xf32, #tpu.memory_space<vmem>>, vector<1x5x64xf32>
        %182 = vector.shape_cast %181 : vector<1x5x64xf32> to vector<5x64xf32>
        %183 = vector.broadcast %92 : vector<1x64xf32> to vector<5x64xf32>
        %184 = arith.mulf %182, %183 : vector<5x64xf32>
        %185 = vector.broadcast %95 : vector<1x64xf32> to vector<5x64xf32>
        %186 = arith.addf %184, %185 : vector<5x64xf32>
        %187 = arith.index_cast %arg8 : i32 to index
        %c55 = arith.constant 55 : index
        %c0_102 = arith.constant 0 : index
        %188 = tpu.strided_load %arg6[%187, %c55, %c0_102] {strides = array<i32: 1, 2, 1>} : memref<2x121x64xf32, #tpu.memory_space<vmem>>, vector<1x5x64xf32>
        %189 = vector.shape_cast %188 : vector<1x5x64xf32> to vector<5x64xf32>
        %190 = vector.broadcast %92 : vector<1x64xf32> to vector<5x64xf32>
        %191 = arith.mulf %189, %190 : vector<5x64xf32>
        %192 = vector.broadcast %95 : vector<1x64xf32> to vector<5x64xf32>
        %193 = arith.addf %191, %192 : vector<5x64xf32>
        %194 = arith.index_cast %arg8 : i32 to index
        %c56 = arith.constant 56 : index
        %c0_103 = arith.constant 0 : index
        %195 = tpu.strided_load %arg6[%194, %c56, %c0_103] {strides = array<i32: 1, 2, 1>} : memref<2x121x64xf32, #tpu.memory_space<vmem>>, vector<1x5x64xf32>
        %196 = vector.shape_cast %195 : vector<1x5x64xf32> to vector<5x64xf32>
        %197 = vector.broadcast %92 : vector<1x64xf32> to vector<5x64xf32>
        %198 = arith.mulf %196, %197 : vector<5x64xf32>
        %199 = vector.broadcast %95 : vector<1x64xf32> to vector<5x64xf32>
        %200 = arith.addf %198, %199 : vector<5x64xf32>
        %201 = arith.maximumf %179, %186 : vector<5x64xf32>
        %202 = arith.maximumf %193, %200 : vector<5x64xf32>
        %203 = arith.maximumf %201, %202 : vector<5x64xf32>
        %cst_104 = arith.constant 0.000000e+00 : f32
        %204 = vector.broadcast %cst_104 : f32 to vector<5x64xf32>
        %205 = arith.maximumf %203, %204 : vector<5x64xf32>
        %206 = arith.truncf %205 : vector<5x64xf32> to vector<5x64xbf16>
        %207 = arith.index_cast %arg8 : i32 to index
        %c10 = arith.constant 10 : index
        %c0_105 = arith.constant 0 : index
        %208 = vector.load %arg5[%207, %c10, %c0_105] : memref<2x25x64xbf16, #tpu.memory_space<vmem>>, vector<1x5x64xbf16>
        %209 = vector.shape_cast %208 : vector<1x5x64xbf16> to vector<5x64xbf16>
        %210 = vector.shape_cast %206 : vector<5x64xbf16> to vector<1x5x64xbf16>
        tpu.vector_store %arg5[%207, %c10, %c0_105], %210 {strides = array<i32>} : memref<2x25x64xbf16, #tpu.memory_space<vmem>>, vector<1x5x64xbf16>,
        %211 = arith.index_cast %arg8 : i32 to index
        %c66 = arith.constant 66 : index
        %c0_106 = arith.constant 0 : index
        %212 = tpu.strided_load %arg6[%211, %c66, %c0_106] {strides = array<i32: 1, 2, 1>} : memref<2x121x64xf32, #tpu.memory_space<vmem>>, vector<1x5x64xf32>
        %213 = vector.shape_cast %212 : vector<1x5x64xf32> to vector<5x64xf32>
        %214 = vector.broadcast %92 : vector<1x64xf32> to vector<5x64xf32>
        %215 = arith.mulf %213, %214 : vector<5x64xf32>
        %216 = vector.broadcast %95 : vector<1x64xf32> to vector<5x64xf32>
        %217 = arith.addf %215, %216 : vector<5x64xf32>
        %218 = arith.index_cast %arg8 : i32 to index
        %c67 = arith.constant 67 : index
        %c0_107 = arith.constant 0 : index
        %219 = tpu.strided_load %arg6[%218, %c67, %c0_107] {strides = array<i32: 1, 2, 1>} : memref<2x121x64xf32, #tpu.memory_space<vmem>>, vector<1x5x64xf32>
        %220 = vector.shape_cast %219 : vector<1x5x64xf32> to vector<5x64xf32>
        %221 = vector.broadcast %92 : vector<1x64xf32> to vector<5x64xf32>
        %222 = arith.mulf %220, %221 : vector<5x64xf32>
        %223 = vector.broadcast %95 : vector<1x64xf32> to vector<5x64xf32>
        %224 = arith.addf %222, %223 : vector<5x64xf32>
        %225 = arith.index_cast %arg8 : i32 to index
        %c77 = arith.constant 77 : index
        %c0_108 = arith.constant 0 : index
        %226 = tpu.strided_load %arg6[%225, %c77, %c0_108] {strides = array<i32: 1, 2, 1>} : memref<2x121x64xf32, #tpu.memory_space<vmem>>, vector<1x5x64xf32>
        %227 = vector.shape_cast %226 : vector<1x5x64xf32> to vector<5x64xf32>
        %228 = vector.broadcast %92 : vector<1x64xf32> to vector<5x64xf32>
        %229 = arith.mulf %227, %228 : vector<5x64xf32>
        %230 = vector.broadcast %95 : vector<1x64xf32> to vector<5x64xf32>
        %231 = arith.addf %229, %230 : vector<5x64xf32>
        %232 = arith.index_cast %arg8 : i32 to index
        %c78 = arith.constant 78 : index
        %c0_109 = arith.constant 0 : index
        %233 = tpu.strided_load %arg6[%232, %c78, %c0_109] {strides = array<i32: 1, 2, 1>} : memref<2x121x64xf32, #tpu.memory_space<vmem>>, vector<1x5x64xf32>
        %234 = vector.shape_cast %233 : vector<1x5x64xf32> to vector<5x64xf32>
        %235 = vector.broadcast %92 : vector<1x64xf32> to vector<5x64xf32>
        %236 = arith.mulf %234, %235 : vector<5x64xf32>
        %237 = vector.broadcast %95 : vector<1x64xf32> to vector<5x64xf32>
        %238 = arith.addf %236, %237 : vector<5x64xf32>
        %239 = arith.maximumf %217, %224 : vector<5x64xf32>
        %240 = arith.maximumf %231, %238 : vector<5x64xf32>
        %241 = arith.maximumf %239, %240 : vector<5x64xf32>
        %cst_110 = arith.constant 0.000000e+00 : f32
        %242 = vector.broadcast %cst_110 : f32 to vector<5x64xf32>
        %243 = arith.maximumf %241, %242 : vector<5x64xf32>
        %244 = arith.truncf %243 : vector<5x64xf32> to vector<5x64xbf16>
        %245 = arith.index_cast %arg8 : i32 to index
        %c15 = arith.constant 15 : index
        %c0_111 = arith.constant 0 : index
        %246 = vector.load %arg5[%245, %c15, %c0_111] : memref<2x25x64xbf16, #tpu.memory_space<vmem>>, vector<1x5x64xbf16>
        %247 = vector.shape_cast %246 : vector<1x5x64xbf16> to vector<5x64xbf16>
        %248 = vector.shape_cast %244 : vector<5x64xbf16> to vector<1x5x64xbf16>
        tpu.vector_store %arg5[%245, %c15, %c0_111], %248 {strides = array<i32>} : memref<2x25x64xbf16, #tpu.memory_space<vmem>>, vector<1x5x64xbf16>,
        %249 = arith.index_cast %arg8 : i32 to index
        %c88 = arith.constant 88 : index
        %c0_112 = arith.constant 0 : index
        %250 = tpu.strided_load %arg6[%249, %c88, %c0_112] {strides = array<i32: 1, 2, 1>} : memref<2x121x64xf32, #tpu.memory_space<vmem>>, vector<1x5x64xf32>
        %251 = vector.shape_cast %250 : vector<1x5x64xf32> to vector<5x64xf32>
        %252 = vector.broadcast %92 : vector<1x64xf32> to vector<5x64xf32>
        %253 = arith.mulf %251, %252 : vector<5x64xf32>
        %254 = vector.broadcast %95 : vector<1x64xf32> to vector<5x64xf32>
        %255 = arith.addf %253, %254 : vector<5x64xf32>
        %256 = arith.index_cast %arg8 : i32 to index
        %c89 = arith.constant 89 : index
        %c0_113 = arith.constant 0 : index
        %257 = tpu.strided_load %arg6[%256, %c89, %c0_113] {strides = array<i32: 1, 2, 1>} : memref<2x121x64xf32, #tpu.memory_space<vmem>>, vector<1x5x64xf32>
        %258 = vector.shape_cast %257 : vector<1x5x64xf32> to vector<5x64xf32>
        %259 = vector.broadcast %92 : vector<1x64xf32> to vector<5x64xf32>
        %260 = arith.mulf %258, %259 : vector<5x64xf32>
        %261 = vector.broadcast %95 : vector<1x64xf32> to vector<5x64xf32>
        %262 = arith.addf %260, %261 : vector<5x64xf32>
        %263 = arith.index_cast %arg8 : i32 to index
        %c99 = arith.constant 99 : index
        %c0_114 = arith.constant 0 : index
        %264 = tpu.strided_load %arg6[%263, %c99, %c0_114] {strides = array<i32: 1, 2, 1>} : memref<2x121x64xf32, #tpu.memory_space<vmem>>, vector<1x5x64xf32>
        %265 = vector.shape_cast %264 : vector<1x5x64xf32> to vector<5x64xf32>
        %266 = vector.broadcast %92 : vector<1x64xf32> to vector<5x64xf32>
        %267 = arith.mulf %265, %266 : vector<5x64xf32>
        %268 = vector.broadcast %95 : vector<1x64xf32> to vector<5x64xf32>
        %269 = arith.addf %267, %268 : vector<5x64xf32>
        %270 = arith.index_cast %arg8 : i32 to index
        %c100 = arith.constant 100 : index
        %c0_115 = arith.constant 0 : index
        %271 = tpu.strided_load %arg6[%270, %c100, %c0_115] {strides = array<i32: 1, 2, 1>} : memref<2x121x64xf32, #tpu.memory_space<vmem>>, vector<1x5x64xf32>
        %272 = vector.shape_cast %271 : vector<1x5x64xf32> to vector<5x64xf32>
        %273 = vector.broadcast %92 : vector<1x64xf32> to vector<5x64xf32>
        %274 = arith.mulf %272, %273 : vector<5x64xf32>
        %275 = vector.broadcast %95 : vector<1x64xf32> to vector<5x64xf32>
        %276 = arith.addf %274, %275 : vector<5x64xf32>
        %277 = arith.maximumf %255, %262 : vector<5x64xf32>
        %278 = arith.maximumf %269, %276 : vector<5x64xf32>
        %279 = arith.maximumf %277, %278 : vector<5x64xf32>
        %cst_116 = arith.constant 0.000000e+00 : f32
        %280 = vector.broadcast %cst_116 : f32 to vector<5x64xf32>
        %281 = arith.maximumf %279, %280 : vector<5x64xf32>
        %282 = arith.truncf %281 : vector<5x64xf32> to vector<5x64xbf16>
        %283 = arith.index_cast %arg8 : i32 to index
        %c20 = arith.constant 20 : index
        %c0_117 = arith.constant 0 : index
        %284 = vector.load %arg5[%283, %c20, %c0_117] : memref<2x25x64xbf16, #tpu.memory_space<vmem>>, vector<1x5x64xbf16>
        %285 = vector.shape_cast %284 : vector<1x5x64xbf16> to vector<5x64xbf16>
        %286 = vector.shape_cast %282 : vector<5x64xbf16> to vector<1x5x64xbf16>
        tpu.vector_store %arg5[%283, %c20, %c0_117], %286 {strides = array<i32>} : memref<2x25x64xbf16, #tpu.memory_space<vmem>>, vector<1x5x64xbf16>,
      }
      %c2_i32_82 = arith.constant 2 : i32
    } else {
    }
    return
  }
  func.func @transform_0(%arg0: i32) -> (i32, i32, i32) {
    %c0_i32 = arith.constant 0 : i32
    %c0_i32_0 = arith.constant 0 : i32
    %c0_i32_1 = arith.constant 0 : i32
    return %arg0, %c0_i32, %c0_i32_0 : i32, i32, i32
  }
  func.func @transform_1(%arg0: i32) -> (i32, i32, i32) {
    %c0_i32 = arith.constant 0 : i32
    %c0_i32_0 = arith.constant 0 : i32
    %c0_i32_1 = arith.constant 0 : i32
    %c0_i32_2 = arith.constant 0 : i32
    return %c0_i32, %c0_i32_0, %c0_i32_1 : i32, i32, i32
  }
  func.func @transform_2(%arg0: i32) -> (i32, i32) {
    %c0_i32 = arith.constant 0 : i32
    %c0_i32_0 = arith.constant 0 : i32
    %c0_i32_1 = arith.constant 0 : i32
    return %c0_i32, %c0_i32_0 : i32, i32
  }
  func.func @transform_3(%arg0: i32) -> (i32, i32) {
    %c0_i32 = arith.constant 0 : i32
    %c0_i32_0 = arith.constant 0 : i32
    %c0_i32_1 = arith.constant 0 : i32
    return %c0_i32, %c0_i32_0 : i32, i32
  }
  func.func @transform_4(%arg0: i32) -> (i32, i32, i32) {
    %c0_i32 = arith.constant 0 : i32
    %c0_i32_0 = arith.constant 0 : i32
    %c0_i32_1 = arith.constant 0 : i32
    %c0_i32_2 = arith.constant 0 : i32
    return %c0_i32, %c0_i32_0, %c0_i32_1 : i32, i32, i32
  }
}

module attributes {stable_mosaic.version = 11 : i64} {
  func.func @_linear_kernel(%arg0: i32, %arg1: memref<8x1600xbf16, #tpu.memory_space<vmem>>, %arg2: memref<1600x10xbf16, #tpu.memory_space<vmem>>, %arg3: memref<1x10xf32, #tpu.memory_space<vmem>>, %arg4: memref<8x10xf32, #tpu.memory_space<vmem>>) attributes {dimension_semantics = [#tpu.dimension_semantics<parallel>], iteration_bounds = array<i64: 1>, scalar_prefetch = 0 : i64, scratch_operands = 0 : i64, tpu.core_type = #tpu.core_type<tc>, window_params = [{transform_indices = @transform_0, window_bounds = array<i64: 8, 1600>}, {pipeline_mode = #tpu.pipeline_mode<synchronous>, transform_indices = @transform_1, window_bounds = array<i64: 1600, 10>}, {pipeline_mode = #tpu.pipeline_mode<synchronous>, transform_indices = @transform_2, window_bounds = array<i64: 1, 10>}, {transform_indices = @transform_3, window_bounds = array<i64: 8, 10>}]} {
    %c0 = arith.constant 0 : index
    %c0_0 = arith.constant 0 : index
    %0 = vector.load %arg1[%c0, %c0_0] : memref<8x1600xbf16, #tpu.memory_space<vmem>>, vector<8x1600xbf16>
    %c0_1 = arith.constant 0 : index
    %c0_2 = arith.constant 0 : index
    %1 = vector.load %arg2[%c0_1, %c0_2] : memref<1600x10xbf16, #tpu.memory_space<vmem>>, vector<1600x10xbf16>
    %cst = arith.constant dense<0.000000e+00> : vector<8x10xf32>
    %2 = tpu.matmul %0, %1, %cst {dimension_numbers = #tpu.dot_dimension_numbers<[1], [0], [0], [1], [0, 0, 1, 1], [], []>} : vector<8x1600xbf16>, vector<1600x10xbf16>, vector<8x10xf32> -> vector<8x10xf32>
    %c0_3 = arith.constant 0 : index
    %c0_4 = arith.constant 0 : index
    %3 = vector.load %arg3[%c0_3, %c0_4] : memref<1x10xf32, #tpu.memory_space<vmem>>, vector<1x10xf32>
    %4 = vector.broadcast %3 : vector<1x10xf32> to vector<8x10xf32>
    %5 = arith.addf %2, %4 : vector<8x10xf32>
    %c0_5 = arith.constant 0 : index
    %c0_6 = arith.constant 0 : index
    %6 = vector.load %arg4[%c0_5, %c0_6] : memref<8x10xf32, #tpu.memory_space<vmem>>, vector<8x10xf32>
    tpu.vector_store %arg4[%c0_5, %c0_6], %5 {strides = array<i32>} : memref<8x10xf32, #tpu.memory_space<vmem>>, vector<8x10xf32>,
    return
  }
  func.func @transform_0(%arg0: i32) -> (i32, i32) {
    %c0_i32 = arith.constant 0 : i32
    %c0_i32_0 = arith.constant 0 : i32
    return %arg0, %c0_i32 : i32, i32
  }
  func.func @transform_1(%arg0: i32) -> (i32, i32) {
    %c0_i32 = arith.constant 0 : i32
    %c0_i32_0 = arith.constant 0 : i32
    %c0_i32_1 = arith.constant 0 : i32
    return %c0_i32, %c0_i32_0 : i32, i32
  }
  func.func @transform_2(%arg0: i32) -> (i32, i32) {
    %c0_i32 = arith.constant 0 : i32
    %c0_i32_0 = arith.constant 0 : i32
    %c0_i32_1 = arith.constant 0 : i32
    return %c0_i32, %c0_i32_0 : i32, i32
  }
  func.func @transform_3(%arg0: i32) -> (i32, i32) {
    %c0_i32 = arith.constant 0 : i32
    %c0_i32_0 = arith.constant 0 : i32
    return %arg0, %c0_i32 : i32, i32
  }
}

</mosaic_0001>

<bundles_post_ra>
// kernel: model_bn_forward.4
= control target key start
LH: loop header
LB: loop body
LE: loop exit
PB: predicated region body
PF: predicated region fallthrough
CT: control target
= control target key end

     0   :  { %vm108_vm0 = vsmask.f32 6400  ;;  %vm216_vm1 = vcmask 785408   ;;  %vm578_vm2 = vcmask 1044480   ;;  %vm22_vm3 = vcmask 517120   ;;  %s3263_s7 = smov 0   ;;  %s3376_s1 = inlined_call_operand.vmem [shape: bf16[3,96,64], index: 1, kind: input, shape index: {}]   ;;  %s3377_s4 = inlined_call_operand.vmem [shape: bf16[2,25,64], index: 4, kind: output, shape index: {}]   ;;  %s3378_s0 = inlined_call_operand.vmem [shape: bf16[2,143,96], index: 0, kind: input, shape index: {}]   ;;  %s3379_s2 = inlined_call_operand.vmem [shape: f32[1,64], index: 2, kind: input, shape index: {}]   ;;  %s3380_s3 = inlined_call_operand.vmem [shape: f32[1,64], index: 3, kind: input, shape index: {}]  }
   0x1   :  { %v2478_v0 = vld [vmem:[%s3376_s1 + $0x58] sm:$0xff]   ;;  %v2479_v1 = vld [vmem:[%s3376_s1 + $0x28] sm:$0xff]   ;;  %v2480_v2 = vld [vmem:[%s3376_s1 + $0x50] sm:$0xff]   ;;  %vm770_vm4 = vcmask 523264   ;;  %vm786_vm5 = vcmask 516096  }
   0x2   :  { %2301 = vmatprep.subr.bf16.mxu0 %v2478_v0  ;;  %2329 = vmatprep.subr.bf16.mxu1 %v2479_v1  ;;  %v2481_v3 = vld [vmem:[%s3376_s1 + $0x20] sm:$0xff]   ;;  %v2482_v4 = vld [vmem:[%s3376_s1 + $0x48] sm:$0xff]   ;;  %v2483_v5 = vld [vmem:[%s3376_s1 + $0x18] sm:$0xff]  }
   0x3   :  { %2302 = vmatpush3.bf16.msra.mxu0 %v2478_v0  ;;  %2330 = vmatpush3.bf16.msra.mxu1 %v2479_v1  ;;  %v2484_v6 = vld [vmem:[%s3376_s1 + $0x40] sm:$0xff]   ;;  %v2485_v7 = vld [vmem:[%s3376_s1 + $0x10] sm:$0xff]   ;;  %v2486_v8 = vld [vmem:[%s3376_s1 + $0x38] sm:$0xff]  }
   0x4   :  { %2303 = vmatprep.subr.bf16.mxu0 %v2480_v2  ;;  %2331 = vmatprep.subr.bf16.mxu1 %v2481_v3  ;;  %v2487_v9 = vld [vmem:[%s3376_s1 + $0x8] sm:$0xff]   ;;  %v2641_v12 = vld [vmem:[%s3378_s0 + $0x10] sm:$0xf]  ;;  %v52_v13 = vld [vmem:[%s3378_s0 + $0x4] sm:$0xe] }
   0x5   :  { %v2631_v10 = vld [vmem:[%s3378_s0 + $0x8] sm:$0xf]  ;;  %v2636_v11 = vld [vmem:[%s3378_s0 + $0xc] sm:$0xf]  ;;  %v2492_v16 = vld [vmem:[%s3378_s0] sm:$0xff]  }
   0x6   :  { %v1984_v14 = vcombine.low %v2636_v11, %v2641_v12  ;;  %v1983_v15 = vcombine.low %v52_v13, %v2631_v10  ;;  %v2655_v17 = vld [vmem:[%s3378_s0 + $0x14] sm:$0xf]  ;;  %v2660_v18 = vld [vmem:[%s3378_s0 + $0x18] sm:$0xf]  ;;  %v2489_v23 = vld [vmem:[%s3376_s1] sm:$0xff]   ;;  %2341 = vmatprep.mubr.msk.bf16.mxu1 %vm216_vm1, %v2492_v16  ;;  %v2006_v46 = vcombine.low %v2631_v10, %v2636_v11 }
   0x7   :  { %2304 = vmatpush3.bf16.msra.mxu0 %v2480_v2  ;;  %2332 = vmatpush3.bf16.msra.mxu1 %v2481_v3  ;;  %v1985_v21 = vcombine.low %v2655_v17, %v2660_v18  ;;  %v2488_v22 = vld [vmem:[%s3376_s1 + $0x30] sm:$0xff]   ;;  %v2495_v35 = vld [vmem:[%s3376_s1 + $0x88] sm:$0xff]   ;;  %v2496_v36 = vld [vmem:[%s3376_s1 + $0x58] sm:$0xff]   ;;  %v2007_v52 = vcombine.low %v2641_v12, %v2655_v17 }
   0x8   :  { %2305 = vmatprep.subr.bf16.mxu0 %v2482_v4  ;;  %2333 = vmatprep.subr.bf16.mxu1 %v2483_v5  ;;  %v118_v19 = vshrl.u32 %v1984_v14, 16  ;;  %v121_v20 = vshll.u32 %v1984_v14, 16  ;;  %v110_v24 = vshrl.u32 %v1983_v15, 16  ;;  %v113_v25 = vshll.u32 %v1983_v15, 16  ;;  %v2680_v37 = vld [vmem:[%s3378_s0 + $0x1c] sm:$0xf] }
   0x9   :  { %v127_v28 = vshrl.u32 %v1985_v21, 16  ;;  %v130_v29 = vshll.u32 %v1985_v21, 16  ;;  %v2685_v39 = vld [vmem:[%s3378_s0 + $0x20] sm:$0xf]  ;;  %v2690_v40 = vld [vmem:[%s3378_s0 + $0x24] sm:$0xf]  ;;  %v2008_v14 = vcombine.low %v2660_v18, %v2680_v37 }
   0xa   :  { %v120_v26 = vrot.slane %v118_v19, 1  ;;  %v123_v27 = vrot.slane %v121_v20, 2  ;;  %v112_v30 = vrot.slane %v110_v24, 1  ;;  %v115_v31 = vrot.slane %v113_v25, 2  ;;  %v2695_v41 = vld [vmem:[%s3378_s0 + $0x28] sm:$0xf] }
   0xb   :  { %2306 = vmatpush3.bf16.msra.mxu0 %v2482_v4  ;;  %2334 = vmatpush3.bf16.msra.mxu1 %v2483_v5  ;;  %v129_v33 = vrot.slane %v127_v28, 1  ;;  %v132_v34 = vrot.slane %v130_v29, 2  ;;  %v1986_v43 = vcombine.low %v2680_v37, %v2685_v39  ;;  %v1987_v44 = vcombine.low %v2690_v40, %v2695_v41  ;;  %v2497_v51 = vld [vmem:[%s3376_s1 + $0x80] sm:$0xff]   ;;  %v2714_v54 = vld [vmem:[%s3378_s0 + $0x2c] sm:$0xf]  ;;  %v2502_v59 = vld [vmem:[%s3376_s1 + $0x50] sm:$0xff]  }
   0xc   :  { %2307 = vmatprep.subr.bf16.mxu0 %v2484_v6  ;;  %2335 = vmatprep.subr.bf16.mxu1 %v2485_v7  ;;  %v124_v32 = vor.u32 %v123_v27, %v120_v26  ;;  %v116_v38 = vor.u32 %v115_v31, %v112_v30  ;;  %v2719_v55 = vld [vmem:[%s3378_s0 + $0x30] sm:$0xf]  ;;  %v2729_v61 = vld [vmem:[%s3378_s0 + $0x34] sm:$0xf]  ;;  %v2503_v63 = vld [vmem:[%s3376_s1 + $0x78] sm:$0xff]   ;;  %v2009_v18 = vcombine.low %v2685_v39, %v2690_v40 }
   0xd   :  { %v133_v42 = vor.u32 %v132_v34, %v129_v33  ;;  %v136_v48 = vshrl.u32 %v1986_v43, 16  ;;  %v139_v49 = vshll.u32 %v1986_v43, 16  ;;  %v145_v50 = vshrl.u32 %v1987_v44, 16  ;;  %v2738_v0 = vld [vmem:[%s3378_s0 + $0x38] sm:$0xf]  ;;  %v2509_v17 = vld [vmem:[%s3376_s1 + $0x70] sm:$0xff]  }
   0xe   :  { %v125_v45 = vsel %vm108_vm0, %v116_v38, %v124_v32  ;;  %v148_v53 = vshll.u32 %v1987_v44, 16  ;;  %v1988_v60 = vcombine.low %v2714_v54, %v2719_v55  ;;  %v1989_v4 = vcombine.low %v2729_v61, %v2738_v0  ;;  %v2512_v12 = vld [vmem:[%s3378_s0 + $0x3c] sm:$0x3f]   ;;  %v2511_v24 = vld [vmem:[%s3376_s1 + $0x68] sm:$0xff]   ;;  %v2778_v30 = vld [vmem:[%s3378_s0 + $0x10] sm:$0xff]  }
   0xf   :  { %2308 = vmatpush3.bf16.msra.mxu0 %v2484_v6  ;;  %2336 = vmatpush3.bf16.msra.mxu1 %v2485_v7  ;;  %v134_v47 = vsel %vm108_vm0, %v124_v32, %v133_v42  ;;  %v138_v56 = vrot.slane %v136_v48, 1  ;;  %v141_v57 = vrot.slane %v139_v49, 2  ;;  %v147_v58 = vrot.slane %v145_v50, 1  ;;  %v2504_v7 = vld [vmem:[%s3376_s1 + $0x48] sm:$0xff]   ;;  %v2510_v20 = vld [vmem:[%s3376_s1 + $0x40] sm:$0xff]   ;;  %v2515_v29 = vld [vmem:[%s3376_s1 + $0x38] sm:$0xff]  }
  0x10   :  { %2309 = vmatprep.subr.bf16.mxu0 %v2486_v8  ;;  %2337 = vmatprep.subr.bf16.mxu1 %v2487_v9  ;;  %v150_v62 = vrot.slane %v148_v53, 2  ;;  %v154_v2 = vshrl.u32 %v1988_v60, 16  ;;  %v157_v3 = vshll.u32 %v1988_v60, 16  ;;  %v163_v10 = vshrl.u32 %v1989_v4, 16  ;;  %v2783_v31 = vld [vmem:[%s3378_s0 + $0x50] sm:$0xf] }
  0x11   :  { %2313 = vmatprep.mubr.msk.bf16.mxu0 %vm216_vm1, %v125_v45  ;;  %v142_v1 = vor.u32 %v141_v57, %v138_v56  ;;  %v166_v11 = vshll.u32 %v1989_v4, 16  ;;  %v172_v21 = vshrl.u32 %v2512_v12, 16  ;;  %v2789_v32 = vld [vmem:[%s3378_s0 + $0x54] sm:$0xf]  ;;  %v2794_v33 = vld [vmem:[%s3378_s0 + $0x58] sm:$0xf]  ;;  %v2010_v39 = vcombine.low %v2695_v41, %v2714_v54 }
  0x12   :  { %v151_v5 = vor.u32 %v150_v62, %v147_v58  ;;  %v165_v16 = vrot.slane %v163_v10, 1  ;;  %v2077_v34 = vld [vmem:[%s3378_s0 + $0x4c] sm:$0xe]  ;;  %v2093_v37 = vcombine.low %v2789_v32, %v2794_v33  ;;  %v2011_v40 = vcombine.low %v2719_v55, %v2729_v61  ;;  %v2816_v43 = vld [vmem:[%s3378_s0 + $0x5c] sm:$0xf]  ;;  %v2517_v45 = vld [vmem:[%s3376_s1 + $0x30] sm:$0xff]  }
  0x13   :  { %2310 = vmatpush3.bf16.msra.mxu0 %v2486_v8  ;;  %2338 = vmatpush3.bf16.msra.mxu1 %v2487_v9  ;;  %v143_v6 = vsel %vm108_vm0, %v133_v42, %v142_v1  ;;  %v156_v8 = vrot.slane %v154_v2, 1  ;;  %v159_v9 = vrot.slane %v157_v3, 2  ;;  %v168_v19 = vrot.slane %v166_v11, 2  ;;  %v2516_v42 = vld [vmem:[%s3376_s1 + $0x60] sm:$0xff]   ;;  %v2840_v60 = vld [vmem:[%s3376_s1 + $0x28] sm:$0xff]  }
  0x14   :  { %2311 = vmatprep.subr.bf16.mxu0 %v2488_v22  ;;  %2339 = vmatprep.subr.bf16.mxu1 %v2489_v23  ;;  %v152_v13 = vsel %vm108_vm0, %v142_v1, %v151_v5  ;;  %v174_v25 = vrot.slane %v172_v21, 1  ;;  %v2821_v44 = vld [vmem:[%s3378_s0 + $0x60] sm:$0xf]  ;;  %v977_v48 = vshrl.u32 %v2093_v37, 16  ;;  %v580_v49 = vrot.slane %v2778_v30, 3  ;;  %v2526_v1 = vld [vmem:[%s3376_s1 + $0x88] sm:$0xff]  }
  0x15   :  { %v160_v15 = vor.u32 %v159_v9, %v156_v8  ;;  %v169_v27 = vor.u32 %v168_v19, %v165_v16  ;;  %v980_v50 = vshll.u32 %v2093_v37, 16  ;;  %v2852_v2 = vld [vmem:[%s3378_s0 + $0x64] sm:$0xf]  ;;  %v2857_v3 = vld [vmem:[%s3378_s0 + $0x68] sm:$0xf]  ;;  %v2535_v37 = vld [vmem:[%s3378_s0 + $0x30] sm:$0xff]  }
  0x16   :  { %v979_v56 = vrot.slane %v977_v48, 1  ;;  %v2865_v8 = vld [vmem:[%s3378_s0 + $0x6c] sm:$0xf]  ;;  %v2870_v9 = vld [vmem:[%s3378_s0 + $0x70] sm:$0xf] }
  0x17   :  { %2312 = vmatpush3.bf16.msra.mxu0 %v2488_v22  ;;  %2340 = vmatpush3.bf16.msra.mxu1 %v2489_v23  ;;  %v175_v22 = vshll.u32 %v2512_v12, 16  ;;  %v161_v23 = vsel %vm108_vm0, %v151_v5, %v160_v15  ;;  %v170_v38 = vsel %vm108_vm0, %v160_v15, %v169_v27  ;;  %v982_v57 = vrot.slane %v980_v50, 2 }
  0x18   :  { %2357 = vmatprep.subr.bf16.mxu0 %v2495_v35  ;;  %2385 = vmatprep.subr.bf16.mxu1 %v2496_v36 }
  0x19   :  { %v177_v26 = vrot.slane %v175_v22, 2  ;;  %v983_v62 = vor.u32 %v982_v57, %v979_v56  ;;  %v2530_v22 = vld [vmem:[%s3378_s0 + $0x28] sm:$0xff]   ;;  %v2537_v57 = vld [vmem:[%s3378_s0 + $0x38] sm:$0xff]  }
  0x1a   :  { %2314 = vmatmul.mubr.msk.bf16.vlgmr.msra.gmra.mxu0 %vm216_vm1, %v134_v47  ;;  %2342 = vmatmul.mubr.msk.bf16.vlgmr.msra.gmra.mxu1 %vm216_vm1, %v2006_v46 }
  0x1b   :  { %2358 = vmatpush3.bf16.msra.mxu0 %v2495_v35  ;;  %2386 = vmatpush3.bf16.msra.mxu1 %v2496_v36  ;;  %v2770_v28 = vor.u32 %v177_v26, %v174_v25  ;;  %v2518_v35 = vld [vmem:[%s3378_s0 + $0x8] sm:$0xf8]   ;;  %v2092_v36 = vcombine.low %v2077_v34, %v2783_v31  ;;  %v2913_v34 = vld [vmem:[%s3378_s0 + $0x80] sm:$0xf] }
  0x1c   :  { %2359 = vmatprep.subr.bf16.mxu0 %v2497_v51  ;;  %2345 = vmatprep.mubr.msk.bf16.mxu1 %vm216_vm1, %v2007_v52  ;;  %v39_v52 = vld [vmem:[%s3378_s0 + $0x3c] sm:$0x1]  ;;  %v579_v53 = vrot.slane %v2518_v35, 3 }
  0x1d   :  { %2387 = vmatprep.subr.bf16.mxu1 %v2502_v59  ;;  %2317 = vmatprep.mubr.msk.bf16.mxu0 %vm216_vm1, %v143_v6  ;;  %v179_v41 = vsel %vm108_vm0, %v169_v27, %v2770_v28  ;;  %v969_v46 = vshrl.u32 %v2092_v36, 16  ;;  %v972_v47 = vshll.u32 %v2092_v36, 16  ;;  %v2095_v6 = vcombine.low %v2852_v2, %v2857_v3 }
  0x1e   :  { %v581_v10 = vsel %vm578_vm2, %v579_v53, %v580_v49 }
  0x1f   :  { %2360 = vmatpush3.bf16.msra.mxu0 %v2497_v51  ;;  %2388 = vmatpush3.bf16.msra.mxu1 %v2502_v59  ;;  %v2094_v51 = vcombine.low %v2816_v43, %v2821_v44  ;;  %v971_v54 = vrot.slane %v969_v46, 1  ;;  %v974_v55 = vrot.slane %v972_v47, 2  ;;  %v995_v11 = vshrl.u32 %v2095_v6, 16  ;;  %v2532_v46 = vld [vmem:[%s3376_s1 + $0x80] sm:$0xff]   ;;  %v2533_v47 = vld [vmem:[%s3376_s1 + $0x18] sm:$0xff]  }
  0x20   :  { %2361 = vmatprep.subr.bf16.mxu0 %v2503_v63  ;;  %2389 = vmatprep.subr.bf16.mxu1 %v2504_v7  ;;  %v998_v12 = vshll.u32 %v2095_v6, 16 }
  0x21   :  { %v986_v58 = vshrl.u32 %v2094_v51, 16  ;;  %v989_v59 = vshll.u32 %v2094_v51, 16  ;;  %v975_v61 = vor.u32 %v974_v55, %v971_v54  ;;  %v997_v15 = vrot.slane %v995_v11, 1  ;;  %v2534_v51 = vld [vmem:[%s3376_s1 + $0x78] sm:$0xff]   ;;  %v2543_v55 = vld [vmem:[%s3378_s0 + $0x84] sm:$0x3f]  }
  0x22   :  { %2318 = vmatmul.mubr.msk.bf16.gmra.mxu0 %vm216_vm1, %v152_v13  ;;  %2346 = vmatmul.mubr.msk.bf16.gmra.mxu1 %vm216_vm1, %v2008_v14  ;;  %v2528_v14 = vld [vmem:[%s3378_s0 + $0x20] sm:$0xff]   ;;  %v1000_v16 = vrot.slane %v998_v12, 2  ;;  %v590_v11 = vrot.slane %v2537_v57, 3  ;;  %v2540_v12 = vld [vmem:[%s3376_s1 + $0x70] sm:$0xff]  }
  0x23   :  { %2362 = vmatpush3.bf16.msra.mxu0 %v2503_v63  ;;  %2390 = vmatpush3.bf16.msra.mxu1 %v2504_v7  ;;  %v2523_v63 = vld [vmem:[%s3378_s0 + $0x18] sm:$0xff]   ;;  %v988_v4 = vrot.slane %v986_v58, 1  ;;  %v991_v5 = vrot.slane %v989_v59, 2  ;;  %v2012_v7 = vcombine.low %v2738_v0, %v39_v52  ;;  %v2096_v0 = vcombine.low %v2865_v8, %v2870_v9  ;;  %v2542_v58 = vld [vmem:[%s3378_s0 + $0x40] sm:$0xff]  }
  0x24   :  { %2321 = vmatprep.mubr.msk.bf16.mxu0 %vm216_vm1, %v161_v23  ;;  %2349 = vmatprep.mubr.msk.bf16.mxu1 %vm216_vm1, %v2009_v18  ;;  %v984_v13 = vsel %vm108_vm0, %v975_v61, %v983_v62  ;;  %v582_v19 = vrot.slane %v2523_v63, 3  ;;  %v2893_v23 = vld [vmem:[%s3378_s0 + $0x74] sm:$0xf]  ;;  %v2898_v18 = vld [vmem:[%s3378_s0 + $0x78] sm:$0xf]  ;;  %v584_v25 = vrot.slane %v2528_v14, 3  ;;  %v1001_v26 = vor.u32 %v1000_v16, %v997_v15 }
  0x25   :  { %2363 = vmatprep.subr.bf16.mxu0 %v2509_v17  ;;  %2391 = vmatprep.subr.bf16.mxu1 %v2510_v20  ;;  %v992_v21 = vor.u32 %v991_v5, %v988_v4  ;;  %v588_v52 = vrot.slane %v2535_v37, 3  ;;  %v1031_v59 = vshrl.u32 %v2543_v55, 16  ;;  %v2539_v63 = vld [vmem:[%s3376_s1 + $0x10] sm:$0xff]   ;;  %v592_v14 = vrot.slane %v2542_v58, 3  ;;  %v2544_v15 = vld [vmem:[%s3376_s1 + $0x68] sm:$0xff]  }
  0x26   :  { %v583_v35 = vsel %vm578_vm2, %v580_v49, %v582_v19 }
  0x27   :  { %2364 = vmatpush3.bf16.msra.mxu0 %v2509_v17  ;;  %2392 = vmatpush3.bf16.msra.mxu1 %v2510_v20  ;;  %v1004_v17 = vshrl.u32 %v2096_v0, 16  ;;  %v1007_v20 = vshll.u32 %v2096_v0, 16  ;;  %v1002_v30 = vsel %vm108_vm0, %v992_v21, %v1001_v26  ;;  %v1033_v5 = vrot.slane %v1031_v59, 1 }
  0x28   :  { %2365 = vmatprep.subr.bf16.mxu0 %v2511_v24  ;;  %2393 = vmatprep.subr.bf16.mxu1 %v2515_v29 }
  0x29   :  { %v1006_v27 = vrot.slane %v1004_v17, 1  ;;  %v1009_v36 = vrot.slane %v1007_v20, 2  ;;  %v591_v17 = vsel %vm578_vm2, %v588_v52, %v590_v11  ;;  %v593_v20 = vsel %vm578_vm2, %v590_v11, %v592_v14 }
  0x2a   :  { %2322 = vmatmul.mubr.msk.bf16.gmra.mxu0 %vm216_vm1, %v170_v38  ;;  %2350 = vmatmul.mubr.msk.bf16.gmra.mxu1 %vm216_vm1, %v2010_v39  ;;  %v993_v38 = vsel %vm108_vm0, %v983_v62, %v992_v21 }
  0x2b   :  { %2325 = vmatprep.mubr.msk.bf16.mxu0 %vm216_vm1, %v179_v41  ;;  %2353 = vmatprep.mubr.msk.bf16.mxu1 %vm216_vm1, %v2011_v40  ;;  %v586_v41 = vrot.slane %v2530_v22, 3  ;;  %v1010_v50 = vor.u32 %v1009_v36, %v1006_v27  ;;  %v2545_v22 = vld [vmem:[%s3376_s1] sm:$0xff]  }
  0x2c   :  { %2366 = vmatpush3.bf16.msra.mxu0 %v2511_v24  ;;  %2394 = vmatpush3.bf16.msra.mxu1 %v2515_v29  ;;  %v2527_v24 = vld [vmem:[%s3376_s1 + $0x20] sm:$0xff]   ;;  %v2908_v29 = vld [vmem:[%s3378_s0 + $0x7c] sm:$0xf] }
  0x2d   :  { %2367 = vmatprep.subr.bf16.mxu0 %v2516_v42  ;;  %2395 = vmatprep.subr.bf16.mxu1 %v2517_v45  ;;  %v587_v61 = vsel %vm578_vm2, %v584_v25, %v586_v41  ;;  %v1011_v62 = vsel %vm108_vm0, %v1001_v26, %v1010_v50  ;;  %v2546_v26 = vld [vmem:[%s3376_s1 + $0x60] sm:$0xff]  }
  0x2e   :  { %v2550_v36 = vld [vmem:[%s3378_s0 + $0x60] sm:$0xff]  }
  0x30   :  { %2368 = vmatpush3.bf16.msra.mxu0 %v2516_v42  ;;  %2396 = vmatpush3.bf16.msra.mxu1 %v2517_v45  ;;  %v2098_v42 = vcombine.low %v2908_v29, %v2913_v34  ;;  %v585_v45 = vsel %vm578_vm2, %v582_v19, %v584_v25  ;;  %v2549_v25 = vld [vmem:[%s3378_s0 + $0x58] sm:$0xff]  }
  0x31   :  { %2413 = vmatprep.subr.bf16.mxu0 %v2840_v60  ;;  %2441 = vmatprep.subr.bf16.mxu1 %v2526_v1 }
  0x32   :  { %2326 = vmatmul.mubr.msk.bf16.gmra.mxu0 %vm216_vm1, %v2770_v28  ;;  %2354 = vmatmul.mubr.msk.bf16.gmra.mxu1 %vm216_vm1, %v2012_v7  ;;  %v2097_v28 = vcombine.low %v2893_v23, %v2898_v18  ;;  %v1022_v53 = vshrl.u32 %v2098_v42, 16  ;;  %v1025_v54 = vshll.u32 %v2098_v42, 16  ;;  %v589_v7 = vsel %vm578_vm2, %v586_v41, %v588_v52 }
  0x33   :  { %2369 = vmatprep.mubr.msk.bf16.mxu0 %vm216_vm1, %v581_v10  ;;  %2397 = vmatprep.mubr.msk.bf16.mxu1 %vm216_vm1, %v984_v13  ;;  %v2541_v13 = vld [vmem:[%s3376_s1 + $0x8] sm:$0xff]   ;;  %v2115_v42 = vcombine.low %v2783_v31, %v2789_v32  ;;  %v2116_v41 = vcombine.low %v2794_v33, %v2816_v43  ;;  %v2117_v33 = vcombine.low %v2821_v44, %v2852_v2 }
  0x34   :  { %v1013_v39 = vshrl.u32 %v2097_v28, 16  ;;  %v1016_v40 = vshll.u32 %v2097_v28, 16  ;;  %v1027_v4 = vrot.slane %v1025_v54, 2  ;;  %v1436_v28 = vrot.slane %v2549_v25, 3  ;;  %v2076_v54 = vld [vmem:[%s3378_s0 + $0x84] sm:$0x1] }
  0x35   :  { %v2118_v43 = vcombine.low %v2857_v3, %v2865_v8  ;;  %v2119_v3 = vcombine.low %v2870_v9, %v2893_v23  ;;  %v2120_v8 = vcombine.low %v2898_v18, %v2908_v29  ;;  %v2121_v9 = vcombine.low %v2913_v34, %v2076_v54 }
  0x36   :  { %v1015_v48 = vrot.slane %v1013_v39, 1  ;;  %v1018_v49 = vrot.slane %v1016_v40, 2  ;;  %v1438_v39 = vrot.slane %v2550_v36, 3  ;;  %v2572_v23 = vmov 0.0  }
  0x37   :  { %23 = vst.msk [vmem:[#allocation3] sm:$0x3] %vm22_vm3, %v2572_v23 }
  0x38   :  { %v1019_v56 = vor.u32 %v1018_v49, %v1015_v48  ;;  %v2558_v49 = vld [vmem:[%s3378_s0 + $0x80] sm:$0xff]  }
  0x39   :  { %v1446_v44 = vrot.slane %v2558_v49, 3 }
  0x3a   :  { %2370 = vmatmul.mubr.msk.bf16.vlgmr.msra.gmra.mxu0 %vm216_vm1, %v583_v35  ;;  %2398 = vmatmul.mubr.msk.bf16.vlgmr.msra.gmra.mxu1 %vm216_vm1, %v993_v38  ;;  %v1020_v10 = vsel %vm108_vm0, %v1010_v50, %v1019_v56  ;;  %v2547_v35 = vld [vmem:[%s3378_s0 + $0x48] sm:$0xff]  }
  0x3b   :  { %2414 = vmatpush3.bf16.msra.mxu0 %v2840_v60  ;;  %2442 = vmatpush3.bf16.msra.mxu1 %v2526_v1  ;;  %v1034_v60 = vshll.u32 %v2543_v55, 16  ;;  %v1024_v1 = vrot.slane %v1022_v53, 1  ;;  %v2552_v38 = vld [vmem:[%s3378_s0 + $0x68] sm:$0xff]  }
  0x3c   :  { %2415 = vmatprep.subr.bf16.mxu0 %v2527_v24  ;;  %2373 = vmatprep.mubr.msk.bf16.mxu0 %vm216_vm1, %v585_v45  ;;  %v1440_v40 = vrot.slane %v2552_v38, 3  ;;  %v1439_v45 = vsel %vm578_vm2, %v1436_v28, %v1438_v39 }
  0x3d   :  { %2401 = vmatprep.mubr.msk.bf16.mxu1 %vm216_vm1, %v1002_v30  ;;  %2443 = vmatprep.subr.bf16.mxu1 %v2532_v46  ;;  %v1036_v6 = vrot.slane %v1034_v60, 2  ;;  %v1028_v0 = vor.u32 %v1027_v4, %v1024_v1  ;;  %v2554_v30 = vld [vmem:[%s3378_s0 + $0x70] sm:$0xff]  }
  0x3e   :  { %v1442_v31 = vrot.slane %v2554_v30, 3 }
  0x3f   :  { %2416 = vmatpush3.bf16.msra.mxu0 %v2527_v24  ;;  %2444 = vmatpush3.bf16.msra.mxu1 %v2532_v46  ;;  %v1037_v16 = vor.u32 %v1036_v6, %v1033_v5  ;;  %v1029_v19 = vsel %vm108_vm0, %v1019_v56, %v1028_v0  ;;  %v2548_v24 = vld [vmem:[%s3378_s0 + $0x50] sm:$0xf8]   ;;  %v1441_v46 = vsel %vm578_vm2, %v1438_v39, %v1440_v40 }
  0x40   :  { %2417 = vmatprep.subr.bf16.mxu0 %v2533_v47  ;;  %2445 = vmatprep.subr.bf16.mxu1 %v2534_v51  ;;  %v1435_v27 = vrot.slane %v2548_v24, 3  ;;  %v1443_v48 = vsel %vm578_vm2, %v1440_v40, %v1442_v31 }
  0x41   :  { %v1038_v21 = vsel %vm108_vm0, %v1028_v0, %v1037_v16 }
  0x42   :  { %2374 = vmatmul.mubr.msk.bf16.gmra.mxu0 %vm216_vm1, %v587_v61  ;;  %2402 = vmatmul.mubr.msk.bf16.gmra.mxu1 %vm216_vm1, %v1011_v62  ;;  %v1437_v37 = vsel %vm578_vm2, %v1435_v27, %v1436_v28 }
  0x43   :  { %2418 = vmatpush3.bf16.msra.mxu0 %v2533_v47  ;;  %2446 = vmatpush3.bf16.msra.mxu1 %v2534_v51  ;;  %v2556_v47 = vld [vmem:[%s3378_s0 + $0x78] sm:$0xff]   ;;  %v2560_v51 = vld [vmem:[%s3378_s0 + $0x88] sm:$0xff]  }
  0x44   :  { %2377 = vmatprep.mubr.msk.bf16.mxu0 %vm216_vm1, %v589_v7  ;;  %2405 = vmatprep.mubr.msk.bf16.mxu1 %vm216_vm1, %v1020_v10  ;;  %v1444_v32 = vrot.slane %v2556_v47, 3  ;;  %v1448_v2 = vrot.slane %v2560_v51, 3 }
  0x45   :  { %2419 = vmatprep.subr.bf16.mxu0 %v2539_v63  ;;  %2447 = vmatprep.subr.bf16.mxu1 %v2540_v12 }
  0x46   :  { %v1445_v50 = vsel %vm578_vm2, %v1442_v31, %v1444_v32  ;;  %v1447_v52 = vsel %vm578_vm2, %v1444_v32, %v1446_v44  ;;  %v1449_v53 = vsel %vm578_vm2, %v1446_v44, %v1448_v2 }
  0x47   :  { %2420 = vmatpush3.bf16.msra.mxu0 %v2539_v63  ;;  %2448 = vmatpush3.bf16.msra.mxu1 %v2540_v12 }
  0x48   :  { %2421 = vmatprep.subr.bf16.mxu0 %v2541_v13  ;;  %2449 = vmatprep.subr.bf16.mxu1 %v2544_v15 }
  0x4a   :  { %2378 = vmatmul.mubr.msk.bf16.gmra.mxu0 %vm216_vm1, %v591_v17  ;;  %2406 = vmatmul.mubr.msk.bf16.gmra.mxu1 %vm216_vm1, %v1029_v19 }
  0x4b   :  { %2381 = vmatprep.mubr.msk.bf16.mxu0 %vm216_vm1, %v593_v20  ;;  %2409 = vmatprep.mubr.msk.bf16.mxu1 %vm216_vm1, %v1038_v21 }
  0x4c   :  { %2422 = vmatpush3.bf16.msra.mxu0 %v2541_v13  ;;  %2450 = vmatpush3.bf16.msra.mxu1 %v2544_v15 }
  0x4d   :  { %2423 = vmatprep.subr.bf16.mxu0 %v2545_v22  ;;  %2451 = vmatprep.subr.bf16.mxu1 %v2546_v26 }
  0x50   :  { %2424 = vmatpush3.bf16.msra.mxu0 %v2545_v22  ;;  %2452 = vmatpush3.bf16.msra.mxu1 %v2546_v26 }
  0x52   :  { %2382 = vmatmul.mubr.msk.bf16.gmra.mxu0 %vm216_vm1, %v592_v14  ;;  %2410 = vmatmul.mubr.msk.bf16.gmra.mxu1 %vm216_vm1, %v1037_v16 }
  0x53   :  { %2425 = vmatprep.mubr.msk.bf16.mxu0 %vm216_vm1, %v2547_v35  ;;  %2453 = vmatprep.mubr.msk.bf16.mxu1 %vm216_vm1, %v1437_v37 }
  0x5a   :  { %2426 = vmatmul.mubr.msk.bf16.vlgmr.msra.gmra.mxu0 %vm216_vm1, %v2115_v42  ;;  %2454 = vmatmul.mubr.msk.bf16.vlgmr.msra.gmra.mxu1 %vm216_vm1, %v1439_v45 }
  0x5b   :  { %2429 = vmatprep.mubr.msk.bf16.mxu0 %vm216_vm1, %v2116_v41  ;;  %2457 = vmatprep.mubr.msk.bf16.mxu1 %vm216_vm1, %v1441_v46 }
  0x62   :  { %2430 = vmatmul.mubr.msk.bf16.gmra.mxu0 %vm216_vm1, %v2117_v33  ;;  %2458 = vmatmul.mubr.msk.bf16.gmra.mxu1 %vm216_vm1, %v1443_v48 }
  0x63   :  { %2433 = vmatprep.mubr.msk.bf16.mxu0 %vm216_vm1, %v2118_v43  ;;  %2461 = vmatprep.mubr.msk.bf16.mxu1 %vm216_vm1, %v1445_v50 }
  0x6a   :  { %2434 = vmatmul.mubr.msk.bf16.gmra.mxu0 %vm216_vm1, %v2119_v3  ;;  %2462 = vmatmul.mubr.msk.bf16.gmra.mxu1 %vm216_vm1, %v1447_v52 }
  0x6b   :  { %2437 = vmatprep.mubr.msk.bf16.mxu0 %vm216_vm1, %v2120_v8  ;;  %2465 = vmatprep.mubr.msk.bf16.mxu1 %vm216_vm1, %v1449_v53 }
  0x72   :  { %2438 = vmatmul.mubr.msk.bf16.gmra.mxu0 %vm216_vm1, %v2121_v9  ;;  %2466 = vmatmul.mubr.msk.bf16.gmra.mxu1 %vm216_vm1, %v1448_v2 }
  0xda   :  { %v2315_v18 = vpop.f32.mrf.mxu0  ;;  %v2343_v29 = vpop.f32.mrf.mxu1 }
  0xdb   :  { %v455_v25 = vadd.f32 %v2343_v29, %v2315_v18 }
  0xdc   :  { %v275_v55 = vpop.f32.mrf.mxu0  ;;  %v446_v56 = vpop.f32.mrf.mxu1 }
  0xdd   :  { %v447_v28 = vadd.f32 %v446_v56, %v275_v55 }
  0xde   :  { %v2316_v57 = vpop.f32.mrf.mxu0  ;;  %v2344_v58 = vpop.f32.mrf.mxu1 }
  0xdf   :  { %v458_v38 = vadd.f32 %v2344_v58, %v2316_v57 }
  0xe0   :  { %v278_v59 = vpop.f32.mrf.mxu0  ;;  %v449_v60 = vpop.f32.mrf.mxu1 }
  0xe1   :  { %v450_v41 = vadd.f32 %v449_v60, %v278_v59 }
  0xe2   :  { %v2319_v61 = vpop.f32.mrf.mxu0  ;;  %v2347_v62 = vpop.f32.mrf.mxu1 }
  0xe3   :  { %v471_v47 = vadd.f32 %v2347_v62, %v2319_v61 }
  0xe4   :  { %v291_v63 = vpop.f32.mrf.mxu0  ;;  %v462_v34 = vpop.f32.mrf.mxu1 }
  0xe5   :  { %v463_v43 = vadd.f32 %v462_v34, %v291_v63 }
  0xe6   :  { %v2320_v1 = vpop.f32.mrf.mxu0  ;;  %v2348_v4 = vpop.f32.mrf.mxu1 }
  0xe7   :  { %v474_v8 = vadd.f32 %v2348_v4, %v2320_v1 }
  0xe8   :  { %v294_v5 = vpop.f32.mrf.mxu0  ;;  %v465_v6 = vpop.f32.mrf.mxu1 }
  0xe9   :  { %v466_v56 = vadd.f32 %v465_v6, %v294_v5 }
  0xea   :  { %v3052_v7 = vpop.f32.mrf.mxu0  ;;  %v3054_v10 = vpop.f32.mrf.mxu1 }
  0xec   :  { %v3056_v11 = vpop.f32.mrf.mxu0  ;;  %v3058_v12 = vpop.f32.mrf.mxu1 }
  0xee   :  { %v3060_v0 = vpop.f32.mrf.mxu0  ;;  %v3062_v13 = vpop.f32.mrf.mxu1 }
  0xf0   :  { %v3064_v14 = vpop.f32.mrf.mxu0  ;;  %v3066_v15 = vpop.f32.mrf.mxu1 }
  0xf2   :  { %v3068_v16 = vpop.f32.mrf.mxu0  ;;  %v3070_v17 = vpop.f32.mrf.mxu1 }
  0xf4   :  { %v3072_v19 = vpop.f32.mrf.mxu0  ;;  %v3074_v20 = vpop.f32.mrf.mxu1 }
  0xf6   :  { %v3076_v21 = vpop.f32.mrf.mxu0  ;;  %v3078_v22 = vpop.f32.mrf.mxu1 }
  0xf8   :  { %v3080_v24 = vpop.f32.mrf.mxu0  ;;  %v3082_v26 = vpop.f32.mrf.mxu1 }
  0xfa   :  { %v2371_v27 = vpop.f32.mrf.mxu0  ;;  %v3084_v36 = vpop.f32.mrf.mxu1 }
  0xfb   :  { %v753_v35 = vadd.f32 %v2371_v27, %v455_v25  ;;  %v487_v27 = vadd.f32 %v3054_v10, %v3052_v7 }
  0xfc   :  { %v688_v37 = vpop.f32.mrf.mxu0  ;;  %v3087_v40 = vpop.f32.mrf.mxu1 }
  0xfd   :  { %773 = vst.msk [vmem:[#allocation2 + $0x10] sm:$0xff] %vm770_vm4, %v753_v35  ;;  %v751_v39 = vadd.f32 %v688_v37, %v447_v28  ;;  %v831_v48 = vmul.f32 %v753_v35, %v753_v35  ;;  %v792_v52 = vsel %vm770_vm4, %v753_v35, 0.0  ;;  %v479_v37 = vadd.f32 %v3058_v12, %v3056_v11 }
  0xfe   :  { %v2372_v42 = vpop.f32.mrf.mxu0  ;;  %v3090_v30 = vpop.f32.mrf.mxu1 }
  0xff   :  { %771 = vst.msk [vmem:[#allocation2] sm:$0xff] %vm770_vm4, %v751_v39  ;;  %v754_v45 = vadd.f32 %v2372_v42, %v458_v38  ;;  %v829_v31 = vmul.f32 %v751_v39, %v751_v39  ;;  %v789_v50 = vsel %vm770_vm4, %v751_v39, 0.0  ;;  %v848_v60 = vsel %vm770_vm4, %v831_v48, 0.0 }
 0x100   :  { %v691_v46 = vpop.f32.mrf.mxu0  ;;  %v3093_v33 = vpop.f32.mrf.mxu1 }
 0x101   :  { %774 = vst.msk [vmem:[#allocation2 + $0x18] sm:$0xff] %vm770_vm4, %v754_v45  ;;  %v752_v32 = vadd.f32 %v691_v46, %v450_v41  ;;  %v845_v9 = vsel %vm770_vm4, %v829_v31, 0.0  ;;  %v832_v23 = vmul.f32 %v754_v45, %v754_v45  ;;  %v794_v61 = vsel %vm770_vm4, %v754_v45, 0.0 }
 0x102   :  { %v2375_v49 = vpop.f32.mrf.mxu0  ;;  %v3098_v3 = vpop.f32.mrf.mxu1  ;;  %v490_v31 = vadd.f32 %v3062_v13, %v3060_v0 }
 0x103   :  { %772 = vst.msk [vmem:[#allocation2 + $0x8] sm:$0xff] %vm770_vm4, %v752_v32  ;;  %v790_v51 = vsel %vm770_vm4, %v752_v32, 0.0  ;;  %v830_v44 = vmul.f32 %v752_v32, %v752_v32  ;;  %v757_v2 = vadd.f32 %v2375_v49, %v471_v47  ;;  %v850_v5 = vsel %vm770_vm4, %v832_v23, 0.0 }
 0x104   :  { %v791_v53 = vadd.f32 %v790_v51, %v789_v50  ;;  %v704_v54 = vpop.f32.mrf.mxu0  ;;  %v3104_v55 = vpop.f32.mrf.mxu1 }
 0x105   :  { %v846_v18 = vsel %vm770_vm4, %v830_v44, 0.0  ;;  %777 = vst.msk [vmem:[#allocation2 + $0x30] sm:$0xff] %vm770_vm4, %v757_v2  ;;  %v755_v29 = vadd.f32 %v704_v54, %v463_v43  ;;  %v835_v38 = vmul.f32 %v757_v2, %v757_v2  ;;  %v800_v12 = vsel %vm770_vm4, %v757_v2, 0.0 }
 0x106   :  { %v793_v57 = vadd.f32 %v792_v52, %v791_v53  ;;  %v847_v58 = vadd.f32 %v846_v18, %v845_v9  ;;  %v2376_v59 = vpop.f32.mrf.mxu0  ;;  %v3109_v34 = vpop.f32.mrf.mxu1  ;;  %v482_v44 = vadd.f32 %v3066_v15, %v3064_v14 }
 0x107   :  { %775 = vst.msk [vmem:[#allocation2 + $0x20] sm:$0xff] %vm770_vm4, %v755_v29  ;;  %v833_v62 = vmul.f32 %v755_v29, %v755_v29  ;;  %v758_v63 = vadd.f32 %v2376_v59, %v474_v8  ;;  %v796_v6 = vsel %vm770_vm4, %v755_v29, 0.0  ;;  %v856_v0 = vsel %vm770_vm4, %v835_v38, 0.0 }
 0x108   :  { %v849_v1 = vadd.f32 %v848_v60, %v847_v58  ;;  %v795_v4 = vadd.f32 %v794_v61, %v793_v57  ;;  %v707_v25 = vpop.f32.mrf.mxu0  ;;  %v3116_v35 = vpop.f32.mrf.mxu1  ;;  %v495_v59 = vadd.f32 %v3074_v20, %v3072_v19 }
 0x109   :  { %778 = vst.msk [vmem:[#allocation2 + $0x38] sm:$0xff] %vm770_vm4, %v758_v63  ;;  %v756_v28 = vadd.f32 %v707_v25, %v466_v56  ;;  %v852_v45 = vsel %vm770_vm4, %v833_v62, 0.0  ;;  %v836_v48 = vmul.f32 %v758_v63, %v758_v63  ;;  %v802_v13 = vsel %vm770_vm4, %v758_v63, 0.0 }
 0x10a   :  { %v797_v39 = vadd.f32 %v796_v6, %v795_v4  ;;  %v851_v42 = vadd.f32 %v850_v5, %v849_v1  ;;  %v2379_v41 = vpop.f32.mrf.mxu0  ;;  %v3123_v47 = vpop.f32.mrf.mxu1  ;;  %v503_v56 = vadd.f32 %v3070_v17, %v3068_v16 }
 0x10b   :  { %776 = vst.msk [vmem:[#allocation2 + $0x28] sm:$0xff] %vm770_vm4, %v756_v28  ;;  %v798_v7 = vsel %vm770_vm4, %v756_v28, 0.0  ;;  %v834_v10 = vmul.f32 %v756_v28, %v756_v28  ;;  %v761_v46 = vadd.f32 %v2379_v41, %v487_v27  ;;  %v858_v14 = vsel %vm770_vm4, %v836_v48, 0.0 }
 0x10c   :  { %v853_v32 = vadd.f32 %v852_v45, %v851_v42  ;;  %v799_v43 = vadd.f32 %v798_v7, %v797_v39  ;;  %v720_v11 = vpop.f32.mrf.mxu0  ;;  %v3130_v51 = vpop.f32.mrf.mxu1  ;;  %v506_v27 = vadd.f32 %v3078_v22, %v3076_v21  ;;  %v498_v42 = vadd.f32 %v3082_v26, %v3080_v24 }
 0x10d   :  { %v854_v49 = vsel %vm770_vm4, %v834_v10, 0.0  ;;  %781 = vst.msk [vmem:[#allocation2 + $0x50] sm:$0xff] %vm770_vm4, %v761_v46  ;;  %v759_v50 = vadd.f32 %v720_v11, %v479_v37  ;;  %v839_v60 = vmul.f32 %v761_v46, %v761_v46  ;;  %v808_v20 = vsel %vm770_vm4, %v761_v46, 0.0 }
 0x10e   :  { %v801_v8 = vadd.f32 %v800_v12, %v799_v43  ;;  %v855_v52 = vadd.f32 %v854_v49, %v853_v32  ;;  %v2380_v53 = vpop.f32.mrf.mxu0  ;;  %v3137_v9 = vpop.f32.mrf.mxu1 }
 0x10f   :  { %779 = vst.msk [vmem:[#allocation2 + $0x40] sm:$0xff] %vm770_vm4, %v759_v50  ;;  %v837_v2 = vmul.f32 %v759_v50, %v759_v50  ;;  %v762_v54 = vadd.f32 %v2380_v53, %v490_v31  ;;  %v804_v15 = vsel %vm770_vm4, %v759_v50, 0.0  ;;  %v864_v21 = vsel %vm770_vm4, %v839_v60, 0.0 }
 0x110   :  { %v857_v23 = vadd.f32 %v856_v0, %v855_v52  ;;  %v803_v18 = vadd.f32 %v802_v13, %v801_v8  ;;  %v723_v29 = vpop.f32.mrf.mxu0  ;;  %v3144_v58 = vpop.f32.mrf.mxu1 }
 0x111   :  { %782 = vst.msk [vmem:[#allocation2 + $0x58] sm:$0xff] %vm770_vm4, %v762_v54  ;;  %v760_v57 = vadd.f32 %v723_v29, %v482_v44  ;;  %v860_v1 = vsel %vm770_vm4, %v837_v2, 0.0  ;;  %v840_v28 = vmul.f32 %v762_v54, %v762_v54  ;;  %v810_v22 = vsel %vm770_vm4, %v762_v54, 0.0 }
 0x112   :  { %v805_v61 = vadd.f32 %v804_v15, %v803_v18  ;;  %v859_v62 = vadd.f32 %v858_v14, %v857_v23  ;;  %v2383_v63 = vpop.f32.mrf.mxu0  ;;  %v3151_v25 = vpop.f32.mrf.mxu1 }
 0x113   :  { %780 = vst.msk [vmem:[#allocation2 + $0x48] sm:$0xff] %vm770_vm4, %v760_v57  ;;  %v806_v16 = vsel %vm770_vm4, %v760_v57, 0.0  ;;  %v838_v17 = vmul.f32 %v760_v57, %v760_v57  ;;  %v765_v4 = vadd.f32 %v2383_v63, %v503_v56  ;;  %v866_v12 = vsel %vm770_vm4, %v840_v28, 0.0 }
 0x114   :  { %v861_v5 = vadd.f32 %v860_v1, %v859_v62  ;;  %v807_v6 = vadd.f32 %v806_v16, %v805_v61  ;;  %v736_v19 = vpop.f32.mrf.mxu0  ;;  %v3158_v39 = vpop.f32.mrf.mxu1 }
 0x115   :  { %v862_v37 = vsel %vm770_vm4, %v838_v17, 0.0  ;;  %785 = vst.msk [vmem:[#allocation2 + $0x70] sm:$0xff] %vm770_vm4, %v765_v4  ;;  %v763_v38 = vadd.f32 %v736_v19, %v495_v59  ;;  %v843_v49 = vmul.f32 %v765_v4, %v765_v4  ;;  %v816_v54 = vsel %vm770_vm4, %v765_v4, 0.0 }
 0x116   :  { %v809_v41 = vadd.f32 %v808_v20, %v807_v6  ;;  %v863_v45 = vadd.f32 %v862_v37, %v861_v5  ;;  %v2384_v7 = vpop.f32.mrf.mxu0  ;;  %v3165_v31 = vpop.f32.mrf.mxu1 }
 0x117   :  { %783 = vst.msk [vmem:[#allocation2 + $0x60] sm:$0xff] %vm770_vm4, %v763_v38  ;;  %v841_v10 = vmul.f32 %v763_v38, %v763_v38  ;;  %v766_v46 = vadd.f32 %v2384_v7, %v506_v27  ;;  %v812_v24 = vsel %vm770_vm4, %v763_v38, 0.0  ;;  %v872_v63 = vsel %vm770_vm4, %v843_v49, 0.0 }
 0x118   :  { %v865_v32 = vadd.f32 %v864_v21, %v863_v45  ;;  %v811_v43 = vadd.f32 %v810_v22, %v809_v41  ;;  %v739_v11 = vpop.f32.mrf.mxu0  ;;  %v3170_v48 = vpop.f32.mrf.mxu1 }
 0x119   :  { %787 = vst.msk [vmem:[#allocation2 + $0x78] sm:$0x1] %vm786_vm5, %v766_v46  ;;  %v764_v26 = vadd.f32 %v739_v11, %v498_v42  ;;  %v868_v52 = vsel %vm770_vm4, %v841_v10, 0.0  ;;  %v844_v56 = vmul.f32 %v766_v46, %v766_v46 }
 0x11a   :  { %v813_v50 = vadd.f32 %v812_v24, %v811_v43  ;;  %v867_v44 = vadd.f32 %v866_v12, %v865_v32  ;;  %v2427_v8 = vpop.f32.mrf.mxu0  ;;  %v2455_v2 = vpop.f32.mrf.mxu1 }
 0x11b   :  { %784 = vst.msk [vmem:[#allocation2 + $0x68] sm:$0xff] %vm770_vm4, %v764_v26  ;;  %v814_v53 = vsel %vm770_vm4, %v764_v26, 0.0  ;;  %v842_v0 = vmul.f32 %v764_v26, %v764_v26  ;;  %v1313_v13 = vadd.f32 %v2427_v8, %v3084_v36  ;;  %v818_v36 = vsel %vm786_vm5, %v766_v46, 0.0 }
 0x11c   :  { %v869_v23 = vadd.f32 %v868_v52, %v867_v44  ;;  %v815_v18 = vadd.f32 %v814_v53, %v813_v50  ;;  %v1304_v29 = vpop.f32.mrf.mxu0  ;;  %v1544_v59 = vpop.f32.mrf.mxu1  ;;  %v874_v6 = vsel %vm786_vm5, %v844_v56, 0.0 }
 0x11d   :  { %v870_v14 = vsel %vm770_vm4, %v842_v0, 0.0  ;;  %v1609_v15 = vadd.f32 %v2455_v2, %v1313_v13  ;;  %v1305_v57 = vadd.f32 %v1304_v29, %v3087_v40 }
 0x11e   :  { %v817_v60 = vadd.f32 %v816_v54, %v815_v18  ;;  %v871_v61 = vadd.f32 %v870_v14, %v869_v23  ;;  %v2428_v62 = vpop.f32.mrf.mxu0  ;;  %v2456_v17 = vpop.f32.mrf.mxu1 }
 0x11f   :  { %1628 = vst.msk [vmem:[#allocation2 + $0x90] sm:$0xff] %vm770_vm4, %v1609_v15  ;;  %v1607_v1 = vadd.f32 %v1544_v59, %v1305_v57  ;;  %v1316_v16 = vadd.f32 %v2428_v62, %v3090_v30  ;;  %v1685_v42 = vmul.f32 %v1609_v15, %v1609_v15  ;;  %v1646_v22 = vsel %vm770_vm4, %v1609_v15, 0.0 }
 0x120   :  { %v819_v4 = vadd.f32 %v818_v36, %v817_v60  ;;  %v873_v27 = vadd.f32 %v872_v63, %v871_v61  ;;  %v1307_v5 = vpop.f32.mrf.mxu0  ;;  %v1547_v19 = vpop.f32.mrf.mxu1  ;;  %v788_v63 = vld [vmem:[#allocation3] sm:$0x1] }
 0x121   :  { %1626 = vst.msk [vmem:[#allocation2 + $0x80] sm:$0xff] %vm770_vm4, %v1607_v1  ;;  %v1610_v40 = vadd.f32 %v2456_v17, %v1316_v16  ;;  %v1308_v37 = vadd.f32 %v1307_v5, %v3093_v33  ;;  %v1683_v41 = vmul.f32 %v1607_v1, %v1607_v1  ;;  %v1643_v32 = vsel %vm770_vm4, %v1607_v1, 0.0 }
 0x122   :  { %v820_v20 = vrot.slane %v819_v4, 4  ;;  %v875_v28 = vadd.f32 %v874_v6, %v873_v27  ;;  %v2431_v38 = vpop.f32.mrf.mxu0  ;;  %v2459_v45 = vpop.f32.mrf.mxu1  ;;  %v1702_v44 = vsel %vm770_vm4, %v1685_v42, 0.0 }
 0x123   :  { %1629 = vst.msk [vmem:[#allocation2 + $0x98] sm:$0xff] %vm770_vm4, %v1610_v40  ;;  %v1329_v30 = vadd.f32 %v2431_v38, %v3098_v3  ;;  %v1608_v10 = vadd.f32 %v1547_v19, %v1308_v37  ;;  %v1686_v43 = vmul.f32 %v1610_v40, %v1610_v40  ;;  %v1699_v8 = vsel %vm770_vm4, %v1683_v41, 0.0  ;;  %v828_v19 = vld [vmem:[#allocation3 + $0x1] sm:$0x1] }
 0x124   :  { %v821_v7 = vadd.f32 %v820_v20, %v819_v4  ;;  %v876_v21 = vrot.slane %v875_v28, 4  ;;  %v1320_v46 = vpop.f32.mrf.mxu0  ;;  %v1560_v12 = vpop.f32.mrf.mxu1  ;;  %v1648_v18 = vsel %vm770_vm4, %v1610_v40, 0.0 }
 0x125   :  { %v1613_v11 = vadd.f32 %v2459_v45, %v1329_v30  ;;  %v1321_v33 = vadd.f32 %v1320_v46, %v3104_v55  ;;  %1627 = vst.msk [vmem:[#allocation2 + $0x88] sm:$0xff] %vm770_vm4, %v1608_v10  ;;  %v1644_v3 = vsel %vm770_vm4, %v1608_v10, 0.0  ;;  %v1684_v49 = vmul.f32 %v1608_v10, %v1608_v10 }
 0x126   :  { %v822_v24 = vrot.slane %v821_v7, 2  ;;  %v877_v26 = vadd.f32 %v876_v21, %v875_v28  ;;  %v2432_v50 = vpop.f32.mrf.mxu0  ;;  %v1645_v52 = vadd.f32 %v1644_v3, %v1643_v32  ;;  %v2460_v0 = vpop.f32.mrf.mxu1  ;;  %v1704_v29 = vsel %vm770_vm4, %v1686_v43, 0.0 }
 0x127   :  { %1632 = vst.msk [vmem:[#allocation2 + $0xb0] sm:$0xff] %vm770_vm4, %v1613_v11  ;;  %v1611_v53 = vadd.f32 %v1560_v12, %v1321_v33  ;;  %v1700_v2 = vsel %vm770_vm4, %v1684_v49, 0.0  ;;  %v1332_v54 = vadd.f32 %v2432_v50, %v3109_v34  ;;  %v1689_v5 = vmul.f32 %v1613_v11, %v1613_v11 }
 0x128   :  { %v823_v13 = vadd.f32 %v822_v24, %v821_v7  ;;  %v878_v55 = vrot.slane %v877_v26, 2  ;;  %v1323_v23 = vpop.f32.mrf.mxu0  ;;  %v1647_v56 = vadd.f32 %v1646_v22, %v1645_v52  ;;  %v1701_v14 = vadd.f32 %v1700_v2, %v1699_v8  ;;  %v1563_v15 = vpop.f32.mrf.mxu1 }
 0x129   :  { %1630 = vst.msk [vmem:[#allocation2 + $0xa0] sm:$0xff] %vm770_vm4, %v1611_v53  ;;  %v1687_v60 = vmul.f32 %v1611_v53, %v1611_v53  ;;  %v1614_v61 = vadd.f32 %v2460_v0, %v1332_v54  ;;  %v1324_v34 = vadd.f32 %v1323_v23, %v3116_v35  ;;  %v1650_v6 = vsel %vm770_vm4, %v1611_v53, 0.0 }
 0x12a   :  { %v824_v57 = vrot.slane %v823_v13, 1  ;;  %v879_v59 = vadd.f32 %v878_v55, %v877_v26  ;;  %v2435_v62 = vpop.f32.mrf.mxu0  ;;  %v1703_v36 = vadd.f32 %v1702_v44, %v1701_v14  ;;  %v1649_v1 = vadd.f32 %v1648_v18, %v1647_v56  ;;  %v2463_v17 = vpop.f32.mrf.mxu1 }
 0x12b   :  { %v1345_v16 = vadd.f32 %v2435_v62, %v3123_v47  ;;  %1633 = vst.msk [vmem:[#allocation2 + $0xb8] sm:$0xff] %vm770_vm4, %v1614_v61  ;;  %v1706_v37 = vsel %vm770_vm4, %v1687_v60, 0.0  ;;  %v1612_v38 = vadd.f32 %v1563_v15, %v1324_v34  ;;  %v1654_v32 = vsel %vm770_vm4, %v1613_v11, 0.0 }
 0x12c   :  { %v825_v4 = vadd.f32 %v824_v57, %v823_v13  ;;  %v880_v27 = vrot.slane %v879_v59, 1  ;;  %v1336_v40 = vpop.f32.mrf.mxu0  ;;  %v1651_v20 = vadd.f32 %v1650_v6, %v1649_v1  ;;  %v1705_v28 = vadd.f32 %v1704_v29, %v1703_v36  ;;  %v1576_v42 = vpop.f32.mrf.mxu1 }
 0x12d   :  { %v1617_v30 = vadd.f32 %v2463_v17, %v1345_v16  ;;  %v1337_v47 = vadd.f32 %v1336_v40, %v3130_v51  ;;  %1631 = vst.msk [vmem:[#allocation2 + $0xa8] sm:$0xff] %vm770_vm4, %v1612_v38  ;;  %v1652_v21 = vsel %vm770_vm4, %v1612_v38, 0.0  ;;  %v1688_v22 = vmul.f32 %v1612_v38, %v1612_v38 }
 0x12e   :  { %v826_v41 = vadd.f32 %v825_v4, %v788_v63  ;;  %v881_v35 = vadd.f32 %v880_v27, %v879_v59  ;;  %v2436_v45 = vpop.f32.mrf.mxu0  ;;  %v1707_v7 = vadd.f32 %v1706_v37, %v1705_v28  ;;  %v2464_v10 = vpop.f32.mrf.mxu1  ;;  %v1690_v43 = vmul.f32 %v1614_v61, %v1614_v61 }
 0x12f   :  { %v1653_v33 = vadd.f32 %v1652_v21, %v1651_v20  ;;  %1636 = vst.msk [vmem:[#allocation2 + $0xd0] sm:$0xff] %vm770_vm4, %v1617_v30  ;;  %v1708_v51 = vsel %vm770_vm4, %v1688_v22, 0.0  ;;  %v1615_v24 = vadd.f32 %v1576_v42, %v1337_v47  ;;  %v1348_v26 = vadd.f32 %v2436_v45, %v3137_v9 }
 0x130   :  { %827 = vst.msk [vmem:[#allocation3] sm:$0x1] %vm786_vm5, %v826_v41  ;;  %v882_v46 = vadd.f32 %v881_v35, %v828_v19  ;;  %v1339_v12 = vpop.f32.mrf.mxu0  ;;  %v1579_v49 = vpop.f32.mrf.mxu1  ;;  %v1710_v50 = vsel %vm770_vm4, %v1689_v5, 0.0  ;;  %v1709_v8 = vadd.f32 %v1708_v51, %v1707_v7  ;;  %v1656_v52 = vsel %vm770_vm4, %v1614_v61, 0.0 }
 0x131   :  { %v1340_v3 = vadd.f32 %v1339_v12, %v3144_v58  ;;  %v1655_v44 = vadd.f32 %v1654_v32, %v1653_v33  ;;  %1634 = vst.msk [vmem:[#allocation2 + $0xc0] sm:$0xff] %vm770_vm4, %v1615_v24  ;;  %v1691_v53 = vmul.f32 %v1615_v24, %v1615_v24  ;;  %v1618_v0 = vadd.f32 %v2464_v10, %v1348_v26 }
 0x132   :  { %883 = vst.msk [vmem:[#allocation3 + $0x1] sm:$0x1] %vm786_vm5, %v882_v46  ;;  %v2439_v11 = vpop.f32.mrf.mxu0  ;;  %v2467_v55 = vpop.f32.mrf.mxu1  ;;  %v1711_v2 = vadd.f32 %v1710_v50, %v1709_v8  ;;  %v1712_v23 = vsel %vm770_vm4, %v1690_v43, 0.0  ;;  %v1658_v18 = vsel %vm770_vm4, %v1615_v24, 0.0  ;;  %v1693_v61 = vmul.f32 %v1617_v30, %v1617_v30 }
 0x133   :  { %v1616_v13 = vadd.f32 %v1579_v49, %v1340_v3  ;;  %v1657_v9 = vadd.f32 %v1656_v52, %v1655_v44  ;;  %v1361_v58 = vadd.f32 %v2439_v11, %v3151_v25  ;;  %1637 = vst.msk [vmem:[#allocation2 + $0xd8] sm:$0xff] %vm770_vm4, %v1618_v0  ;;  %v1714_v25 = vsel %vm770_vm4, %v1691_v53, 0.0 }
 0x134   :  { %v1352_v54 = vpop.f32.mrf.mxu0  ;;  %v1592_v56 = vpop.f32.mrf.mxu1  ;;  %v1713_v15 = vadd.f32 %v1712_v23, %v1711_v2  ;;  %v1662_v1 = vsel %vm770_vm4, %v1617_v30, 0.0  ;;  %v1694_v27 = vmul.f32 %v1618_v0, %v1618_v0 }
 0x135   :  { %1635 = vst.msk [vmem:[#allocation2 + $0xc8] sm:$0xff] %vm770_vm4, %v1616_v13  ;;  %v1660_v29 = vsel %vm770_vm4, %v1616_v13, 0.0  ;;  %v1659_v14 = vadd.f32 %v1658_v18, %v1657_v9  ;;  %v1692_v57 = vmul.f32 %v1616_v13, %v1616_v13  ;;  %v1621_v59 = vadd.f32 %v2467_v55, %v1361_v58 }
 0x136   :  { %v2440_v60 = vpop.f32.mrf.mxu0  ;;  %v1353_v62 = vadd.f32 %v1352_v54, %v3158_v39  ;;  %v2468_v36 = vpop.f32.mrf.mxu1  ;;  %v1715_v34 = vadd.f32 %v1714_v25, %v1713_v15  ;;  %v1718_v39 = vsel %vm770_vm4, %v1693_v61, 0.0  ;;  %v1720_v35 = vsel %vm770_vm4, %v1694_v27, 0.0 }
 0x137   :  { %v1364_v63 = vadd.f32 %v2440_v60, %v3165_v31  ;;  %v1661_v16 = vadd.f32 %v1660_v29, %v1659_v14  ;;  %v1716_v17 = vsel %vm770_vm4, %v1692_v57, 0.0  ;;  %1640 = vst.msk [vmem:[#allocation2 + $0xf0] sm:$0xff] %vm770_vm4, %v1621_v59  ;;  %v1664_v31 = vsel %vm770_vm4, %v1618_v0, 0.0  ;;  %v1642_v23 = vld [vmem:[#allocation3] sm:$0x1] }
 0x138   :  { %v1355_v4 = vpop.f32.mrf.mxu0  ;;  %v1619_v5 = vadd.f32 %v1592_v56, %v1353_v62  ;;  %v1717_v20 = vadd.f32 %v1716_v17, %v1715_v34  ;;  %v1595_v37 = vpop.f32.mrf.mxu1  ;;  %v1697_v7 = vmul.f32 %v1621_v59, %v1621_v59  ;;  %v1670_v32 = vsel %vm770_vm4, %v1621_v59, 0.0 }
 0x139   :  { %v1622_v6 = vadd.f32 %v2468_v36, %v1364_v63  ;;  %v1356_v40 = vadd.f32 %v1355_v4, %v3170_v48  ;;  %v1663_v19 = vadd.f32 %v1662_v1, %v1661_v16  ;;  %v1682_v56 = vld [vmem:[#allocation3 + $0x1] sm:$0x1]  ;;  %v1748_v36 = vld [vmem:[%s3379_s2] sm:$0x1] }
 0x13a   :  { %1638 = vst.msk [vmem:[#allocation2 + $0xe0] sm:$0xff] %vm770_vm4, %v1619_v5  ;;  %v1695_v28 = vmul.f32 %v1619_v5, %v1619_v5  ;;  %v1719_v38 = vadd.f32 %v1718_v39, %v1717_v20  ;;  %v1666_v30 = vsel %vm770_vm4, %v1619_v5, 0.0  ;;  %v1726_v24 = vsel %vm770_vm4, %v1697_v7, 0.0  ;;  %v3256_v16 = vld [vmem:[%s3380_s3] sm:$0x1] }
 0x13b   :  { %1641 = vst.msk [vmem:[#allocation2 + $0xf8] sm:$0x1] %vm786_vm5, %v1622_v6  ;;  %v1665_v42 = vadd.f32 %v1664_v31, %v1663_v19  ;;  %v1620_v41 = vadd.f32 %v1595_v37, %v1356_v40  ;;  %v1698_v43 = vmul.f32 %v1622_v6, %v1622_v6  ;;  %v1672_v26 = vsel %vm786_vm5, %v1622_v6, 0.0 }
 0x13c   :  { %v1721_v47 = vadd.f32 %v1720_v35, %v1719_v38  ;;  %v1722_v21 = vsel %vm770_vm4, %v1695_v28, 0.0 }
 0x13d   :  { %v1667_v48 = vadd.f32 %v1666_v30, %v1665_v42  ;;  %1639 = vst.msk [vmem:[#allocation2 + $0xe8] sm:$0xff] %vm770_vm4, %v1620_v41  ;;  %v1668_v45 = vsel %vm770_vm4, %v1620_v41, 0.0  ;;  %v1696_v22 = vmul.f32 %v1620_v41, %v1620_v41  ;;  %v1728_v50 = vsel %vm786_vm5, %v1698_v43, 0.0 }
 0x13e   :  { %v1723_v10 = vadd.f32 %v1722_v21, %v1721_v47 }
 0x13f   :  { %v1669_v46 = vadd.f32 %v1668_v45, %v1667_v48  ;;  %v1724_v33 = vsel %vm770_vm4, %v1696_v22, 0.0 }
 0x140   :  { %v1725_v51 = vadd.f32 %v1724_v33, %v1723_v10 }
 0x141   :  { %v1671_v12 = vadd.f32 %v1670_v32, %v1669_v46 }
 0x142   :  { %v1727_v49 = vadd.f32 %v1726_v24, %v1725_v51 }
 0x143   :  { %v1673_v3 = vadd.f32 %v1672_v26, %v1671_v12 }
 0x144   :  { %v1729_v8 = vadd.f32 %v1728_v50, %v1727_v49 }
 0x145   :  { %v1674_v44 = vrot.slane %v1673_v3, 4 }
 0x146   :  { %v1730_v52 = vrot.slane %v1729_v8, 4 }
 0x147   :  { %v1675_v11 = vadd.f32 %v1674_v44, %v1673_v3 }
 0x148   :  { %v1731_v0 = vadd.f32 %v1730_v52, %v1729_v8 }
 0x149   :  { %v1676_v53 = vrot.slane %v1675_v11, 2 }
 0x14a   :  { %v1732_v55 = vrot.slane %v1731_v0, 2 }
 0x14b   :  { %v1677_v13 = vadd.f32 %v1676_v53, %v1675_v11 }
 0x14c   :  { %v1733_v9 = vadd.f32 %v1732_v55, %v1731_v0 }
 0x14d   :  { %v1678_v2 = vrot.slane %v1677_v13, 1 }
 0x14e   :  { %v1734_v54 = vrot.slane %v1733_v9, 1 }
 0x14f   :  { %v1679_v58 = vadd.f32 %v1678_v2, %v1677_v13 }
 0x150   :  { %v1735_v29 = vadd.f32 %v1734_v54, %v1733_v9 }
 0x151   :  { %v1680_v18 = vadd.f32 %v1679_v58, %v1642_v23 }
 0x152   :  { %v1736_v14 = vadd.f32 %v1735_v29, %v1682_v56 }
 0x153   :  { %1681 = vst.msk [vmem:[#allocation3] sm:$0x1] %vm786_vm5, %v1680_v18 }
 0x154   :  { %1737 = vst.msk [vmem:[#allocation3 + $0x1] sm:$0x1] %vm786_vm5, %v1736_v14 }
 0x15a   :  { %v1741_v15 = vld [vmem:[#allocation3] sm:$0x1] }
 0x15b   :  { %v1742_v57 = vmul.f32 0.004132231, %v1741_v15  ;;  %v1743_v59 = vld [vmem:[#allocation3 + $0x1] sm:$0x1] }
 0x15c   :  { %v1744_v60 = vmul.f32 0.004132231, %v1743_v59 }
 0x15d   :  { %v1745_v61 = vmul.f32 %v1742_v57, %v1742_v57 }
 0x15f   :  { %v1746_v25 = vsub.f32 %v1744_v60, %v1745_v61 }
 0x161   :  { %v1747_v62 = vmax.f32 %v1746_v25, 0.0 }
 0x163   :  { %v1749_v63 = vadd.f32 1e-05, %v1747_v62 }
 0x165   :  { %2562 = vrsqrt.f32 %v1749_v63 }
 0x172   :  { %v2563_v1 = vpop.eup %2562 }
 0x173   :  { %v3251_v34 = vmul.f32 %v2563_v1, %v1748_v36 }
 0x175   :  { %v3259_v17 = vmul.f32 %v3251_v34, %v1742_v57 }
 0x177   :  { %v1754_v4 = vsub.f32 %v3256_v16, %v3259_v17 }
 0x178 LB: > { %v1765_v27 = vlaneseq  ;;  %s2186_s2 = sshll.u32 %s2570_s7, 7  ;;  %vm1798_vm6 = vcmask 518144   ;;  %vm1799_vm7 = vsmask.f32 2304  ;;  %vm1872_vm8 = vcmask 519169   ;;  %s2212_s3 = sshll.u32 %s2570_s7, 4  ;;  %s2570_s7 = sphi %s3263_s7, %s1760_s7  }
 0x179   : > { %s3269_s8 = scalar_lea.vmem [#allocation2], %s2186_s2  ;;  %vm1873_vm9 = vsmask.f32 3328  ;;  %s3318_s11 = scalar_lea.vmem %s3377_s4, %s2212_s3  ;;  %vm3333_vm10 = vmand %vm1798_vm6, %vm1799_vm7  ;;  %vm1839_vm12 = vcmask 519170   ;;  %vm1840_vm13 = vsmask.f32 7946 }
 0x17a   : > { %v1766_v5 = vshrl.u32 %v1765_v27, 7  ;;  %v1763_v6 = vld [vmem:[%s3269_s8] ss:$2 sm:$0x1f]  ;;  %vm1874_vm11 = vmand %vm1872_vm8, %vm1873_vm9  ;;  %vm1913_vm14 = vcmask 519171   ;;  %s1760_s7 = sadd.s32 1, %s2570_s7  }
 0x17b   : > { %v2187_v19 = vld [vmem:[%s3269_s8 + $0x1] ss:$2 sm:$0x1f]  ;;  %v2188_v20 = vld [vmem:[%s3269_s8 + $0xb] ss:$2 sm:$0x1f]  ;;  %vm1841_vm0 = vmand %vm1839_vm12, %vm1840_vm13 }
 0x17c   : > { %v1767_v40 = vsub.s32 0, %v1766_v5  ;;  %v2189_v31 = vld [vmem:[%s3269_s8 + $0xc] ss:$2 sm:$0x1f]  ;;  %v1801_v27 = vld [vmem:[%s3318_s11] sm:$0x7] }
 0x17d   : > { %v2197_v28 = vld [vmem:[%s3269_s8 + $0x2c] ss:$2 sm:$0x1f]  ;;  %v2198_v38 = vld [vmem:[%s3269_s8 + $0x2d] ss:$2 sm:$0x1f] }
 0x17e   : > { %v3275_v39 = vrot.slane %v3251_v34, %v1767_v40  ;;  %v3282_v37 = vrot.slane %v1754_v4, %v1767_v40  ;;  %v2199_v42 = vld [vmem:[%s3269_s8 + $0x37] ss:$2 sm:$0x1f]  ;;  %v2200_v47 = vld [vmem:[%s3269_s8 + $0x38] ss:$2 sm:$0x1f] }
 0x17f   : > { %v2192_v10 = vld [vmem:[%s3269_s8 + $0x16] ss:$2 sm:$0x1f]  ;;  %v2193_v46 = vld [vmem:[%s3269_s8 + $0x17] ss:$2 sm:$0x1f] }
 0x180   : > { %v1770_v41 = vmul.f32 %v3275_v39, %v1763_v6  ;;  %v1780_v35 = vmul.f32 %v2187_v19, %v3275_v39  ;;  %v1784_v30 = vmul.f32 %v2188_v20, %v3275_v39  ;;  %v1788_v48 = vmul.f32 %v2189_v31, %v3275_v39  ;;  %v2194_v51 = vld [vmem:[%s3269_s8 + $0x21] ss:$2 sm:$0x1f]  ;;  %v2195_v24 = vld [vmem:[%s3269_s8 + $0x22] ss:$2 sm:$0x1f] }
 0x181   : > { %v1848_v45 = vmul.f32 %v2197_v28, %v3275_v39  ;;  %v1852_v7 = vmul.f32 %v2198_v38, %v3275_v39  ;;  %v1856_v21 = vmul.f32 %v2199_v42, %v3275_v39  ;;  %v1860_v22 = vmul.f32 %v2200_v47, %v3275_v39  ;;  %v2202_v44 = vld [vmem:[%s3269_s8 + $0x42] ss:$2 sm:$0x1f]  ;;  %v2203_v0 = vld [vmem:[%s3269_s8 + $0x43] ss:$2 sm:$0x1f] }
 0x182   : > { %v1777_v32 = vadd.f32 %v3282_v37, %v1770_v41  ;;  %v1781_v43 = vadd.f32 %v1780_v35, %v3282_v37  ;;  %v1785_v33 = vadd.f32 %v1784_v30, %v3282_v37  ;;  %v1789_v12 = vadd.f32 %v1788_v48, %v3282_v37  ;;  %v2204_v58 = vld [vmem:[%s3269_s8 + $0x4d] ss:$2 sm:$0x1f]  ;;  %v2205_v56 = vld [vmem:[%s3269_s8 + $0x4e] ss:$2 sm:$0x1f] }
 0x183   : > { %v1849_v26 = vadd.f32 %v1848_v45, %v3282_v37  ;;  %v1853_v3 = vadd.f32 %v1852_v7, %v3282_v37  ;;  %v1857_v49 = vadd.f32 %v1856_v21, %v3282_v37  ;;  %v1861_v50 = vadd.f32 %v1860_v22, %v3282_v37  ;;  %v2207_v60 = vld [vmem:[%s3269_s8 + $0x58] ss:$2 sm:$0x1f]  ;;  %v2208_v61 = vld [vmem:[%s3269_s8 + $0x59] ss:$2 sm:$0x1f] }
 0x184   : > { %v1790_v8 = vmax.f32 %v1777_v32, %v1781_v43  ;;  %v1791_v11 = vmax.f32 %v1785_v33, %v1789_v12  ;;  %v1806_v52 = vmul.f32 %v2192_v10, %v3275_v39  ;;  %v1810_v53 = vmul.f32 %v2193_v46, %v3275_v39  ;;  %v2209_v20 = vld [vmem:[%s3269_s8 + $0x63] ss:$2 sm:$0x1f]  ;;  %v2210_v41 = vld [vmem:[%s3269_s8 + $0x64] ss:$2 sm:$0x1f] }
 0x185   : > { %v1862_v13 = vmax.f32 %v1849_v26, %v1853_v3  ;;  %v1863_v55 = vmax.f32 %v1857_v49, %v1861_v50  ;;  %v1814_v2 = vmul.f32 %v2194_v51, %v3275_v39  ;;  %v1818_v9 = vmul.f32 %v2195_v24, %v3275_v39  ;;  %v1875_v7 = vld [vmem:[%s3318_s11 + $0x4] sm:$0xe]  ;;  %p1757_p0 = scmp.ge.s32.totalorder %s1760_s7, 2  }
 0x186   : > { %v1792_v54 = vmax.f32 %v1790_v8, %v1791_v11  ;;  %v1807_v23 = vadd.f32 %v1806_v52, %v3282_v37  ;;  %v1811_v18 = vadd.f32 %v1810_v53, %v3282_v37  ;;  %v1880_v29 = vmul.f32 %v2202_v44, %v3275_v39 }
 0x187   : > { %v1864_v14 = vmax.f32 %v1862_v13, %v1863_v55  ;;  %v1815_v15 = vadd.f32 %v1814_v2, %v3282_v37  ;;  %v1819_v57 = vadd.f32 %v1818_v9, %v3282_v37  ;;  %v1884_v59 = vmul.f32 %v2203_v0, %v3275_v39 }
 0x188   : > { %v1793_v25 = vmax.f32 %v1792_v54, 0.0  ;;  %v1820_v62 = vmax.f32 %v1807_v23, %v1811_v18  ;;  %v1881_v63 = vadd.f32 %v1880_v29, %v3282_v37  ;;  %v1888_v36 = vmul.f32 %v2204_v58, %v3275_v39 }
 0x189   : > { %v1865_v5 = vmax.f32 %v1864_v14, 0.0  ;;  %v1821_v6 = vmax.f32 %v1815_v15, %v1819_v57  ;;  %v1885_v40 = vadd.f32 %v1884_v59, %v3282_v37  ;;  %v1892_v19 = vmul.f32 %v2205_v56, %v3275_v39 }
 0x18a   : > { %v1794_v31 = vpack.c.bf16 %v1793_v25, %v1793_v25  ;;  %v1889_v28 = vadd.f32 %v1888_v36, %v3282_v37  ;;  %v1923_v38 = vmul.f32 %v2207_v60, %v3275_v39  ;;  %v1927_v42 = vmul.f32 %v2208_v61, %v3275_v39  ;;  %v1954_v60 = vld [vmem:[%s3318_s11 + $0xc] sm:$0x1] }
 0x18b   : > { %v2214_v35 = vpack.c.bf16 %v1865_v5, %v1865_v5  ;;  %v1822_v30 = vmax.f32 %v1820_v62, %v1821_v6  ;;  %v1893_v48 = vadd.f32 %v1892_v19, %v3282_v37  ;;  %v1894_v47 = vmax.f32 %v1881_v63, %v1885_v40 }
 0x18c   : > { %v1802_v45 = vsel %vm3333_vm10, %v1794_v31, %v1801_v27  ;;  %v1924_v21 = vadd.f32 %v1923_v38, %v3282_v37  ;;  %v1928_v22 = vadd.f32 %v1927_v42, %v3282_v37  ;;  %v1931_v10 = vmul.f32 %v2209_v20, %v3275_v39 }
 0x18d   : > { %1803 = vst [vmem:[%s3318_s11] sm:$0x7] %v1802_v45  ;;  %v1870_v46 = vrot.slane %v2214_v35, 7  ;;  %v1823_v32 = vmax.f32 %v1822_v30, 0.0  ;;  %v1895_v43 = vmax.f32 %v1889_v28, %v1893_v48  ;;  %v1935_v33 = vmul.f32 %v2210_v41, %v3275_v39 }
 0x18e   : > { %v1932_v12 = vadd.f32 %v1931_v10, %v3282_v37  ;;  %v1937_v51 = vmax.f32 %v1924_v21, %v1928_v22  ;;  %vm1914_vm15 = vsmask.f32 7950  ;;  %vm1952_vm2 = vsmask.f32 256 }
 0x18f   : > { %v1876_v24 = vsel %vm1874_vm11, %v1870_v46, %v1875_v7  ;;  %v2213_v26 = vpack.c.bf16 %v1823_v32, %v1823_v32  ;;  %v1896_v3 = vmax.f32 %v1894_v47, %v1895_v43  ;;  %v1936_v49 = vadd.f32 %v1935_v33, %v3282_v37  ;;  %vm1915_vm1 = vmand %vm1913_vm14, %vm1914_vm15 }
 0x190   : > { %1877 = vst [vmem:[%s3318_s11 + $0x4] sm:$0xe] %v1876_v24  ;;  %vm1953_vm4 = vmand %vm786_vm5, %vm1952_vm2 }
 0x191   : > { %v1829_v50 = vshrl.u32 %v2213_v26, 16  ;;  %v1832_v44 = vshll.u32 %v2213_v26, 16  ;;  %v1897_v8 = vmax.f32 %v1896_v3, 0.0  ;;  %v1938_v11 = vmax.f32 %v1932_v12, %v1936_v49 }
 0x193   : > { %v1831_v39 = vrot.slane %v1829_v50, 5  ;;  %v1834_v52 = vrot.slane %v1832_v44, 6  ;;  %v2215_v53 = vpack.c.bf16 %v1897_v8, %v1897_v8  ;;  %v1939_v0 = vmax.f32 %v1937_v51, %v1938_v11 }
 0x194   : > { %v1842_v13 = vld [vmem:[%s3318_s11] sm:$0xc] }
 0x195   : > { %v1835_v37 = vor.u32 %v1834_v52, %v1831_v39  ;;  %v1903_v55 = vshll.u32 %v2215_v53, 16  ;;  %v1906_v2 = vshrl.u32 %v2215_v53, 16  ;;  %v1940_v9 = vmax.f32 %v1939_v0, 0.0 }
 0x197   : > { %v1843_v58 = vsel %vm1841_vm0, %v1835_v37, %v1842_v13  ;;  %v1836_v54 = vrot.slane %v1835_v37, 4  ;;  %v1905_v23 = vrot.slane %v1903_v55, 5  ;;  %v1916_v18 = vld [vmem:[%s3318_s11 + $0x4] sm:$0x8]  ;;  %v1908_v29 = vrot.slane %v1906_v2, 4 }
 0x198   : > { %1844 = vst [vmem:[%s3318_s11] sm:$0xc] %v1843_v58  ;;  %v2216_v56 = vpack.c.bf16 %v1940_v9, %v1940_v9 }
 0x199   : > { %1845 = vst.msk [vmem:[%s3318_s11 + $0x4] sm:$0x1] %vm786_vm5, %v1836_v54  ;;  %v1917_v14 = vsel %vm1915_vm1, %v1905_v23, %v1916_v18  ;;  %v1909_v15 = vor.u32 %v1908_v29, %v1905_v23 }
 0x19a   : > { %1918 = vst [vmem:[%s3318_s11 + $0x4] sm:$0x8] %v1917_v14  ;;  %v1945_v57 = vrot.slane %v2216_v56, 6 }
 0x19b   : > { %v1910_v59 = vrot.slane %v1909_v15, 4  ;;  %1759 = sbr.rel (!%p1757_p0) target bundleno = 376 (0x178), region = 77 }
 0x19c   : > { %v1946_v61 = vrot.slane %v1945_v57, 4  ;;  %1950 = vst.msk [vmem:[%s3318_s11 + $0x8] sm:$0xc] %vm1839_vm12, %v1945_v57 }
 0x19d   : > { %1920 = vst.msk [vmem:[%s3318_s11 + $0x8] sm:$0x3] %vm22_vm3, %v1910_v59 }
 0x19e   : > { %v1955_v25 = vsel %vm1953_vm4, %v1946_v61, %v1954_v60 }
 0x19f   : > { %1956 = vst [vmem:[%s3318_s11 + $0xc] sm:$0x1] %v1955_v25 }

// kernel: model_bn_forward.5
= control target key start
LH: loop header
LB: loop body
LE: loop exit
PB: predicated region body
PF: predicated region fallthrough
CT: control target
= control target key end

     0   :  { %vm1544_vm0 = vmmov 0   ;;  %vm874_vm1 = vcmask 523264   ;;  %vm1158_vm2 = vcmask 80896   ;;  %s1892_s1 = inlined_call_operand.vmem [shape: bf16[1600,10], index: 1, kind: input, shape index: {}]   ;;  %s1893_s0 = inlined_call_operand.vmem [shape: bf16[8,1600], index: 0, kind: input, shape index: {}]   ;;  %s1894_s2 = inlined_call_operand.vmem [shape: f32[1,10], index: 2, kind: input, shape index: {}]   ;;  %s1895_s3 = inlined_call_operand.vmem [shape: f32[8,10], index: 3, kind: output, shape index: {}]  }
   0x1   :  { %v1430_v0 = vld [vmem:[%s1892_s1 + $0x78] sm:$0xff]   ;;  %v1434_v4 = vld [vmem:[%s1892_s1 + $0x70] sm:$0xff]   ;;  %v1438_v8 = vld [vmem:[%s1892_s1 + $0x68] sm:$0xff]  }
   0x2   :  { %v1431_v1 = vld [vmem:[%s1892_s1 + $0x38] sm:$0xff]   ;;  %1279 = vmatprep.subr.bf16.mxu0 %v1430_v0  ;;  %v1435_v5 = vld [vmem:[%s1892_s1 + $0x30] sm:$0xff]   ;;  %v1439_v9 = vld [vmem:[%s1892_s1 + $0x28] sm:$0xff]  }
   0x3   :  { %v1432_v2 = vld [vmem:[%s1892_s1 + $0xf8] sm:$0xff]   ;;  %1280 = vmatpush3.bf16.msra.mxu0 %v1431_v1  ;;  %v1436_v6 = vld [vmem:[%s1892_s1 + $0xf0] sm:$0xff]   ;;  %v1440_v10 = vld [vmem:[%s1892_s1 + $0xe8] sm:$0xff]  }
   0x4   :  { %v1433_v3 = vld [vmem:[%s1892_s1 + $0xb8] sm:$0xff]   ;;  %1301 = vmatprep.subr.bf16.mxu1 %v1432_v2  ;;  %1281 = vmatprep.subr.bf16.mxu0 %v1434_v4  ;;  %v1437_v7 = vld [vmem:[%s1892_s1 + $0xb0] sm:$0xff]   ;;  %v1441_v11 = vld [vmem:[%s1892_s1 + $0xa8] sm:$0xff]  }
   0x5   :  { %1302 = vmatpush3.bf16.msra.mxu1 %v1433_v3  ;;  %v1442_v12 = vld [vmem:[%s1892_s1 + $0x60] sm:$0xff]   ;;  %v1446_v16 = vld [vmem:[%s1892_s1 + $0x58] sm:$0xff]   ;;  %v1450_v20 = vld [vmem:[%s1892_s1 + $0x50] sm:$0xff]  }
   0x6   :  { %1303 = vmatprep.subr.bf16.mxu1 %v1436_v6  ;;  %v1443_v13 = vld [vmem:[%s1892_s1 + $0x20] sm:$0xff]   ;;  %v1447_v17 = vld [vmem:[%s1892_s1 + $0x18] sm:$0xff]   ;;  %v1451_v21 = vld [vmem:[%s1892_s1 + $0x10] sm:$0xff]  }
   0x7   :  { %1282 = vmatpush3.bf16.msra.mxu0 %v1435_v5  ;;  %v1444_v14 = vld [vmem:[%s1892_s1 + $0xe0] sm:$0xff]   ;;  %v1448_v18 = vld [vmem:[%s1892_s1 + $0xd8] sm:$0xff]   ;;  %v1452_v22 = vld [vmem:[%s1892_s1 + $0xd0] sm:$0xff]  }
   0x8   :  { %1283 = vmatprep.subr.bf16.mxu0 %v1438_v8  ;;  %v1445_v15 = vld [vmem:[%s1892_s1 + $0xa0] sm:$0xff]   ;;  %v1449_v19 = vld [vmem:[%s1892_s1 + $0x98] sm:$0xff]   ;;  %v1453_v23 = vld [vmem:[%s1892_s1 + $0x90] sm:$0xff]  }
   0x9   :  { %1304 = vmatpush3.bf16.msra.mxu1 %v1437_v7  ;;  %v1454_v24 = vld [vmem:[%s1892_s1 + $0x48] sm:$0xff]   ;;  %v1458_v28 = vld [vmem:[%s1892_s1 + $0x40] sm:$0xff]   ;;  %v1464_v35 = vld [vmem:[%s1892_s1 + $0x178] sm:$0xff]  }
   0xa   :  { %1305 = vmatprep.subr.bf16.mxu1 %v1440_v10  ;;  %v1455_v25 = vld [vmem:[%s1892_s1 + $0x8] sm:$0xff]   ;;  %v1459_v29 = vld [vmem:[%s1892_s1] sm:$0xff]   ;;  %v1467_v39 = vld [vmem:[%s1892_s1 + $0x138] sm:$0xff]  }
   0xb   :  { %1284 = vmatpush3.bf16.msra.mxu0 %v1439_v9  ;;  %v1456_v26 = vld [vmem:[%s1892_s1 + $0xc8] sm:$0xff]   ;;  %v1460_v30 = vld [vmem:[%s1892_s1 + $0xc0] sm:$0xff]   ;;  %v1468_v40 = vld [vmem:[%s1892_s1 + $0x1f8] sm:$0xff]  }
   0xc   :  { %1285 = vmatprep.subr.bf16.mxu0 %v1442_v12  ;;  %v1457_v27 = vld [vmem:[%s1892_s1 + $0x88] sm:$0xff]   ;;  %v15_v31 = vld [vmem:[%s1893_s0] sm:$0xff]  ;;  %v1469_v41 = vld [vmem:[%s1892_s1 + $0x1b8] sm:$0xff]  }
   0xd   :  { %1306 = vmatpush3.bf16.msra.mxu1 %v1441_v11  ;;  %v1165_v32 = vcombine.low %v15_v31, %v15_v31  ;;  %v1166_v33 = vcombine.high %v15_v31, %v15_v31  ;;  %v1463_v34 = vld [vmem:[%s1892_s1 + $0x80] sm:$0xff]   ;;  %v16_v36 = vld [vmem:[%s1893_s0 + $0x8] sm:$0xff]  ;;  %v1470_v42 = vld [vmem:[%s1892_s1 + $0x170] sm:$0xff]  }
   0xe   :  { %1307 = vmatprep.subr.bf16.mxu1 %v1444_v14  ;;  %v1167_v37 = vcombine.low %v16_v36, %v16_v36  ;;  %v1168_v38 = vcombine.high %v16_v36, %v16_v36  ;;  %v1471_v43 = vld [vmem:[%s1892_s1 + $0x130] sm:$0xff]   ;;  %v1474_v46 = vld [vmem:[%s1892_s1 + $0x168] sm:$0xff]   ;;  %v1478_v50 = vld [vmem:[%s1892_s1 + $0x160] sm:$0xff]  }
   0xf   :  { %1286 = vmatpush3.bf16.msra.mxu0 %v1443_v13  ;;  %910 = vmatprep.mubr.bf16.mxu0 %v1166_v33  ;;  %v1472_v44 = vld [vmem:[%s1892_s1 + $0x1f0] sm:$0xff]   ;;  %v1475_v47 = vld [vmem:[%s1892_s1 + $0x128] sm:$0xff]   ;;  %v1479_v51 = vld [vmem:[%s1892_s1 + $0x120] sm:$0xff]  }
  0x10   :  { %1287 = vmatprep.subr.bf16.mxu0 %v1446_v16  ;;  %950 = vmatprep.mubr.bf16.mxu1 %v1168_v38  ;;  %v1473_v45 = vld [vmem:[%s1892_s1 + $0x1b0] sm:$0xff]   ;;  %v1476_v48 = vld [vmem:[%s1892_s1 + $0x1e8] sm:$0xff]   ;;  %v1480_v52 = vld [vmem:[%s1892_s1 + $0x1e0] sm:$0xff]  }
  0x11   :  { %1308 = vmatpush3.bf16.msra.mxu1 %v1445_v15  ;;  %v1477_v49 = vld [vmem:[%s1892_s1 + $0x1a8] sm:$0xff]   ;;  %v1481_v53 = vld [vmem:[%s1892_s1 + $0x1a0] sm:$0xff]   ;;  %v1482_v54 = vld [vmem:[%s1892_s1 + $0x158] sm:$0xff]  }
  0x12   :  { %1309 = vmatprep.subr.bf16.mxu1 %v1448_v18  ;;  %v1483_v55 = vld [vmem:[%s1892_s1 + $0x118] sm:$0xff]   ;;  %v1486_v58 = vld [vmem:[%s1892_s1 + $0x150] sm:$0xff]   ;;  %v1490_v62 = vld [vmem:[%s1892_s1 + $0x148] sm:$0xff]  }
  0x13   :  { %1288 = vmatpush3.bf16.msra.mxu0 %v1447_v17  ;;  %v1484_v56 = vld [vmem:[%s1892_s1 + $0x1d8] sm:$0xff]   ;;  %v1487_v59 = vld [vmem:[%s1892_s1 + $0x110] sm:$0xff]   ;;  %v1491_v63 = vld [vmem:[%s1892_s1 + $0x108] sm:$0xff]  }
  0x14   :  { %1289 = vmatprep.subr.bf16.mxu0 %v1450_v20  ;;  %v1485_v57 = vld [vmem:[%s1892_s1 + $0x198] sm:$0xff]   ;;  %v1488_v60 = vld [vmem:[%s1892_s1 + $0x1d0] sm:$0xff]   ;;  %v1492_v0 = vld [vmem:[%s1892_s1 + $0x1c8] sm:$0xff]  }
  0x15   :  { %1310 = vmatpush3.bf16.msra.mxu1 %v1449_v19  ;;  %v1489_v61 = vld [vmem:[%s1892_s1 + $0x190] sm:$0xff]   ;;  %v1493_v1 = vld [vmem:[%s1892_s1 + $0x188] sm:$0xff]   ;;  %v1494_v2 = vld [vmem:[%s1892_s1 + $0x140] sm:$0xff]  }
  0x16   :  { %1311 = vmatprep.subr.bf16.mxu1 %v1452_v22  ;;  %v1495_v3 = vld [vmem:[%s1892_s1 + $0x100] sm:$0xff]   ;;  %v17_v5 = vld [vmem:[%s1893_s0 + $0x10] sm:$0xff]  ;;  %v1500_v9 = vld [vmem:[%s1892_s1 + $0x278] sm:$0xff]  }
  0x17   :  { %1290 = vmatpush3.bf16.msra.mxu0 %v1451_v21  ;;  %v1496_v4 = vld [vmem:[%s1892_s1 + $0x1c0] sm:$0xff]   ;;  %v1169_v6 = vcombine.low %v17_v5, %v17_v5  ;;  %v1170_v7 = vcombine.high %v17_v5, %v17_v5  ;;  %v18_v10 = vld [vmem:[%s1893_s0 + $0x18] sm:$0xff]  ;;  %v1506_v16 = vld [vmem:[%s1892_s1 + $0x270] sm:$0xff]  }
  0x18   :  { %1291 = vmatprep.subr.bf16.mxu0 %v1454_v24  ;;  %v1499_v8 = vld [vmem:[%s1892_s1 + $0x180] sm:$0xff]   ;;  %v1171_v11 = vcombine.low %v18_v10, %v18_v10  ;;  %v1172_v12 = vcombine.high %v18_v10, %v18_v10  ;;  %v1503_v13 = vld [vmem:[%s1892_s1 + $0x238] sm:$0xff]   ;;  %v1507_v17 = vld [vmem:[%s1892_s1 + $0x230] sm:$0xff]  }
  0x19   :  { %1312 = vmatpush3.bf16.msra.mxu1 %v1453_v23  ;;  %v1504_v14 = vld [vmem:[%s1892_s1 + $0x2f8] sm:$0xff]   ;;  %v1508_v18 = vld [vmem:[%s1892_s1 + $0x2f0] sm:$0xff]   ;;  %v1510_v20 = vld [vmem:[%s1892_s1 + $0x268] sm:$0xff]  }
  0x1a   :  { %1313 = vmatprep.subr.bf16.mxu1 %v1456_v26  ;;  %v1505_v15 = vld [vmem:[%s1892_s1 + $0x2b8] sm:$0xff]   ;;  %v1509_v19 = vld [vmem:[%s1892_s1 + $0x2b0] sm:$0xff]   ;;  %v1511_v21 = vld [vmem:[%s1892_s1 + $0x228] sm:$0xff]  }
  0x1b   :  { %1292 = vmatpush3.bf16.msra.mxu0 %v1455_v25  ;;  %v1512_v22 = vld [vmem:[%s1892_s1 + $0x2e8] sm:$0xff]   ;;  %v1514_v24 = vld [vmem:[%s1892_s1 + $0x260] sm:$0xff]   ;;  %v1521_v31 = vld [vmem:[%s1892_s1 + $0x298] sm:$0xff]  }
  0x1c   :  { %1293 = vmatprep.subr.bf16.mxu0 %v1458_v28  ;;  %v1513_v23 = vld [vmem:[%s1892_s1 + $0x2a8] sm:$0xff]   ;;  %v1515_v25 = vld [vmem:[%s1892_s1 + $0x220] sm:$0xff]   ;;  %v1518_v28 = vld [vmem:[%s1892_s1 + $0x258] sm:$0xff]  }
  0x1d   :  { %1314 = vmatpush3.bf16.msra.mxu1 %v1457_v27  ;;  %v1516_v26 = vld [vmem:[%s1892_s1 + $0x2e0] sm:$0xff]   ;;  %v1523_v33 = vld [vmem:[%s1892_s1 + $0x210] sm:$0xff]   ;;  %v1526_v36 = vld [vmem:[%s1892_s1 + $0x248] sm:$0xff]  }
  0x1e   :  { %1315 = vmatprep.subr.bf16.mxu1 %v1460_v30  ;;  %v1517_v27 = vld [vmem:[%s1892_s1 + $0x2a0] sm:$0xff]   ;;  %v1520_v30 = vld [vmem:[%s1892_s1 + $0x2d8] sm:$0xff]   ;;  %v1528_v38 = vld [vmem:[%s1892_s1 + $0x2c8] sm:$0xff]  }
  0x1f   :  { %1294 = vmatpush3.bf16.msra.mxu0 %v1459_v29  ;;  %v1519_v29 = vld [vmem:[%s1892_s1 + $0x218] sm:$0xff]  }
  0x20   :  { %1323 = vmatprep.subr.bf16.mxu0 %v1464_v35  ;;  %v1525_v35 = vld [vmem:[%s1892_s1 + $0x290] sm:$0xff]  }
  0x21   :  { %1316 = vmatpush3.bf16.msra.mxu1 %v1463_v34  ;;  %v1524_v34 = vld [vmem:[%s1892_s1 + $0x2d0] sm:$0xff]  }
  0x22   :  { %911 = vmatmul.mubr.bf16.vlgmr.msra.gmra.mxu0 %v1165_v32  ;;  %1345 = vmatprep.subr.bf16.mxu1 %v1468_v40  ;;  %v1522_v32 = vld [vmem:[%s1892_s1 + $0x250] sm:$0xff]   ;;  %v1530_v40 = vld [vmem:[%s1892_s1 + $0x240] sm:$0xff]  }
  0x23   :  { %1324 = vmatpush3.bf16.msra.mxu0 %v1467_v39  ;;  %990 = vmatprep.mubr.bf16.mxu0 %v1170_v7  ;;  %v1529_v39 = vld [vmem:[%s1892_s1 + $0x288] sm:$0xff]  }
  0x24   :  { %951 = vmatmul.mubr.bf16.vlgmr.msra.gmra.mxu1 %v1167_v37  ;;  %1325 = vmatprep.subr.bf16.mxu0 %v1470_v42  ;;  %v1527_v37 = vld [vmem:[%s1892_s1 + $0x208] sm:$0xff]   ;;  %v1532_v42 = vld [vmem:[%s1892_s1 + $0x2c0] sm:$0xff]  }
  0x25   :  { %1346 = vmatpush3.bf16.msra.mxu1 %v1469_v41  ;;  %1030 = vmatprep.mubr.bf16.mxu1 %v1172_v12  ;;  %v1531_v41 = vld [vmem:[%s1892_s1 + $0x200] sm:$0xff]  }
  0x26   :  { %1347 = vmatprep.subr.bf16.mxu1 %v1472_v44 }
  0x27   :  { %1326 = vmatpush3.bf16.msra.mxu0 %v1471_v43  ;;  %v19_v43 = vld [vmem:[%s1893_s0 + $0x20] sm:$0xff] }
  0x28   :  { %1327 = vmatprep.subr.bf16.mxu0 %v1474_v46  ;;  %v1173_v44 = vcombine.low %v19_v43, %v19_v43  ;;  %v1535_v46 = vld [vmem:[%s1892_s1 + $0x280] sm:$0xff]  }
  0x29   :  { %1348 = vmatpush3.bf16.msra.mxu1 %v1473_v45  ;;  %v1174_v45 = vcombine.high %v19_v43, %v19_v43 }
  0x2a   :  { %1349 = vmatprep.subr.bf16.mxu1 %v1476_v48  ;;  %v1543_v48 = vmov 0.0  }
  0x2b   :  { %1328 = vmatpush3.bf16.msra.mxu0 %v1475_v47  ;;  %v20_v47 = vld [vmem:[%s1893_s0 + $0x28] sm:$0xff] }
  0x2c   :  { %1329 = vmatprep.subr.bf16.mxu0 %v1478_v50  ;;  %v1176_v50 = vcombine.high %v20_v47, %v20_v47 }
  0x2d   :  { %1350 = vmatpush3.bf16.msra.mxu1 %v1477_v49  ;;  %v1175_v49 = vcombine.low %v20_v47, %v20_v47 }
  0x2e   :  { %1351 = vmatprep.subr.bf16.mxu1 %v1480_v52  ;;  %v1539_v52 = vld [vmem:[%s1892_s1 + $0x310] sm:$0xff]  }
  0x2f   :  { %1330 = vmatpush3.bf16.msra.mxu0 %v1479_v51  ;;  %v1538_v51 = vld [vmem:[%s1892_s1 + $0x318] sm:$0xff]  }
  0x30   :  { %1331 = vmatprep.subr.bf16.mxu0 %v1482_v54  ;;  %v1541_v54 = vld [vmem:[%s1892_s1 + $0x300] sm:$0xff]  }
  0x31   :  { %1352 = vmatpush3.bf16.msra.mxu1 %v1481_v53  ;;  %v1540_v53 = vld [vmem:[%s1892_s1 + $0x308] sm:$0xff]  }
  0x32   :  { %1353 = vmatprep.subr.bf16.mxu1 %v1484_v56 }
  0x33   :  { %1332 = vmatpush3.bf16.msra.mxu0 %v1483_v55  ;;  %v1542_v55 = vld [vmem:[%s1893_s0 + $0x30] ss:$0 sps:$4 sm:$0xff]  }
  0x34   :  { %1333 = vmatprep.subr.bf16.mxu0 %v1486_v58 }
  0x35   :  { %1354 = vmatpush3.bf16.msra.mxu1 %v1485_v57  ;;  %v1164_v57 = vld [vmem:[%s1894_s2] ss:$0 sm:$0xff] }
  0x36   :  { %1355 = vmatprep.subr.bf16.mxu1 %v1488_v60 }
  0x37   :  { %1334 = vmatpush3.bf16.msra.mxu0 %v1487_v59 }
  0x38   :  { %1335 = vmatprep.subr.bf16.mxu0 %v1490_v62 }
  0x39   :  { %1356 = vmatpush3.bf16.msra.mxu1 %v1489_v61 }
  0x3a   :  { %1357 = vmatprep.subr.bf16.mxu1 %v1492_v0 }
  0x3b   :  { %1336 = vmatpush3.bf16.msra.mxu0 %v1491_v63 }
  0x3c   :  { %1337 = vmatprep.subr.bf16.mxu0 %v1494_v2 }
  0x3d   :  { %1358 = vmatpush3.bf16.msra.mxu1 %v1493_v1 }
  0x3e   :  { %1359 = vmatprep.subr.bf16.mxu1 %v1496_v4 }
  0x3f   :  { %1338 = vmatpush3.bf16.msra.mxu0 %v1495_v3 }
  0x40   :  { %1367 = vmatprep.subr.bf16.mxu0 %v1500_v9 }
  0x41   :  { %1360 = vmatpush3.bf16.msra.mxu1 %v1499_v8 }
  0x42   :  { %991 = vmatmul.mubr.bf16.vlgmr.msra.gmra.mxu0 %v1169_v6  ;;  %1389 = vmatprep.subr.bf16.mxu1 %v1504_v14 }
  0x43   :  { %1368 = vmatpush3.bf16.msra.mxu0 %v1503_v13  ;;  %1070 = vmatprep.mubr.bf16.mxu0 %v1174_v45 }
  0x44   :  { %1031 = vmatmul.mubr.bf16.vlgmr.msra.gmra.mxu1 %v1171_v11  ;;  %1369 = vmatprep.subr.bf16.mxu0 %v1506_v16 }
  0x45   :  { %1390 = vmatpush3.bf16.msra.mxu1 %v1505_v15  ;;  %1110 = vmatprep.mubr.bf16.mxu1 %v1176_v50 }
  0x46   :  { %1391 = vmatprep.subr.bf16.mxu1 %v1508_v18 }
  0x47   :  { %1370 = vmatpush3.bf16.msra.mxu0 %v1507_v17 }
  0x48   :  { %1371 = vmatprep.subr.bf16.mxu0 %v1510_v20 }
  0x49   :  { %1392 = vmatpush3.bf16.msra.mxu1 %v1509_v19 }
  0x4a   :  { %1393 = vmatprep.subr.bf16.mxu1 %v1512_v22 }
  0x4b   :  { %1372 = vmatpush3.bf16.msra.mxu0 %v1511_v21 }
  0x4c   :  { %1373 = vmatprep.subr.bf16.mxu0 %v1514_v24 }
  0x4d   :  { %1394 = vmatpush3.bf16.msra.mxu1 %v1513_v23 }
  0x4e   :  { %1395 = vmatprep.subr.bf16.mxu1 %v1516_v26 }
  0x4f   :  { %1374 = vmatpush3.bf16.msra.mxu0 %v1515_v25 }
  0x50   :  { %1375 = vmatprep.subr.bf16.mxu0 %v1518_v28 }
  0x51   :  { %1396 = vmatpush3.bf16.msra.mxu1 %v1517_v27 }
  0x52   :  { %1397 = vmatprep.subr.bf16.mxu1 %v1520_v30 }
  0x53   :  { %1376 = vmatpush3.bf16.msra.mxu0 %v1519_v29 }
  0x54   :  { %1377 = vmatprep.subr.bf16.mxu0 %v1522_v32 }
  0x55   :  { %1398 = vmatpush3.bf16.msra.mxu1 %v1521_v31 }
  0x56   :  { %1399 = vmatprep.subr.bf16.mxu1 %v1524_v34 }
  0x57   :  { %1378 = vmatpush3.bf16.msra.mxu0 %v1523_v33 }
  0x58   :  { %1379 = vmatprep.subr.bf16.mxu0 %v1526_v36 }
  0x59   :  { %1400 = vmatpush3.bf16.msra.mxu1 %v1525_v35 }
  0x5a   :  { %1401 = vmatprep.subr.bf16.mxu1 %v1528_v38 }
  0x5b   :  { %1380 = vmatpush3.bf16.msra.mxu0 %v1527_v37 }
  0x5c   :  { %1381 = vmatprep.subr.bf16.mxu0 %v1530_v40 }
  0x5d   :  { %1402 = vmatpush3.bf16.msra.mxu1 %v1529_v39 }
  0x5e   :  { %1403 = vmatprep.subr.bf16.mxu1 %v1532_v42 }
  0x5f   :  { %1382 = vmatpush3.bf16.msra.mxu0 %v1531_v41 }
  0x60   :  { %1416 = vmatprep.subr.bf16.mxu0 %v1543_v48 }
  0x61   :  { %1404 = vmatpush3.bf16.msra.mxu1 %v1535_v46 }
  0x62   :  { %1071 = vmatmul.mubr.bf16.vlgmr.msra.gmra.mxu0 %v1173_v44 }
  0x63   :  { %1417 = vmatpush3.bf16.msra.mxu0 %v1538_v51  ;;  %1424 = vmatprep.mubr.msk.bf16.mxu0 %vm1544_vm0, %v1543_v48 }
  0x64   :  { %1111 = vmatmul.mubr.bf16.vlgmr.msra.gmra.mxu1 %v1175_v49  ;;  %1418 = vmatprep.subr.bf16.mxu0 %v1543_v48 }
  0x67   :  { %1419 = vmatpush3.bf16.msra.mxu0 %v1539_v52 }
  0x68   :  { %1420 = vmatprep.subr.bf16.mxu0 %v1543_v48 }
  0x6b   :  { %1421 = vmatpush3.bf16.msra.mxu0 %v1540_v53 }
  0x6c   :  { %1422 = vmatprep.subr.bf16.mxu0 %v1543_v48 }
  0x6f   :  { %1423 = vmatpush3.bf16.msra.mxu0 %v1541_v54 }
  0x72   :  { %1425 = vmatmul.mubr.msk.bf16.vlgmr.msra.gmra.mxu0 %vm874_vm1, %v1542_v55 }
  0xe2   :  { %v1295_v56 = vpop.f32.mrf.mxu0 }
  0xe4   :  { %v1296_v58 = vpop.f32.mrf.mxu0  ;;  %v1317_v59 = vpop.f32.mrf.mxu1 }
  0xe5   :  { %v1297_v60 = vadd.f32 %v1296_v58, %v1295_v56 }
  0xe6   :  { %v1298_v61 = vpop.f32.mrf.mxu0  ;;  %v1318_v62 = vpop.f32.mrf.mxu1 }
  0xe7   :  { %v913_v63 = vadd.f32 %v1297_v60, %v1164_v57  ;;  %v1319_v0 = vadd.f32 %v1318_v62, %v1317_v59 }
  0xe8   :  { %v1299_v1 = vpop.f32.mrf.mxu0  ;;  %v1320_v2 = vpop.f32.mrf.mxu1 }
  0xe9   :  { %v953_v3 = vadd.f32 %v1319_v0, %v913_v63 }
  0xea   :  { %v1321_v4 = vpop.f32.mrf.mxu1 }
 0x102   :  { %v1339_v5 = vpop.f32.mrf.mxu0 }
 0x104   :  { %v1340_v6 = vpop.f32.mrf.mxu0  ;;  %v1361_v7 = vpop.f32.mrf.mxu1 }
 0x105   :  { %v1341_v14 = vadd.f32 %v1340_v6, %v1339_v5 }
 0x106   :  { %v1342_v8 = vpop.f32.mrf.mxu0  ;;  %v1362_v9 = vpop.f32.mrf.mxu1 }
 0x107   :  { %v993_v19 = vadd.f32 %v1341_v14, %v953_v3  ;;  %v1363_v20 = vadd.f32 %v1362_v9, %v1361_v7 }
 0x108   :  { %v1343_v10 = vpop.f32.mrf.mxu0  ;;  %v1364_v11 = vpop.f32.mrf.mxu1 }
 0x109   :  { %v1033_v25 = vadd.f32 %v1363_v20, %v993_v19 }
 0x10a   :  { %v1365_v12 = vpop.f32.mrf.mxu1 }
 0x122   :  { %v1383_v13 = vpop.f32.mrf.mxu0 }
 0x124   :  { %v1384_v15 = vpop.f32.mrf.mxu0  ;;  %v1405_v16 = vpop.f32.mrf.mxu1 }
 0x125   :  { %v1385_v23 = vadd.f32 %v1384_v15, %v1383_v13 }
 0x126   :  { %v1386_v17 = vpop.f32.mrf.mxu0  ;;  %v1406_v18 = vpop.f32.mrf.mxu1 }
 0x127   :  { %v1073_v26 = vadd.f32 %v1385_v23, %v1033_v25  ;;  %v1407_v27 = vadd.f32 %v1406_v18, %v1405_v16 }
 0x128   :  { %v1387_v21 = vpop.f32.mrf.mxu0  ;;  %v1408_v22 = vpop.f32.mrf.mxu1 }
 0x129   :  { %v1113_v28 = vadd.f32 %v1407_v27, %v1073_v26 }
 0x12a   :  { %v1409_v24 = vpop.f32.mrf.mxu1 }
 0x132   :  { %v1152_v29 = vpop.f32.mrf.mxu0 }
 0x133   :  { %v1153_v30 = vadd.f32 %v1152_v29, %v1113_v28 }
 0x134   :  { %v1426_v31 = vpop.f32.mrf.mxu0 }
 0x135   :  { %1159 = vst.msk [vmem:[%s1895_s3] sm:$0xff] %vm1158_vm2, %v1153_v30 }
 0x136   :  { %v1155_v32 = vpop.f32.mrf.mxu0 }
 0x138   :  { %v1427_v33 = vpop.f32.mrf.mxu0 }

// kernel: model_bn_forward.3
= control target key start
LH: loop header
LB: loop body
LE: loop exit
PB: predicated region body
PF: predicated region fallthrough
CT: control target
= control target key end

     0   :  { %vm13439_vm0 = vcmask 1040384   ;;  %vm13443_vm1 = vcmask 1041408   ;;  %v13437_v0 = vmov 0.0   ;;  %v9368_v2 = vmov 65535   ;;  %s12883_s15 = smov 0   ;;  %s13432_s4 = inlined_call_operand.vmem [shape: bf16[2,169,32], index: 4, kind: output, shape index: {}]   ;;  %s13433_s1 = inlined_call_operand.vmem [shape: bf16[3,3,32], index: 1, kind: input, shape index: {}]   ;;  %s13434_s0 = inlined_call_operand.vmem [shape: bf16[2,728,3], index: 0, kind: input, shape index: {}]   ;;  %s13435_s2 = inlined_call_operand.vmem [shape: f32[1,32], index: 2, kind: input, shape index: {}]   ;;  %s13436_s3 = inlined_call_operand.vmem [shape: f32[1,32], index: 3, kind: input, shape index: {}]  }
   0x1   :  { %8004 = vmatprep.subr.bf16.mxu0 %v13437_v0  ;;  %8178 = vmatprep.subr.bf16.mxu1 %v13437_v0  ;;  %v6888_v1 = vld [vmem:[%s13433_s1 + $0x2] sm:$0x3]  ;;  %v548_v3 = vsel %vm13439_vm0, 4294967295, %v9368_v2  ;;  %v109_v4 = vld [vmem:[%s13433_s1] sm:$0x3]  ;;  %vm9369_vm2 = vmmov 0  }
   0x2   :  { %v9405_v5 = vsel %vm13443_vm1, %v548_v3, 0  ;;  %8006 = vmatprep.mubr.msk.bf16.mxu0 %vm9369_vm2, %v13437_v0  ;;  %8180 = vmatprep.mubr.msk.bf16.mxu1 %vm9369_vm2, %v13437_v0  ;;  %v28_v6 = vld [vmem:[%s13434_s0 + $0x10] sm:$0xf]  ;;  %v29_v7 = vld [vmem:[%s13434_s0 + $0x14] sm:$0xf]  ;;  %vm330_vm3 = vcmask 1046528  }
   0x3   :  { %v551_v8 = vand.u32 %v6888_v1, %v9405_v5  ;;  %v1112_v9 = vand.u32 %v9405_v5, %v109_v4  ;;  %v30_v10 = vld [vmem:[%s13434_s0 + $0x18] sm:$0xf]  ;;  %v110_v11 = vld [vmem:[%s13434_s0 + $0xc] sm:$0xe]  ;;  %vm416_vm4 = vcmask 23552   ;;  %v9061_v12 = vld [vmem:[%s13434_s0] sm:$0xff]   ;;  %v6977_v34 = vcombine.low %v28_v6, %v29_v7 }
   0x4   :  { %v6889_v13 = vcombine.low %v110_v11, %v28_v6  ;;  %v6890_v14 = vcombine.low %v29_v7, %v30_v10  ;;  %v7061_v15 = vld [vmem:[%s13433_s1 + $0x4] sm:$0x3]  ;;  %v7238_v17 = vld [vmem:[%s13433_s1 + $0x2] sm:$0x3]  ;;  %v31_v18 = vld [vmem:[%s13434_s0 + $0x1c] sm:$0xf] }
   0x5   :  { %8005 = vmatpush3.bf16.msra.mxu0 %v551_v8  ;;  %8179 = vmatpush3.bf16.msra.mxu1 %v1112_v9  ;;  %v2006_v16 = vand.u32 %v7061_v15, %v9405_v5  ;;  %v32_v19 = vld [vmem:[%s13434_s0 + $0x20] sm:$0xf]  ;;  %v3522_v22 = vand.u32 %v7238_v17, %v9405_v5  ;;  %v33_v26 = vld [vmem:[%s13434_s0 + $0x24] sm:$0xf]  ;;  %v34_v27 = vld [vmem:[%s13434_s0 + $0x28] sm:$0xf]  ;;  %v6978_v40 = vcombine.low %v30_v10, %v31_v18 }
   0x6   :  { %v331_v20 = vrot.slane %v6889_v13, 1  ;;  %v332_v21 = vrot.slane %v6890_v14, 1  ;;  %8352 = vmatprep.subr.bf16.mxu0 %v13437_v0  ;;  %8526 = vmatprep.subr.bf16.mxu1 %v13437_v0  ;;  %v6891_v23 = vcombine.low %v31_v18, %v32_v19  ;;  %v9063_v28 = vld [vmem:[%s13434_s0 + $0x8] sm:$0xff]   ;;  %v6892_v30 = vcombine.low %v33_v26, %v34_v27  ;;  %v36_v33 = vld [vmem:[%s13434_s0 + $0x30] sm:$0xf] }
   0x7   :  { %v35_v32 = vld [vmem:[%s13434_s0 + $0x2c] sm:$0xf]  ;;  %v37_v38 = vld [vmem:[%s13434_s0 + $0x34] sm:$0xf]  ;;  %v38_v39 = vld [vmem:[%s13434_s0 + $0x38] sm:$0xf]  ;;  %v6979_v46 = vcombine.low %v32_v19, %v33_v26 }
   0x8   :  { %v333_v24 = vsel %vm330_vm3, %v331_v20, %v332_v21  ;;  %8181 = vmatmul.mubr.msk.bf16.vlgmr.msra.gmra.mxu1 %vm416_vm4, %v9061_v12  ;;  %v334_v25 = vrot.slane %v6891_v23, 1  ;;  %v336_v31 = vrot.slane %v6892_v30, 1  ;;  %v6893_v36 = vcombine.low %v35_v32, %v36_v33  ;;  %v39_v43 = vld [vmem:[%s13434_s0 + $0x3c] sm:$0xf]  ;;  %v40_v45 = vld [vmem:[%s13434_s0 + $0x40] sm:$0xf] }
   0x9   :  { %8007 = vmatmul.mubr.msk.bf16.vlgmr.msra.gmra.mxu0 %vm416_vm4, %v333_v24  ;;  %8527 = vmatpush3.bf16.msra.mxu1 %v3522_v22  ;;  %v6894_v42 = vcombine.low %v37_v38, %v38_v39  ;;  %v6895_v48 = vcombine.low %v39_v43, %v40_v45  ;;  %v41_v49 = vld [vmem:[%s13434_s0 + $0x44] sm:$0xf]  ;;  %v42_v51 = vld [vmem:[%s13434_s0 + $0x48] sm:$0xf]  ;;  %v6980_v52 = vcombine.low %v34_v27, %v35_v32  ;;  %v43_v55 = vld [vmem:[%s13434_s0 + $0x4c] sm:$0xf] }
   0xa   :  { %8353 = vmatpush3.bf16.msra.mxu0 %v2006_v16  ;;  %8010 = vmatprep.mubr.msk.bf16.mxu0 %vm9369_vm2, %v13437_v0  ;;  %v335_v29 = vsel %vm330_vm3, %v332_v21, %v334_v25  ;;  %v337_v35 = vsel %vm330_vm3, %v334_v25, %v336_v31  ;;  %v338_v37 = vrot.slane %v6893_v36, 1  ;;  %v6896_v54 = vcombine.low %v41_v49, %v42_v51  ;;  %v44_v57 = vld [vmem:[%s13434_s0 + $0x50] sm:$0xf]  ;;  %v45_v59 = vld [vmem:[%s13434_s0 + $0x54] sm:$0xf] }
   0xb   :  { %8184 = vmatprep.mubr.msk.bf16.mxu1 %vm9369_vm2, %v13437_v0  ;;  %8700 = vmatprep.subr.bf16.mxu0 %v13437_v0  ;;  %v340_v44 = vrot.slane %v6894_v42, 1  ;;  %v342_v50 = vrot.slane %v6895_v48, 1  ;;  %v6981_v58 = vcombine.low %v36_v33, %v37_v38  ;;  %v46_v60 = vld [vmem:[%s13434_s0 + $0x58] sm:$0xf]  ;;  %v6897_v62 = vcombine.low %v43_v55, %v44_v57  ;;  %v47_v4 = vld [vmem:[%s13434_s0 + $0x5c] sm:$0xf] }
   0xc   :  { %8874 = vmatprep.subr.bf16.mxu1 %v13437_v0  ;;  %v339_v41 = vsel %vm330_vm3, %v336_v31, %v338_v37  ;;  %v344_v56 = vrot.slane %v6896_v54, 1  ;;  %v6898_v63 = vcombine.low %v45_v59, %v46_v60  ;;  %v6982_v2 = vcombine.low %v38_v39, %v39_v43  ;;  %v48_v6 = vld [vmem:[%s13434_s0 + $0x60] sm:$0xf]  ;;  %v49_v10 = vld [vmem:[%s13434_s0 + $0x64] sm:$0xf] }
   0xd   :  { %v341_v47 = vsel %vm330_vm3, %v338_v37, %v340_v44  ;;  %v343_v53 = vsel %vm330_vm3, %v340_v44, %v342_v50  ;;  %v346_v1 = vrot.slane %v6897_v62, 1  ;;  %v6899_v8 = vcombine.low %v47_v4, %v48_v6  ;;  %v50_v11 = vld [vmem:[%s13434_s0 + $0x68] sm:$0xf]  ;;  %v51_v16 = vld [vmem:[%s13434_s0 + $0x6c] sm:$0xf] }
   0xe   :  { %v345_v61 = vsel %vm330_vm3, %v342_v50, %v344_v56  ;;  %v348_v3 = vrot.slane %v6898_v63, 1  ;;  %v6983_v9 = vcombine.low %v40_v45, %v41_v49  ;;  %v6900_v14 = vcombine.low %v49_v10, %v50_v11  ;;  %v52_v17 = vld [vmem:[%s13434_s0 + $0x70] sm:$0xf]  ;;  %v53_v24 = vld [vmem:[%s13434_s0 + $0x74] sm:$0xf] }
   0xf   :  { %v347_v7 = vsel %vm330_vm3, %v344_v56, %v346_v1  ;;  %v350_v13 = vrot.slane %v6899_v8, 1  ;;  %v6984_v15 = vcombine.low %v42_v51, %v43_v55  ;;  %v6901_v20 = vcombine.low %v51_v16, %v52_v17  ;;  %v54_v25 = vld [vmem:[%s13434_s0 + $0x78] sm:$0xf]  ;;  %v55_v30 = vld [vmem:[%s13434_s0 + $0x7c] sm:$0xf] }
  0x10   :  { %8185 = vmatmul.mubr.msk.bf16.gmra.mxu1 %vm416_vm4, %v9063_v28  ;;  %v349_v12 = vsel %vm330_vm3, %v346_v1, %v348_v3  ;;  %v352_v19 = vrot.slane %v6900_v14, 1  ;;  %v6985_v21 = vcombine.low %v44_v57, %v45_v59  ;;  %v6986_v26 = vcombine.low %v46_v60, %v47_v4  ;;  %v56_v31 = vld [vmem:[%s13434_s0 + $0x80] sm:$0xf]  ;;  %v57_v36 = vld [vmem:[%s13434_s0 + $0x84] sm:$0xf] }
  0x11   :  { %8011 = vmatmul.mubr.msk.bf16.gmra.mxu0 %vm416_vm4, %v335_v29  ;;  %8188 = vmatprep.mubr.msk.bf16.mxu1 %vm9369_vm2, %v13437_v0  ;;  %v351_v18 = vsel %vm330_vm3, %v348_v3, %v350_v13  ;;  %v354_v23 = vrot.slane %v6901_v20, 1  ;;  %v6902_v28 = vcombine.low %v53_v24, %v54_v25  ;;  %v6987_v32 = vcombine.low %v48_v6, %v49_v10  ;;  %v58_v37 = vld [vmem:[%s13434_s0 + $0x88] sm:$0xf]  ;;  %v59_v42 = vld [vmem:[%s13434_s0 + $0x8c] sm:$0xf] }
  0x12   :  { %8014 = vmatprep.mubr.msk.bf16.mxu0 %vm9369_vm2, %v13437_v0  ;;  %v353_v22 = vsel %vm330_vm3, %v350_v13, %v352_v19  ;;  %v6988_v38 = vcombine.low %v50_v11, %v51_v16  ;;  %v60_v43 = vld [vmem:[%s13434_s0 + $0x90] sm:$0xf]  ;;  %v6989_v44 = vcombine.low %v52_v17, %v53_v24  ;;  %v61_v48 = vld [vmem:[%s13434_s0 + $0x94] sm:$0xf]  ;;  %v62_v49 = vld [vmem:[%s13434_s0 + $0x98] sm:$0xf]  ;;  %v6990_v50 = vcombine.low %v54_v25, %v55_v30 }
  0x13   :  { %v355_v27 = vsel %vm330_vm3, %v352_v19, %v354_v23  ;;  %v356_v29 = vrot.slane %v6902_v28, 1  ;;  %v63_v54 = vld [vmem:[%s13434_s0 + $0x9c] sm:$0xf]  ;;  %v64_v55 = vld [vmem:[%s13434_s0 + $0xa0] sm:$0xf]  ;;  %v6991_v56 = vcombine.low %v56_v31, %v57_v36  ;;  %v6992_v62 = vcombine.low %v58_v37, %v59_v42 }
  0x14   :  { %v65_v60 = vld [vmem:[%s13434_s0 + $0xa4] sm:$0xf]  ;;  %v67_v3 = vld [vmem:[%s13434_s0 + $0xac] sm:$0xf]  ;;  %v68_v4 = vld [vmem:[%s13434_s0 + $0xb0] sm:$0xf]  ;;  %v6993_v6 = vcombine.low %v60_v43, %v61_v48 }
  0x15   :  { %v357_v33 = vsel %vm330_vm3, %v354_v23, %v356_v29  ;;  %v6909_v8 = vcombine.low %v67_v3, %v68_v4  ;;  %v69_v10 = vld [vmem:[%s13434_s0 + $0xb4] sm:$0xf]  ;;  %v70_v11 = vld [vmem:[%s13434_s0 + $0xb8] sm:$0xf]  ;;  %v71_v16 = vld [vmem:[%s13434_s0 + $0xbc] sm:$0xf] }
  0x16   :  { %v6910_v14 = vcombine.low %v69_v10, %v70_v11  ;;  %v72_v17 = vld [vmem:[%s13434_s0 + $0xc0] sm:$0xf]  ;;  %v74_v23 = vld [vmem:[%s13434_s0 + $0xc8] sm:$0xf]  ;;  %v75_v28 = vld [vmem:[%s13434_s0 + $0xcc] sm:$0xf] }
  0x17   :  { %v6911_v20 = vcombine.low %v71_v16, %v72_v17  ;;  %vm1790_vm5 = vcmask 1045504   ;;  %vm2472_vm6 = vcmask 261120   ;;  %vm13445_vm7 = vcmask 254976  }
  0x18   :  { %8189 = vmatmul.mubr.msk.bf16.gmra.mxu1 %vm416_vm4, %v6977_v34  ;;  %v6903_v34 = vcombine.low %v55_v30, %v56_v31  ;;  %v6997_v30 = vcombine.low %v68_v4, %v69_v10  ;;  %v9808_v4 = vld [vmem:[%s13434_s0 + $0xec] sm:$0xf]  ;;  %vm2557_vm8 = vcmask 257024   ;;  %vm13446_vm9 = vcmask 253952  }
  0x19   :  { %8015 = vmatmul.mubr.msk.bf16.gmra.mxu0 %vm416_vm4, %v337_v35  ;;  %8192 = vmatprep.mubr.msk.bf16.mxu1 %vm9369_vm2, %v13437_v0 }
  0x1a   :  { %8018 = vmatprep.mubr.msk.bf16.mxu0 %vm9369_vm2, %v13437_v0  ;;  %v358_v35 = vrot.slane %v6903_v34, 1  ;;  %v77_v34 = vld [vmem:[%s13434_s0 + $0xd4] sm:$0xf] }
  0x1c   :  { %v359_v39 = vsel %vm330_vm3, %v356_v29, %v358_v35  ;;  %v9735_v29 = vld [vmem:[%s13434_s0 + $0xd0] sm:$0xf] }
  0x20   :  { %8193 = vmatmul.mubr.msk.bf16.gmra.mxu1 %vm416_vm4, %v6978_v40  ;;  %v6904_v40 = vcombine.low %v57_v36, %v58_v37  ;;  %v6998_v36 = vcombine.low %v70_v11, %v71_v16 }
  0x21   :  { %8019 = vmatmul.mubr.msk.bf16.gmra.mxu0 %vm416_vm4, %v339_v41  ;;  %8196 = vmatprep.mubr.msk.bf16.mxu1 %vm9369_vm2, %v13437_v0 }
  0x22   :  { %8022 = vmatprep.mubr.msk.bf16.mxu0 %vm9369_vm2, %v13437_v0  ;;  %v360_v41 = vrot.slane %v6904_v40, 1  ;;  %v9764_v40 = vld [vmem:[%s13434_s0 + $0xdc] sm:$0xf] }
  0x24   :  { %v361_v45 = vsel %vm330_vm3, %v358_v35, %v360_v41  ;;  %v9751_v35 = vld [vmem:[%s13434_s0 + $0xd8] sm:$0xf] }
  0x28   :  { %8197 = vmatmul.mubr.msk.bf16.gmra.mxu1 %vm416_vm4, %v6979_v46  ;;  %v6905_v46 = vcombine.low %v59_v42, %v60_v43 }
  0x29   :  { %8023 = vmatmul.mubr.msk.bf16.gmra.mxu0 %vm416_vm4, %v341_v47  ;;  %8200 = vmatprep.mubr.msk.bf16.mxu1 %vm9369_vm2, %v13437_v0 }
  0x2a   :  { %8026 = vmatprep.mubr.msk.bf16.mxu0 %vm9369_vm2, %v13437_v0  ;;  %v362_v47 = vrot.slane %v6905_v46, 1 }
  0x2c   :  { %v363_v51 = vsel %vm330_vm3, %v360_v41, %v362_v47  ;;  %v9769_v41 = vld [vmem:[%s13434_s0 + $0xe0] sm:$0xf] }
  0x30   :  { %8201 = vmatmul.mubr.msk.bf16.gmra.mxu1 %vm416_vm4, %v6980_v52  ;;  %v6906_v52 = vcombine.low %v61_v48, %v62_v49 }
  0x31   :  { %8027 = vmatmul.mubr.msk.bf16.gmra.mxu0 %vm416_vm4, %v343_v53  ;;  %8204 = vmatprep.mubr.msk.bf16.mxu1 %vm9369_vm2, %v13437_v0 }
  0x32   :  { %8030 = vmatprep.mubr.msk.bf16.mxu0 %vm9369_vm2, %v13437_v0  ;;  %v364_v53 = vrot.slane %v6906_v52, 1  ;;  %v9790_v52 = vld [vmem:[%s13434_s0 + $0xe8] sm:$0xf] }
  0x34   :  { %v365_v57 = vsel %vm330_vm3, %v362_v47, %v364_v53 }
  0x38   :  { %8205 = vmatmul.mubr.msk.bf16.gmra.mxu1 %vm416_vm4, %v6981_v58  ;;  %v6907_v58 = vcombine.low %v63_v54, %v64_v55 }
  0x39   :  { %8031 = vmatmul.mubr.msk.bf16.gmra.mxu0 %vm416_vm4, %v345_v61  ;;  %8208 = vmatprep.mubr.msk.bf16.mxu1 %vm9369_vm2, %v13437_v0  ;;  %v66_v61 = vld [vmem:[%s13434_s0 + $0xa8] sm:$0xf] }
  0x3a   :  { %8034 = vmatprep.mubr.msk.bf16.mxu0 %vm9369_vm2, %v13437_v0  ;;  %v366_v59 = vrot.slane %v6907_v58, 1  ;;  %v6908_v1 = vcombine.low %v65_v60, %v66_v61  ;;  %v6996_v24 = vcombine.low %v66_v61, %v67_v3 }
  0x3c   :  { %v367_v63 = vsel %vm330_vm3, %v364_v53, %v366_v59 }
  0x40   :  { %8209 = vmatmul.mubr.msk.bf16.gmra.mxu1 %vm416_vm4, %v6982_v2  ;;  %v368_v2 = vrot.slane %v6908_v1, 1 }
  0x41   :  { %8035 = vmatmul.mubr.msk.bf16.gmra.mxu0 %vm416_vm4, %v347_v7  ;;  %8212 = vmatprep.mubr.msk.bf16.mxu1 %vm9369_vm2, %v13437_v0 }
  0x42   :  { %8038 = vmatprep.mubr.msk.bf16.mxu0 %vm9369_vm2, %v13437_v0  ;;  %v369_v7 = vsel %vm330_vm3, %v366_v59, %v368_v2 }
  0x48   :  { %8213 = vmatmul.mubr.msk.bf16.gmra.mxu1 %vm416_vm4, %v6983_v9  ;;  %v370_v9 = vrot.slane %v6909_v8, 1  ;;  %v7001_v8 = vcombine.low %v9735_v29, %v77_v34 }
  0x49   :  { %8039 = vmatmul.mubr.msk.bf16.gmra.mxu0 %vm416_vm4, %v349_v12  ;;  %8216 = vmatprep.mubr.msk.bf16.mxu1 %vm9369_vm2, %v13437_v0  ;;  %v6994_v12 = vcombine.low %v62_v49, %v63_v54  ;;  %v7000_v54 = vcombine.low %v74_v23, %v75_v28 }
  0x4a   :  { %8042 = vmatprep.mubr.msk.bf16.mxu0 %vm9369_vm2, %v13437_v0  ;;  %v371_v13 = vsel %vm330_vm3, %v368_v2, %v370_v9 }
  0x50   :  { %8217 = vmatmul.mubr.msk.bf16.gmra.mxu1 %vm416_vm4, %v6984_v15  ;;  %v372_v15 = vrot.slane %v6910_v14, 1 }
  0x51   :  { %8043 = vmatmul.mubr.msk.bf16.gmra.mxu0 %vm416_vm4, %v351_v18  ;;  %8220 = vmatprep.mubr.msk.bf16.mxu1 %vm9369_vm2, %v13437_v0  ;;  %v6995_v18 = vcombine.low %v64_v55, %v65_v60 }
  0x52   :  { %8046 = vmatprep.mubr.msk.bf16.mxu0 %vm9369_vm2, %v13437_v0  ;;  %v373_v19 = vsel %vm330_vm3, %v370_v9, %v372_v15 }
  0x58   :  { %8221 = vmatmul.mubr.msk.bf16.gmra.mxu1 %vm416_vm4, %v6985_v21  ;;  %v374_v21 = vrot.slane %v6911_v20, 1 }
  0x59   :  { %8047 = vmatmul.mubr.msk.bf16.gmra.mxu0 %vm416_vm4, %v353_v22  ;;  %8224 = vmatprep.mubr.msk.bf16.mxu1 %vm9369_vm2, %v13437_v0  ;;  %v73_v22 = vld [vmem:[%s13434_s0 + $0xc4] sm:$0xf] }
  0x5a   :  { %8050 = vmatprep.mubr.msk.bf16.mxu0 %vm9369_vm2, %v13437_v0  ;;  %v375_v25 = vsel %vm330_vm3, %v372_v15, %v374_v21  ;;  %v6999_v42 = vcombine.low %v72_v17, %v73_v22 }
  0x60   :  { %8225 = vmatmul.mubr.msk.bf16.gmra.mxu1 %vm416_vm4, %v6986_v26  ;;  %v6912_v26 = vcombine.low %v73_v22, %v74_v23  ;;  %v9837_v22 = vld [vmem:[%s13434_s0 + $0xf8] sm:$0xf] }
  0x61   :  { %8051 = vmatmul.mubr.msk.bf16.gmra.mxu0 %vm416_vm4, %v355_v27  ;;  %8228 = vmatprep.mubr.msk.bf16.mxu1 %vm9369_vm2, %v13437_v0 }
  0x62   :  { %8054 = vmatprep.mubr.msk.bf16.mxu0 %vm9369_vm2, %v13437_v0  ;;  %v376_v27 = vrot.slane %v6912_v26, 1 }
  0x64   :  { %v377_v31 = vsel %vm330_vm3, %v374_v21, %v376_v27  ;;  %v9832_v21 = vld [vmem:[%s13434_s0 + $0xf4] sm:$0xf] }
  0x68   :  { %8229 = vmatmul.mubr.msk.bf16.gmra.mxu1 %vm416_vm4, %v6987_v32  ;;  %v6913_v32 = vcombine.low %v75_v28, %v9735_v29  ;;  %v6918_v29 = vcombine.low %v9832_v21, %v9837_v22 }
  0x69   :  { %8055 = vmatmul.mubr.msk.bf16.gmra.mxu0 %vm416_vm4, %v357_v33  ;;  %8232 = vmatprep.mubr.msk.bf16.mxu1 %vm9369_vm2, %v13437_v0 }
  0x6a   :  { %8058 = vmatprep.mubr.msk.bf16.mxu0 %vm9369_vm2, %v13437_v0  ;;  %v378_v33 = vrot.slane %v6913_v32, 1 }
  0x6c   :  { %v379_v37 = vsel %vm330_vm3, %v376_v27, %v378_v33 }
  0x70   :  { %8233 = vmatmul.mubr.msk.bf16.gmra.mxu1 %vm416_vm4, %v6988_v38  ;;  %v6914_v38 = vcombine.low %v77_v34, %v9751_v35 }
  0x71   :  { %8059 = vmatmul.mubr.msk.bf16.gmra.mxu0 %vm416_vm4, %v359_v39  ;;  %8236 = vmatprep.mubr.msk.bf16.mxu1 %vm9369_vm2, %v13437_v0 }
  0x72   :  { %8062 = vmatprep.mubr.msk.bf16.mxu0 %vm9369_vm2, %v13437_v0  ;;  %v380_v39 = vrot.slane %v6914_v38, 1  ;;  %v9862_v38 = vld [vmem:[%s13434_s0 + $0x100] sm:$0xf] }
  0x74   :  { %v381_v43 = vsel %vm330_vm3, %v378_v33, %v380_v39 }
  0x78   :  { %8237 = vmatmul.mubr.msk.bf16.gmra.mxu1 %vm416_vm4, %v6989_v44  ;;  %v6915_v44 = vcombine.low %v9764_v40, %v9769_v41 }
  0x79   :  { %8063 = vmatmul.mubr.msk.bf16.gmra.mxu0 %vm416_vm4, %v361_v45  ;;  %8240 = vmatprep.mubr.msk.bf16.mxu1 %vm9369_vm2, %v13437_v0 }
  0x7a   :  { %8066 = vmatprep.mubr.msk.bf16.mxu0 %vm9369_vm2, %v13437_v0  ;;  %v382_v49 = vrot.slane %v6915_v44, 1 }
  0x7c   :  { %v383_v58 = vsel %vm330_vm3, %v380_v39, %v382_v49 }
  0x80   :  { %8241 = vmatmul.mubr.msk.bf16.gmra.mxu1 %vm416_vm4, %v6990_v50 }
  0x81   :  { %8067 = vmatmul.mubr.msk.bf16.gmra.mxu0 %vm416_vm4, %v363_v51  ;;  %8244 = vmatprep.mubr.msk.bf16.mxu1 %vm9369_vm2, %v13437_v0  ;;  %v9785_v51 = vld [vmem:[%s13434_s0 + $0xe4] sm:$0xf] }
  0x82   :  { %8070 = vmatprep.mubr.msk.bf16.mxu0 %vm9369_vm2, %v13437_v0  ;;  %v6916_v59 = vcombine.low %v9785_v51, %v9790_v52  ;;  %v7003_v39 = vcombine.low %v9769_v41, %v9785_v51 }
  0x84   :  { %v384_v2 = vrot.slane %v6916_v59, 1 }
  0x88   :  { %8245 = vmatmul.mubr.msk.bf16.gmra.mxu1 %vm416_vm4, %v6991_v56 }
  0x89   :  { %8071 = vmatmul.mubr.msk.bf16.gmra.mxu0 %vm416_vm4, %v365_v57  ;;  %8248 = vmatprep.mubr.msk.bf16.mxu1 %vm9369_vm2, %v13437_v0 }
  0x8a   :  { %8074 = vmatprep.mubr.msk.bf16.mxu0 %vm9369_vm2, %v13437_v0 }
  0x90   :  { %8249 = vmatmul.mubr.msk.bf16.gmra.mxu1 %vm416_vm4, %v6992_v62 }
  0x91   :  { %8075 = vmatmul.mubr.msk.bf16.gmra.mxu0 %vm416_vm4, %v367_v63  ;;  %8252 = vmatprep.mubr.msk.bf16.mxu1 %vm9369_vm2, %v13437_v0 }
  0x92   :  { %8078 = vmatprep.mubr.msk.bf16.mxu0 %vm9369_vm2, %v13437_v0 }
  0x98   :  { %8253 = vmatmul.mubr.msk.bf16.gmra.mxu1 %vm416_vm4, %v6993_v6  ;;  %v9813_v6 = vld [vmem:[%s13434_s0 + $0xf0] sm:$0xf] }
  0x99   :  { %8079 = vmatmul.mubr.msk.bf16.gmra.mxu0 %vm416_vm4, %v369_v7  ;;  %8256 = vmatprep.mubr.msk.bf16.mxu1 %vm9369_vm2, %v13437_v0 }
  0x9a   :  { %8082 = vmatprep.mubr.msk.bf16.mxu0 %vm9369_vm2, %v13437_v0 }
  0xa0   :  { %8257 = vmatmul.mubr.msk.bf16.gmra.mxu1 %vm416_vm4, %v6994_v12  ;;  %v385_v12 = vsel %vm330_vm3, %v382_v49, %v384_v2 }
  0xa1   :  { %8083 = vmatmul.mubr.msk.bf16.gmra.mxu0 %vm416_vm4, %v371_v13  ;;  %8260 = vmatprep.mubr.msk.bf16.mxu1 %vm9369_vm2, %v13437_v0  ;;  %v6917_v13 = vcombine.low %v9808_v4, %v9813_v6 }
  0xa2   :  { %8086 = vmatprep.mubr.msk.bf16.mxu0 %vm9369_vm2, %v13437_v0 }
  0xa8   :  { %8261 = vmatmul.mubr.msk.bf16.gmra.mxu1 %vm416_vm4, %v6995_v18 }
  0xa9   :  { %8087 = vmatmul.mubr.msk.bf16.gmra.mxu0 %vm416_vm4, %v373_v19  ;;  %8264 = vmatprep.mubr.msk.bf16.mxu1 %vm9369_vm2, %v13437_v0  ;;  %v386_v19 = vrot.slane %v6917_v13, 1  ;;  %v9912_v13 = vld [vmem:[%s13434_s0 + $0x110] sm:$0xf] }
  0xaa   :  { %8090 = vmatprep.mubr.msk.bf16.mxu0 %vm9369_vm2, %v13437_v0 }
  0xab   :  { %v387_v28 = vsel %vm330_vm3, %v384_v2, %v386_v19 }
  0xb0   :  { %8265 = vmatmul.mubr.msk.bf16.gmra.mxu1 %vm416_vm4, %v6996_v24  ;;  %v7002_v24 = vcombine.low %v9751_v35, %v9764_v40  ;;  %v388_v35 = vrot.slane %v6918_v29, 1 }
  0xb1   :  { %8091 = vmatmul.mubr.msk.bf16.gmra.mxu0 %vm416_vm4, %v375_v25  ;;  %8268 = vmatprep.mubr.msk.bf16.mxu1 %vm9369_vm2, %v13437_v0 }
  0xb2   :  { %8094 = vmatprep.mubr.msk.bf16.mxu0 %vm9369_vm2, %v13437_v0 }
  0xb8   :  { %8269 = vmatmul.mubr.msk.bf16.gmra.mxu1 %vm416_vm4, %v6997_v30 }
  0xb9   :  { %8095 = vmatmul.mubr.msk.bf16.gmra.mxu0 %vm416_vm4, %v377_v31  ;;  %8272 = vmatprep.mubr.msk.bf16.mxu1 %vm9369_vm2, %v13437_v0 }
  0xba   :  { %8098 = vmatprep.mubr.msk.bf16.mxu0 %vm9369_vm2, %v13437_v0 }
  0xc0   :  { %8273 = vmatmul.mubr.msk.bf16.gmra.mxu1 %vm416_vm4, %v6998_v36 }
  0xc1   :  { %8099 = vmatmul.mubr.msk.bf16.gmra.mxu0 %vm416_vm4, %v379_v37  ;;  %8276 = vmatprep.mubr.msk.bf16.mxu1 %vm9369_vm2, %v13437_v0  ;;  %v9857_v37 = vld [vmem:[%s13434_s0 + $0xfc] sm:$0xf] }
  0xc2   :  { %8102 = vmatprep.mubr.msk.bf16.mxu0 %vm9369_vm2, %v13437_v0 }
  0xc8   :  { %v1148_v45 = vpop.f32.mrf.mxu1  ;;  %8277 = vmatmul.mubr.msk.bf16.gmra.mxu1 %vm416_vm4, %v6999_v42 }
  0xc9   :  { %v587_v46 = vpop.f32.mrf.mxu0  ;;  %8103 = vmatmul.mubr.msk.bf16.gmra.mxu0 %vm416_vm4, %v381_v43  ;;  %8280 = vmatprep.mubr.msk.bf16.mxu1 %vm9369_vm2, %v13437_v0 }
  0xca   :  { %v9778_v47 = vadd.f32 %v1148_v45, %v587_v46  ;;  %v8182_v48 = vpop.f32.mrf.mxu1  ;;  %8106 = vmatprep.mubr.msk.bf16.mxu0 %vm9369_vm2, %v13437_v0  ;;  %v389_v45 = vsel %vm330_vm3, %v386_v19, %v388_v35  ;;  %v6919_v46 = vcombine.low %v9857_v37, %v9862_v38 }
  0xcb   :  { %v8008_v50 = vpop.f32.mrf.mxu0 }
  0xcc   :  { %v1151_v53 = vpop.f32.mrf.mxu1 }
  0xcd   :  { %v590_v55 = vpop.f32.mrf.mxu0 }
  0xce   :  { %v9792_v56 = vadd.f32 %v1151_v53, %v590_v55  ;;  %v8183_v57 = vpop.f32.mrf.mxu1  ;;  %v390_v53 = vrot.slane %v6919_v46, 1  ;;  %v9882_v55 = vld [vmem:[%s13434_s0 + $0x104] sm:$0xf] }
  0xcf   :  { %v8009_v60 = vpop.f32.mrf.mxu0  ;;  %v9887_v57 = vld [vmem:[%s13434_s0 + $0x108] sm:$0xf] }
  0xd0   :  { %v1156_v61 = vpop.f32.mrf.mxu1  ;;  %8281 = vmatmul.mubr.msk.bf16.gmra.mxu1 %vm416_vm4, %v7000_v54  ;;  %v6920_v2 = vcombine.low %v9882_v55, %v9887_v57 }
  0xd1   :  { %v595_v62 = vpop.f32.mrf.mxu0  ;;  %8107 = vmatmul.mubr.msk.bf16.gmra.mxu0 %vm416_vm4, %v383_v58  ;;  %8284 = vmatprep.mubr.msk.bf16.mxu1 %vm9369_vm2, %v13437_v0  ;;  %v7004_v58 = vcombine.low %v9790_v52, %v9808_v4 }
  0xd2   :  { %v9801_v63 = vadd.f32 %v1156_v61, %v595_v62  ;;  %v8186_v1 = vpop.f32.mrf.mxu1  ;;  %8110 = vmatprep.mubr.msk.bf16.mxu0 %vm9369_vm2, %v13437_v0 }
  0xd3   :  { %v8012_v3 = vpop.f32.mrf.mxu0  ;;  %v391_v1 = vsel %vm330_vm3, %v388_v35, %v390_v53 }
  0xd4   :  { %v1159_v7 = vpop.f32.mrf.mxu1 }
  0xd5   :  { %v598_v9 = vpop.f32.mrf.mxu0 }
  0xd6   :  { %v9816_v10 = vadd.f32 %v1159_v7, %v598_v9  ;;  %v8187_v11 = vpop.f32.mrf.mxu1  ;;  %v392_v9 = vrot.slane %v6920_v2, 1 }
  0xd7   :  { %v8013_v14 = vpop.f32.mrf.mxu0 }
  0xd8   :  { %v1164_v15 = vpop.f32.mrf.mxu1  ;;  %8285 = vmatmul.mubr.msk.bf16.gmra.mxu1 %vm416_vm4, %v7001_v8  ;;  %v7005_v14 = vcombine.low %v9813_v6, %v9832_v21 }
  0xd9   :  { %v603_v16 = vpop.f32.mrf.mxu0  ;;  %8111 = vmatmul.mubr.msk.bf16.gmra.mxu0 %vm416_vm4, %v385_v12  ;;  %8288 = vmatprep.mubr.msk.bf16.mxu1 %vm9369_vm2, %v13437_v0  ;;  %v9907_v12 = vld [vmem:[%s13434_s0 + $0x10c] sm:$0xf] }
  0xda   :  { %v9825_v17 = vadd.f32 %v1164_v15, %v603_v16  ;;  %v8190_v18 = vpop.f32.mrf.mxu1  ;;  %8114 = vmatprep.mubr.msk.bf16.mxu0 %vm9369_vm2, %v13437_v0 }
  0xdb   :  { %v8016_v20 = vpop.f32.mrf.mxu0 }
  0xdc   :  { %v1167_v23 = vpop.f32.mrf.mxu1  ;;  %v393_v20 = vsel %vm330_vm3, %v390_v53, %v392_v9 }
  0xdd   :  { %v606_v25 = vpop.f32.mrf.mxu0 }
  0xde   :  { %v9841_v26 = vadd.f32 %v1167_v23, %v606_v25  ;;  %v8191_v27 = vpop.f32.mrf.mxu1  ;;  %v6921_v23 = vcombine.low %v9907_v12, %v9912_v13 }
  0xdf   :  { %v8017_v30 = vpop.f32.mrf.mxu0 }
  0xe0   :  { %v1172_v31 = vpop.f32.mrf.mxu1  ;;  %8289 = vmatmul.mubr.msk.bf16.gmra.mxu1 %vm416_vm4, %v7002_v24  ;;  %v9932_v30 = vld [vmem:[%s13434_s0 + $0x114] sm:$0xf] }
  0xe1   :  { %v611_v32 = vpop.f32.mrf.mxu0  ;;  %8115 = vmatmul.mubr.msk.bf16.gmra.mxu0 %vm416_vm4, %v387_v28  ;;  %8292 = vmatprep.mubr.msk.bf16.mxu1 %vm9369_vm2, %v13437_v0  ;;  %v394_v28 = vrot.slane %v6921_v23, 1 }
  0xe2   :  { %v9850_v33 = vadd.f32 %v1172_v31, %v611_v32  ;;  %v8194_v34 = vpop.f32.mrf.mxu1  ;;  %8118 = vmatprep.mubr.msk.bf16.mxu0 %vm9369_vm2, %v13437_v0  ;;  %v9937_v31 = vld [vmem:[%s13434_s0 + $0x118] sm:$0xf] }
  0xe3   :  { %v8020_v36 = vpop.f32.mrf.mxu0  ;;  %v7006_v34 = vcombine.low %v9837_v22, %v9857_v37 }
  0xe4   :  { %v1175_v40 = vpop.f32.mrf.mxu1 }
  0xe5   :  { %v614_v42 = vpop.f32.mrf.mxu0 }
  0xe6   :  { %v9866_v43 = vadd.f32 %v1175_v40, %v614_v42  ;;  %v8195_v44 = vpop.f32.mrf.mxu1  ;;  %v395_v40 = vsel %vm330_vm3, %v392_v9, %v394_v28  ;;  %v6922_v42 = vcombine.low %v9932_v30, %v9937_v31  ;;  %v9982_v9 = vld [vmem:[%s13434_s0 + $0x124] sm:$0xf] }
  0xe7   :  { %v8021_v48 = vpop.f32.mrf.mxu0 }
  0xe8   :  { %v1180_v49 = vpop.f32.mrf.mxu1  ;;  %8293 = vmatmul.mubr.msk.bf16.gmra.mxu1 %vm416_vm4, %v7003_v39  ;;  %v396_v48 = vrot.slane %v6922_v42, 1 }
  0xe9   :  { %v619_v50 = vpop.f32.mrf.mxu0  ;;  %8119 = vmatmul.mubr.msk.bf16.gmra.mxu0 %vm416_vm4, %v389_v45  ;;  %8296 = vmatprep.mubr.msk.bf16.mxu1 %vm9369_vm2, %v13437_v0 }
  0xea   :  { %v9875_v41 = vadd.f32 %v1180_v49, %v619_v50  ;;  %v8198_v51 = vpop.f32.mrf.mxu1  ;;  %8122 = vmatprep.mubr.msk.bf16.mxu0 %vm9369_vm2, %v13437_v0  ;;  %v9957_v50 = vld [vmem:[%s13434_s0 + $0x11c] sm:$0xf] }
  0xeb   :  { %v8024_v54 = vpop.f32.mrf.mxu0  ;;  %v9962_v51 = vld [vmem:[%s13434_s0 + $0x120] sm:$0xf] }
  0xec   :  { %v1183_v59 = vpop.f32.mrf.mxu1  ;;  %v7007_v54 = vcombine.low %v9862_v38, %v9882_v55 }
  0xed   :  { %v622_v60 = vpop.f32.mrf.mxu0 }
  0xee   :  { %v9891_v61 = vadd.f32 %v1183_v59, %v622_v60  ;;  %v8199_v62 = vpop.f32.mrf.mxu1 }
  0xef   :  { %v8025_v3 = vpop.f32.mrf.mxu0  ;;  %v397_v62 = vsel %vm330_vm3, %v394_v28, %v396_v48 }
  0xf0   :  { %v1188_v7 = vpop.f32.mrf.mxu1  ;;  %8297 = vmatmul.mubr.msk.bf16.gmra.mxu1 %vm416_vm4, %v7004_v58 }
  0xf1   :  { %v627_v8 = vpop.f32.mrf.mxu0  ;;  %8123 = vmatmul.mubr.msk.bf16.gmra.mxu0 %vm416_vm4, %v391_v1  ;;  %8300 = vmatprep.mubr.msk.bf16.mxu1 %vm9369_vm2, %v13437_v0  ;;  %v6923_v1 = vcombine.low %v9957_v50, %v9962_v51 }
  0xf2   :  { %v9900_v52 = vadd.f32 %v1188_v7, %v627_v8  ;;  %v8202_v4 = vpop.f32.mrf.mxu1  ;;  %8126 = vmatprep.mubr.msk.bf16.mxu0 %vm9369_vm2, %v13437_v0 }
  0xf3   :  { %v8028_v11 = vpop.f32.mrf.mxu0  ;;  %v398_v8 = vrot.slane %v6923_v1, 1  ;;  %v7010_v1 = vcombine.low %v9937_v31, %v9957_v50 }
  0xf4   :  { %v1191_v15 = vpop.f32.mrf.mxu1  ;;  %v9987_v11 = vld [vmem:[%s13434_s0 + $0x128] sm:$0xf] }
  0xf5   :  { %v630_v16 = vpop.f32.mrf.mxu0  ;;  %v399_v23 = vsel %vm330_vm3, %v396_v48, %v398_v8 }
  0xf6   :  { %v9916_v18 = vadd.f32 %v1191_v15, %v630_v16  ;;  %v8203_v19 = vpop.f32.mrf.mxu1  ;;  %v7008_v15 = vcombine.low %v9887_v57, %v9907_v12 }
  0xf7   :  { %v8029_v24 = vpop.f32.mrf.mxu0 }
  0xf8   :  { %v1196_v25 = vpop.f32.mrf.mxu1  ;;  %8301 = vmatmul.mubr.msk.bf16.gmra.mxu1 %vm416_vm4, %v7005_v14  ;;  %v6924_v24 = vcombine.low %v9982_v9, %v9987_v11 }
  0xf9   :  { %v635_v27 = vpop.f32.mrf.mxu0  ;;  %8127 = vmatmul.mubr.msk.bf16.gmra.mxu0 %vm416_vm4, %v393_v20  ;;  %8304 = vmatprep.mubr.msk.bf16.mxu1 %vm9369_vm2, %v13437_v0 }
  0xfa   :  { %v9925_v6 = vadd.f32 %v1196_v25, %v635_v27  ;;  %v8206_v21 = vpop.f32.mrf.mxu1  ;;  %8130 = vmatprep.mubr.msk.bf16.mxu0 %vm9369_vm2, %v13437_v0  ;;  %v400_v28 = vrot.slane %v6924_v24, 1  ;;  %v10062_v24 = vld [vmem:[%s13434_s0 + $0x140] sm:$0xf] }
  0xfb   :  { %v8032_v29 = vpop.f32.mrf.mxu0 }
  0xfc   :  { %v1199_v32 = vpop.f32.mrf.mxu1 }
  0xfd   :  { %v638_v35 = vpop.f32.mrf.mxu0 }
  0xfe   :  { %v9941_v36 = vadd.f32 %v1199_v32, %v638_v35  ;;  %v8207_v39 = vpop.f32.mrf.mxu1  ;;  %v10007_v32 = vld [vmem:[%s13434_s0 + $0x12c] sm:$0xf] }
  0xff   :  { %v8033_v44 = vpop.f32.mrf.mxu0  ;;  %v7009_v39 = vcombine.low %v9912_v13, %v9932_v30 }
 0x100   :  { %v1204_v45 = vpop.f32.mrf.mxu1  ;;  %8305 = vmatmul.mubr.msk.bf16.gmra.mxu1 %vm416_vm4, %v7006_v34  ;;  %v10012_v34 = vld [vmem:[%s13434_s0 + $0x130] sm:$0xf] }
 0x101   :  { %v643_v46 = vpop.f32.mrf.mxu0  ;;  %8131 = vmatmul.mubr.msk.bf16.gmra.mxu0 %vm416_vm4, %v395_v40  ;;  %8308 = vmatprep.mubr.msk.bf16.mxu1 %vm9369_vm2, %v13437_v0 }
 0x102   :  { %v9950_v22 = vadd.f32 %v1204_v45, %v643_v46  ;;  %v8210_v37 = vpop.f32.mrf.mxu1  ;;  %8134 = vmatprep.mubr.msk.bf16.mxu0 %vm9369_vm2, %v13437_v0  ;;  %v401_v45 = vsel %vm330_vm3, %v398_v8, %v400_v28  ;;  %v6925_v46 = vcombine.low %v10007_v32, %v10012_v34 }
 0x103   :  { %v8036_v49 = vpop.f32.mrf.mxu0 }
 0x104   :  { %v1207_v53 = vpop.f32.mrf.mxu1 }
 0x105   :  { %v646_v58 = vpop.f32.mrf.mxu0 }
 0x106   :  { %v9966_v59 = vadd.f32 %v1207_v53, %v646_v58  ;;  %v8211_v60 = vpop.f32.mrf.mxu1  ;;  %v402_v53 = vrot.slane %v6925_v46, 1  ;;  %v10032_v58 = vld [vmem:[%s13434_s0 + $0x134] sm:$0xf] }
 0x107   :  { %v8037_v2 = vpop.f32.mrf.mxu0  ;;  %v10037_v60 = vld [vmem:[%s13434_s0 + $0x138] sm:$0xf] }
 0x108   :  { %v1212_v3 = vpop.f32.mrf.mxu1  ;;  %8309 = vmatmul.mubr.msk.bf16.gmra.mxu1 %vm416_vm4, %v7007_v54  ;;  %v6926_v8 = vcombine.low %v10032_v58, %v10037_v60 }
 0x109   :  { %v651_v7 = vpop.f32.mrf.mxu0  ;;  %8135 = vmatmul.mubr.msk.bf16.gmra.mxu0 %vm416_vm4, %v397_v62  ;;  %8312 = vmatprep.mubr.msk.bf16.mxu1 %vm9369_vm2, %v13437_v0 }
 0x10a   :  { %v9975_v38 = vadd.f32 %v1212_v3, %v651_v7  ;;  %v8214_v55 = vpop.f32.mrf.mxu1  ;;  %8138 = vmatprep.mubr.msk.bf16.mxu0 %vm9369_vm2, %v13437_v0 }
 0x10b   :  { %v8040_v4 = vpop.f32.mrf.mxu0  ;;  %v403_v55 = vsel %vm330_vm3, %v400_v28, %v402_v53 }
 0x10c   :  { %v1215_v14 = vpop.f32.mrf.mxu1 }
 0x10d   :  { %v654_v16 = vpop.f32.mrf.mxu0 }
 0x10e   :  { %v9991_v19 = vadd.f32 %v1215_v14, %v654_v16  ;;  %v8215_v20 = vpop.f32.mrf.mxu1  ;;  %v404_v16 = vrot.slane %v6926_v8, 1 }
 0x10f   :  { %v8041_v25 = vpop.f32.mrf.mxu0 }
 0x110   :  { %v1220_v27 = vpop.f32.mrf.mxu1  ;;  %8313 = vmatmul.mubr.msk.bf16.gmra.mxu1 %vm416_vm4, %v7008_v15 }
 0x111   :  { %v659_v21 = vpop.f32.mrf.mxu0  ;;  %8139 = vmatmul.mubr.msk.bf16.gmra.mxu0 %vm416_vm4, %v399_v23  ;;  %8316 = vmatprep.mubr.msk.bf16.mxu1 %vm9369_vm2, %v13437_v0  ;;  %v10057_v23 = vld [vmem:[%s13434_s0 + $0x13c] sm:$0xf] }
 0x112   :  { %v10000_v57 = vadd.f32 %v1220_v27, %v659_v21  ;;  %v8218_v12 = vpop.f32.mrf.mxu1  ;;  %8142 = vmatprep.mubr.msk.bf16.mxu0 %vm9369_vm2, %v13437_v0  ;;  %v7011_v27 = vcombine.low %v9962_v51, %v9982_v9 }
 0x113   :  { %v8044_v29 = vpop.f32.mrf.mxu0 }
 0x114   :  { %v1223_v35 = vpop.f32.mrf.mxu1  ;;  %v405_v29 = vsel %vm330_vm3, %v402_v53, %v404_v16 }
 0x115   :  { %v662_v40 = vpop.f32.mrf.mxu0 }
 0x116   :  { %v10016_v42 = vadd.f32 %v1223_v35, %v662_v40  ;;  %v8219_v44 = vpop.f32.mrf.mxu1  ;;  %v6927_v35 = vcombine.low %v10057_v23, %v10062_v24 }
 0x117   :  { %v8045_v37 = vpop.f32.mrf.mxu0 }
 0x118   :  { %v1228_v48 = vpop.f32.mrf.mxu1  ;;  %8317 = vmatmul.mubr.msk.bf16.gmra.mxu1 %vm416_vm4, %v7009_v39  ;;  %v10082_v37 = vld [vmem:[%s13434_s0 + $0x144] sm:$0xf] }
 0x119   :  { %v667_v49 = vpop.f32.mrf.mxu0  ;;  %8143 = vmatmul.mubr.msk.bf16.gmra.mxu0 %vm416_vm4, %v401_v45  ;;  %8320 = vmatprep.mubr.msk.bf16.mxu1 %vm9369_vm2, %v13437_v0  ;;  %v406_v45 = vrot.slane %v6927_v35, 1 }
 0x11a   :  { %v10025_v13 = vadd.f32 %v1228_v48, %v667_v49  ;;  %v8222_v30 = vpop.f32.mrf.mxu1  ;;  %8146 = vmatprep.mubr.msk.bf16.mxu0 %vm9369_vm2, %v13437_v0  ;;  %v10087_v48 = vld [vmem:[%s13434_s0 + $0x148] sm:$0xf] }
 0x11b   :  { %v8048_v54 = vpop.f32.mrf.mxu0  ;;  %v7012_v30 = vcombine.low %v9987_v11, %v10007_v32 }
 0x11c   :  { %v1231_v62 = vpop.f32.mrf.mxu1 }
 0x11d   :  { %v670_v2 = vpop.f32.mrf.mxu0 }
 0x11e   :  { %v10041_v3 = vadd.f32 %v1231_v62, %v670_v2  ;;  %v8223_v7 = vpop.f32.mrf.mxu1  ;;  %v6928_v2 = vcombine.low %v10082_v37, %v10087_v48 }
 0x11f   :  { %v8049_v4 = vpop.f32.mrf.mxu0 }
 0x120   :  { %v1236_v14 = vpop.f32.mrf.mxu1  ;;  %8321 = vmatmul.mubr.msk.bf16.gmra.mxu1 %vm416_vm4, %v7010_v1  ;;  %v407_v1 = vsel %vm330_vm3, %v404_v16, %v406_v45  ;;  %v408_v4 = vrot.slane %v6928_v2, 1 }
 0x121   :  { %v675_v15 = vpop.f32.mrf.mxu0  ;;  %8147 = vmatmul.mubr.msk.bf16.gmra.mxu0 %vm416_vm4, %v403_v55  ;;  %8324 = vmatprep.mubr.msk.bf16.mxu1 %vm9369_vm2, %v13437_v0 }
 0x122   :  { %v10050_v31 = vadd.f32 %v1236_v14, %v675_v15  ;;  %v8226_v50 = vpop.f32.mrf.mxu1  ;;  %8150 = vmatprep.mubr.msk.bf16.mxu0 %vm9369_vm2, %v13437_v0  ;;  %v10107_v15 = vld [vmem:[%s13434_s0 + $0x14c] sm:$0xf] }
 0x123   :  { %v8052_v20 = vpop.f32.mrf.mxu0  ;;  %v111_v50 = vld [vmem:[%s13434_s0 + $0x150] sm:$0xf] }
 0x124   :  { %v1239_v25 = vpop.f32.mrf.mxu1  ;;  %v7013_v20 = vcombine.low %v10012_v34, %v10032_v58 }
 0x125   :  { %v678_v21 = vpop.f32.mrf.mxu0 }
 0x126   :  { %v10066_v12 = vadd.f32 %v1239_v25, %v678_v21  ;;  %v8227_v28 = vpop.f32.mrf.mxu1 }
 0x127   :  { %v8053_v39 = vpop.f32.mrf.mxu0  ;;  %v409_v28 = vsel %vm330_vm3, %v406_v45, %v408_v4 }
 0x128   :  { %v1244_v40 = vpop.f32.mrf.mxu1  ;;  %8325 = vmatmul.mubr.msk.bf16.gmra.mxu1 %vm416_vm4, %v7011_v27 }
 0x129   :  { %v683_v44 = vpop.f32.mrf.mxu0  ;;  %8151 = vmatmul.mubr.msk.bf16.gmra.mxu0 %vm416_vm4, %v405_v29  ;;  %8328 = vmatprep.mubr.msk.bf16.mxu1 %vm9369_vm2, %v13437_v0  ;;  %v6929_v29 = vcombine.low %v10107_v15, %v111_v50 }
 0x12a   :  { %v10075_v51 = vadd.f32 %v1244_v40, %v683_v44  ;;  %v8230_v9 = vpop.f32.mrf.mxu1  ;;  %8154 = vmatprep.mubr.msk.bf16.mxu0 %vm9369_vm2, %v13437_v0 }
 0x12b   :  { %v8056_v46 = vpop.f32.mrf.mxu0  ;;  %v410_v58 = vrot.slane %v6929_v29, 1 }
 0x12c   :  { %v1247_v49 = vpop.f32.mrf.mxu1  ;;  %v7014_v46 = vcombine.low %v10037_v60, %v10057_v23 }
 0x12d   :  { %v686_v53 = vpop.f32.mrf.mxu0 }
 0x12e   :  { %v10091_v54 = vadd.f32 %v1247_v49, %v686_v53  ;;  %v8231_v62 = vpop.f32.mrf.mxu1 }
 0x12f   :  { %v8057_v7 = vpop.f32.mrf.mxu0  ;;  %v411_v62 = vsel %vm330_vm3, %v408_v4, %v410_v58 }
 0x130   :  { %v1252_v55 = vpop.f32.mrf.mxu1  ;;  %8329 = vmatmul.mubr.msk.bf16.gmra.mxu1 %vm416_vm4, %v7012_v30 }
 0x131   :  { %v691_v8 = vpop.f32.mrf.mxu0  ;;  %8155 = vmatmul.mubr.msk.bf16.gmra.mxu0 %vm416_vm4, %v407_v1  ;;  %8332 = vmatprep.mubr.msk.bf16.mxu1 %vm9369_vm2, %v13437_v0  ;;  %v9140_v1 = vld [vmem:[%s13434_s0 + $0x154] sm:$0xff]  }
 0x132   :  { %v10100_v11 = vadd.f32 %v1252_v55, %v691_v8  ;;  %v8234_v32 = vpop.f32.mrf.mxu1  ;;  %8158 = vmatprep.mubr.msk.bf16.mxu0 %vm9369_vm2, %v13437_v0  ;;  %v412_v8 = vrot.slane %v9140_v1, 1 }
 0x133   :  { %v8060_v14 = vpop.f32.mrf.mxu0 }
 0x134   :  { %v1255_v16 = vpop.f32.mrf.mxu1  ;;  %v7015_v14 = vcombine.low %v10062_v24, %v10082_v37 }
 0x135   :  { %v694_v25 = vpop.f32.mrf.mxu0 }
 0x136   :  { %v10114_v27 = vadd.f32 %v1255_v16, %v694_v25  ;;  %v8235_v21 = vpop.f32.mrf.mxu1  ;;  %v413_v25 = vsel %vm330_vm3, %v410_v58, %v412_v8  ;;  %v7016_v58 = vcombine.low %v10087_v48, %v10107_v15  ;;  %v7152_v48 = vld [vmem:[%s13434_s0 + $0x17c] sm:$0xf] }
 0x137   :  { %v8061_v35 = vpop.f32.mrf.mxu0  ;;  %v9142_v21 = vld [vmem:[%s13434_s0 + $0x15c] ss:$0 sps:$4 sm:$0x77]  }
 0x138   :  { %v1260_v39 = vpop.f32.mrf.mxu1  ;;  %8333 = vmatmul.mubr.msk.bf16.gmra.mxu1 %vm416_vm4, %v7013_v20 }
 0x139   :  { %v699_v40 = vpop.f32.mrf.mxu0  ;;  %8159 = vmatmul.mubr.msk.bf16.gmra.mxu0 %vm416_vm4, %v409_v28  ;;  %8336 = vmatprep.mubr.msk.bf16.mxu1 %vm9369_vm2, %v13437_v0 }
 0x13a   :  { %v10122_v44 = vadd.f32 %v1260_v39, %v699_v40  ;;  %v8238_v34 = vpop.f32.mrf.mxu1  ;;  %8162 = vmatprep.mubr.msk.bf16.mxu0 %vm9369_vm2, %v13437_v0  ;;  %v414_v39 = vrot.slane %v9142_v21, 1 }
 0x13b   :  { %v8064_v9 = vpop.f32.mrf.mxu0 }
 0x13c   :  { %v1263_v45 = vpop.f32.mrf.mxu1 }
 0x13d   :  { %v702_v49 = vpop.f32.mrf.mxu0 }
 0x13e   :  { %v10128_v30 = vadd.f32 %v1263_v45, %v702_v49  ;;  %v8239_v53 = vpop.f32.mrf.mxu1  ;;  %v415_v49 = vsel %vm330_vm3, %v412_v8, %v414_v39 }
 0x13f   :  { %v8065_v2 = vpop.f32.mrf.mxu0 }
 0x140   :  { %v1268_v7 = vpop.f32.mrf.mxu1  ;;  %8337 = vmatmul.mubr.msk.bf16.gmra.mxu1 %vm416_vm4, %v7014_v46 }
 0x141   :  { %v707_v55 = vpop.f32.mrf.mxu0  ;;  %8163 = vmatmul.mubr.msk.bf16.gmra.mxu0 %vm416_vm4, %v411_v62  ;;  %8340 = vmatprep.mubr.msk.bf16.mxu1 %vm9369_vm2, %v13437_v0 }
 0x142   :  { %v10138_v60 = vadd.f32 %v1268_v7, %v707_v55  ;;  %v8242_v23 = vpop.f32.mrf.mxu1  ;;  %8166 = vmatprep.mubr.msk.bf16.mxu0 %vm9369_vm2, %v13437_v0  ;;  %v7153_v7 = vld [vmem:[%s13434_s0 + $0x180] sm:$0xf]  ;;  %v7154_v55 = vld [vmem:[%s13434_s0 + $0x184] sm:$0xf] }
 0x143   :  { %v8068_v32 = vpop.f32.mrf.mxu0  ;;  %v7233_v23 = vld [vmem:[%s13434_s0 + $0x178] sm:$0xe]  ;;  %v7240_v21 = vcombine.low %v7153_v7, %v7154_v55 }
 0x144   :  { %v1271_v4 = vpop.f32.mrf.mxu1 }
 0x145   :  { %v710_v50 = vpop.f32.mrf.mxu0 }
 0x146   :  { %v10144_v16 = vadd.f32 %v1271_v4, %v710_v50  ;;  %v8243_v20 = vpop.f32.mrf.mxu1  ;;  %v9144_v4 = vld [vmem:[%s13434_s0 + $0x150] ss:$0 sps:$4 sm:$0x33]   ;;  %v9145_v50 = vld [vmem:[%s13434_s0 + $0x18] sm:$0xfc]  }
 0x147   :  { %v8069_v28 = vpop.f32.mrf.mxu0  ;;  %v9146_v20 = vld [vmem:[%s13434_s0 + $0x20] sm:$0xff]  }
 0x148   :  { %v1276_v29 = vpop.f32.mrf.mxu1  ;;  %8341 = vmatmul.mubr.msk.bf16.gmra.mxu1 %vm416_vm4, %v7015_v14 }
 0x149   :  { %v715_v35 = vpop.f32.mrf.mxu0  ;;  %8167 = vmatmul.mubr.msk.bf16.gmra.mxu0 %vm416_vm4, %v413_v25  ;;  %8344 = vmatprep.mubr.msk.bf16.mxu1 %vm9369_vm2, %v13437_v0  ;;  %v7239_v25 = vcombine.low %v7233_v23, %v7152_v48 }
 0x14a   :  { %v10154_v24 = vadd.f32 %v1276_v29, %v715_v35  ;;  %v8246_v37 = vpop.f32.mrf.mxu1  ;;  %8170 = vmatprep.mubr.msk.bf16.mxu0 %vm9369_vm2, %v13437_v0 }
 0x14b   :  { %v8072_v40 = vpop.f32.mrf.mxu0 }
 0x14c   :  { %v1279_v34 = vpop.f32.mrf.mxu1 }
 0x14d   :  { %v718_v9 = vpop.f32.mrf.mxu0 }
 0x14e   :  { %v10160_v45 = vadd.f32 %v1279_v34, %v718_v9  ;;  %v8247_v46 = vpop.f32.mrf.mxu1  ;;  %v1791_v34 = vrot.slane %v9145_v50, 2  ;;  %v3307_v9 = vrot.slane %v7239_v25, 1  ;;  %v9149_v25 = vld [vmem:[%s13434_s0 + $0x28] sm:$0xff]  }
 0x14f   :  { %v8073_v53 = vpop.f32.mrf.mxu0  ;;  %v3308_v46 = vrot.slane %v7240_v21, 1 }
 0x150   :  { %v1284_v62 = vpop.f32.mrf.mxu1  ;;  %8345 = vmatmul.mubr.msk.bf16.gmra.mxu1 %vm416_vm4, %v7016_v58  ;;  %v1792_v58 = vrot.slane %v9146_v20, 2 }
 0x151   :  { %v723_v1 = vpop.f32.mrf.mxu0  ;;  %8171 = vmatmul.mubr.msk.bf16.gmra.mxu0 %vm416_vm4, %v415_v49  ;;  %8348 = vmatprep.mubr.msk.bf16.mxu1 %vm9369_vm2, %v13437_v0  ;;  %v3309_v23 = vsel %vm330_vm3, %v3307_v9, %v3308_v46 }
 0x152   :  { %v10170_v15 = vadd.f32 %v1284_v62, %v723_v1  ;;  %v8250_v2 = vpop.f32.mrf.mxu1  ;;  %8174 = vmatprep.mubr.msk.bf16.mxu0 %vm9369_vm2, %v13437_v0  ;;  %v7496_v62 = vld [vmem:[%s13433_s1 + $0x4] sm:$0x3]  ;;  %v7156_v1 = vld [vmem:[%s13434_s0 + $0x18c] sm:$0xf]  ;;  %v1793_v50 = vsel %vm1790_vm5, %v1791_v34, %v1792_v58  ;;  %v7157_v34 = vld [vmem:[%s13434_s0 + $0x190] sm:$0xf] }
 0x153   :  { %v8076_v8 = vpop.f32.mrf.mxu0  ;;  %v3087_v2 = vld [vmem:[%s13433_s1] sm:$0x3] }
 0x154   :  { %v1287_v32 = vpop.f32.mrf.mxu1  ;;  %v4975_v8 = vand.u32 %v7496_v62, %v9405_v5  ;;  %v4083_v20 = vand.u32 %v3087_v2, %v9405_v5  ;;  %v1794_v5 = vrot.slane %v9149_v25, 2 }
 0x155   :  { %v726_v14 = vpop.f32.mrf.mxu0 }
 0x156   :  { %v10192_v28 = vadd.f32 %v1287_v32, %v726_v14  ;;  %v8251_v29 = vpop.f32.mrf.mxu1 }
 0x157   :  { %v8077_v35 = vpop.f32.mrf.mxu0 }
 0x158   :  { %v1292_v37 = vpop.f32.mrf.mxu1  ;;  %8349 = vmatmul.mubr.msk.bf16.gmra.mxu1 %vm416_vm4, %v9144_v4 }
 0x159   :  { %v731_v40 = vpop.f32.mrf.mxu0  ;;  %8175 = vmatmul.mubr.msk.bf16.gmra.mxu0 %vm416_vm4, %v414_v39  ;;  %8528 = vmatprep.mubr.msk.bf16.mxu1 %vm9369_vm2, %v13437_v0  ;;  %v7155_v39 = vld [vmem:[%s13434_s0 + $0x188] sm:$0xf] }
 0x15a   :  { %v10198_v49 = vadd.f32 %v1292_v37, %v731_v40  ;;  %v8254_v53 = vpop.f32.mrf.mxu1  ;;  %8354 = vmatprep.mubr.msk.bf16.mxu0 %vm9369_vm2, %v13437_v0  ;;  %v7241_v32 = vcombine.low %v7155_v39, %v7156_v1 }
 0x15b   :  { %v8080_v48 = vpop.f32.mrf.mxu0  ;;  %v7158_v53 = vld [vmem:[%s13434_s0 + $0x194] sm:$0xf] }
 0x15c   :  { %v1295_v7 = vpop.f32.mrf.mxu1  ;;  %v3310_v37 = vrot.slane %v7241_v32, 1  ;;  %v7242_v2 = vcombine.low %v7157_v34, %v7158_v53 }
 0x15d   :  { %v734_v55 = vpop.f32.mrf.mxu0 }
 0x15e   :  { %v10216_v4 = vadd.f32 %v1295_v7, %v734_v55  ;;  %v8255_v14 = vpop.f32.mrf.mxu1  ;;  %v3311_v48 = vsel %vm330_vm3, %v3308_v46, %v3310_v37  ;;  %v3312_v46 = vrot.slane %v7242_v2, 1  ;;  %v9153_v2 = vld [vmem:[%s13434_s0 + $0x38] sm:$0xff]  }
 0x15f   :  { %v8081_v21 = vpop.f32.mrf.mxu0 }
 0x160   :  { %v1300_v29 = vpop.f32.mrf.mxu1  ;;  %8529 = vmatmul.mubr.msk.bf16.vlgmr.msra.gmra.mxu1 %vm416_vm4, %v3309_v23  ;;  %v1795_v23 = vsel %vm1790_vm5, %v1792_v58, %v1794_v5  ;;  %v7159_v21 = vld [vmem:[%s13434_s0 + $0x198] sm:$0xf]  ;;  %v3313_v53 = vsel %vm330_vm3, %v3310_v37, %v3312_v46 }
 0x161   :  { %v739_v35 = vpop.f32.mrf.mxu0  ;;  %8355 = vmatmul.mubr.msk.bf16.vlgmr.msra.gmra.mxu0 %vm416_vm4, %v1793_v50  ;;  %8875 = vmatpush3.bf16.msra.mxu1 %v4975_v8  ;;  %v9151_v8 = vld [vmem:[%s13434_s0 + $0x30] sm:$0xff]  }
 0x162   :  { %v10225_v40 = vadd.f32 %v1300_v29, %v739_v35  ;;  %8701 = vmatpush3.bf16.msra.mxu0 %v4083_v20  ;;  %v8258_v9 = vpop.f32.mrf.mxu1  ;;  %8358 = vmatprep.mubr.msk.bf16.mxu0 %vm9369_vm2, %v13437_v0  ;;  %v1796_v58 = vrot.slane %v9151_v8, 2  ;;  %v7160_v29 = vld [vmem:[%s13434_s0 + $0x19c] sm:$0xf] }
 0x163   :  { %v8084_v62 = vpop.f32.mrf.mxu0  ;;  %8532 = vmatprep.mubr.msk.bf16.mxu1 %vm9369_vm2, %v13437_v0 }
 0x164   :  { %v1303_v39 = vpop.f32.mrf.mxu1  ;;  %v7243_v62 = vcombine.low %v7159_v21, %v7160_v29 }
 0x165   :  { %v742_v1 = vpop.f32.mrf.mxu0 }
 0x166   :  { %v10238_v7 = vadd.f32 %v1303_v39, %v742_v1  ;;  %v8259_v55 = vpop.f32.mrf.mxu1  ;;  %v3314_v37 = vrot.slane %v7243_v62, 1 }
 0x167   :  { %v8085_v32 = vpop.f32.mrf.mxu0 }
 0x168   :  { %v1308_v14 = vpop.f32.mrf.mxu1  ;;  %8533 = vmatmul.mubr.msk.bf16.gmra.mxu1 %vm416_vm4, %v3311_v48  ;;  %v1797_v48 = vsel %vm1790_vm5, %v1794_v5, %v1796_v58  ;;  %v1798_v5 = vrot.slane %v9153_v2, 2 }
 0x169   :  { %v747_v50 = vpop.f32.mrf.mxu0  ;;  %8359 = vmatmul.mubr.msk.bf16.gmra.mxu0 %vm416_vm4, %v1795_v23  ;;  %8536 = vmatprep.mubr.msk.bf16.mxu1 %vm9369_vm2, %v13437_v0 }
 0x16a   :  { %v10248_v20 = vadd.f32 %v1308_v14, %v747_v50  ;;  %v8262_v25 = vpop.f32.mrf.mxu1  ;;  %8362 = vmatprep.mubr.msk.bf16.mxu0 %vm9369_vm2, %v13437_v0  ;;  %v7161_v50 = vld [vmem:[%s13434_s0 + $0x1a0] sm:$0xf] }
 0x16b   :  { %v8088_v35 = vpop.f32.mrf.mxu0  ;;  %v7162_v25 = vld [vmem:[%s13434_s0 + $0x1a4] sm:$0xf] }
 0x16c   :  { %v1311_v9 = vpop.f32.mrf.mxu1 }
 0x16d   :  { %v750_v34 = vpop.f32.mrf.mxu0 }
 0x16e   :  { %v10259_v39 = vadd.f32 %v1311_v9, %v750_v34  ;;  %v8263_v1 = vpop.f32.mrf.mxu1  ;;  %v3315_v9 = vsel %vm330_vm3, %v3312_v46, %v3314_v37  ;;  %v7244_v34 = vcombine.low %v7161_v50, %v7162_v25  ;;  %v7163_v50 = vld [vmem:[%s13434_s0 + $0x1a8] sm:$0xf]  ;;  %v7164_v25 = vld [vmem:[%s13434_s0 + $0x1ac] sm:$0xf] }
 0x16f   :  { %v8089_v55 = vpop.f32.mrf.mxu0  ;;  %v1799_v1 = vsel %vm1790_vm5, %v1796_v58, %v1798_v5 }
 0x170   :  { %v1316_v23 = vpop.f32.mrf.mxu1  ;;  %8537 = vmatmul.mubr.msk.bf16.gmra.mxu1 %vm416_vm4, %v3313_v53  ;;  %v3316_v46 = vrot.slane %v7244_v34, 1  ;;  %v7245_v34 = vcombine.low %v7163_v50, %v7164_v25 }
 0x171   :  { %v755_v8 = vpop.f32.mrf.mxu0  ;;  %8363 = vmatmul.mubr.msk.bf16.gmra.mxu0 %vm416_vm4, %v1797_v48  ;;  %8540 = vmatprep.mubr.msk.bf16.mxu1 %vm9369_vm2, %v13437_v0  ;;  %v9155_v48 = vld [vmem:[%s13434_s0 + $0x40] sm:$0xff]  }
 0x172   :  { %v10269_v32 = vadd.f32 %v1316_v23, %v755_v8  ;;  %v8266_v14 = vpop.f32.mrf.mxu1  ;;  %8366 = vmatprep.mubr.msk.bf16.mxu0 %vm9369_vm2, %v13437_v0  ;;  %v1800_v58 = vrot.slane %v9155_v48, 2  ;;  %v9157_v48 = vld [vmem:[%s13434_s0 + $0x48] sm:$0xff]  }
 0x173   :  { %v8092_v21 = vpop.f32.mrf.mxu0 }
 0x174   :  { %v1319_v29 = vpop.f32.mrf.mxu1 }
 0x175   :  { %v758_v35 = vpop.f32.mrf.mxu0 }
 0x176   :  { %v10280_v53 = vadd.f32 %v1319_v29, %v758_v35  ;;  %v8267_v62 = vpop.f32.mrf.mxu1 }
 0x177   :  { %v8093_v2 = vpop.f32.mrf.mxu0 }
 0x178   :  { %v1324_v55 = vpop.f32.mrf.mxu1  ;;  %8541 = vmatmul.mubr.msk.bf16.gmra.mxu1 %vm416_vm4, %v3315_v9  ;;  %v3317_v9 = vsel %vm330_vm3, %v3314_v37, %v3316_v46  ;;  %v1801_v2 = vsel %vm1790_vm5, %v1798_v5, %v1800_v58  ;;  %v3318_v37 = vrot.slane %v7245_v34, 1  ;;  %v1802_v5 = vrot.slane %v9157_v48, 2  ;;  %v9159_v48 = vld [vmem:[%s13434_s0 + $0x50] sm:$0xff]  }
 0x179   :  { %v763_v23 = vpop.f32.mrf.mxu0  ;;  %8367 = vmatmul.mubr.msk.bf16.gmra.mxu0 %vm416_vm4, %v1799_v1  ;;  %8544 = vmatprep.mubr.msk.bf16.mxu1 %vm9369_vm2, %v13437_v0 }
 0x17a   :  { %v10290_v8 = vadd.f32 %v1324_v55, %v763_v23  ;;  %v8270_v14 = vpop.f32.mrf.mxu1  ;;  %8370 = vmatprep.mubr.msk.bf16.mxu0 %vm9369_vm2, %v13437_v0  ;;  %v3319_v34 = vsel %vm330_vm3, %v3316_v46, %v3318_v37 }
 0x17b   :  { %v8096_v21 = vpop.f32.mrf.mxu0 }
 0x17c   :  { %13447 = vst [vmem:[#allocation4_spill] sm:$0xff] %v10290_v8  ;;  %v1327_v29 = vpop.f32.mrf.mxu1  ;;  %v7165_v21 = vld [vmem:[%s13434_s0 + $0x1b0] sm:$0xf] }
 0x17d   :  { %v766_v35 = vpop.f32.mrf.mxu0 }
 0x17e   :  { %v10301_v62 = vadd.f32 %v1327_v29, %v766_v35  ;;  %v8271_v1 = vpop.f32.mrf.mxu1  ;;  %v7166_v29 = vld [vmem:[%s13434_s0 + $0x1b4] sm:$0xf] }
 0x17f   :  { %v8097_v55 = vpop.f32.mrf.mxu0 }
 0x180   :  { %13448 = vst [vmem:[#allocation5_spill] sm:$0xff] %v10301_v62  ;;  %v1332_v23 = vpop.f32.mrf.mxu1  ;;  %8545 = vmatmul.mubr.msk.bf16.gmra.mxu1 %vm416_vm4, %v3317_v9 }
 0x181   :  { %v771_v14 = vpop.f32.mrf.mxu0  ;;  %8371 = vmatmul.mubr.msk.bf16.gmra.mxu0 %vm416_vm4, %v1801_v2  ;;  %8548 = vmatprep.mubr.msk.bf16.mxu1 %vm9369_vm2, %v13437_v0  ;;  %v7246_v2 = vcombine.low %v7165_v21, %v7166_v29 }
 0x182   :  { %v10311_v50 = vadd.f32 %v1332_v23, %v771_v14  ;;  %v8274_v25 = vpop.f32.mrf.mxu1  ;;  %8374 = vmatprep.mubr.msk.bf16.mxu0 %vm9369_vm2, %v13437_v0  ;;  %v1803_v14 = vsel %vm1790_vm5, %v1800_v58, %v1802_v5  ;;  %v1804_v58 = vrot.slane %v9159_v48, 2  ;;  %v9161_v48 = vld [vmem:[%s13434_s0 + $0x58] sm:$0xff]  }
 0x183   :  { %v8100_v35 = vpop.f32.mrf.mxu0  ;;  %v3320_v46 = vrot.slane %v7246_v2, 1 }
 0x184   :  { %13449 = vst [vmem:[#allocation6_spill] sm:$0xff] %v10311_v50  ;;  %v1335_v9 = vpop.f32.mrf.mxu1  ;;  %v13451_v35 = vmov 0.0  }
 0x185   :  { %v774_v1 = vpop.f32.mrf.mxu0  ;;  %v3321_v2 = vsel %vm330_vm3, %v3318_v37, %v3320_v46  ;;  %23 = vst.msk [vmem:[#allocation3] sm:$0x3] %vm13445_vm7, %v13451_v35 }
 0x186   :  { %v10322_v55 = vadd.f32 %v1335_v9, %v774_v1  ;;  %v8275_v23 = vpop.f32.mrf.mxu1  ;;  %v7167_v9 = vld [vmem:[%s13434_s0 + $0x1b8] sm:$0xf]  ;;  %v7168_v1 = vld [vmem:[%s13434_s0 + $0x1bc] sm:$0xf] }
 0x187   :  { %v8101_v25 = vpop.f32.mrf.mxu0 }
 0x188   :  { %13450 = vst [vmem:[#allocation7_spill] sm:$0xff] %v10322_v55  ;;  %v1340_v0 = vpop.f32.mrf.mxu1  ;;  %8549 = vmatmul.mubr.msk.bf16.gmra.mxu1 %vm416_vm4, %v3319_v34 }
 0x189   :  { %v779_v50 = vpop.f32.mrf.mxu0  ;;  %8375 = vmatmul.mubr.msk.bf16.gmra.mxu0 %vm416_vm4, %v1803_v14  ;;  %8552 = vmatprep.mubr.msk.bf16.mxu1 %vm9369_vm2, %v13451_v35 }
 0x18a   :  { %v10332_v21 = vadd.f32 %v1340_v0, %v779_v50  ;;  %v8278_v29 = vpop.f32.mrf.mxu1  ;;  %8378 = vmatprep.mubr.msk.bf16.mxu0 %vm9369_vm2, %v13451_v35  ;;  %v7247_v0 = vcombine.low %v7167_v9, %v7168_v1 }
 0x18b   :  { %v8104_v34 = vpop.f32.mrf.mxu0  ;;  %v1805_v29 = vsel %vm1790_vm5, %v1802_v5, %v1804_v58  ;;  %v1806_v5 = vrot.slane %v9161_v48, 2  ;;  %v9163_v48 = vld [vmem:[%s13434_s0 + $0x60] sm:$0xff]  }
 0x18c   :  { %13452 = vst [vmem:[#allocation8_spill] sm:$0xff] %v10332_v21  ;;  %v1343_v23 = vpop.f32.mrf.mxu1  ;;  %v3322_v37 = vrot.slane %v7247_v0, 1  ;;  %v7170_v34 = vld [vmem:[%s13434_s0 + $0x1c4] sm:$0xf] }
 0x18d   :  { %v782_v14 = vpop.f32.mrf.mxu0 }
 0x18e   :  { %v10343_v50 = vadd.f32 %v1343_v23, %v782_v14  ;;  %v8279_v25 = vpop.f32.mrf.mxu1  ;;  %v3323_v0 = vsel %vm330_vm3, %v3320_v46, %v3322_v37 }
 0x18f   :  { %v8105_v21 = vpop.f32.mrf.mxu0 }
 0x190   :  { %13453 = vst [vmem:[#allocation9_spill] sm:$0xff] %v10343_v50  ;;  %v1348_v55 = vpop.f32.mrf.mxu1  ;;  %8553 = vmatmul.mubr.msk.bf16.gmra.mxu1 %vm416_vm4, %v3321_v2  ;;  %v7169_v21 = vld [vmem:[%s13434_s0 + $0x1c0] sm:$0xf] }
 0x191   :  { %v787_v62 = vpop.f32.mrf.mxu0  ;;  %8379 = vmatmul.mubr.msk.bf16.gmra.mxu0 %vm416_vm4, %v1805_v29  ;;  %8556 = vmatprep.mubr.msk.bf16.mxu1 %vm9369_vm2, %v13451_v35  ;;  %v1807_v29 = vsel %vm1790_vm5, %v1804_v58, %v1806_v5  ;;  %v1808_v58 = vrot.slane %v9163_v48, 2  ;;  %v9165_v48 = vld [vmem:[%s13434_s0 + $0x68] sm:$0xff]  }
 0x192   :  { %v10353_v9 = vadd.f32 %v1348_v55, %v787_v62  ;;  %v8282_v1 = vpop.f32.mrf.mxu1  ;;  %8382 = vmatprep.mubr.msk.bf16.mxu0 %vm9369_vm2, %v13451_v35  ;;  %v7248_v62 = vcombine.low %v7169_v21, %v7170_v34 }
 0x193   :  { %v8108_v23 = vpop.f32.mrf.mxu0 }
 0x194   :  { %13454 = vst [vmem:[#allocation10_spill] sm:$0xff] %v10353_v9  ;;  %v1351_v14 = vpop.f32.mrf.mxu1  ;;  %v3324_v46 = vrot.slane %v7248_v62, 1  ;;  %v7171_v23 = vld [vmem:[%s13434_s0 + $0x1c8] sm:$0xf] }
 0x195   :  { %v790_v2 = vpop.f32.mrf.mxu0 }
 0x196   :  { %v10364_v55 = vadd.f32 %v1351_v14, %v790_v2  ;;  %v8283_v25 = vpop.f32.mrf.mxu1  ;;  %v7172_v14 = vld [vmem:[%s13434_s0 + $0x1cc] sm:$0xf]  ;;  %v3325_v62 = vsel %vm330_vm3, %v3322_v37, %v3324_v46 }
 0x197   :  { %v8109_v1 = vpop.f32.mrf.mxu0 }
 0x198   :  { %13455 = vst [vmem:[#allocation11_spill] sm:$0xff] %v10364_v55  ;;  %v1356_v9 = vpop.f32.mrf.mxu1  ;;  %8557 = vmatmul.mubr.msk.bf16.gmra.mxu1 %vm416_vm4, %v3323_v0  ;;  %v1809_v1 = vsel %vm1790_vm5, %v1806_v5, %v1808_v58  ;;  %v1810_v5 = vrot.slane %v9165_v48, 2  ;;  %v9167_v48 = vld [vmem:[%s13434_s0 + $0x70] sm:$0xff]  }
 0x199   :  { %v795_v50 = vpop.f32.mrf.mxu0  ;;  %8383 = vmatmul.mubr.msk.bf16.gmra.mxu0 %vm416_vm4, %v1807_v29  ;;  %8560 = vmatprep.mubr.msk.bf16.mxu1 %vm9369_vm2, %v13451_v35 }
 0x19a   :  { %v10374_v21 = vadd.f32 %v1356_v9, %v795_v50  ;;  %v8286_v34 = vpop.f32.mrf.mxu1  ;;  %8386 = vmatprep.mubr.msk.bf16.mxu0 %vm9369_vm2, %v13451_v35  ;;  %v7249_v50 = vcombine.low %v7171_v23, %v7172_v14 }
 0x19b   :  { %v8112_v2 = vpop.f32.mrf.mxu0 }
 0x19c   :  { %13456 = vst [vmem:[#allocation12_spill] sm:$0xff] %v10374_v21  ;;  %v1359_v0 = vpop.f32.mrf.mxu1  ;;  %v3326_v37 = vrot.slane %v7249_v50, 1  ;;  %v7173_v2 = vld [vmem:[%s13434_s0 + $0x1d0] sm:$0xf] }
 0x19d   :  { %v798_v25 = vpop.f32.mrf.mxu0 }
 0x19e   :  { %v10385_v9 = vadd.f32 %v1359_v0, %v798_v25  ;;  %v8287_v29 = vpop.f32.mrf.mxu1  ;;  %v7174_v0 = vld [vmem:[%s13434_s0 + $0x1d4] sm:$0xf]  ;;  %v3327_v50 = vsel %vm330_vm3, %v3324_v46, %v3326_v37 }
 0x19f   :  { %v8113_v34 = vpop.f32.mrf.mxu0 }
 0x1a0   :  { %13457 = vst [vmem:[#allocation13_spill] sm:$0xff] %v10385_v9  ;;  %v1364_v21 = vpop.f32.mrf.mxu1  ;;  %8561 = vmatmul.mubr.msk.bf16.gmra.mxu1 %vm416_vm4, %v3325_v62  ;;  %v1811_v34 = vsel %vm1790_vm5, %v1808_v58, %v1810_v5  ;;  %v1812_v58 = vrot.slane %v9167_v48, 2  ;;  %v9169_v48 = vld [vmem:[%s13434_s0 + $0x78] sm:$0xff]  }
 0x1a1   :  { %v803_v55 = vpop.f32.mrf.mxu0  ;;  %8387 = vmatmul.mubr.msk.bf16.gmra.mxu0 %vm416_vm4, %v1809_v1  ;;  %8564 = vmatprep.mubr.msk.bf16.mxu1 %vm9369_vm2, %v13451_v35 }
 0x1a2   :  { %v10395_v23 = vadd.f32 %v1364_v21, %v803_v55  ;;  %v8290_v14 = vpop.f32.mrf.mxu1  ;;  %8390 = vmatprep.mubr.msk.bf16.mxu0 %vm9369_vm2, %v13451_v35  ;;  %v7250_v55 = vcombine.low %v7173_v2, %v7174_v0 }
 0x1a3   :  { %v8116_v25 = vpop.f32.mrf.mxu0 }
 0x1a4   :  { %13458 = vst [vmem:[#allocation14_spill] sm:$0xff] %v10395_v23  ;;  %v1367_v62 = vpop.f32.mrf.mxu1  ;;  %v3328_v46 = vrot.slane %v7250_v55, 1  ;;  %v7175_v25 = vld [vmem:[%s13434_s0 + $0x1d8] sm:$0xf] }
 0x1a5   :  { %v806_v29 = vpop.f32.mrf.mxu0 }
 0x1a6   :  { %v10406_v21 = vadd.f32 %v1367_v62, %v806_v29  ;;  %v8291_v1 = vpop.f32.mrf.mxu1  ;;  %v7176_v62 = vld [vmem:[%s13434_s0 + $0x1dc] sm:$0xf]  ;;  %v3329_v55 = vsel %vm330_vm3, %v3326_v37, %v3328_v46 }
 0x1a7   :  { %v8117_v14 = vpop.f32.mrf.mxu0 }
 0x1a8   :  { %13459 = vst [vmem:[#allocation15_spill] sm:$0xff] %v10406_v21  ;;  %v1372_v23 = vpop.f32.mrf.mxu1  ;;  %8565 = vmatmul.mubr.msk.bf16.gmra.mxu1 %vm416_vm4, %v3327_v50  ;;  %v1813_v14 = vsel %vm1790_vm5, %v1810_v5, %v1812_v58  ;;  %v1814_v5 = vrot.slane %v9169_v48, 2  ;;  %v9171_v48 = vld [vmem:[%s13434_s0 + $0x80] sm:$0xff]  }
 0x1a9   :  { %v811_v9 = vpop.f32.mrf.mxu0  ;;  %8391 = vmatmul.mubr.msk.bf16.gmra.mxu0 %vm416_vm4, %v1811_v34  ;;  %8568 = vmatprep.mubr.msk.bf16.mxu1 %vm9369_vm2, %v13451_v35 }
 0x1aa   :  { %v10416_v2 = vadd.f32 %v1372_v23, %v811_v9  ;;  %v8294_v0 = vpop.f32.mrf.mxu1  ;;  %8394 = vmatprep.mubr.msk.bf16.mxu0 %vm9369_vm2, %v13451_v35  ;;  %v7251_v9 = vcombine.low %v7175_v25, %v7176_v62 }
 0x1ab   :  { %v8120_v29 = vpop.f32.mrf.mxu0 }
 0x1ac   :  { %13460 = vst [vmem:[#allocation16_spill] sm:$0xff] %v10416_v2  ;;  %v1375_v50 = vpop.f32.mrf.mxu1  ;;  %v3330_v37 = vrot.slane %v7251_v9, 1  ;;  %v7177_v29 = vld [vmem:[%s13434_s0 + $0x1e0] sm:$0xf] }
 0x1ad   :  { %v814_v1 = vpop.f32.mrf.mxu0 }
 0x1ae   :  { %v10427_v23 = vadd.f32 %v1375_v50, %v814_v1  ;;  %v8295_v34 = vpop.f32.mrf.mxu1  ;;  %v7178_v50 = vld [vmem:[%s13434_s0 + $0x1e4] sm:$0xf]  ;;  %v3331_v9 = vsel %vm330_vm3, %v3328_v46, %v3330_v37 }
 0x1af   :  { %v8121_v0 = vpop.f32.mrf.mxu0 }
 0x1b0   :  { %13461 = vst [vmem:[#allocation17_spill] sm:$0xff] %v10427_v23  ;;  %v1380_v2 = vpop.f32.mrf.mxu1  ;;  %8569 = vmatmul.mubr.msk.bf16.gmra.mxu1 %vm416_vm4, %v3329_v55  ;;  %v1815_v0 = vsel %vm1790_vm5, %v1812_v58, %v1814_v5  ;;  %v1816_v58 = vrot.slane %v9171_v48, 2  ;;  %v9173_v48 = vld [vmem:[%s13434_s0 + $0x88] sm:$0xff]  }
 0x1b1   :  { %v819_v21 = vpop.f32.mrf.mxu0  ;;  %8395 = vmatmul.mubr.msk.bf16.gmra.mxu0 %vm416_vm4, %v1813_v14  ;;  %8572 = vmatprep.mubr.msk.bf16.mxu1 %vm9369_vm2, %v13451_v35 }
 0x1b2   :  { %v10437_v25 = vadd.f32 %v1380_v2, %v819_v21  ;;  %v8298_v62 = vpop.f32.mrf.mxu1  ;;  %8398 = vmatprep.mubr.msk.bf16.mxu0 %vm9369_vm2, %v13451_v35  ;;  %v7252_v21 = vcombine.low %v7177_v29, %v7178_v50 }
 0x1b3   :  { %v8124_v1 = vpop.f32.mrf.mxu0 }
 0x1b4   :  { %13462 = vst [vmem:[#allocation18_spill] sm:$0xff] %v10437_v25  ;;  %v1383_v55 = vpop.f32.mrf.mxu1  ;;  %v3332_v46 = vrot.slane %v7252_v21, 1  ;;  %v7179_v1 = vld [vmem:[%s13434_s0 + $0x1e8] sm:$0xf] }
 0x1b5   :  { %v822_v34 = vpop.f32.mrf.mxu0 }
 0x1b6   :  { %v10448_v2 = vadd.f32 %v1383_v55, %v822_v34  ;;  %v8299_v14 = vpop.f32.mrf.mxu1  ;;  %v7180_v55 = vld [vmem:[%s13434_s0 + $0x1ec] sm:$0xf]  ;;  %v3333_v21 = vsel %vm330_vm3, %v3330_v37, %v3332_v46 }
 0x1b7   :  { %v8125_v62 = vpop.f32.mrf.mxu0 }
 0x1b8   :  { %13463 = vst [vmem:[#allocation19_spill] sm:$0xff] %v10448_v2  ;;  %v1388_v25 = vpop.f32.mrf.mxu1  ;;  %8573 = vmatmul.mubr.msk.bf16.gmra.mxu1 %vm416_vm4, %v3331_v9  ;;  %v1817_v62 = vsel %vm1790_vm5, %v1814_v5, %v1816_v58  ;;  %v1818_v5 = vrot.slane %v9173_v48, 2  ;;  %v9175_v48 = vld [vmem:[%s13434_s0 + $0x90] sm:$0xff]  }
 0x1b9   :  { %v827_v23 = vpop.f32.mrf.mxu0  ;;  %8399 = vmatmul.mubr.msk.bf16.gmra.mxu0 %vm416_vm4, %v1815_v0  ;;  %8576 = vmatprep.mubr.msk.bf16.mxu1 %vm9369_vm2, %v13451_v35 }
 0x1ba   :  { %v10458_v29 = vadd.f32 %v1388_v25, %v827_v23  ;;  %v8302_v50 = vpop.f32.mrf.mxu1  ;;  %8402 = vmatprep.mubr.msk.bf16.mxu0 %vm9369_vm2, %v13451_v35  ;;  %v7253_v23 = vcombine.low %v7179_v1, %v7180_v55 }
 0x1bb   :  { %v8128_v34 = vpop.f32.mrf.mxu0 }
 0x1bc   :  { %13464 = vst [vmem:[#allocation20_spill] sm:$0xff] %v10458_v29  ;;  %v1391_v9 = vpop.f32.mrf.mxu1  ;;  %v3334_v37 = vrot.slane %v7253_v23, 1  ;;  %v7181_v34 = vld [vmem:[%s13434_s0 + $0x1f0] sm:$0xf] }
 0x1bd   :  { %v830_v14 = vpop.f32.mrf.mxu0 }
 0x1be   :  { %v10469_v25 = vadd.f32 %v1391_v9, %v830_v14  ;;  %v8303_v0 = vpop.f32.mrf.mxu1  ;;  %v7182_v9 = vld [vmem:[%s13434_s0 + $0x1f4] sm:$0xf]  ;;  %v3335_v23 = vsel %vm330_vm3, %v3332_v46, %v3334_v37 }
 0x1bf   :  { %v8129_v50 = vpop.f32.mrf.mxu0 }
 0x1c0   :  { %13465 = vst [vmem:[#allocation21_spill] sm:$0xff] %v10469_v25  ;;  %v1396_v29 = vpop.f32.mrf.mxu1  ;;  %8577 = vmatmul.mubr.msk.bf16.gmra.mxu1 %vm416_vm4, %v3333_v21  ;;  %v1819_v50 = vsel %vm1790_vm5, %v1816_v58, %v1818_v5  ;;  %v1820_v58 = vrot.slane %v9175_v48, 2  ;;  %v9177_v48 = vld [vmem:[%s13434_s0 + $0x98] sm:$0xff]  }
 0x1c1   :  { %v835_v2 = vpop.f32.mrf.mxu0  ;;  %8403 = vmatmul.mubr.msk.bf16.gmra.mxu0 %vm416_vm4, %v1817_v62  ;;  %8580 = vmatprep.mubr.msk.bf16.mxu1 %vm9369_vm2, %v13451_v35 }
 0x1c2   :  { %v10479_v1 = vadd.f32 %v1396_v29, %v835_v2  ;;  %v8306_v55 = vpop.f32.mrf.mxu1  ;;  %8406 = vmatprep.mubr.msk.bf16.mxu0 %vm9369_vm2, %v13451_v35  ;;  %v7254_v2 = vcombine.low %v7181_v34, %v7182_v9 }
 0x1c3   :  { %v8132_v14 = vpop.f32.mrf.mxu0 }
 0x1c4   :  { %13466 = vst [vmem:[#allocation22_spill] sm:$0xff] %v10479_v1  ;;  %v1399_v21 = vpop.f32.mrf.mxu1  ;;  %v3336_v46 = vrot.slane %v7254_v2, 1  ;;  %v7183_v14 = vld [vmem:[%s13434_s0 + $0x1f8] sm:$0xf] }
 0x1c5   :  { %v838_v0 = vpop.f32.mrf.mxu0 }
 0x1c6   :  { %v10490_v29 = vadd.f32 %v1399_v21, %v838_v0  ;;  %v8307_v62 = vpop.f32.mrf.mxu1  ;;  %v7184_v21 = vld [vmem:[%s13434_s0 + $0x1fc] sm:$0xf]  ;;  %v3337_v2 = vsel %vm330_vm3, %v3334_v37, %v3336_v46 }
 0x1c7   :  { %v8133_v55 = vpop.f32.mrf.mxu0 }
 0x1c8   :  { %13467 = vst [vmem:[#allocation23_spill] sm:$0xff] %v10490_v29  ;;  %v1404_v1 = vpop.f32.mrf.mxu1  ;;  %8581 = vmatmul.mubr.msk.bf16.gmra.mxu1 %vm416_vm4, %v3335_v23  ;;  %v1821_v55 = vsel %vm1790_vm5, %v1818_v5, %v1820_v58  ;;  %v1822_v5 = vrot.slane %v9177_v48, 2  ;;  %v9179_v48 = vld [vmem:[%s13434_s0 + $0xa0] sm:$0xff]  }
 0x1c9   :  { %v843_v25 = vpop.f32.mrf.mxu0  ;;  %8407 = vmatmul.mubr.msk.bf16.gmra.mxu0 %vm416_vm4, %v1819_v50  ;;  %8584 = vmatprep.mubr.msk.bf16.mxu1 %vm9369_vm2, %v13451_v35 }
 0x1ca   :  { %v10500_v34 = vadd.f32 %v1404_v1, %v843_v25  ;;  %v8310_v9 = vpop.f32.mrf.mxu1  ;;  %8410 = vmatprep.mubr.msk.bf16.mxu0 %vm9369_vm2, %v13451_v35  ;;  %v7255_v25 = vcombine.low %v7183_v14, %v7184_v21 }
 0x1cb   :  { %v8136_v0 = vpop.f32.mrf.mxu0 }
 0x1cc   :  { %13468 = vst [vmem:[#allocation24_spill] sm:$0xff] %v10500_v34  ;;  %v1407_v23 = vpop.f32.mrf.mxu1  ;;  %v3338_v37 = vrot.slane %v7255_v25, 1  ;;  %v7185_v0 = vld [vmem:[%s13434_s0 + $0x200] sm:$0xf] }
 0x1cd   :  { %v846_v62 = vpop.f32.mrf.mxu0 }
 0x1ce   :  { %v10511_v1 = vadd.f32 %v1407_v23, %v846_v62  ;;  %v8311_v50 = vpop.f32.mrf.mxu1  ;;  %v7186_v23 = vld [vmem:[%s13434_s0 + $0x204] sm:$0xf]  ;;  %v3339_v25 = vsel %vm330_vm3, %v3336_v46, %v3338_v37 }
 0x1cf   :  { %v8137_v9 = vpop.f32.mrf.mxu0 }
 0x1d0   :  { %13469 = vst [vmem:[#allocation25_spill] sm:$0xff] %v10511_v1  ;;  %v1412_v34 = vpop.f32.mrf.mxu1  ;;  %8585 = vmatmul.mubr.msk.bf16.gmra.mxu1 %vm416_vm4, %v3337_v2  ;;  %v1823_v9 = vsel %vm1790_vm5, %v1820_v58, %v1822_v5  ;;  %v1824_v58 = vrot.slane %v9179_v48, 2  ;;  %v9181_v48 = vld [vmem:[%s13434_s0 + $0xa8] sm:$0xff]  }
 0x1d1   :  { %v851_v29 = vpop.f32.mrf.mxu0  ;;  %8411 = vmatmul.mubr.msk.bf16.gmra.mxu0 %vm416_vm4, %v1821_v55  ;;  %8588 = vmatprep.mubr.msk.bf16.mxu1 %vm9369_vm2, %v13451_v35 }
 0x1d2   :  { %v10521_v14 = vadd.f32 %v1412_v34, %v851_v29  ;;  %v8314_v21 = vpop.f32.mrf.mxu1  ;;  %8414 = vmatprep.mubr.msk.bf16.mxu0 %vm9369_vm2, %v13451_v35  ;;  %v7256_v29 = vcombine.low %v7185_v0, %v7186_v23 }
 0x1d3   :  { %v8140_v62 = vpop.f32.mrf.mxu0 }
 0x1d4   :  { %13470 = vst [vmem:[#allocation26_spill] sm:$0xff] %v10521_v14  ;;  %v1415_v2 = vpop.f32.mrf.mxu1  ;;  %v3340_v46 = vrot.slane %v7256_v29, 1  ;;  %v7187_v62 = vld [vmem:[%s13434_s0 + $0x208] sm:$0xf] }
 0x1d5   :  { %v854_v50 = vpop.f32.mrf.mxu0 }
 0x1d6   :  { %v10532_v34 = vadd.f32 %v1415_v2, %v854_v50  ;;  %v8315_v55 = vpop.f32.mrf.mxu1  ;;  %v7188_v2 = vld [vmem:[%s13434_s0 + $0x20c] sm:$0xf]  ;;  %v3341_v29 = vsel %vm330_vm3, %v3338_v37, %v3340_v46 }
 0x1d7   :  { %v8141_v21 = vpop.f32.mrf.mxu0 }
 0x1d8   :  { %13471 = vst [vmem:[#allocation27_spill] sm:$0xff] %v10532_v34  ;;  %v1420_v14 = vpop.f32.mrf.mxu1  ;;  %8589 = vmatmul.mubr.msk.bf16.gmra.mxu1 %vm416_vm4, %v3339_v25  ;;  %v1825_v21 = vsel %vm1790_vm5, %v1822_v5, %v1824_v58  ;;  %v1826_v5 = vrot.slane %v9181_v48, 2  ;;  %v9183_v48 = vld [vmem:[%s13434_s0 + $0xb0] sm:$0xff]  }
 0x1d9   :  { %v859_v1 = vpop.f32.mrf.mxu0  ;;  %8415 = vmatmul.mubr.msk.bf16.gmra.mxu0 %vm416_vm4, %v1823_v9  ;;  %8592 = vmatprep.mubr.msk.bf16.mxu1 %vm9369_vm2, %v13451_v35 }
 0x1da   :  { %v10542_v0 = vadd.f32 %v1420_v14, %v859_v1  ;;  %v8318_v23 = vpop.f32.mrf.mxu1  ;;  %8418 = vmatprep.mubr.msk.bf16.mxu0 %vm9369_vm2, %v13451_v35  ;;  %v7257_v1 = vcombine.low %v7187_v62, %v7188_v2 }
 0x1db   :  { %v8144_v50 = vpop.f32.mrf.mxu0 }
 0x1dc   :  { %13472 = vst [vmem:[#allocation28_spill] sm:$0xff] %v10542_v0  ;;  %v1423_v25 = vpop.f32.mrf.mxu1  ;;  %v3342_v37 = vrot.slane %v7257_v1, 1  ;;  %v7189_v50 = vld [vmem:[%s13434_s0 + $0x210] sm:$0xf] }
 0x1dd   :  { %v862_v55 = vpop.f32.mrf.mxu0 }
 0x1de   :  { %v10553_v14 = vadd.f32 %v1423_v25, %v862_v55  ;;  %v8319_v9 = vpop.f32.mrf.mxu1  ;;  %v7190_v25 = vld [vmem:[%s13434_s0 + $0x214] sm:$0xf]  ;;  %v3343_v1 = vsel %vm330_vm3, %v3340_v46, %v3342_v37 }
 0x1df   :  { %v8145_v23 = vpop.f32.mrf.mxu0 }
 0x1e0   :  { %13473 = vst [vmem:[#allocation29_spill] sm:$0xff] %v10553_v14  ;;  %v1428_v0 = vpop.f32.mrf.mxu1  ;;  %8593 = vmatmul.mubr.msk.bf16.gmra.mxu1 %vm416_vm4, %v3341_v29  ;;  %v1827_v23 = vsel %vm1790_vm5, %v1824_v58, %v1826_v5  ;;  %v1828_v58 = vrot.slane %v9183_v48, 2  ;;  %v9185_v48 = vld [vmem:[%s13434_s0 + $0xb8] sm:$0xff]  }
 0x1e1   :  { %v867_v34 = vpop.f32.mrf.mxu0  ;;  %8419 = vmatmul.mubr.msk.bf16.gmra.mxu0 %vm416_vm4, %v1825_v21  ;;  %8596 = vmatprep.mubr.msk.bf16.mxu1 %vm9369_vm2, %v13451_v35 }
 0x1e2   :  { %v10563_v62 = vadd.f32 %v1428_v0, %v867_v34  ;;  %v8322_v2 = vpop.f32.mrf.mxu1  ;;  %8422 = vmatprep.mubr.msk.bf16.mxu0 %vm9369_vm2, %v13451_v35  ;;  %v7258_v34 = vcombine.low %v7189_v50, %v7190_v25 }
 0x1e3   :  { %v8148_v55 = vpop.f32.mrf.mxu0 }
 0x1e4   :  { %13474 = vst [vmem:[#allocation30_spill] sm:$0xff] %v10563_v62  ;;  %v1431_v29 = vpop.f32.mrf.mxu1  ;;  %v3344_v46 = vrot.slane %v7258_v34, 1  ;;  %v7191_v55 = vld [vmem:[%s13434_s0 + $0x218] sm:$0xf] }
 0x1e5   :  { %v870_v9 = vpop.f32.mrf.mxu0 }
 0x1e6   :  { %v10574_v0 = vadd.f32 %v1431_v29, %v870_v9  ;;  %v8323_v21 = vpop.f32.mrf.mxu1  ;;  %v7192_v29 = vld [vmem:[%s13434_s0 + $0x21c] sm:$0xf]  ;;  %v3345_v34 = vsel %vm330_vm3, %v3342_v37, %v3344_v46 }
 0x1e7   :  { %v8149_v2 = vpop.f32.mrf.mxu0 }
 0x1e8   :  { %13475 = vst [vmem:[#allocation31_spill] sm:$0xff] %v10574_v0  ;;  %v1436_v62 = vpop.f32.mrf.mxu1  ;;  %8597 = vmatmul.mubr.msk.bf16.gmra.mxu1 %vm416_vm4, %v3343_v1  ;;  %v1829_v2 = vsel %vm1790_vm5, %v1826_v5, %v1828_v58  ;;  %v1830_v5 = vrot.slane %v9185_v48, 2  ;;  %v9187_v48 = vld [vmem:[%s13434_s0 + $0xc0] sm:$0xff]  }
 0x1e9   :  { %v875_v14 = vpop.f32.mrf.mxu0  ;;  %8423 = vmatmul.mubr.msk.bf16.gmra.mxu0 %vm416_vm4, %v1827_v23  ;;  %8600 = vmatprep.mubr.msk.bf16.mxu1 %vm9369_vm2, %v13451_v35 }
 0x1ea   :  { %v10584_v50 = vadd.f32 %v1436_v62, %v875_v14  ;;  %v8326_v25 = vpop.f32.mrf.mxu1  ;;  %8426 = vmatprep.mubr.msk.bf16.mxu0 %vm9369_vm2, %v13451_v35  ;;  %v7259_v14 = vcombine.low %v7191_v55, %v7192_v29 }
 0x1eb   :  { %v8152_v9 = vpop.f32.mrf.mxu0 }
 0x1ec   :  { %13476 = vst [vmem:[#allocation32_spill] sm:$0xff] %v10584_v50  ;;  %v1439_v1 = vpop.f32.mrf.mxu1  ;;  %v3346_v37 = vrot.slane %v7259_v14, 1  ;;  %v7193_v9 = vld [vmem:[%s13434_s0 + $0x220] sm:$0xf] }
 0x1ed   :  { %v878_v21 = vpop.f32.mrf.mxu0 }
 0x1ee   :  { %v10595_v62 = vadd.f32 %v1439_v1, %v878_v21  ;;  %v8327_v23 = vpop.f32.mrf.mxu1  ;;  %v7194_v1 = vld [vmem:[%s13434_s0 + $0x224] sm:$0xf]  ;;  %v3347_v14 = vsel %vm330_vm3, %v3344_v46, %v3346_v37 }
 0x1ef   :  { %v8153_v25 = vpop.f32.mrf.mxu0 }
 0x1f0   :  { %13477 = vst [vmem:[#allocation33_spill] sm:$0xff] %v10595_v62  ;;  %v1444_v50 = vpop.f32.mrf.mxu1  ;;  %8601 = vmatmul.mubr.msk.bf16.gmra.mxu1 %vm416_vm4, %v3345_v34  ;;  %v1831_v25 = vsel %vm1790_vm5, %v1828_v58, %v1830_v5  ;;  %v1832_v58 = vrot.slane %v9187_v48, 2  ;;  %v9189_v48 = vld [vmem:[%s13434_s0 + $0xc8] sm:$0xff]  }
 0x1f1   :  { %v883_v0 = vpop.f32.mrf.mxu0  ;;  %8427 = vmatmul.mubr.msk.bf16.gmra.mxu0 %vm416_vm4, %v1829_v2  ;;  %8604 = vmatprep.mubr.msk.bf16.mxu1 %vm9369_vm2, %v13451_v35 }
 0x1f2   :  { %v10605_v55 = vadd.f32 %v1444_v50, %v883_v0  ;;  %v8330_v29 = vpop.f32.mrf.mxu1  ;;  %8430 = vmatprep.mubr.msk.bf16.mxu0 %vm9369_vm2, %v13451_v35  ;;  %v7260_v0 = vcombine.low %v7193_v9, %v7194_v1 }
 0x1f3   :  { %v8156_v21 = vpop.f32.mrf.mxu0 }
 0x1f4   :  { %13478 = vst [vmem:[#allocation34_spill] sm:$0xff] %v10605_v55  ;;  %v1447_v34 = vpop.f32.mrf.mxu1  ;;  %v3348_v46 = vrot.slane %v7260_v0, 1  ;;  %v7195_v21 = vld [vmem:[%s13434_s0 + $0x228] sm:$0xf] }
 0x1f5   :  { %v886_v23 = vpop.f32.mrf.mxu0 }
 0x1f6   :  { %v10616_v50 = vadd.f32 %v1447_v34, %v886_v23  ;;  %v8331_v2 = vpop.f32.mrf.mxu1  ;;  %v7196_v34 = vld [vmem:[%s13434_s0 + $0x22c] sm:$0xf]  ;;  %v3349_v0 = vsel %vm330_vm3, %v3346_v37, %v3348_v46 }
 0x1f7   :  { %v8157_v29 = vpop.f32.mrf.mxu0 }
 0x1f8   :  { %13479 = vst [vmem:[#allocation35_spill] sm:$0xff] %v10616_v50  ;;  %v1452_v55 = vpop.f32.mrf.mxu1  ;;  %8605 = vmatmul.mubr.msk.bf16.gmra.mxu1 %vm416_vm4, %v3347_v14  ;;  %v1833_v29 = vsel %vm1790_vm5, %v1830_v5, %v1832_v58  ;;  %v1834_v5 = vrot.slane %v9189_v48, 2  ;;  %v9191_v48 = vld [vmem:[%s13434_s0 + $0xd0] sm:$0xff]  }
 0x1f9   :  { %v891_v62 = vpop.f32.mrf.mxu0  ;;  %8431 = vmatmul.mubr.msk.bf16.gmra.mxu0 %vm416_vm4, %v1831_v25  ;;  %8608 = vmatprep.mubr.msk.bf16.mxu1 %vm9369_vm2, %v13451_v35 }
 0x1fa   :  { %v10626_v9 = vadd.f32 %v1452_v55, %v891_v62  ;;  %v8334_v1 = vpop.f32.mrf.mxu1  ;;  %8434 = vmatprep.mubr.msk.bf16.mxu0 %vm9369_vm2, %v13451_v35  ;;  %v7261_v62 = vcombine.low %v7195_v21, %v7196_v34 }
 0x1fb   :  { %v8160_v23 = vpop.f32.mrf.mxu0 }
 0x1fc   :  { %13480 = vst [vmem:[#allocation36_spill] sm:$0xff] %v10626_v9  ;;  %v1455_v14 = vpop.f32.mrf.mxu1  ;;  %v3350_v37 = vrot.slane %v7261_v62, 1  ;;  %v7197_v23 = vld [vmem:[%s13434_s0 + $0x230] sm:$0xf] }
 0x1fd   :  { %v894_v2 = vpop.f32.mrf.mxu0 }
 0x1fe   :  { %v10637_v55 = vadd.f32 %v1455_v14, %v894_v2  ;;  %v8335_v25 = vpop.f32.mrf.mxu1  ;;  %v7198_v14 = vld [vmem:[%s13434_s0 + $0x234] sm:$0xf]  ;;  %v3351_v62 = vsel %vm330_vm3, %v3348_v46, %v3350_v37 }
 0x1ff   :  { %v8161_v1 = vpop.f32.mrf.mxu0 }
 0x200   :  { %13481 = vst [vmem:[#allocation37_spill] sm:$0xff] %v10637_v55  ;;  %v1460_v9 = vpop.f32.mrf.mxu1  ;;  %8609 = vmatmul.mubr.msk.bf16.gmra.mxu1 %vm416_vm4, %v3349_v0  ;;  %v1835_v1 = vsel %vm1790_vm5, %v1832_v58, %v1834_v5  ;;  %v1836_v58 = vrot.slane %v9191_v48, 2  ;;  %v9193_v48 = vld [vmem:[%s13434_s0 + $0xd8] sm:$0xff]  }
 0x201   :  { %v899_v50 = vpop.f32.mrf.mxu0  ;;  %8435 = vmatmul.mubr.msk.bf16.gmra.mxu0 %vm416_vm4, %v1833_v29  ;;  %8612 = vmatprep.mubr.msk.bf16.mxu1 %vm9369_vm2, %v13451_v35 }
 0x202   :  { %v10647_v21 = vadd.f32 %v1460_v9, %v899_v50  ;;  %v8338_v34 = vpop.f32.mrf.mxu1  ;;  %8438 = vmatprep.mubr.msk.bf16.mxu0 %vm9369_vm2, %v13451_v35  ;;  %v7262_v50 = vcombine.low %v7197_v23, %v7198_v14 }
 0x203   :  { %v8164_v2 = vpop.f32.mrf.mxu0 }
 0x204   :  { %13482 = vst [vmem:[#allocation38_spill] sm:$0xff] %v10647_v21  ;;  %v1463_v0 = vpop.f32.mrf.mxu1  ;;  %v3352_v46 = vrot.slane %v7262_v50, 1  ;;  %v7199_v2 = vld [vmem:[%s13434_s0 + $0x238] sm:$0xf] }
 0x205   :  { %v902_v25 = vpop.f32.mrf.mxu0 }
 0x206   :  { %v10658_v9 = vadd.f32 %v1463_v0, %v902_v25  ;;  %v8339_v29 = vpop.f32.mrf.mxu1  ;;  %v7200_v0 = vld [vmem:[%s13434_s0 + $0x23c] sm:$0xf]  ;;  %v3353_v50 = vsel %vm330_vm3, %v3350_v37, %v3352_v46 }
 0x207   :  { %v8165_v34 = vpop.f32.mrf.mxu0 }
 0x208   :  { %13483 = vst [vmem:[#allocation39_spill] sm:$0xff] %v10658_v9  ;;  %v1468_v21 = vpop.f32.mrf.mxu1  ;;  %8613 = vmatmul.mubr.msk.bf16.gmra.mxu1 %vm416_vm4, %v3351_v62  ;;  %v1837_v34 = vsel %vm1790_vm5, %v1834_v5, %v1836_v58  ;;  %v1838_v5 = vrot.slane %v9193_v48, 2  ;;  %v9195_v48 = vld [vmem:[%s13434_s0 + $0xe0] sm:$0xff]  }
 0x209   :  { %v907_v55 = vpop.f32.mrf.mxu0  ;;  %8439 = vmatmul.mubr.msk.bf16.gmra.mxu0 %vm416_vm4, %v1835_v1  ;;  %8616 = vmatprep.mubr.msk.bf16.mxu1 %vm9369_vm2, %v13451_v35 }
 0x20a   :  { %v10668_v23 = vadd.f32 %v1468_v21, %v907_v55  ;;  %v8342_v14 = vpop.f32.mrf.mxu1  ;;  %8442 = vmatprep.mubr.msk.bf16.mxu0 %vm9369_vm2, %v13451_v35  ;;  %v7263_v55 = vcombine.low %v7199_v2, %v7200_v0 }
 0x20b   :  { %v8168_v25 = vpop.f32.mrf.mxu0 }
 0x20c   :  { %13484 = vst [vmem:[#allocation40_spill] sm:$0xff] %v10668_v23  ;;  %v1471_v62 = vpop.f32.mrf.mxu1  ;;  %v3354_v37 = vrot.slane %v7263_v55, 1  ;;  %v7201_v25 = vld [vmem:[%s13434_s0 + $0x240] sm:$0xf] }
 0x20d   :  { %v910_v29 = vpop.f32.mrf.mxu0 }
 0x20e   :  { %v10679_v21 = vadd.f32 %v1471_v62, %v910_v29  ;;  %v8343_v1 = vpop.f32.mrf.mxu1  ;;  %v7202_v62 = vld [vmem:[%s13434_s0 + $0x244] sm:$0xf]  ;;  %v3355_v55 = vsel %vm330_vm3, %v3352_v46, %v3354_v37 }
 0x20f   :  { %v8169_v14 = vpop.f32.mrf.mxu0 }
 0x210   :  { %13485 = vst [vmem:[#allocation41_spill] sm:$0xff] %v10679_v21  ;;  %v1476_v23 = vpop.f32.mrf.mxu1  ;;  %8617 = vmatmul.mubr.msk.bf16.gmra.mxu1 %vm416_vm4, %v3353_v50  ;;  %v1839_v14 = vsel %vm1790_vm5, %v1836_v58, %v1838_v5  ;;  %v1840_v58 = vrot.slane %v9195_v48, 2  ;;  %v9197_v48 = vld [vmem:[%s13434_s0 + $0xe8] sm:$0xff]  }
 0x211   :  { %v915_v9 = vpop.f32.mrf.mxu0  ;;  %8443 = vmatmul.mubr.msk.bf16.gmra.mxu0 %vm416_vm4, %v1837_v34  ;;  %8620 = vmatprep.mubr.msk.bf16.mxu1 %vm9369_vm2, %v13451_v35 }
 0x212   :  { %v10689_v2 = vadd.f32 %v1476_v23, %v915_v9  ;;  %v8346_v0 = vpop.f32.mrf.mxu1  ;;  %8446 = vmatprep.mubr.msk.bf16.mxu0 %vm9369_vm2, %v13451_v35  ;;  %v7264_v9 = vcombine.low %v7201_v25, %v7202_v62 }
 0x213   :  { %v8172_v29 = vpop.f32.mrf.mxu0 }
 0x214   :  { %13486 = vst [vmem:[#allocation42_spill] sm:$0xff] %v10689_v2  ;;  %v1479_v50 = vpop.f32.mrf.mxu1  ;;  %v3356_v46 = vrot.slane %v7264_v9, 1  ;;  %v7203_v29 = vld [vmem:[%s13434_s0 + $0x248] sm:$0xf] }
 0x215   :  { %v918_v1 = vpop.f32.mrf.mxu0 }
 0x216   :  { %v10700_v23 = vadd.f32 %v1479_v50, %v918_v1  ;;  %v8347_v34 = vpop.f32.mrf.mxu1  ;;  %v7204_v50 = vld [vmem:[%s13434_s0 + $0x24c] sm:$0xf]  ;;  %v3357_v9 = vsel %vm330_vm3, %v3354_v37, %v3356_v46 }
 0x217   :  { %v8173_v0 = vpop.f32.mrf.mxu0 }
 0x218   :  { %13487 = vst [vmem:[#allocation43_spill] sm:$0xff] %v10700_v23  ;;  %v1484_v2 = vpop.f32.mrf.mxu1  ;;  %8621 = vmatmul.mubr.msk.bf16.gmra.mxu1 %vm416_vm4, %v3355_v55 }
 0x219   :  { %v923_v21 = vpop.f32.mrf.mxu0  ;;  %8447 = vmatmul.mubr.msk.bf16.gmra.mxu0 %vm416_vm4, %v1839_v14  ;;  %8624 = vmatprep.mubr.msk.bf16.mxu1 %vm9369_vm2, %v13451_v35  ;;  %v1841_v14 = vsel %vm1790_vm5, %v1838_v5, %v1840_v58 }
 0x21a   :  { %v10710_v25 = vadd.f32 %v1484_v2, %v923_v21  ;;  %v8350_v62 = vpop.f32.mrf.mxu1  ;;  %8450 = vmatprep.mubr.msk.bf16.mxu0 %vm9369_vm2, %v13451_v35  ;;  %v7265_v21 = vcombine.low %v7203_v29, %v7204_v50  ;;  %v1842_v50 = vrot.slane %v9197_v48, 2 }
 0x21b   :  { %v8176_v1 = vpop.f32.mrf.mxu0 }
 0x21c   :  { %13488 = vst [vmem:[#allocation44_spill] sm:$0xff] %v10710_v25  ;;  %v1487_v55 = vpop.f32.mrf.mxu1  ;;  %v3358_v37 = vrot.slane %v7265_v21, 1  ;;  %v7205_v1 = vld [vmem:[%s13434_s0 + $0x250] sm:$0xf] }
 0x21d   :  { %v926_v34 = vpop.f32.mrf.mxu0  ;;  %v7206_v55 = vld [vmem:[%s13434_s0 + $0x254] sm:$0xf] }
 0x21e   :  { %v8351_v2 = vpop.f32.mrf.mxu1 }
 0x21f   :  { %v8177_v0 = vpop.f32.mrf.mxu0  ;;  %v7266_v2 = vcombine.low %v7205_v1, %v7206_v55 }
 0x220   :  { %v10725_v62 = vpop.f32.mrf.mxu1  ;;  %8625 = vmatmul.mubr.msk.bf16.gmra.mxu1 %vm416_vm4, %v3357_v9 }
 0x221   :  { %13489 = vst [vmem:[#allocation45_spill] sm:$0xff] %v10725_v62  ;;  %v2042_v25 = vpop.f32.mrf.mxu0  ;;  %8451 = vmatmul.mubr.msk.bf16.gmra.mxu0 %vm416_vm4, %v1841_v14  ;;  %8628 = vmatprep.mubr.msk.bf16.mxu1 %vm9369_vm2, %v13451_v35 }
 0x222   :  { %v2384_v29 = vadd.f32 %v2042_v25, %v9778_v47  ;;  %v8530_v5 = vpop.f32.mrf.mxu1  ;;  %8454 = vmatprep.mubr.msk.bf16.mxu0 %vm9369_vm2, %v13451_v35  ;;  %v3359_v47 = vsel %vm330_vm3, %v3356_v46, %v3358_v37  ;;  %v10747_v25 = vld [vmem:[%s13434_s0 + $0xf0] sm:$0xff]  }
 0x223   :  { %v8356_v34 = vpop.f32.mrf.mxu0  ;;  %v1843_v5 = vsel %vm1790_vm5, %v1840_v58, %v1842_v50  ;;  %v3360_v58 = vrot.slane %v7266_v2, 1 }
 0x224   :  { %2473 = vst.msk [vmem:[#allocation2] sm:$0xff] %vm2472_vm6, %v2384_v29  ;;  %v10741_v9 = vpop.f32.mrf.mxu1  ;;  %v2739_v14 = vmul.f32 %v2384_v29, %v2384_v29  ;;  %v2560_v62 = vsel %vm2472_vm6, %v2384_v29, 0.0 }
 0x225   :  { %13490 = vst [vmem:[#allocation46_spill] sm:$0xff] %v10741_v9  ;;  %v2045_v21 = vpop.f32.mrf.mxu0 }
 0x226   :  { %v2385_v48 = vadd.f32 %v2045_v21, %v9792_v56  ;;  %v8531_v0 = vpop.f32.mrf.mxu1  ;;  %v1844_v56 = vrot.slane %v10747_v25, 2  ;;  %v2824_v29 = vsel %vm2472_vm6, %v2739_v14, 0.0 }
 0x227   :  { %v8357_v34 = vpop.f32.mrf.mxu0 }
 0x228   :  { %2474 = vst.msk [vmem:[#allocation2 + $0x8] sm:$0xff] %vm2472_vm6, %v2385_v48  ;;  %v2561_v9 = vsel %vm2472_vm6, %v2385_v48, 0.0  ;;  %v2740_v46 = vmul.f32 %v2385_v48, %v2385_v48  ;;  %v10754_v23 = vpop.f32.mrf.mxu1  ;;  %8629 = vmatmul.mubr.msk.bf16.gmra.mxu1 %vm416_vm4, %v3359_v47  ;;  %v3361_v34 = vsel %vm330_vm3, %v3358_v37, %v3360_v58 }
 0x229   :  { %13491 = vst [vmem:[#allocation47_spill] sm:$0xff] %v10754_v23  ;;  %v2562_v8 = vadd.f32 %v2561_v9, %v2560_v62  ;;  %v2050_v1 = vpop.f32.mrf.mxu0  ;;  %8455 = vmatmul.mubr.msk.bf16.gmra.mxu0 %vm416_vm4, %v1843_v5  ;;  %8632 = vmatprep.mubr.msk.bf16.mxu1 %vm9369_vm2, %v13451_v35  ;;  %v7207_v62 = vld [vmem:[%s13434_s0 + $0x258] sm:$0xf]  ;;  %v7208_v9 = vld [vmem:[%s13434_s0 + $0x25c] sm:$0xf] }
 0x22a   :  { %v2825_v55 = vsel %vm2472_vm6, %v2740_v46, 0.0  ;;  %v2386_v21 = vadd.f32 %v2050_v1, %v9801_v63  ;;  %v8534_v48 = vpop.f32.mrf.mxu1  ;;  %8458 = vmatprep.mubr.msk.bf16.mxu0 %vm9369_vm2, %v13451_v35  ;;  %v7267_v46 = vcombine.low %v7207_v62, %v7208_v9 }
 0x22b   :  { %v2826_v47 = vadd.f32 %v2825_v55, %v2824_v29  ;;  %v8360_v25 = vpop.f32.mrf.mxu0  ;;  %v1845_v29 = vsel %vm1790_vm5, %v1842_v50, %v1844_v56  ;;  %v10783_v55 = vld [vmem:[%s13434_s0 + $0xf8] sm:$0xff]  }
 0x22c   :  { %2475 = vst.msk [vmem:[#allocation2 + $0x10] sm:$0xff] %vm2472_vm6, %v2386_v21  ;;  %v2563_v2 = vsel %vm2472_vm6, %v2386_v21, 0.0  ;;  %v2741_v14 = vmul.f32 %v2386_v21, %v2386_v21  ;;  %v10774_v63 = vpop.f32.mrf.mxu1  ;;  %v3362_v50 = vrot.slane %v7267_v46, 1 }
 0x22d   :  { %v2564_v0 = vadd.f32 %v2563_v2, %v2562_v8  ;;  %v2053_v5 = vpop.f32.mrf.mxu0 }
 0x22e   :  { %v2827_v1 = vsel %vm2472_vm6, %v2741_v14, 0.0  ;;  %v2387_v48 = vadd.f32 %v2053_v5, %v9816_v10  ;;  %v8535_v23 = vpop.f32.mrf.mxu1  ;;  %v1846_v14 = vrot.slane %v10783_v55, 2  ;;  %v7210_v5 = vld [vmem:[%s13434_s0 + $0x264] sm:$0xf]  ;;  %v3363_v55 = vsel %vm330_vm3, %v3360_v58, %v3362_v50 }
 0x22f   :  { %v2828_v21 = vadd.f32 %v2827_v1, %v2826_v47  ;;  %v8361_v25 = vpop.f32.mrf.mxu0 }
 0x230   :  { %2476 = vst.msk [vmem:[#allocation2 + $0x18] sm:$0xff] %vm2472_vm6, %v2387_v48  ;;  %v2565_v8 = vsel %vm2472_vm6, %v2387_v48, 0.0  ;;  %v2742_v37 = vmul.f32 %v2387_v48, %v2387_v48  ;;  %v10787_v62 = vpop.f32.mrf.mxu1  ;;  %8633 = vmatmul.mubr.msk.bf16.gmra.mxu1 %vm416_vm4, %v3361_v34 }
 0x231   :  { %v2566_v10 = vadd.f32 %v2565_v8, %v2564_v0  ;;  %v2058_v23 = vpop.f32.mrf.mxu0  ;;  %8459 = vmatmul.mubr.msk.bf16.gmra.mxu0 %vm416_vm4, %v1845_v29  ;;  %8636 = vmatprep.mubr.msk.bf16.mxu1 %vm9369_vm2, %v13451_v35  ;;  %v7209_v0 = vld [vmem:[%s13434_s0 + $0x260] sm:$0xf] }
 0x232   :  { %v2829_v9 = vsel %vm2472_vm6, %v2742_v37, 0.0  ;;  %v2388_v47 = vadd.f32 %v2058_v23, %v9825_v17  ;;  %v8538_v2 = vpop.f32.mrf.mxu1  ;;  %8462 = vmatprep.mubr.msk.bf16.mxu0 %vm9369_vm2, %v13451_v35  ;;  %v7268_v8 = vcombine.low %v7209_v0, %v7210_v5 }
 0x233   :  { %v2830_v34 = vadd.f32 %v2829_v9, %v2828_v21  ;;  %v8364_v46 = vpop.f32.mrf.mxu0  ;;  %v1847_v21 = vsel %vm1790_vm5, %v1844_v56, %v1846_v14  ;;  %v10815_v9 = vld [vmem:[%s13434_s0 + $0x100] sm:$0xff]  }
 0x234   :  { %2477 = vst.msk [vmem:[#allocation2 + $0x20] sm:$0xff] %vm2472_vm6, %v2388_v47  ;;  %v2567_v17 = vsel %vm2472_vm6, %v2388_v47, 0.0  ;;  %v2743_v1 = vmul.f32 %v2388_v47, %v2388_v47  ;;  %v10806_v48 = vpop.f32.mrf.mxu1  ;;  %v3364_v56 = vrot.slane %v7268_v8, 1 }
 0x235   :  { %v2568_v29 = vadd.f32 %v2567_v17, %v2566_v10  ;;  %v2061_v25 = vpop.f32.mrf.mxu0 }
 0x236   :  { %v2831_v37 = vsel %vm2472_vm6, %v2743_v1, 0.0  ;;  %v2389_v23 = vadd.f32 %v2061_v25, %v9841_v26  ;;  %v8539_v2 = vpop.f32.mrf.mxu1  ;;  %v1848_v25 = vrot.slane %v10815_v9, 2  ;;  %v3365_v9 = vsel %vm330_vm3, %v3362_v50, %v3364_v56 }
 0x237   :  { %v2832_v47 = vadd.f32 %v2831_v37, %v2830_v34  ;;  %v8365_v46 = vpop.f32.mrf.mxu0 }
 0x238   :  { %2478 = vst.msk [vmem:[#allocation2 + $0x28] sm:$0xff] %vm2472_vm6, %v2389_v23  ;;  %v2569_v10 = vsel %vm2472_vm6, %v2389_v23, 0.0  ;;  %v2744_v58 = vmul.f32 %v2389_v23, %v2389_v23  ;;  %v10819_v0 = vpop.f32.mrf.mxu1  ;;  %8637 = vmatmul.mubr.msk.bf16.gmra.mxu1 %vm416_vm4, %v3363_v55  ;;  %v7212_v55 = vld [vmem:[%s13434_s0 + $0x26c] sm:$0xf] }
 0x239   :  { %v2570_v26 = vadd.f32 %v2569_v10, %v2568_v29  ;;  %v2066_v5 = vpop.f32.mrf.mxu0  ;;  %8463 = vmatmul.mubr.msk.bf16.gmra.mxu0 %vm416_vm4, %v1847_v21  ;;  %8640 = vmatprep.mubr.msk.bf16.mxu1 %vm9369_vm2, %v13451_v35  ;;  %v7211_v29 = vld [vmem:[%s13434_s0 + $0x268] sm:$0xf] }
 0x23a   :  { %v2833_v34 = vsel %vm2472_vm6, %v2744_v58, 0.0  ;;  %v2390_v17 = vadd.f32 %v2066_v5, %v9850_v33  ;;  %v8542_v1 = vpop.f32.mrf.mxu1  ;;  %8466 = vmatprep.mubr.msk.bf16.mxu0 %vm9369_vm2, %v13451_v35  ;;  %v7269_v10 = vcombine.low %v7211_v29, %v7212_v55 }
 0x23b   :  { %v2834_v37 = vadd.f32 %v2833_v34, %v2832_v47  ;;  %v8368_v8 = vpop.f32.mrf.mxu0  ;;  %v1849_v47 = vsel %vm1790_vm5, %v1846_v14, %v1848_v25  ;;  %v10847_v34 = vld [vmem:[%s13434_s0 + $0x108] sm:$0xff]  }
 0x23c   :  { %2479 = vst.msk [vmem:[#allocation2 + $0x30] sm:$0xff] %vm2472_vm6, %v2390_v17  ;;  %v2571_v33 = vsel %vm2472_vm6, %v2390_v17, 0.0  ;;  %v2745_v23 = vmul.f32 %v2390_v17, %v2390_v17  ;;  %v10838_v2 = vpop.f32.mrf.mxu1  ;;  %v3366_v14 = vrot.slane %v7269_v10, 1 }
 0x23d   :  { %v2572_v21 = vadd.f32 %v2571_v33, %v2570_v26  ;;  %v2069_v46 = vpop.f32.mrf.mxu0 }
 0x23e   :  { %v2835_v58 = vsel %vm2472_vm6, %v2745_v23, 0.0  ;;  %v2391_v5 = vadd.f32 %v2069_v46, %v9866_v43  ;;  %v8543_v1 = vpop.f32.mrf.mxu1  ;;  %v1850_v46 = vrot.slane %v10847_v34, 2  ;;  %v3367_v34 = vsel %vm330_vm3, %v3364_v56, %v3366_v14 }
 0x23f   :  { %v2836_v17 = vadd.f32 %v2835_v58, %v2834_v37  ;;  %v8369_v8 = vpop.f32.mrf.mxu0 }
 0x240   :  { %2480 = vst.msk [vmem:[#allocation2 + $0x38] sm:$0xff] %vm2472_vm6, %v2391_v5  ;;  %v2573_v26 = vsel %vm2472_vm6, %v2391_v5, 0.0  ;;  %v2746_v50 = vmul.f32 %v2391_v5, %v2391_v5  ;;  %v10851_v29 = vpop.f32.mrf.mxu1  ;;  %8641 = vmatmul.mubr.msk.bf16.gmra.mxu1 %vm416_vm4, %v3365_v9  ;;  %v7214_v9 = vld [vmem:[%s13434_s0 + $0x274] sm:$0xf] }
 0x241   :  { %v2574_v43 = vadd.f32 %v2573_v26, %v2572_v21  ;;  %v2074_v55 = vpop.f32.mrf.mxu0  ;;  %8467 = vmatmul.mubr.msk.bf16.gmra.mxu0 %vm416_vm4, %v1849_v47  ;;  %8644 = vmatprep.mubr.msk.bf16.mxu1 %vm9369_vm2, %v13451_v35  ;;  %v7213_v21 = vld [vmem:[%s13434_s0 + $0x270] sm:$0xf] }
 0x242   :  { %v2837_v37 = vsel %vm2472_vm6, %v2746_v50, 0.0  ;;  %v2392_v33 = vadd.f32 %v2074_v55, %v9875_v41  ;;  %v8546_v23 = vpop.f32.mrf.mxu1  ;;  %8470 = vmatprep.mubr.msk.bf16.mxu0 %vm9369_vm2, %v13451_v35  ;;  %v7270_v26 = vcombine.low %v7213_v21, %v7214_v9 }
 0x243   :  { %v2838_v58 = vadd.f32 %v2837_v37, %v2836_v17  ;;  %v8372_v10 = vpop.f32.mrf.mxu0  ;;  %v1851_v17 = vsel %vm1790_vm5, %v1848_v25, %v1850_v46  ;;  %v10879_v37 = vld [vmem:[%s13434_s0 + $0x110] sm:$0xff]  }
 0x244   :  { %2481 = vst.msk [vmem:[#allocation2 + $0x40] sm:$0xff] %vm2472_vm6, %v2392_v33  ;;  %v2575_v41 = vsel %vm2472_vm6, %v2392_v33, 0.0  ;;  %v2747_v5 = vmul.f32 %v2392_v33, %v2392_v33  ;;  %v10870_v1 = vpop.f32.mrf.mxu1  ;;  %v3368_v25 = vrot.slane %v7270_v26, 1 }
 0x245   :  { %v2576_v47 = vadd.f32 %v2575_v41, %v2574_v43  ;;  %v2077_v8 = vpop.f32.mrf.mxu0 }
 0x246   :  { %v2839_v50 = vsel %vm2472_vm6, %v2747_v5, 0.0  ;;  %v2393_v55 = vadd.f32 %v2077_v8, %v9891_v61  ;;  %v8547_v23 = vpop.f32.mrf.mxu1  ;;  %v1852_v8 = vrot.slane %v10879_v37, 2  ;;  %v3369_v37 = vsel %vm330_vm3, %v3366_v14, %v3368_v25 }
 0x247   :  { %v2840_v33 = vadd.f32 %v2839_v50, %v2838_v58  ;;  %v8373_v10 = vpop.f32.mrf.mxu0 }
 0x248   :  { %2482 = vst.msk [vmem:[#allocation2 + $0x48] sm:$0xff] %vm2472_vm6, %v2393_v55  ;;  %v2577_v43 = vsel %vm2472_vm6, %v2393_v55, 0.0  ;;  %v2748_v56 = vmul.f32 %v2393_v55, %v2393_v55  ;;  %v10883_v21 = vpop.f32.mrf.mxu1  ;;  %8645 = vmatmul.mubr.msk.bf16.gmra.mxu1 %vm416_vm4, %v3367_v34  ;;  %v7216_v34 = vld [vmem:[%s13434_s0 + $0x27c] sm:$0xf] }
 0x249   :  { %v2578_v61 = vadd.f32 %v2577_v43, %v2576_v47  ;;  %v2082_v9 = vpop.f32.mrf.mxu0  ;;  %8471 = vmatmul.mubr.msk.bf16.gmra.mxu0 %vm416_vm4, %v1851_v17  ;;  %8648 = vmatprep.mubr.msk.bf16.mxu1 %vm9369_vm2, %v13451_v35  ;;  %v7215_v47 = vld [vmem:[%s13434_s0 + $0x278] sm:$0xf] }
 0x24a   :  { %v2841_v58 = vsel %vm2472_vm6, %v2748_v56, 0.0  ;;  %v2394_v41 = vadd.f32 %v2082_v9, %v9900_v52  ;;  %v8550_v5 = vpop.f32.mrf.mxu1  ;;  %8474 = vmatprep.mubr.msk.bf16.mxu0 %vm9369_vm2, %v13451_v35  ;;  %v7271_v43 = vcombine.low %v7215_v47, %v7216_v34 }
 0x24b   :  { %v2842_v50 = vadd.f32 %v2841_v58, %v2840_v33  ;;  %v8376_v26 = vpop.f32.mrf.mxu0  ;;  %v1853_v33 = vsel %vm1790_vm5, %v1850_v46, %v1852_v8  ;;  %v10911_v58 = vld [vmem:[%s13434_s0 + $0x118] sm:$0xff]  }
 0x24c   :  { %2483 = vst.msk [vmem:[#allocation2 + $0x50] sm:$0xff] %vm2472_vm6, %v2394_v41  ;;  %v2579_v52 = vsel %vm2472_vm6, %v2394_v41, 0.0  ;;  %v2749_v55 = vmul.f32 %v2394_v41, %v2394_v41  ;;  %v10902_v23 = vpop.f32.mrf.mxu1  ;;  %v3370_v46 = vrot.slane %v7271_v43, 1 }
 0x24d   :  { %v2580_v17 = vadd.f32 %v2579_v52, %v2578_v61  ;;  %v2085_v10 = vpop.f32.mrf.mxu0 }
 0x24e   :  { %v2843_v56 = vsel %vm2472_vm6, %v2749_v55, 0.0  ;;  %v2395_v9 = vadd.f32 %v2085_v10, %v9916_v18  ;;  %v8551_v5 = vpop.f32.mrf.mxu1  ;;  %v1854_v10 = vrot.slane %v10911_v58, 2  ;;  %v3371_v58 = vsel %vm330_vm3, %v3368_v25, %v3370_v46 }
 0x24f   :  { %v2844_v41 = vadd.f32 %v2843_v56, %v2842_v50  ;;  %v8377_v26 = vpop.f32.mrf.mxu0 }
 0x250   :  { %2484 = vst.msk [vmem:[#allocation2 + $0x58] sm:$0xff] %vm2472_vm6, %v2395_v9  ;;  %v2581_v61 = vsel %vm2472_vm6, %v2395_v9, 0.0  ;;  %v2750_v14 = vmul.f32 %v2395_v9, %v2395_v9  ;;  %v10915_v47 = vpop.f32.mrf.mxu1  ;;  %8649 = vmatmul.mubr.msk.bf16.gmra.mxu1 %vm416_vm4, %v3369_v37  ;;  %v7218_v37 = vld [vmem:[%s13434_s0 + $0x284] sm:$0xf] }
 0x251   :  { %v2582_v18 = vadd.f32 %v2581_v61, %v2580_v17  ;;  %v2090_v34 = vpop.f32.mrf.mxu0  ;;  %8475 = vmatmul.mubr.msk.bf16.gmra.mxu0 %vm416_vm4, %v1853_v33  ;;  %8652 = vmatprep.mubr.msk.bf16.mxu1 %vm9369_vm2, %v13451_v35  ;;  %v7217_v17 = vld [vmem:[%s13434_s0 + $0x280] sm:$0xf] }
 0x252   :  { %v2845_v50 = vsel %vm2472_vm6, %v2750_v14, 0.0  ;;  %v2396_v52 = vadd.f32 %v2090_v34, %v9925_v6  ;;  %v8554_v55 = vpop.f32.mrf.mxu1  ;;  %8478 = vmatprep.mubr.msk.bf16.mxu0 %vm9369_vm2, %v13451_v35  ;;  %v7272_v61 = vcombine.low %v7217_v17, %v7218_v37 }
 0x253   :  { %v2846_v56 = vadd.f32 %v2845_v50, %v2844_v41  ;;  %v8380_v43 = vpop.f32.mrf.mxu0  ;;  %v1855_v41 = vsel %vm1790_vm5, %v1852_v8, %v1854_v10  ;;  %v10943_v50 = vld [vmem:[%s13434_s0 + $0x120] sm:$0xff]  }
 0x254   :  { %2485 = vst.msk [vmem:[#allocation2 + $0x60] sm:$0xff] %vm2472_vm6, %v2396_v52  ;;  %v2583_v6 = vsel %vm2472_vm6, %v2396_v52, 0.0  ;;  %v2751_v9 = vmul.f32 %v2396_v52, %v2396_v52  ;;  %v10934_v5 = vpop.f32.mrf.mxu1  ;;  %v3372_v8 = vrot.slane %v7272_v61, 1 }
 0x255   :  { %v2584_v33 = vadd.f32 %v2583_v6, %v2582_v18  ;;  %v2093_v26 = vpop.f32.mrf.mxu0 }
 0x256   :  { %v2847_v14 = vsel %vm2472_vm6, %v2751_v9, 0.0  ;;  %v2397_v34 = vadd.f32 %v2093_v26, %v9941_v36  ;;  %v8555_v55 = vpop.f32.mrf.mxu1  ;;  %v1856_v26 = vrot.slane %v10943_v50, 2  ;;  %v3373_v50 = vsel %vm330_vm3, %v3370_v46, %v3372_v8 }
 0x257   :  { %v2848_v52 = vadd.f32 %v2847_v14, %v2846_v56  ;;  %v8381_v43 = vpop.f32.mrf.mxu0 }
 0x258   :  { %2486 = vst.msk [vmem:[#allocation2 + $0x68] sm:$0xff] %vm2472_vm6, %v2397_v34  ;;  %v2585_v18 = vsel %vm2472_vm6, %v2397_v34, 0.0  ;;  %v2752_v25 = vmul.f32 %v2397_v34, %v2397_v34  ;;  %v10947_v17 = vpop.f32.mrf.mxu1  ;;  %8653 = vmatmul.mubr.msk.bf16.gmra.mxu1 %vm416_vm4, %v3371_v58  ;;  %v7220_v58 = vld [vmem:[%s13434_s0 + $0x28c] sm:$0xf] }
 0x259   :  { %v2586_v36 = vadd.f32 %v2585_v18, %v2584_v33  ;;  %v2098_v37 = vpop.f32.mrf.mxu0  ;;  %8479 = vmatmul.mubr.msk.bf16.gmra.mxu0 %vm416_vm4, %v1855_v41  ;;  %8656 = vmatprep.mubr.msk.bf16.mxu1 %vm9369_vm2, %v13451_v35  ;;  %v7219_v33 = vld [vmem:[%s13434_s0 + $0x288] sm:$0xf] }
 0x25a   :  { %v2849_v56 = vsel %vm2472_vm6, %v2752_v25, 0.0  ;;  %v2398_v6 = vadd.f32 %v2098_v37, %v9950_v22  ;;  %v8558_v9 = vpop.f32.mrf.mxu1  ;;  %8482 = vmatprep.mubr.msk.bf16.mxu0 %vm9369_vm2, %v13451_v35  ;;  %v7273_v18 = vcombine.low %v7219_v33, %v7220_v58 }
 0x25b   :  { %v2850_v14 = vadd.f32 %v2849_v56, %v2848_v52  ;;  %v8384_v61 = vpop.f32.mrf.mxu0  ;;  %v1857_v52 = vsel %vm1790_vm5, %v1854_v10, %v1856_v26  ;;  %v10975_v56 = vld [vmem:[%s13434_s0 + $0x128] sm:$0xff]  }
 0x25c   :  { %2487 = vst.msk [vmem:[#allocation2 + $0x70] sm:$0xff] %vm2472_vm6, %v2398_v6  ;;  %v2587_v22 = vsel %vm2472_vm6, %v2398_v6, 0.0  ;;  %v2753_v34 = vmul.f32 %v2398_v6, %v2398_v6  ;;  %v10966_v55 = vpop.f32.mrf.mxu1  ;;  %v3374_v10 = vrot.slane %v7273_v18, 1 }
 0x25d   :  { %v2588_v41 = vadd.f32 %v2587_v22, %v2586_v36  ;;  %v2101_v43 = vpop.f32.mrf.mxu0 }
 0x25e   :  { %v2851_v25 = vsel %vm2472_vm6, %v2753_v34, 0.0  ;;  %v2399_v37 = vadd.f32 %v2101_v43, %v9966_v59  ;;  %v8559_v9 = vpop.f32.mrf.mxu1  ;;  %v1858_v43 = vrot.slane %v10975_v56, 2  ;;  %v3375_v56 = vsel %vm330_vm3, %v3372_v8, %v3374_v10 }
 0x25f   :  { %v2852_v6 = vadd.f32 %v2851_v25, %v2850_v14  ;;  %v8385_v61 = vpop.f32.mrf.mxu0 }
 0x260   :  { %2488 = vst.msk [vmem:[#allocation2 + $0x78] sm:$0xff] %vm2472_vm6, %v2399_v37  ;;  %v2589_v36 = vsel %vm2472_vm6, %v2399_v37, 0.0  ;;  %v2754_v46 = vmul.f32 %v2399_v37, %v2399_v37  ;;  %v10979_v33 = vpop.f32.mrf.mxu1  ;;  %8657 = vmatmul.mubr.msk.bf16.gmra.mxu1 %vm416_vm4, %v3373_v50  ;;  %v7222_v50 = vld [vmem:[%s13434_s0 + $0x294] sm:$0xf] }
 0x261   :  { %v2590_v59 = vadd.f32 %v2589_v36, %v2588_v41  ;;  %v2106_v58 = vpop.f32.mrf.mxu0  ;;  %8483 = vmatmul.mubr.msk.bf16.gmra.mxu0 %vm416_vm4, %v1857_v52  ;;  %8660 = vmatprep.mubr.msk.bf16.mxu1 %vm9369_vm2, %v13451_v35  ;;  %v7221_v41 = vld [vmem:[%s13434_s0 + $0x290] sm:$0xf] }
 0x262   :  { %v2853_v14 = vsel %vm2472_vm6, %v2754_v46, 0.0  ;;  %v2400_v22 = vadd.f32 %v2106_v58, %v9975_v38  ;;  %v8562_v34 = vpop.f32.mrf.mxu1  ;;  %8486 = vmatprep.mubr.msk.bf16.mxu0 %vm9369_vm2, %v13451_v35  ;;  %v7274_v36 = vcombine.low %v7221_v41, %v7222_v50 }
 0x263   :  { %v2854_v25 = vadd.f32 %v2853_v14, %v2852_v6  ;;  %v8388_v18 = vpop.f32.mrf.mxu0  ;;  %v1859_v6 = vsel %vm1790_vm5, %v1856_v26, %v1858_v43  ;;  %v11007_v14 = vld [vmem:[%s13434_s0 + $0x130] sm:$0xff]  }
 0x264   :  { %2489 = vst.msk [vmem:[#allocation2 + $0x80] sm:$0xff] %vm2472_vm6, %v2400_v22  ;;  %v2591_v38 = vsel %vm2472_vm6, %v2400_v22, 0.0  ;;  %v2755_v37 = vmul.f32 %v2400_v22, %v2400_v22  ;;  %v10998_v9 = vpop.f32.mrf.mxu1  ;;  %v3376_v26 = vrot.slane %v7274_v36, 1 }
 0x265   :  { %v2592_v52 = vadd.f32 %v2591_v38, %v2590_v59  ;;  %v2109_v61 = vpop.f32.mrf.mxu0 }
 0x266   :  { %v2855_v46 = vsel %vm2472_vm6, %v2755_v37, 0.0  ;;  %v2401_v58 = vadd.f32 %v2109_v61, %v9991_v19  ;;  %v8563_v34 = vpop.f32.mrf.mxu1  ;;  %v1860_v61 = vrot.slane %v11007_v14, 2  ;;  %v3377_v14 = vsel %vm330_vm3, %v3374_v10, %v3376_v26 }
 0x267   :  { %v2856_v22 = vadd.f32 %v2855_v46, %v2854_v25  ;;  %v8389_v18 = vpop.f32.mrf.mxu0 }
 0x268   :  { %2490 = vst.msk [vmem:[#allocation2 + $0x88] sm:$0xff] %vm2472_vm6, %v2401_v58  ;;  %v2593_v59 = vsel %vm2472_vm6, %v2401_v58, 0.0  ;;  %v2756_v8 = vmul.f32 %v2401_v58, %v2401_v58  ;;  %v11011_v41 = vpop.f32.mrf.mxu1  ;;  %8661 = vmatmul.mubr.msk.bf16.gmra.mxu1 %vm416_vm4, %v3375_v56  ;;  %v7224_v56 = vld [vmem:[%s13434_s0 + $0x29c] sm:$0xf] }
 0x269   :  { %v2594_v19 = vadd.f32 %v2593_v59, %v2592_v52  ;;  %v2114_v50 = vpop.f32.mrf.mxu0  ;;  %8487 = vmatmul.mubr.msk.bf16.gmra.mxu0 %vm416_vm4, %v1859_v6  ;;  %8664 = vmatprep.mubr.msk.bf16.mxu1 %vm9369_vm2, %v13451_v35  ;;  %v7223_v52 = vld [vmem:[%s13434_s0 + $0x298] sm:$0xf] }
 0x26a   :  { %v2857_v25 = vsel %vm2472_vm6, %v2756_v8, 0.0  ;;  %v2402_v38 = vadd.f32 %v2114_v50, %v10000_v57  ;;  %v8566_v37 = vpop.f32.mrf.mxu1  ;;  %8490 = vmatprep.mubr.msk.bf16.mxu0 %vm9369_vm2, %v13451_v35  ;;  %v7275_v59 = vcombine.low %v7223_v52, %v7224_v56 }
 0x26b   :  { %v2858_v46 = vadd.f32 %v2857_v25, %v2856_v22  ;;  %v8392_v36 = vpop.f32.mrf.mxu0  ;;  %v1861_v22 = vsel %vm1790_vm5, %v1858_v43, %v1860_v61  ;;  %v11039_v25 = vld [vmem:[%s13434_s0 + $0x138] sm:$0xff]  }
 0x26c   :  { %2491 = vst.msk [vmem:[#allocation2 + $0x90] sm:$0xff] %vm2472_vm6, %v2402_v38  ;;  %v2595_v57 = vsel %vm2472_vm6, %v2402_v38, 0.0  ;;  %v2757_v58 = vmul.f32 %v2402_v38, %v2402_v38  ;;  %v11030_v34 = vpop.f32.mrf.mxu1  ;;  %v3378_v43 = vrot.slane %v7275_v59, 1 }
 0x26d   :  { %v2596_v6 = vadd.f32 %v2595_v57, %v2594_v19  ;;  %v2117_v18 = vpop.f32.mrf.mxu0 }
 0x26e   :  { %v2859_v8 = vsel %vm2472_vm6, %v2757_v58, 0.0  ;;  %v2403_v50 = vadd.f32 %v2117_v18, %v10016_v42  ;;  %v8567_v37 = vpop.f32.mrf.mxu1  ;;  %v1862_v18 = vrot.slane %v11039_v25, 2  ;;  %v3379_v25 = vsel %vm330_vm3, %v3376_v26, %v3378_v43 }
 0x26f   :  { %v2860_v38 = vadd.f32 %v2859_v8, %v2858_v46  ;;  %v8393_v36 = vpop.f32.mrf.mxu0 }
 0x270   :  { %2492 = vst.msk [vmem:[#allocation2 + $0x98] sm:$0xff] %vm2472_vm6, %v2403_v50  ;;  %v2597_v19 = vsel %vm2472_vm6, %v2403_v50, 0.0  ;;  %v2758_v10 = vmul.f32 %v2403_v50, %v2403_v50  ;;  %v11043_v52 = vpop.f32.mrf.mxu1  ;;  %8665 = vmatmul.mubr.msk.bf16.gmra.mxu1 %vm416_vm4, %v3377_v14  ;;  %v7226_v14 = vld [vmem:[%s13434_s0 + $0x2a4] sm:$0xf] }
 0x271   :  { %v2598_v42 = vadd.f32 %v2597_v19, %v2596_v6  ;;  %v2122_v56 = vpop.f32.mrf.mxu0  ;;  %8491 = vmatmul.mubr.msk.bf16.gmra.mxu0 %vm416_vm4, %v1861_v22  ;;  %8668 = vmatprep.mubr.msk.bf16.mxu1 %vm9369_vm2, %v13451_v35  ;;  %v7225_v6 = vld [vmem:[%s13434_s0 + $0x2a0] sm:$0xf] }
 0x272   :  { %v2861_v46 = vsel %vm2472_vm6, %v2758_v10, 0.0  ;;  %v2404_v57 = vadd.f32 %v2122_v56, %v10025_v13  ;;  %v8570_v58 = vpop.f32.mrf.mxu1  ;;  %8494 = vmatprep.mubr.msk.bf16.mxu0 %vm9369_vm2, %v13451_v35  ;;  %v7276_v19 = vcombine.low %v7225_v6, %v7226_v14 }
 0x273   :  { %v2862_v8 = vadd.f32 %v2861_v46, %v2860_v38  ;;  %v8396_v59 = vpop.f32.mrf.mxu0  ;;  %v1863_v38 = vsel %vm1790_vm5, %v1860_v61, %v1862_v18  ;;  %v11071_v46 = vld [vmem:[%s13434_s0 + $0x140] sm:$0xff]  }
 0x274   :  { %2493 = vst.msk [vmem:[#allocation2 + $0xa0] sm:$0xff] %vm2472_vm6, %v2404_v57  ;;  %v2599_v13 = vsel %vm2472_vm6, %v2404_v57, 0.0  ;;  %v2759_v50 = vmul.f32 %v2404_v57, %v2404_v57  ;;  %v11062_v37 = vpop.f32.mrf.mxu1  ;;  %v3380_v61 = vrot.slane %v7276_v19, 1 }
 0x275   :  { %v2600_v22 = vadd.f32 %v2599_v13, %v2598_v42  ;;  %v2125_v36 = vpop.f32.mrf.mxu0 }
 0x276   :  { %v2863_v10 = vsel %vm2472_vm6, %v2759_v50, 0.0  ;;  %v2405_v56 = vadd.f32 %v2125_v36, %v10041_v3  ;;  %v8571_v58 = vpop.f32.mrf.mxu1  ;;  %v1864_v36 = vrot.slane %v11071_v46, 2  ;;  %v3381_v46 = vsel %vm330_vm3, %v3378_v43, %v3380_v61 }
 0x277   :  { %v2864_v57 = vadd.f32 %v2863_v10, %v2862_v8  ;;  %v8397_v59 = vpop.f32.mrf.mxu0 }
 0x278   :  { %2494 = vst.msk [vmem:[#allocation2 + $0xa8] sm:$0xff] %vm2472_vm6, %v2405_v56  ;;  %v2601_v42 = vsel %vm2472_vm6, %v2405_v56, 0.0  ;;  %v2760_v26 = vmul.f32 %v2405_v56, %v2405_v56  ;;  %v11075_v6 = vpop.f32.mrf.mxu1  ;;  %8669 = vmatmul.mubr.msk.bf16.gmra.mxu1 %vm416_vm4, %v3379_v25  ;;  %v7228_v25 = vld [vmem:[%s13434_s0 + $0x2ac] sm:$0xf] }
 0x279   :  { %v2602_v3 = vadd.f32 %v2601_v42, %v2600_v22  ;;  %v2130_v14 = vpop.f32.mrf.mxu0  ;;  %8495 = vmatmul.mubr.msk.bf16.gmra.mxu0 %vm416_vm4, %v1863_v38  ;;  %8672 = vmatprep.mubr.msk.bf16.mxu1 %vm9369_vm2, %v13451_v35  ;;  %v7227_v22 = vld [vmem:[%s13434_s0 + $0x2a8] sm:$0xf] }
 0x27a   :  { %v2865_v8 = vsel %vm2472_vm6, %v2760_v26, 0.0  ;;  %v2406_v13 = vadd.f32 %v2130_v14, %v10050_v31  ;;  %v8574_v50 = vpop.f32.mrf.mxu1  ;;  %8498 = vmatprep.mubr.msk.bf16.mxu0 %vm9369_vm2, %v13451_v35  ;;  %v7277_v42 = vcombine.low %v7227_v22, %v7228_v25 }
 0x27b   :  { %v2866_v10 = vadd.f32 %v2865_v8, %v2864_v57  ;;  %v8400_v19 = vpop.f32.mrf.mxu0  ;;  %v1865_v57 = vsel %vm1790_vm5, %v1862_v18, %v1864_v36  ;;  %v11103_v8 = vld [vmem:[%s13434_s0 + $0x148] sm:$0xff]  }
 0x27c   :  { %2495 = vst.msk [vmem:[#allocation2 + $0xb0] sm:$0xff] %vm2472_vm6, %v2406_v13  ;;  %v2603_v31 = vsel %vm2472_vm6, %v2406_v13, 0.0  ;;  %v2761_v56 = vmul.f32 %v2406_v13, %v2406_v13  ;;  %v11094_v58 = vpop.f32.mrf.mxu1  ;;  %v3382_v18 = vrot.slane %v7277_v42, 1 }
 0x27d   :  { %v2604_v38 = vadd.f32 %v2603_v31, %v2602_v3  ;;  %v2133_v59 = vpop.f32.mrf.mxu0 }
 0x27e   :  { %v2867_v26 = vsel %vm2472_vm6, %v2761_v56, 0.0  ;;  %v2407_v14 = vadd.f32 %v2133_v59, %v10066_v12  ;;  %v8575_v50 = vpop.f32.mrf.mxu1  ;;  %v1866_v59 = vrot.slane %v11103_v8, 2  ;;  %v3383_v8 = vsel %vm330_vm3, %v3380_v61, %v3382_v18 }
 0x27f   :  { %v2868_v13 = vadd.f32 %v2867_v26, %v2866_v10  ;;  %v8401_v19 = vpop.f32.mrf.mxu0 }
 0x280   :  { %2496 = vst.msk [vmem:[#allocation2 + $0xb8] sm:$0xff] %vm2472_vm6, %v2407_v14  ;;  %v2605_v3 = vsel %vm2472_vm6, %v2407_v14, 0.0  ;;  %v2762_v43 = vmul.f32 %v2407_v14, %v2407_v14  ;;  %v11107_v22 = vpop.f32.mrf.mxu1  ;;  %8673 = vmatmul.mubr.msk.bf16.gmra.mxu1 %vm416_vm4, %v3381_v46  ;;  %v7230_v46 = vld [vmem:[%s13434_s0 + $0x2b4] sm:$0xf] }
 0x281   :  { %v2606_v12 = vadd.f32 %v2605_v3, %v2604_v38  ;;  %v2138_v25 = vpop.f32.mrf.mxu0  ;;  %8499 = vmatmul.mubr.msk.bf16.gmra.mxu0 %vm416_vm4, %v1865_v57  ;;  %8676 = vmatprep.mubr.msk.bf16.mxu1 %vm9369_vm2, %v13451_v35  ;;  %v7229_v38 = vld [vmem:[%s13434_s0 + $0x2b0] sm:$0xf] }
 0x282   :  { %v2869_v10 = vsel %vm2472_vm6, %v2762_v43, 0.0  ;;  %v2408_v31 = vadd.f32 %v2138_v25, %v10075_v51  ;;  %v8578_v56 = vpop.f32.mrf.mxu1  ;;  %8502 = vmatprep.mubr.msk.bf16.mxu0 %vm9369_vm2, %v13451_v35  ;;  %v7278_v3 = vcombine.low %v7229_v38, %v7230_v46 }
 0x283   :  { %v2870_v26 = vadd.f32 %v2869_v10, %v2868_v13  ;;  %v8404_v42 = vpop.f32.mrf.mxu0  ;;  %v1867_v13 = vsel %vm1790_vm5, %v1864_v36, %v1866_v59  ;;  %v11135_v10 = vld [vmem:[%s13434_s0 + $0x150] sm:$0xff]  }
 0x284   :  { %2497 = vst.msk [vmem:[#allocation2 + $0xc0] sm:$0xff] %vm2472_vm6, %v2408_v31  ;;  %v2607_v51 = vsel %vm2472_vm6, %v2408_v31, 0.0  ;;  %v2763_v14 = vmul.f32 %v2408_v31, %v2408_v31  ;;  %v11126_v50 = vpop.f32.mrf.mxu1  ;;  %v3384_v36 = vrot.slane %v7278_v3, 1 }
 0x285   :  { %v2608_v57 = vadd.f32 %v2607_v51, %v2606_v12  ;;  %v2141_v19 = vpop.f32.mrf.mxu0 }
 0x286   :  { %v2871_v43 = vsel %vm2472_vm6, %v2763_v14, 0.0  ;;  %v2409_v25 = vadd.f32 %v2141_v19, %v10091_v54  ;;  %v8579_v56 = vpop.f32.mrf.mxu1  ;;  %v1868_v19 = vrot.slane %v11135_v10, 2  ;;  %v3385_v10 = vsel %vm330_vm3, %v3382_v18, %v3384_v36 }
 0x287   :  { %v2872_v31 = vadd.f32 %v2871_v43, %v2870_v26  ;;  %v8405_v42 = vpop.f32.mrf.mxu0 }
 0x288   :  { %2498 = vst.msk [vmem:[#allocation2 + $0xc8] sm:$0xff] %vm2472_vm6, %v2409_v25  ;;  %v2609_v12 = vsel %vm2472_vm6, %v2409_v25, 0.0  ;;  %v2764_v61 = vmul.f32 %v2409_v25, %v2409_v25  ;;  %v11139_v38 = vpop.f32.mrf.mxu1  ;;  %8677 = vmatmul.mubr.msk.bf16.gmra.mxu1 %vm416_vm4, %v3383_v8  ;;  %v7234_v8 = vld [vmem:[%s13434_s0 + $0x2bc] sm:$0xf] }
 0x289   :  { %v2610_v54 = vadd.f32 %v2609_v12, %v2608_v57  ;;  %v2146_v46 = vpop.f32.mrf.mxu0  ;;  %8503 = vmatmul.mubr.msk.bf16.gmra.mxu0 %vm416_vm4, %v1867_v13  ;;  %8680 = vmatprep.mubr.msk.bf16.mxu1 %vm9369_vm2, %v13451_v35  ;;  %v7231_v57 = vld [vmem:[%s13434_s0 + $0x2b8] sm:$0xf] }
 0x28a   :  { %v2873_v26 = vsel %vm2472_vm6, %v2764_v61, 0.0  ;;  %v2410_v51 = vadd.f32 %v2146_v46, %v10100_v11  ;;  %v8582_v14 = vpop.f32.mrf.mxu1  ;;  %8506 = vmatprep.mubr.msk.bf16.mxu0 %vm9369_vm2, %v13451_v35  ;;  %v7279_v12 = vcombine.low %v7231_v57, %v7234_v8 }
 0x28b   :  { %v2874_v43 = vadd.f32 %v2873_v26, %v2872_v31  ;;  %v8408_v3 = vpop.f32.mrf.mxu0  ;;  %v1869_v31 = vsel %vm1790_vm5, %v1866_v59, %v1868_v19  ;;  %v11167_v26 = vld [vmem:[%s13434_s0 + $0x158] sm:$0xff]  }
 0x28c   :  { %2499 = vst.msk [vmem:[#allocation2 + $0xd0] sm:$0xff] %vm2472_vm6, %v2410_v51  ;;  %v2611_v11 = vsel %vm2472_vm6, %v2410_v51, 0.0  ;;  %v2765_v25 = vmul.f32 %v2410_v51, %v2410_v51  ;;  %v11158_v56 = vpop.f32.mrf.mxu1  ;;  %v3386_v59 = vrot.slane %v7279_v12, 1 }
 0x28d   :  { %v2612_v13 = vadd.f32 %v2611_v11, %v2610_v54  ;;  %v2149_v42 = vpop.f32.mrf.mxu0 }
 0x28e   :  { %v2875_v61 = vsel %vm2472_vm6, %v2765_v25, 0.0  ;;  %v2411_v46 = vadd.f32 %v2149_v42, %v10114_v27  ;;  %v8583_v14 = vpop.f32.mrf.mxu1  ;;  %v1870_v42 = vrot.slane %v11167_v26, 2 }
 0x28f   :  { %v2876_v51 = vadd.f32 %v2875_v61, %v2874_v43  ;;  %v8409_v3 = vpop.f32.mrf.mxu0 }
 0x290   :  { %2500 = vst.msk [vmem:[#allocation2 + $0xd8] sm:$0xff] %vm2472_vm6, %v2411_v46  ;;  %v2613_v54 = vsel %vm2472_vm6, %v2411_v46, 0.0  ;;  %v2766_v18 = vmul.f32 %v2411_v46, %v2411_v46  ;;  %v11171_v57 = vpop.f32.mrf.mxu1  ;;  %8681 = vmatmul.mubr.msk.bf16.gmra.mxu1 %vm416_vm4, %v3385_v10  ;;  %v3387_v3 = vsel %vm330_vm3, %v3384_v36, %v3386_v59 }
 0x291   :  { %v2614_v27 = vadd.f32 %v2613_v54, %v2612_v13  ;;  %v2154_v8 = vpop.f32.mrf.mxu0  ;;  %8507 = vmatmul.mubr.msk.bf16.gmra.mxu0 %vm416_vm4, %v1869_v31  ;;  %8684 = vmatprep.mubr.msk.bf16.mxu1 %vm9369_vm2, %v13451_v35 }
 0x292   :  { %v2877_v43 = vsel %vm2472_vm6, %v2766_v18, 0.0  ;;  %v2412_v11 = vadd.f32 %v2154_v8, %v10122_v44  ;;  %v8586_v25 = vpop.f32.mrf.mxu1  ;;  %8510 = vmatprep.mubr.msk.bf16.mxu0 %vm9369_vm2, %v13451_v35  ;;  %v11190_v44 = vld [vmem:[%s13434_s0 + $0x2c0] sm:$0xff]   ;;  %v1871_v18 = vsel %vm1790_vm5, %v1868_v19, %v1870_v42 }
 0x293   :  { %v2878_v61 = vadd.f32 %v2877_v43, %v2876_v51  ;;  %v8412_v10 = vpop.f32.mrf.mxu0  ;;  %v11198_v8 = vld [vmem:[%s13434_s0 + $0x160] sm:$0xff]   ;;  %v3388_v19 = vrot.slane %v11190_v44, 1 }
 0x294   :  { %2501 = vst.msk [vmem:[#allocation2 + $0xe0] sm:$0xff] %vm2472_vm6, %v2412_v11  ;;  %v2615_v13 = vsel %vm2472_vm6, %v2412_v11, 0.0  ;;  %v2767_v46 = vmul.f32 %v2412_v11, %v2412_v11  ;;  %v11184_v14 = vpop.f32.mrf.mxu1 }
 0x295   :  { %v2616_v12 = vadd.f32 %v2615_v13, %v2614_v27  ;;  %v2157_v31 = vpop.f32.mrf.mxu0 }
 0x296   :  { %v2879_v26 = vsel %vm2472_vm6, %v2767_v46, 0.0  ;;  %v2413_v51 = vadd.f32 %v2157_v31, %v10128_v30  ;;  %v8587_v54 = vpop.f32.mrf.mxu1  ;;  %v1872_v31 = vrot.slane %v11198_v8, 2 }
 0x297   :  { %v2880_v27 = vadd.f32 %v2879_v26, %v2878_v61  ;;  %v8413_v43 = vpop.f32.mrf.mxu0 }
 0x298   :  { %2502 = vst.msk [vmem:[#allocation2 + $0xe8] sm:$0xff] %vm2472_vm6, %v2413_v51  ;;  %v2617_v36 = vsel %vm2472_vm6, %v2413_v51, 0.0  ;;  %v2768_v11 = vmul.f32 %v2413_v51, %v2413_v51  ;;  %v11202_v25 = vpop.f32.mrf.mxu1  ;;  %8685 = vmatmul.mubr.msk.bf16.gmra.mxu1 %vm416_vm4, %v3387_v3  ;;  %v3389_v43 = vsel %vm330_vm3, %v3386_v59, %v3388_v19 }
 0x299   :  { %v2618_v30 = vadd.f32 %v2617_v36, %v2616_v12  ;;  %v2162_v10 = vpop.f32.mrf.mxu0  ;;  %8511 = vmatmul.mubr.msk.bf16.gmra.mxu0 %vm416_vm4, %v1871_v18  ;;  %8688 = vmatprep.mubr.msk.bf16.mxu1 %vm9369_vm2, %v13451_v35 }
 0x29a   :  { %v2881_v61 = vsel %vm2472_vm6, %v2768_v11, 0.0  ;;  %v2414_v13 = vadd.f32 %v2162_v10, %v10138_v60  ;;  %v8590_v46 = vpop.f32.mrf.mxu1  ;;  %8514 = vmatprep.mubr.msk.bf16.mxu0 %vm9369_vm2, %v13451_v35  ;;  %v11222_v60 = vld [vmem:[%s13434_s0 + $0x2c8] ss:$0 sps:$4 sm:$0x77]   ;;  %v1873_v11 = vsel %vm1790_vm5, %v1870_v42, %v1872_v31 }
 0x29b   :  { %v2882_v3 = vadd.f32 %v2881_v61, %v2880_v27  ;;  %v8416_v12 = vpop.f32.mrf.mxu0  ;;  %v11230_v10 = vld [vmem:[%s13434_s0 + $0x168] ss:$0 sps:$4 sm:$0xff]   ;;  %v3390_v42 = vrot.slane %v11222_v60, 1 }
 0x29c   :  { %2503 = vst.msk [vmem:[#allocation2 + $0xf0] sm:$0xff] %vm2472_vm6, %v2414_v13  ;;  %v2619_v26 = vsel %vm2472_vm6, %v2414_v13, 0.0  ;;  %v2769_v51 = vmul.f32 %v2414_v13, %v2414_v13  ;;  %v11216_v54 = vpop.f32.mrf.mxu1 }
 0x29d   :  { %v2620_v44 = vadd.f32 %v2619_v26, %v2618_v30  ;;  %v2165_v18 = vpop.f32.mrf.mxu0 }
 0x29e   :  { %v2883_v8 = vsel %vm2472_vm6, %v2769_v51, 0.0  ;;  %v2415_v27 = vadd.f32 %v2165_v18, %v10144_v16  ;;  %v8591_v36 = vpop.f32.mrf.mxu1  ;;  %v1874_v18 = vrot.slane %v11230_v10, 2 }
 0x29f   :  { %v2884_v30 = vadd.f32 %v2883_v8, %v2882_v3  ;;  %v8417_v61 = vpop.f32.mrf.mxu0 }
 0x2a0   :  { %2504 = vst.msk [vmem:[#allocation2 + $0xf8] sm:$0xff] %vm2472_vm6, %v2415_v27  ;;  %v2621_v59 = vsel %vm2472_vm6, %v2415_v27, 0.0  ;;  %v2770_v13 = vmul.f32 %v2415_v27, %v2415_v27  ;;  %v11234_v46 = vpop.f32.mrf.mxu1  ;;  %8689 = vmatmul.mubr.msk.bf16.gmra.mxu1 %vm416_vm4, %v3389_v43  ;;  %v3391_v61 = vsel %vm330_vm3, %v3388_v19, %v3390_v42  ;;  %v1875_v10 = vsel %vm1790_vm5, %v1872_v31, %v1874_v18 }
 0x2a1   :  { %v2622_v16 = vadd.f32 %v2621_v59, %v2620_v44  ;;  %v2170_v12 = vpop.f32.mrf.mxu0  ;;  %8515 = vmatmul.mubr.msk.bf16.gmra.mxu0 %vm416_vm4, %v1873_v11  ;;  %8692 = vmatprep.mubr.msk.bf16.mxu1 %vm9369_vm2, %v13451_v35 }
 0x2a2   :  { %v2885_v3 = vsel %vm2472_vm6, %v2770_v13, 0.0  ;;  %v2416_v26 = vadd.f32 %v2170_v12, %v10154_v24  ;;  %v8594_v51 = vpop.f32.mrf.mxu1  ;;  %8518 = vmatprep.mubr.msk.bf16.mxu0 %vm9369_vm2, %v13451_v35 }
 0x2a3   :  { %v2886_v43 = vadd.f32 %v2885_v3, %v2884_v30  ;;  %v8420_v44 = vpop.f32.mrf.mxu0 }
 0x2a4   :  { %2505 = vst.msk [vmem:[#allocation2 + $0x100] sm:$0xff] %vm2472_vm6, %v2416_v26  ;;  %v2623_v8 = vsel %vm2472_vm6, %v2416_v26, 0.0  ;;  %v2771_v27 = vmul.f32 %v2416_v26, %v2416_v26  ;;  %v11248_v36 = vpop.f32.mrf.mxu1 }
 0x2a5   :  { %v2624_v60 = vadd.f32 %v2623_v8, %v2622_v16  ;;  %v2173_v11 = vpop.f32.mrf.mxu0 }
 0x2a6   :  { %v2887_v24 = vsel %vm2472_vm6, %v2771_v27, 0.0  ;;  %v2417_v59 = vadd.f32 %v2173_v11, %v10160_v45  ;;  %v8595_v13 = vpop.f32.mrf.mxu1 }
 0x2a7   :  { %v2888_v30 = vadd.f32 %v2887_v24, %v2886_v43  ;;  %v8421_v12 = vpop.f32.mrf.mxu0 }
 0x2a8   :  { %2506 = vst.msk [vmem:[#allocation2 + $0x108] sm:$0xff] %vm2472_vm6, %v2417_v59  ;;  %v2625_v3 = vsel %vm2472_vm6, %v2417_v59, 0.0  ;;  %v2772_v26 = vmul.f32 %v2417_v59, %v2417_v59  ;;  %v11256_v51 = vpop.f32.mrf.mxu1  ;;  %8693 = vmatmul.mubr.msk.bf16.gmra.mxu1 %vm416_vm4, %v3391_v61  ;;  %v9232_v59 = vld [vmem:[%s13434_s0 + $0x184] sm:$0xfc]  }
 0x2a9   :  { %v2626_v16 = vadd.f32 %v2625_v3, %v2624_v60  ;;  %v2178_v19 = vpop.f32.mrf.mxu0  ;;  %8519 = vmatmul.mubr.msk.bf16.gmra.mxu0 %vm416_vm4, %v1875_v10  ;;  %8696 = vmatprep.mubr.msk.bf16.mxu1 %vm9369_vm2, %v13451_v35 }
 0x2aa   :  { %v2889_v45 = vsel %vm2472_vm6, %v2772_v26, 0.0  ;;  %v2418_v31 = vadd.f32 %v2178_v19, %v10170_v15  ;;  %v8598_v43 = vpop.f32.mrf.mxu1  ;;  %8522 = vmatprep.mubr.msk.bf16.mxu0 %vm9369_vm2, %v13451_v35  ;;  %v9233_v15 = vld [vmem:[%s13434_s0 + $0x18c] sm:$0xff]  }
 0x2ab   :  { %v2890_v44 = vadd.f32 %v2889_v45, %v2888_v30  ;;  %v8424_v8 = vpop.f32.mrf.mxu0  ;;  %v4761_v43 = vrot.slane %v9233_v15, 2  ;;  %v9231_v15 = vld [vmem:[%s13434_s0 + $0x16c] sm:$0xff]  }
 0x2ac   :  { %2507 = vst.msk [vmem:[#allocation2 + $0x110] sm:$0xff] %vm2472_vm6, %v2418_v31  ;;  %v2627_v27 = vsel %vm2472_vm6, %v2418_v31, 0.0  ;;  %v2773_v60 = vmul.f32 %v2418_v31, %v2418_v31  ;;  %v11268_v11 = vpop.f32.mrf.mxu1 }
 0x2ad   :  { %v2628_v61 = vadd.f32 %v2627_v27, %v2626_v16  ;;  %v2181_v24 = vpop.f32.mrf.mxu0 }
 0x2ae   :  { %v2891_v13 = vsel %vm2472_vm6, %v2773_v60, 0.0  ;;  %v2419_v10 = vadd.f32 %v2181_v24, %v10192_v28  ;;  %v8599_v30 = vpop.f32.mrf.mxu1  ;;  %v4760_v28 = vrot.slane %v9232_v59, 2 }
 0x2af   :  { %v2892_v12 = vadd.f32 %v2891_v13, %v2890_v44  ;;  %v8425_v3 = vpop.f32.mrf.mxu0 }
 0x2b0   :  { %2508 = vst.msk [vmem:[#allocation2 + $0x118] sm:$0xff] %vm2472_vm6, %v2419_v10  ;;  %v2629_v26 = vsel %vm2472_vm6, %v2419_v10, 0.0  ;;  %v2774_v16 = vmul.f32 %v2419_v10, %v2419_v10  ;;  %v11280_v19 = vpop.f32.mrf.mxu1  ;;  %8697 = vmatmul.mubr.msk.bf16.gmra.mxu1 %vm416_vm4, %v3390_v42  ;;  %v11301_v10 = vld [vmem:[%s13434_s0 + $0x194] sm:$0xff]  }
 0x2b1   :  { %v2630_v45 = vadd.f32 %v2629_v26, %v2628_v61  ;;  %v2186_v31 = vpop.f32.mrf.mxu0  ;;  %8523 = vmatmul.mubr.msk.bf16.gmra.mxu0 %vm416_vm4, %v1874_v18  ;;  %8876 = vmatprep.mubr.msk.bf16.mxu1 %vm9369_vm2, %v13451_v35 }
 0x2b2   :  { %v2893_v44 = vsel %vm2472_vm6, %v2774_v16, 0.0  ;;  %v2420_v8 = vadd.f32 %v2186_v31, %v10198_v49  ;;  %v8602_v27 = vpop.f32.mrf.mxu1  ;;  %8702 = vmatprep.mubr.msk.bf16.mxu0 %vm9369_vm2, %v13451_v35  ;;  %v4762_v49 = vsel %vm1790_vm5, %v4760_v28, %v4761_v43 }
 0x2b3   :  { %v2894_v60 = vadd.f32 %v2893_v44, %v2892_v12  ;;  %v8428_v24 = vpop.f32.mrf.mxu0 }
 0x2b4   :  { %2509 = vst.msk [vmem:[#allocation2 + $0x120] sm:$0xff] %vm2472_vm6, %v2420_v8  ;;  %v2631_v42 = vsel %vm2472_vm6, %v2420_v8, 0.0  ;;  %v2775_v18 = vmul.f32 %v2420_v8, %v2420_v8  ;;  %v11292_v61 = vpop.f32.mrf.mxu1 }
 0x2b5   :  { %v2632_v13 = vadd.f32 %v2631_v42, %v2630_v45  ;;  %v2189_v59 = vpop.f32.mrf.mxu0 }
 0x2b6   :  { %v2895_v30 = vsel %vm2472_vm6, %v2775_v18, 0.0  ;;  %v2421_v12 = vadd.f32 %v2189_v59, %v10216_v4  ;;  %v8603_v3 = vpop.f32.mrf.mxu1  ;;  %v4763_v4 = vrot.slane %v11301_v10, 2  ;;  %v9234_v10 = vld [vmem:[%s13434_s0 + $0x174] sm:$0xff]  }
 0x2b7   :  { %v2896_v26 = vadd.f32 %v2895_v30, %v2894_v60  ;;  %v8429_v16 = vpop.f32.mrf.mxu0 }
 0x2b8   :  { %2510 = vst.msk [vmem:[#allocation2 + $0x128] sm:$0xff] %vm2472_vm6, %v2421_v12  ;;  %v2633_v45 = vsel %vm2472_vm6, %v2421_v12, 0.0  ;;  %v2776_v31 = vmul.f32 %v2421_v12, %v2421_v12  ;;  %v11307_v44 = vpop.f32.mrf.mxu1  ;;  %8877 = vmatmul.mubr.msk.bf16.vlgmr.msra.gmra.mxu1 %vm416_vm4, %v4762_v49  ;;  %v11329_v12 = vld [vmem:[%s13434_s0 + $0x19c] sm:$0xff]  }
 0x2b9   :  { %v2634_v28 = vadd.f32 %v2633_v45, %v2632_v13  ;;  %v2194_v8 = vpop.f32.mrf.mxu0  ;;  %8703 = vmatmul.mubr.msk.bf16.vlgmr.msra.gmra.mxu0 %vm416_vm4, %v9231_v15  ;;  %8880 = vmatprep.mubr.msk.bf16.mxu1 %vm9369_vm2, %v13451_v35 }
 0x2ba   :  { %v2897_v27 = vsel %vm2472_vm6, %v2776_v31, 0.0  ;;  %v2422_v60 = vadd.f32 %v2194_v8, %v10225_v40  ;;  %v8606_v24 = vpop.f32.mrf.mxu1  ;;  %8706 = vmatprep.mubr.msk.bf16.mxu0 %vm9369_vm2, %v13451_v35  ;;  %v4764_v40 = vsel %vm1790_vm5, %v4761_v43, %v4763_v4 }
 0x2bb   :  { %v2898_v42 = vadd.f32 %v2897_v27, %v2896_v26  ;;  %v8432_v18 = vpop.f32.mrf.mxu0 }
 0x2bc   :  { %2511 = vst.msk [vmem:[#allocation2 + $0x130] sm:$0xff] %vm2472_vm6, %v2422_v60  ;;  %v2635_v13 = vsel %vm2472_vm6, %v2422_v60, 0.0  ;;  %v2777_v59 = vmul.f32 %v2422_v60, %v2422_v60  ;;  %v11320_v15 = vpop.f32.mrf.mxu1 }
 0x2bd   :  { %13492 = vst [vmem:[#allocation48_spill] sm:$0xff] %v11320_v15  ;;  %v2636_v49 = vadd.f32 %v2635_v13, %v2634_v28  ;;  %v2197_v30 = vpop.f32.mrf.mxu0 }
 0x2be   :  { %v2899_v3 = vsel %vm2472_vm6, %v2777_v59, 0.0  ;;  %v2423_v26 = vadd.f32 %v2197_v30, %v10238_v7  ;;  %v8607_v16 = vpop.f32.mrf.mxu1  ;;  %v4765_v7 = vrot.slane %v11329_v12, 2  ;;  %v9279_v12 = vld [vmem:[%s13434_s0 + $0x17c] sm:$0xf] }
 0x2bf   :  { %v2900_v45 = vadd.f32 %v2899_v3, %v2898_v42  ;;  %v8433_v31 = vpop.f32.mrf.mxu0 }
 0x2c0   :  { %2512 = vst.msk [vmem:[#allocation2 + $0x138] sm:$0xff] %vm2472_vm6, %v2423_v26  ;;  %v2637_v28 = vsel %vm2472_vm6, %v2423_v26, 0.0  ;;  %v2778_v8 = vmul.f32 %v2423_v26, %v2423_v26  ;;  %v11335_v27 = vpop.f32.mrf.mxu1  ;;  %8881 = vmatmul.mubr.msk.bf16.gmra.mxu1 %vm416_vm4, %v4764_v40  ;;  %v4766_v16 = vsel %vm1790_vm5, %v4763_v4, %v4765_v7 }
 0x2c1   :  { %13493 = vst [vmem:[#allocation49_spill] sm:$0xff] %v11335_v27  ;;  %v2638_v43 = vadd.f32 %v2637_v28, %v2636_v49  ;;  %v2202_v60 = vpop.f32.mrf.mxu0  ;;  %8707 = vmatmul.mubr.msk.bf16.gmra.mxu0 %vm416_vm4, %v9234_v10  ;;  %8884 = vmatprep.mubr.msk.bf16.mxu1 %vm9369_vm2, %v13451_v35 }
 0x2c2   :  { %v2901_v24 = vsel %vm2472_vm6, %v2778_v8, 0.0  ;;  %v2424_v42 = vadd.f32 %v2202_v60, %v10248_v20  ;;  %v8610_v18 = vpop.f32.mrf.mxu1  ;;  %8710 = vmatprep.mubr.msk.bf16.mxu0 %vm9369_vm2, %v13451_v35  ;;  %v9280_v20 = vld [vmem:[%s13434_s0 + $0x180] sm:$0xf] }
 0x2c3   :  { %v2902_v13 = vadd.f32 %v2901_v24, %v2900_v45  ;;  %v8436_v59 = vpop.f32.mrf.mxu0  ;;  %v7327_v26 = vcombine.low %v9279_v12, %v9280_v20  ;;  %v11360_v45 = vld [vmem:[%s13434_s0 + $0x1a4] sm:$0xff]  }
 0x2c4   :  { %2513 = vst.msk [vmem:[#allocation2 + $0x140] sm:$0xff] %vm2472_vm6, %v2424_v42  ;;  %v2639_v49 = vsel %vm2472_vm6, %v2424_v42, 0.0  ;;  %v2779_v30 = vmul.f32 %v2424_v42, %v2424_v42  ;;  %v11348_v10 = vpop.f32.mrf.mxu1 }
 0x2c5   :  { %13494 = vst [vmem:[#allocation50_spill] sm:$0xff] %v11348_v10  ;;  %v2640_v40 = vadd.f32 %v2639_v49, %v2638_v43  ;;  %v2205_v3 = vpop.f32.mrf.mxu0 }
 0x2c6   :  { %v2903_v31 = vsel %vm2472_vm6, %v2779_v30, 0.0  ;;  %v2425_v28 = vadd.f32 %v2205_v3, %v10259_v39  ;;  %v8611_v8 = vpop.f32.mrf.mxu1  ;;  %v4767_v39 = vrot.slane %v11360_v45, 2  ;;  %v9281_v45 = vld [vmem:[%s13434_s0 + $0x184] sm:$0xf] }
 0x2c7   :  { %v2904_v43 = vadd.f32 %v2903_v31, %v2902_v13  ;;  %v8437_v60 = vpop.f32.mrf.mxu0 }
 0x2c8   :  { %2514 = vst.msk [vmem:[#allocation2 + $0x148] sm:$0xff] %vm2472_vm6, %v2425_v28  ;;  %v2641_v24 = vsel %vm2472_vm6, %v2425_v28, 0.0  ;;  %v2780_v42 = vmul.f32 %v2425_v28, %v2425_v28  ;;  %v11366_v18 = vpop.f32.mrf.mxu1  ;;  %8885 = vmatmul.mubr.msk.bf16.gmra.mxu1 %vm416_vm4, %v4766_v16  ;;  %v4768_v8 = vsel %vm1790_vm5, %v4765_v7, %v4767_v39 }
 0x2c9   :  { %13495 = vst [vmem:[#allocation51_spill] sm:$0xff] %v11366_v18  ;;  %v2642_v4 = vadd.f32 %v2641_v24, %v2640_v40  ;;  %v2210_v59 = vpop.f32.mrf.mxu0  ;;  %8711 = vmatmul.mubr.msk.bf16.gmra.mxu0 %vm416_vm4, %v7327_v26  ;;  %8888 = vmatprep.mubr.msk.bf16.mxu1 %vm9369_vm2, %v13451_v35 }
 0x2ca   :  { %v2905_v13 = vsel %vm2472_vm6, %v2780_v42, 0.0  ;;  %v2426_v49 = vadd.f32 %v2210_v59, %v10269_v32  ;;  %v8614_v30 = vpop.f32.mrf.mxu1  ;;  %8714 = vmatprep.mubr.msk.bf16.mxu0 %vm9369_vm2, %v13451_v35  ;;  %v9282_v32 = vld [vmem:[%s13434_s0 + $0x188] sm:$0xf] }
 0x2cb   :  { %v2906_v3 = vadd.f32 %v2905_v13, %v2904_v43  ;;  %v8440_v12 = vpop.f32.mrf.mxu0  ;;  %v7328_v28 = vcombine.low %v9281_v45, %v9282_v32  ;;  %v11391_v43 = vld [vmem:[%s13434_s0 + $0x1ac] sm:$0xff]  }
 0x2cc   :  { %2515 = vst.msk [vmem:[#allocation2 + $0x150] sm:$0xff] %vm2472_vm6, %v2426_v49  ;;  %v2643_v40 = vsel %vm2472_vm6, %v2426_v49, 0.0  ;;  %v2781_v20 = vmul.f32 %v2426_v49, %v2426_v49  ;;  %v11379_v26 = vpop.f32.mrf.mxu1 }
 0x2cd   :  { %13496 = vst [vmem:[#allocation52_spill] sm:$0xff] %v11379_v26  ;;  %v2644_v16 = vadd.f32 %v2643_v40, %v2642_v4  ;;  %v2213_v31 = vpop.f32.mrf.mxu0  ;;  %v13498_v40 = vld [vmem:[#allocation4_spill] sm:$0xff] }
 0x2ce   :  { %v2907_v60 = vsel %vm2472_vm6, %v2781_v20, 0.0  ;;  %v2427_v24 = vadd.f32 %v2213_v31, %v10280_v53  ;;  %v8615_v42 = vpop.f32.mrf.mxu1  ;;  %v4769_v53 = vrot.slane %v11391_v43, 2  ;;  %v9283_v43 = vld [vmem:[%s13434_s0 + $0x18c] sm:$0xf] }
 0x2cf   :  { %v2908_v4 = vadd.f32 %v2907_v60, %v2906_v3  ;;  %v8441_v59 = vpop.f32.mrf.mxu0  ;;  %v9284_v42 = vld [vmem:[%s13434_s0 + $0x190] sm:$0xf] }
 0x2d0   :  { %2516 = vst.msk [vmem:[#allocation2 + $0x158] sm:$0xff] %vm2472_vm6, %v2427_v24  ;;  %v2645_v13 = vsel %vm2472_vm6, %v2427_v24, 0.0  ;;  %v2782_v49 = vmul.f32 %v2427_v24, %v2427_v24  ;;  %v11397_v30 = vpop.f32.mrf.mxu1  ;;  %8889 = vmatmul.mubr.msk.bf16.gmra.mxu1 %vm416_vm4, %v4768_v8  ;;  %v7329_v59 = vcombine.low %v9283_v43, %v9284_v42 }
 0x2d1   :  { %13497 = vst [vmem:[#allocation53_spill] sm:$0xff] %v11397_v30  ;;  %v2646_v7 = vadd.f32 %v2645_v13, %v2644_v16  ;;  %v2218_v12 = vpop.f32.mrf.mxu0  ;;  %8715 = vmatmul.mubr.msk.bf16.gmra.mxu0 %vm416_vm4, %v7328_v28  ;;  %8892 = vmatprep.mubr.msk.bf16.mxu1 %vm9369_vm2, %v13451_v35  ;;  %v11422_v13 = vld [vmem:[%s13434_s0 + $0x1b4] sm:$0xff]  }
 0x2d2   :  { %v2909_v3 = vsel %vm2472_vm6, %v2782_v49, 0.0  ;;  %v2428_v20 = vadd.f32 %v2218_v12, %v13498_v40  ;;  %v8618_v31 = vpop.f32.mrf.mxu1  ;;  %8718 = vmatprep.mubr.msk.bf16.mxu0 %vm9369_vm2, %v13451_v35 }
 0x2d3   :  { %v2910_v45 = vadd.f32 %v2909_v3, %v2908_v4  ;;  %v8444_v32 = vpop.f32.mrf.mxu0  ;;  %v4770_v4 = vsel %vm1790_vm5, %v4767_v39, %v4769_v53 }
 0x2d4   :  { %2517 = vst.msk [vmem:[#allocation2 + $0x160] sm:$0xff] %vm2472_vm6, %v2428_v20  ;;  %v2647_v16 = vsel %vm2472_vm6, %v2428_v20, 0.0  ;;  %v2783_v28 = vmul.f32 %v2428_v20, %v2428_v20  ;;  %v11410_v8 = vpop.f32.mrf.mxu1 }
 0x2d5   :  { %13499 = vst [vmem:[#allocation4_spill] sm:$0xff] %v11410_v8  ;;  %v2648_v60 = vadd.f32 %v2647_v16, %v2646_v7  ;;  %v2221_v24 = vpop.f32.mrf.mxu0  ;;  %v13500_v7 = vld [vmem:[#allocation5_spill] sm:$0xff] }
 0x2d6   :  { %v2911_v49 = vsel %vm2472_vm6, %v2783_v28, 0.0  ;;  %v2429_v12 = vadd.f32 %v2221_v24, %v13500_v7  ;;  %v8619_v3 = vpop.f32.mrf.mxu1  ;;  %v4771_v28 = vrot.slane %v11422_v13, 2  ;;  %v13502_v24 = vld [vmem:[#allocation6_spill] sm:$0xff]  ;;  %v9285_v13 = vld [vmem:[%s13434_s0 + $0x194] sm:$0xf] }
 0x2d7   :  { %v2912_v40 = vadd.f32 %v2911_v49, %v2910_v45  ;;  %v8445_v20 = vpop.f32.mrf.mxu0 }
 0x2d8   :  { %2518 = vst.msk [vmem:[#allocation2 + $0x168] sm:$0xff] %vm2472_vm6, %v2429_v12  ;;  %v2649_v31 = vsel %vm2472_vm6, %v2429_v12, 0.0  ;;  %v2784_v32 = vmul.f32 %v2429_v12, %v2429_v12  ;;  %v11428_v16 = vpop.f32.mrf.mxu1  ;;  %8893 = vmatmul.mubr.msk.bf16.gmra.mxu1 %vm416_vm4, %v4770_v4 }
 0x2d9   :  { %13501 = vst [vmem:[#allocation5_spill] sm:$0xff] %v11428_v16  ;;  %v2650_v39 = vadd.f32 %v2649_v31, %v2648_v60  ;;  %v2226_v43 = vpop.f32.mrf.mxu0  ;;  %8719 = vmatmul.mubr.msk.bf16.gmra.mxu0 %vm416_vm4, %v7329_v59  ;;  %8896 = vmatprep.mubr.msk.bf16.mxu1 %vm9369_vm2, %v13451_v35  ;;  %v9286_v31 = vld [vmem:[%s13434_s0 + $0x198] sm:$0xf] }
 0x2da   :  { %v2913_v45 = vsel %vm2472_vm6, %v2784_v32, 0.0  ;;  %v2430_v42 = vadd.f32 %v2226_v43, %v13502_v24  ;;  %v8622_v49 = vpop.f32.mrf.mxu1  ;;  %8722 = vmatprep.mubr.msk.bf16.mxu0 %vm9369_vm2, %v13451_v35  ;;  %v7330_v32 = vcombine.low %v9285_v13, %v9286_v31  ;;  %v11453_v43 = vld [vmem:[%s13434_s0 + $0x1bc] sm:$0xff]  }
 0x2db   :  { %v2914_v7 = vadd.f32 %v2913_v45, %v2912_v40  ;;  %v8448_v12 = vpop.f32.mrf.mxu0  ;;  %v4772_v40 = vsel %vm1790_vm5, %v4769_v53, %v4771_v28 }
 0x2dc   :  { %2519 = vst.msk [vmem:[#allocation2 + $0x170] sm:$0xff] %vm2472_vm6, %v2430_v42  ;;  %v2651_v60 = vsel %vm2472_vm6, %v2430_v42, 0.0  ;;  %v2785_v59 = vmul.f32 %v2430_v42, %v2430_v42  ;;  %v11441_v4 = vpop.f32.mrf.mxu1 }
 0x2dd   :  { %13503 = vst [vmem:[#allocation6_spill] sm:$0xff] %v11441_v4  ;;  %v2652_v3 = vadd.f32 %v2651_v60, %v2650_v39  ;;  %v2229_v20 = vpop.f32.mrf.mxu0  ;;  %v13504_v39 = vld [vmem:[#allocation7_spill] sm:$0xff] }
 0x2de   :  { %v2915_v45 = vsel %vm2472_vm6, %v2785_v59, 0.0  ;;  %v2431_v24 = vadd.f32 %v2229_v20, %v13504_v39  ;;  %v8623_v42 = vpop.f32.mrf.mxu1  ;;  %v4773_v59 = vrot.slane %v11453_v43, 2  ;;  %v13506_v20 = vld [vmem:[#allocation8_spill] sm:$0xff]  ;;  %v9288_v43 = vld [vmem:[%s13434_s0 + $0x1a0] sm:$0xf] }
 0x2df   :  { %v2916_v49 = vadd.f32 %v2915_v45, %v2914_v7  ;;  %v8449_v12 = vpop.f32.mrf.mxu0 }
 0x2e0   :  { %2520 = vst.msk [vmem:[#allocation2 + $0x178] sm:$0xff] %vm2472_vm6, %v2431_v24  ;;  %v2653_v60 = vsel %vm2472_vm6, %v2431_v24, 0.0  ;;  %v2786_v4 = vmul.f32 %v2431_v24, %v2431_v24  ;;  %v11459_v13 = vpop.f32.mrf.mxu1  ;;  %8897 = vmatmul.mubr.msk.bf16.gmra.mxu1 %vm416_vm4, %v4772_v40 }
 0x2e1   :  { %13505 = vst [vmem:[#allocation7_spill] sm:$0xff] %v11459_v13  ;;  %v2654_v53 = vadd.f32 %v2653_v60, %v2652_v3  ;;  %v2234_v31 = vpop.f32.mrf.mxu0  ;;  %8723 = vmatmul.mubr.msk.bf16.gmra.mxu0 %vm416_vm4, %v7330_v32  ;;  %8900 = vmatprep.mubr.msk.bf16.mxu1 %vm9369_vm2, %v13451_v35 }
 0x2e2   :  { %v2917_v7 = vsel %vm2472_vm6, %v2786_v4, 0.0  ;;  %v2432_v45 = vadd.f32 %v2234_v31, %v13506_v20  ;;  %v8626_v39 = vpop.f32.mrf.mxu1  ;;  %8726 = vmatprep.mubr.msk.bf16.mxu0 %vm9369_vm2, %v13451_v35  ;;  %v9287_v4 = vld [vmem:[%s13434_s0 + $0x19c] sm:$0xf] }
 0x2e3   :  { %v2918_v24 = vadd.f32 %v2917_v7, %v2916_v49  ;;  %v8452_v42 = vpop.f32.mrf.mxu0  ;;  %v7331_v31 = vcombine.low %v9287_v4, %v9288_v43  ;;  %v4774_v49 = vsel %vm1790_vm5, %v4771_v28, %v4773_v59  ;;  %v11484_v7 = vld [vmem:[%s13434_s0 + $0x1c4] sm:$0xff]  }
 0x2e4   :  { %2521 = vst.msk [vmem:[#allocation2 + $0x180] sm:$0xff] %vm2472_vm6, %v2432_v45  ;;  %v2655_v3 = vsel %vm2472_vm6, %v2432_v45, 0.0  ;;  %v2787_v32 = vmul.f32 %v2432_v45, %v2432_v45  ;;  %v11472_v40 = vpop.f32.mrf.mxu1 }
 0x2e5   :  { %13507 = vst [vmem:[#allocation8_spill] sm:$0xff] %v11472_v40  ;;  %v2656_v12 = vadd.f32 %v2655_v3, %v2654_v53  ;;  %v2237_v60 = vpop.f32.mrf.mxu0  ;;  %v13508_v53 = vld [vmem:[#allocation9_spill] sm:$0xff] }
 0x2e6   :  { %v2919_v20 = vsel %vm2472_vm6, %v2787_v32, 0.0  ;;  %v2433_v45 = vadd.f32 %v2237_v60, %v13508_v53  ;;  %v8627_v39 = vpop.f32.mrf.mxu1  ;;  %v4775_v32 = vrot.slane %v11484_v7, 2  ;;  %v13510_v60 = vld [vmem:[#allocation10_spill] sm:$0xff] }
 0x2e7   :  { %v2920_v42 = vadd.f32 %v2919_v20, %v2918_v24  ;;  %v8453_v3 = vpop.f32.mrf.mxu0  ;;  %v9290_v7 = vld [vmem:[%s13434_s0 + $0x1a8] sm:$0xf] }
 0x2e8   :  { %2522 = vst.msk [vmem:[#allocation2 + $0x188] sm:$0xff] %vm2472_vm6, %v2433_v45  ;;  %v2657_v40 = vsel %vm2472_vm6, %v2433_v45, 0.0  ;;  %v2788_v13 = vmul.f32 %v2433_v45, %v2433_v45  ;;  %v11490_v4 = vpop.f32.mrf.mxu1  ;;  %8901 = vmatmul.mubr.msk.bf16.gmra.mxu1 %vm416_vm4, %v4774_v49 }
 0x2e9   :  { %13509 = vst [vmem:[#allocation9_spill] sm:$0xff] %v11490_v4  ;;  %v2658_v28 = vadd.f32 %v2657_v40, %v2656_v12  ;;  %v2242_v43 = vpop.f32.mrf.mxu0  ;;  %8727 = vmatmul.mubr.msk.bf16.gmra.mxu0 %vm416_vm4, %v7331_v31  ;;  %8904 = vmatprep.mubr.msk.bf16.mxu1 %vm9369_vm2, %v13451_v35 }
 0x2ea   :  { %v2921_v24 = vsel %vm2472_vm6, %v2788_v13, 0.0  ;;  %v2434_v20 = vadd.f32 %v2242_v43, %v13510_v60  ;;  %v8630_v53 = vpop.f32.mrf.mxu1  ;;  %8730 = vmatprep.mubr.msk.bf16.mxu0 %vm9369_vm2, %v13451_v35  ;;  %v9289_v13 = vld [vmem:[%s13434_s0 + $0x1a4] sm:$0xf] }
 0x2eb   :  { %v2922_v45 = vadd.f32 %v2921_v24, %v2920_v42  ;;  %v8456_v39 = vpop.f32.mrf.mxu0  ;;  %v7332_v43 = vcombine.low %v9289_v13, %v9290_v7  ;;  %v4776_v42 = vsel %vm1790_vm5, %v4773_v59, %v4775_v32  ;;  %v11515_v24 = vld [vmem:[%s13434_s0 + $0x1cc] sm:$0xff]  }
 0x2ec   :  { %2523 = vst.msk [vmem:[#allocation2 + $0x190] sm:$0xff] %vm2472_vm6, %v2434_v20  ;;  %v2659_v40 = vsel %vm2472_vm6, %v2434_v20, 0.0  ;;  %v2789_v12 = vmul.f32 %v2434_v20, %v2434_v20  ;;  %v11503_v31 = vpop.f32.mrf.mxu1 }
 0x2ed   :  { %13511 = vst [vmem:[#allocation10_spill] sm:$0xff] %v11503_v31  ;;  %v2660_v49 = vadd.f32 %v2659_v40, %v2658_v28  ;;  %v2245_v3 = vpop.f32.mrf.mxu0  ;;  %v13512_v28 = vld [vmem:[#allocation11_spill] sm:$0xff] }
 0x2ee   :  { %v2923_v60 = vsel %vm2472_vm6, %v2789_v12, 0.0  ;;  %v2435_v20 = vadd.f32 %v2245_v3, %v13512_v28  ;;  %v8631_v53 = vpop.f32.mrf.mxu1  ;;  %v4777_v12 = vrot.slane %v11515_v24, 2  ;;  %v13514_v3 = vld [vmem:[#allocation12_spill] sm:$0xff]  ;;  %v9291_v24 = vld [vmem:[%s13434_s0 + $0x1ac] sm:$0xf] }
 0x2ef   :  { %v2924_v39 = vadd.f32 %v2923_v60, %v2922_v45  ;;  %v8457_v40 = vpop.f32.mrf.mxu0 }
 0x2f0   :  { %2524 = vst.msk [vmem:[#allocation2 + $0x198] sm:$0xff] %vm2472_vm6, %v2435_v20  ;;  %v2661_v31 = vsel %vm2472_vm6, %v2435_v20, 0.0  ;;  %v2790_v4 = vmul.f32 %v2435_v20, %v2435_v20  ;;  %v11521_v13 = vpop.f32.mrf.mxu1  ;;  %8905 = vmatmul.mubr.msk.bf16.gmra.mxu1 %vm416_vm4, %v4776_v42 }
 0x2f1   :  { %13513 = vst [vmem:[#allocation11_spill] sm:$0xff] %v11521_v13  ;;  %v2662_v59 = vadd.f32 %v2661_v31, %v2660_v49  ;;  %v2250_v7 = vpop.f32.mrf.mxu0  ;;  %8731 = vmatmul.mubr.msk.bf16.gmra.mxu0 %vm416_vm4, %v7332_v43  ;;  %8908 = vmatprep.mubr.msk.bf16.mxu1 %vm9369_vm2, %v13451_v35 }
 0x2f2   :  { %v2925_v45 = vsel %vm2472_vm6, %v2790_v4, 0.0  ;;  %v2436_v60 = vadd.f32 %v2250_v7, %v13514_v3  ;;  %v8634_v28 = vpop.f32.mrf.mxu1  ;;  %8734 = vmatprep.mubr.msk.bf16.mxu0 %vm9369_vm2, %v13451_v35  ;;  %v4778_v7 = vsel %vm1790_vm5, %v4775_v32, %v4777_v12 }
 0x2f3   :  { %v2926_v20 = vadd.f32 %v2925_v45, %v2924_v39  ;;  %v8460_v53 = vpop.f32.mrf.mxu0  ;;  %v9292_v39 = vld [vmem:[%s13434_s0 + $0x1b0] sm:$0xf]  ;;  %v11548_v45 = vld [vmem:[%s13434_s0 + $0x1d4] sm:$0xff]  }
 0x2f4   :  { %2525 = vst.msk [vmem:[#allocation2 + $0x1a0] sm:$0xff] %vm2472_vm6, %v2436_v60  ;;  %v2663_v31 = vsel %vm2472_vm6, %v2436_v60, 0.0  ;;  %v2791_v49 = vmul.f32 %v2436_v60, %v2436_v60  ;;  %v11534_v43 = vpop.f32.mrf.mxu1  ;;  %v7333_v40 = vcombine.low %v9291_v24, %v9292_v39 }
 0x2f5   :  { %13515 = vst [vmem:[#allocation12_spill] sm:$0xff] %v11534_v43  ;;  %v2664_v4 = vadd.f32 %v2663_v31, %v2662_v59  ;;  %v2253_v42 = vpop.f32.mrf.mxu0  ;;  %v13516_v59 = vld [vmem:[#allocation13_spill] sm:$0xff] }
 0x2f6   :  { %v2927_v3 = vsel %vm2472_vm6, %v2791_v49, 0.0  ;;  %v2437_v60 = vadd.f32 %v2253_v42, %v13516_v59  ;;  %v8635_v28 = vpop.f32.mrf.mxu1  ;;  %v4779_v49 = vrot.slane %v11548_v45, 2  ;;  %v13518_v42 = vld [vmem:[#allocation14_spill] sm:$0xff]  ;;  %v9294_v45 = vld [vmem:[%s13434_s0 + $0x1b8] sm:$0xf] }
 0x2f7   :  { %v2928_v53 = vadd.f32 %v2927_v3, %v2926_v20  ;;  %v8461_v31 = vpop.f32.mrf.mxu0 }
 0x2f8   :  { %2526 = vst.msk [vmem:[#allocation2 + $0x1a8] sm:$0xff] %vm2472_vm6, %v2437_v60  ;;  %v2665_v43 = vsel %vm2472_vm6, %v2437_v60, 0.0  ;;  %v2792_v13 = vmul.f32 %v2437_v60, %v2437_v60  ;;  %v11554_v24 = vpop.f32.mrf.mxu1  ;;  %8909 = vmatmul.mubr.msk.bf16.gmra.mxu1 %vm416_vm4, %v4778_v7 }
 0x2f9   :  { %13517 = vst [vmem:[#allocation13_spill] sm:$0xff] %v11554_v24  ;;  %v2666_v32 = vadd.f32 %v2665_v43, %v2664_v4  ;;  %v2258_v39 = vpop.f32.mrf.mxu0  ;;  %8735 = vmatmul.mubr.msk.bf16.gmra.mxu0 %vm416_vm4, %v7333_v40  ;;  %8912 = vmatprep.mubr.msk.bf16.mxu1 %vm9369_vm2, %v13451_v35 }
 0x2fa   :  { %v2929_v20 = vsel %vm2472_vm6, %v2792_v13, 0.0  ;;  %v2438_v3 = vadd.f32 %v2258_v39, %v13518_v42  ;;  %v8638_v59 = vpop.f32.mrf.mxu1  ;;  %8738 = vmatprep.mubr.msk.bf16.mxu0 %vm9369_vm2, %v13451_v35  ;;  %v9293_v13 = vld [vmem:[%s13434_s0 + $0x1b4] sm:$0xf] }
 0x2fb   :  { %v2930_v60 = vadd.f32 %v2929_v20, %v2928_v53  ;;  %v8464_v28 = vpop.f32.mrf.mxu0  ;;  %v7334_v39 = vcombine.low %v9293_v13, %v9294_v45  ;;  %v4780_v53 = vsel %vm1790_vm5, %v4777_v12, %v4779_v49  ;;  %v11579_v20 = vld [vmem:[%s13434_s0 + $0x1dc] sm:$0xff]  }
 0x2fc   :  { %2527 = vst.msk [vmem:[#allocation2 + $0x1b0] sm:$0xff] %vm2472_vm6, %v2438_v3  ;;  %v2667_v43 = vsel %vm2472_vm6, %v2438_v3, 0.0  ;;  %v2793_v4 = vmul.f32 %v2438_v3, %v2438_v3  ;;  %v11567_v40 = vpop.f32.mrf.mxu1 }
 0x2fd   :  { %13519 = vst [vmem:[#allocation14_spill] sm:$0xff] %v11567_v40  ;;  %v2668_v7 = vadd.f32 %v2667_v43, %v2666_v32  ;;  %v2261_v31 = vpop.f32.mrf.mxu0  ;;  %v13520_v32 = vld [vmem:[#allocation15_spill] sm:$0xff] }
 0x2fe   :  { %v2931_v42 = vsel %vm2472_vm6, %v2793_v4, 0.0  ;;  %v2439_v3 = vadd.f32 %v2261_v31, %v13520_v32  ;;  %v8639_v59 = vpop.f32.mrf.mxu1  ;;  %v4781_v4 = vrot.slane %v11579_v20, 2  ;;  %v13522_v31 = vld [vmem:[#allocation16_spill] sm:$0xff]  ;;  %v9296_v20 = vld [vmem:[%s13434_s0 + $0x1c0] sm:$0xf] }
 0x2ff   :  { %v2932_v28 = vadd.f32 %v2931_v42, %v2930_v60  ;;  %v8465_v43 = vpop.f32.mrf.mxu0 }
 0x300   :  { %2528 = vst.msk [vmem:[#allocation2 + $0x1b8] sm:$0xff] %vm2472_vm6, %v2439_v3  ;;  %v2669_v40 = vsel %vm2472_vm6, %v2439_v3, 0.0  ;;  %v2794_v24 = vmul.f32 %v2439_v3, %v2439_v3  ;;  %v11585_v13 = vpop.f32.mrf.mxu1  ;;  %8913 = vmatmul.mubr.msk.bf16.gmra.mxu1 %vm416_vm4, %v4780_v53 }
 0x301   :  { %13521 = vst [vmem:[#allocation15_spill] sm:$0xff] %v11585_v13  ;;  %v2670_v12 = vadd.f32 %v2669_v40, %v2668_v7  ;;  %v2266_v45 = vpop.f32.mrf.mxu0  ;;  %8739 = vmatmul.mubr.msk.bf16.gmra.mxu0 %vm416_vm4, %v7334_v39  ;;  %8916 = vmatprep.mubr.msk.bf16.mxu1 %vm9369_vm2, %v13451_v35 }
 0x302   :  { %v2933_v60 = vsel %vm2472_vm6, %v2794_v24, 0.0  ;;  %v2440_v42 = vadd.f32 %v2266_v45, %v13522_v31  ;;  %v8642_v32 = vpop.f32.mrf.mxu1  ;;  %8742 = vmatprep.mubr.msk.bf16.mxu0 %vm9369_vm2, %v13451_v35  ;;  %v9295_v24 = vld [vmem:[%s13434_s0 + $0x1bc] sm:$0xf] }
 0x303   :  { %v2934_v3 = vadd.f32 %v2933_v60, %v2932_v28  ;;  %v8468_v59 = vpop.f32.mrf.mxu0  ;;  %v7335_v45 = vcombine.low %v9295_v24, %v9296_v20  ;;  %v4782_v28 = vsel %vm1790_vm5, %v4779_v49, %v4781_v4  ;;  %v11610_v60 = vld [vmem:[%s13434_s0 + $0x1e4] sm:$0xff]  }
 0x304   :  { %2529 = vst.msk [vmem:[#allocation2 + $0x1c0] sm:$0xff] %vm2472_vm6, %v2440_v42  ;;  %v2671_v40 = vsel %vm2472_vm6, %v2440_v42, 0.0  ;;  %v2795_v7 = vmul.f32 %v2440_v42, %v2440_v42  ;;  %v11598_v39 = vpop.f32.mrf.mxu1 }
 0x305   :  { %13523 = vst [vmem:[#allocation16_spill] sm:$0xff] %v11598_v39  ;;  %v2672_v53 = vadd.f32 %v2671_v40, %v2670_v12  ;;  %v2269_v43 = vpop.f32.mrf.mxu0  ;;  %v13524_v12 = vld [vmem:[#allocation17_spill] sm:$0xff] }
 0x306   :  { %v2935_v31 = vsel %vm2472_vm6, %v2795_v7, 0.0  ;;  %v2441_v42 = vadd.f32 %v2269_v43, %v13524_v12  ;;  %v8643_v32 = vpop.f32.mrf.mxu1  ;;  %v4783_v7 = vrot.slane %v11610_v60, 2  ;;  %v13526_v43 = vld [vmem:[#allocation18_spill] sm:$0xff] }
 0x307   :  { %v2936_v59 = vadd.f32 %v2935_v31, %v2934_v3  ;;  %v8469_v40 = vpop.f32.mrf.mxu0  ;;  %v9298_v60 = vld [vmem:[%s13434_s0 + $0x1c8] sm:$0xf] }
 0x308   :  { %2530 = vst.msk [vmem:[#allocation2 + $0x1c8] sm:$0xff] %vm2472_vm6, %v2441_v42  ;;  %v2673_v39 = vsel %vm2472_vm6, %v2441_v42, 0.0  ;;  %v2796_v13 = vmul.f32 %v2441_v42, %v2441_v42  ;;  %v11616_v24 = vpop.f32.mrf.mxu1  ;;  %8917 = vmatmul.mubr.msk.bf16.gmra.mxu1 %vm416_vm4, %v4782_v28 }
 0x309   :  { %13525 = vst [vmem:[#allocation17_spill] sm:$0xff] %v11616_v24  ;;  %v2674_v49 = vadd.f32 %v2673_v39, %v2672_v53  ;;  %v2274_v20 = vpop.f32.mrf.mxu0  ;;  %8743 = vmatmul.mubr.msk.bf16.gmra.mxu0 %vm416_vm4, %v7335_v45  ;;  %8920 = vmatprep.mubr.msk.bf16.mxu1 %vm9369_vm2, %v13451_v35 }
 0x30a   :  { %v2937_v3 = vsel %vm2472_vm6, %v2796_v13, 0.0  ;;  %v2442_v31 = vadd.f32 %v2274_v20, %v13526_v43  ;;  %v8646_v12 = vpop.f32.mrf.mxu1  ;;  %8746 = vmatprep.mubr.msk.bf16.mxu0 %vm9369_vm2, %v13451_v35  ;;  %v9297_v13 = vld [vmem:[%s13434_s0 + $0x1c4] sm:$0xf] }
 0x30b   :  { %v2938_v42 = vadd.f32 %v2937_v3, %v2936_v59  ;;  %v8472_v32 = vpop.f32.mrf.mxu0  ;;  %v7336_v20 = vcombine.low %v9297_v13, %v9298_v60  ;;  %v4784_v59 = vsel %vm1790_vm5, %v4781_v4, %v4783_v7  ;;  %v11641_v3 = vld [vmem:[%s13434_s0 + $0x1ec] sm:$0xff]  }
 0x30c   :  { %2531 = vst.msk [vmem:[#allocation2 + $0x1d0] sm:$0xff] %vm2472_vm6, %v2442_v31  ;;  %v2675_v39 = vsel %vm2472_vm6, %v2442_v31, 0.0  ;;  %v2797_v53 = vmul.f32 %v2442_v31, %v2442_v31  ;;  %v11629_v45 = vpop.f32.mrf.mxu1 }
 0x30d   :  { %13527 = vst [vmem:[#allocation18_spill] sm:$0xff] %v11629_v45  ;;  %v2676_v28 = vadd.f32 %v2675_v39, %v2674_v49  ;;  %v2277_v40 = vpop.f32.mrf.mxu0  ;;  %v13528_v49 = vld [vmem:[#allocation19_spill] sm:$0xff] }
 0x30e   :  { %v2939_v43 = vsel %vm2472_vm6, %v2797_v53, 0.0  ;;  %v2443_v31 = vadd.f32 %v2277_v40, %v13528_v49  ;;  %v8647_v12 = vpop.f32.mrf.mxu1  ;;  %v4785_v53 = vrot.slane %v11641_v3, 2  ;;  %v13530_v40 = vld [vmem:[#allocation20_spill] sm:$0xff] }
 0x30f   :  { %v2940_v32 = vadd.f32 %v2939_v43, %v2938_v42  ;;  %v8473_v39 = vpop.f32.mrf.mxu0  ;;  %v9300_v3 = vld [vmem:[%s13434_s0 + $0x1d0] sm:$0xf] }
 0x310   :  { %2532 = vst.msk [vmem:[#allocation2 + $0x1d8] sm:$0xff] %vm2472_vm6, %v2443_v31  ;;  %v2677_v45 = vsel %vm2472_vm6, %v2443_v31, 0.0  ;;  %v2798_v24 = vmul.f32 %v2443_v31, %v2443_v31  ;;  %v11647_v13 = vpop.f32.mrf.mxu1  ;;  %8921 = vmatmul.mubr.msk.bf16.gmra.mxu1 %vm416_vm4, %v4784_v59 }
 0x311   :  { %13529 = vst [vmem:[#allocation19_spill] sm:$0xff] %v11647_v13  ;;  %v2678_v4 = vadd.f32 %v2677_v45, %v2676_v28  ;;  %v2282_v60 = vpop.f32.mrf.mxu0  ;;  %8747 = vmatmul.mubr.msk.bf16.gmra.mxu0 %vm416_vm4, %v7336_v20  ;;  %8924 = vmatprep.mubr.msk.bf16.mxu1 %vm9369_vm2, %v13451_v35 }
 0x312   :  { %v2941_v42 = vsel %vm2472_vm6, %v2798_v24, 0.0  ;;  %v2444_v43 = vadd.f32 %v2282_v60, %v13530_v40  ;;  %v8650_v49 = vpop.f32.mrf.mxu1  ;;  %8750 = vmatprep.mubr.msk.bf16.mxu0 %vm9369_vm2, %v13451_v35  ;;  %v9299_v24 = vld [vmem:[%s13434_s0 + $0x1cc] sm:$0xf] }
 0x313   :  { %v2942_v31 = vadd.f32 %v2941_v42, %v2940_v32  ;;  %v8476_v12 = vpop.f32.mrf.mxu0  ;;  %v7337_v60 = vcombine.low %v9299_v24, %v9300_v3  ;;  %v4786_v32 = vsel %vm1790_vm5, %v4783_v7, %v4785_v53  ;;  %v11672_v42 = vld [vmem:[%s13434_s0 + $0x1f4] sm:$0xff]  }
 0x314   :  { %2533 = vst.msk [vmem:[#allocation2 + $0x1e0] sm:$0xff] %vm2472_vm6, %v2444_v43  ;;  %v2679_v45 = vsel %vm2472_vm6, %v2444_v43, 0.0  ;;  %v2799_v28 = vmul.f32 %v2444_v43, %v2444_v43  ;;  %v11660_v20 = vpop.f32.mrf.mxu1 }
 0x315   :  { %13531 = vst [vmem:[#allocation20_spill] sm:$0xff] %v11660_v20  ;;  %v2680_v59 = vadd.f32 %v2679_v45, %v2678_v4  ;;  %v2285_v39 = vpop.f32.mrf.mxu0  ;;  %v13532_v4 = vld [vmem:[#allocation21_spill] sm:$0xff] }
 0x316   :  { %v2943_v40 = vsel %vm2472_vm6, %v2799_v28, 0.0  ;;  %v2445_v43 = vadd.f32 %v2285_v39, %v13532_v4  ;;  %v8651_v49 = vpop.f32.mrf.mxu1  ;;  %v4787_v28 = vrot.slane %v11672_v42, 2  ;;  %v13534_v39 = vld [vmem:[#allocation22_spill] sm:$0xff]  ;;  %v9302_v42 = vld [vmem:[%s13434_s0 + $0x1d8] sm:$0xf] }
 0x317   :  { %v2944_v12 = vadd.f32 %v2943_v40, %v2942_v31  ;;  %v8477_v45 = vpop.f32.mrf.mxu0 }
 0x318   :  { %2534 = vst.msk [vmem:[#allocation2 + $0x1e8] sm:$0xff] %vm2472_vm6, %v2445_v43  ;;  %v2681_v20 = vsel %vm2472_vm6, %v2445_v43, 0.0  ;;  %v2800_v13 = vmul.f32 %v2445_v43, %v2445_v43  ;;  %v11678_v24 = vpop.f32.mrf.mxu1  ;;  %8925 = vmatmul.mubr.msk.bf16.gmra.mxu1 %vm416_vm4, %v4786_v32 }
 0x319   :  { %13533 = vst [vmem:[#allocation21_spill] sm:$0xff] %v11678_v24  ;;  %v2682_v7 = vadd.f32 %v2681_v20, %v2680_v59  ;;  %v2290_v3 = vpop.f32.mrf.mxu0  ;;  %8751 = vmatmul.mubr.msk.bf16.gmra.mxu0 %vm416_vm4, %v7337_v60  ;;  %8928 = vmatprep.mubr.msk.bf16.mxu1 %vm9369_vm2, %v13451_v35 }
 0x31a   :  { %v2945_v31 = vsel %vm2472_vm6, %v2800_v13, 0.0  ;;  %v2446_v40 = vadd.f32 %v2290_v3, %v13534_v39  ;;  %v8654_v4 = vpop.f32.mrf.mxu1  ;;  %8754 = vmatprep.mubr.msk.bf16.mxu0 %vm9369_vm2, %v13451_v35  ;;  %v9301_v13 = vld [vmem:[%s13434_s0 + $0x1d4] sm:$0xf] }
 0x31b   :  { %v2946_v43 = vadd.f32 %v2945_v31, %v2944_v12  ;;  %v8480_v49 = vpop.f32.mrf.mxu0  ;;  %v7338_v3 = vcombine.low %v9301_v13, %v9302_v42  ;;  %v4788_v12 = vsel %vm1790_vm5, %v4785_v53, %v4787_v28  ;;  %v11703_v31 = vld [vmem:[%s13434_s0 + $0x1fc] sm:$0xff]  }
 0x31c   :  { %2535 = vst.msk [vmem:[#allocation2 + $0x1f0] sm:$0xff] %vm2472_vm6, %v2446_v40  ;;  %v2683_v20 = vsel %vm2472_vm6, %v2446_v40, 0.0  ;;  %v2801_v59 = vmul.f32 %v2446_v40, %v2446_v40  ;;  %v11691_v60 = vpop.f32.mrf.mxu1 }
 0x31d   :  { %13535 = vst [vmem:[#allocation22_spill] sm:$0xff] %v11691_v60  ;;  %v2684_v32 = vadd.f32 %v2683_v20, %v2682_v7  ;;  %v2293_v45 = vpop.f32.mrf.mxu0  ;;  %v13536_v7 = vld [vmem:[#allocation23_spill] sm:$0xff] }
 0x31e   :  { %v2947_v39 = vsel %vm2472_vm6, %v2801_v59, 0.0  ;;  %v2447_v40 = vadd.f32 %v2293_v45, %v13536_v7  ;;  %v8655_v4 = vpop.f32.mrf.mxu1  ;;  %v4789_v59 = vrot.slane %v11703_v31, 2  ;;  %v13538_v45 = vld [vmem:[#allocation24_spill] sm:$0xff]  ;;  %v9304_v31 = vld [vmem:[%s13434_s0 + $0x1e0] sm:$0xf] }
 0x31f   :  { %v2948_v49 = vadd.f32 %v2947_v39, %v2946_v43  ;;  %v8481_v20 = vpop.f32.mrf.mxu0 }
 0x320   :  { %2536 = vst.msk [vmem:[#allocation2 + $0x1f8] sm:$0xff] %vm2472_vm6, %v2447_v40  ;;  %v2685_v60 = vsel %vm2472_vm6, %v2447_v40, 0.0  ;;  %v2802_v24 = vmul.f32 %v2447_v40, %v2447_v40  ;;  %v11709_v13 = vpop.f32.mrf.mxu1  ;;  %8929 = vmatmul.mubr.msk.bf16.gmra.mxu1 %vm416_vm4, %v4788_v12 }
 0x321   :  { %13537 = vst [vmem:[#allocation23_spill] sm:$0xff] %v11709_v13  ;;  %v2686_v53 = vadd.f32 %v2685_v60, %v2684_v32  ;;  %v2298_v42 = vpop.f32.mrf.mxu0  ;;  %8755 = vmatmul.mubr.msk.bf16.gmra.mxu0 %vm416_vm4, %v7338_v3  ;;  %8932 = vmatprep.mubr.msk.bf16.mxu1 %vm9369_vm2, %v13451_v35 }
 0x322   :  { %v2949_v43 = vsel %vm2472_vm6, %v2802_v24, 0.0  ;;  %v2448_v39 = vadd.f32 %v2298_v42, %v13538_v45  ;;  %v8658_v7 = vpop.f32.mrf.mxu1  ;;  %8758 = vmatprep.mubr.msk.bf16.mxu0 %vm9369_vm2, %v13451_v35  ;;  %v9303_v24 = vld [vmem:[%s13434_s0 + $0x1dc] sm:$0xf] }
 0x323   :  { %v2950_v40 = vadd.f32 %v2949_v43, %v2948_v49  ;;  %v8484_v4 = vpop.f32.mrf.mxu0  ;;  %v7339_v42 = vcombine.low %v9303_v24, %v9304_v31  ;;  %v4790_v49 = vsel %vm1790_vm5, %v4787_v28, %v4789_v59  ;;  %v11734_v43 = vld [vmem:[%s13434_s0 + $0x204] sm:$0xff]  }
 0x324   :  { %2537 = vst.msk [vmem:[#allocation2 + $0x200] sm:$0xff] %vm2472_vm6, %v2448_v39  ;;  %v2687_v60 = vsel %vm2472_vm6, %v2448_v39, 0.0  ;;  %v2803_v32 = vmul.f32 %v2448_v39, %v2448_v39  ;;  %v11722_v3 = vpop.f32.mrf.mxu1 }
 0x325   :  { %13539 = vst [vmem:[#allocation24_spill] sm:$0xff] %v11722_v3  ;;  %v2688_v12 = vadd.f32 %v2687_v60, %v2686_v53  ;;  %v2301_v20 = vpop.f32.mrf.mxu0  ;;  %v13540_v53 = vld [vmem:[#allocation25_spill] sm:$0xff] }
 0x326   :  { %v2951_v45 = vsel %vm2472_vm6, %v2803_v32, 0.0  ;;  %v2449_v39 = vadd.f32 %v2301_v20, %v13540_v53  ;;  %v8659_v7 = vpop.f32.mrf.mxu1  ;;  %v4791_v32 = vrot.slane %v11734_v43, 2  ;;  %v13542_v20 = vld [vmem:[#allocation26_spill] sm:$0xff] }
 0x327   :  { %v2952_v4 = vadd.f32 %v2951_v45, %v2950_v40  ;;  %v8485_v60 = vpop.f32.mrf.mxu0  ;;  %v9306_v43 = vld [vmem:[%s13434_s0 + $0x1e8] sm:$0xf] }
 0x328   :  { %2538 = vst.msk [vmem:[#allocation2 + $0x208] sm:$0xff] %vm2472_vm6, %v2449_v39  ;;  %v2689_v3 = vsel %vm2472_vm6, %v2449_v39, 0.0  ;;  %v2804_v13 = vmul.f32 %v2449_v39, %v2449_v39  ;;  %v11740_v24 = vpop.f32.mrf.mxu1  ;;  %8933 = vmatmul.mubr.msk.bf16.gmra.mxu1 %vm416_vm4, %v4790_v49 }
 0x329   :  { %13541 = vst [vmem:[#allocation25_spill] sm:$0xff] %v11740_v24  ;;  %v2690_v28 = vadd.f32 %v2689_v3, %v2688_v12  ;;  %v2306_v31 = vpop.f32.mrf.mxu0  ;;  %8759 = vmatmul.mubr.msk.bf16.gmra.mxu0 %vm416_vm4, %v7339_v42  ;;  %8936 = vmatprep.mubr.msk.bf16.mxu1 %vm9369_vm2, %v13451_v35 }
 0x32a   :  { %v2953_v40 = vsel %vm2472_vm6, %v2804_v13, 0.0  ;;  %v2450_v45 = vadd.f32 %v2306_v31, %v13542_v20  ;;  %v8662_v53 = vpop.f32.mrf.mxu1  ;;  %8762 = vmatprep.mubr.msk.bf16.mxu0 %vm9369_vm2, %v13451_v35  ;;  %v9305_v13 = vld [vmem:[%s13434_s0 + $0x1e4] sm:$0xf] }
 0x32b   :  { %v2954_v39 = vadd.f32 %v2953_v40, %v2952_v4  ;;  %v8488_v7 = vpop.f32.mrf.mxu0  ;;  %v7340_v31 = vcombine.low %v9305_v13, %v9306_v43  ;;  %v4792_v4 = vsel %vm1790_vm5, %v4789_v59, %v4791_v32  ;;  %v11765_v40 = vld [vmem:[%s13434_s0 + $0x20c] sm:$0xff]  }
 0x32c   :  { %2539 = vst.msk [vmem:[#allocation2 + $0x210] sm:$0xff] %vm2472_vm6, %v2450_v45  ;;  %v2691_v3 = vsel %vm2472_vm6, %v2450_v45, 0.0  ;;  %v2805_v12 = vmul.f32 %v2450_v45, %v2450_v45  ;;  %v11753_v42 = vpop.f32.mrf.mxu1 }
 0x32d   :  { %13543 = vst [vmem:[#allocation26_spill] sm:$0xff] %v11753_v42  ;;  %v2692_v49 = vadd.f32 %v2691_v3, %v2690_v28  ;;  %v2309_v60 = vpop.f32.mrf.mxu0  ;;  %v13544_v28 = vld [vmem:[#allocation27_spill] sm:$0xff] }
 0x32e   :  { %v2955_v20 = vsel %vm2472_vm6, %v2805_v12, 0.0  ;;  %v2451_v45 = vadd.f32 %v2309_v60, %v13544_v28  ;;  %v8663_v53 = vpop.f32.mrf.mxu1  ;;  %v4793_v12 = vrot.slane %v11765_v40, 2  ;;  %v13546_v60 = vld [vmem:[#allocation28_spill] sm:$0xff] }
 0x32f   :  { %v2956_v7 = vadd.f32 %v2955_v20, %v2954_v39  ;;  %v8489_v3 = vpop.f32.mrf.mxu0  ;;  %v9308_v40 = vld [vmem:[%s13434_s0 + $0x1f0] sm:$0xf] }
 0x330   :  { %2540 = vst.msk [vmem:[#allocation2 + $0x218] sm:$0xff] %vm2472_vm6, %v2451_v45  ;;  %v2693_v42 = vsel %vm2472_vm6, %v2451_v45, 0.0  ;;  %v2806_v24 = vmul.f32 %v2451_v45, %v2451_v45  ;;  %v11771_v13 = vpop.f32.mrf.mxu1  ;;  %8937 = vmatmul.mubr.msk.bf16.gmra.mxu1 %vm416_vm4, %v4792_v4 }
 0x331   :  { %13545 = vst [vmem:[#allocation27_spill] sm:$0xff] %v11771_v13  ;;  %v2694_v59 = vadd.f32 %v2693_v42, %v2692_v49  ;;  %v2314_v43 = vpop.f32.mrf.mxu0  ;;  %8763 = vmatmul.mubr.msk.bf16.gmra.mxu0 %vm416_vm4, %v7340_v31  ;;  %8940 = vmatprep.mubr.msk.bf16.mxu1 %vm9369_vm2, %v13451_v35 }
 0x332   :  { %v2957_v39 = vsel %vm2472_vm6, %v2806_v24, 0.0  ;;  %v2452_v20 = vadd.f32 %v2314_v43, %v13546_v60  ;;  %v8666_v28 = vpop.f32.mrf.mxu1  ;;  %8766 = vmatprep.mubr.msk.bf16.mxu0 %vm9369_vm2, %v13451_v35  ;;  %v9307_v24 = vld [vmem:[%s13434_s0 + $0x1ec] sm:$0xf] }
 0x333   :  { %v2958_v45 = vadd.f32 %v2957_v39, %v2956_v7  ;;  %v8492_v53 = vpop.f32.mrf.mxu0  ;;  %v7341_v43 = vcombine.low %v9307_v24, %v9308_v40  ;;  %v4794_v7 = vsel %vm1790_vm5, %v4791_v32, %v4793_v12  ;;  %v11796_v39 = vld [vmem:[%s13434_s0 + $0x214] sm:$0xff]  }
 0x334   :  { %2541 = vst.msk [vmem:[#allocation2 + $0x220] sm:$0xff] %vm2472_vm6, %v2452_v20  ;;  %v2695_v42 = vsel %vm2472_vm6, %v2452_v20, 0.0  ;;  %v2807_v49 = vmul.f32 %v2452_v20, %v2452_v20  ;;  %v11784_v31 = vpop.f32.mrf.mxu1 }
 0x335   :  { %13547 = vst [vmem:[#allocation28_spill] sm:$0xff] %v11784_v31  ;;  %v2696_v4 = vadd.f32 %v2695_v42, %v2694_v59  ;;  %v2317_v3 = vpop.f32.mrf.mxu0  ;;  %v13548_v59 = vld [vmem:[#allocation29_spill] sm:$0xff] }
 0x336   :  { %v2959_v60 = vsel %vm2472_vm6, %v2807_v49, 0.0  ;;  %v2453_v20 = vadd.f32 %v2317_v3, %v13548_v59  ;;  %v8667_v28 = vpop.f32.mrf.mxu1  ;;  %v4795_v49 = vrot.slane %v11796_v39, 2  ;;  %v13550_v3 = vld [vmem:[#allocation30_spill] sm:$0xff]  ;;  %v9310_v39 = vld [vmem:[%s13434_s0 + $0x1f8] sm:$0xf] }
 0x337   :  { %v2960_v53 = vadd.f32 %v2959_v60, %v2958_v45  ;;  %v8493_v42 = vpop.f32.mrf.mxu0 }
 0x338   :  { %2542 = vst.msk [vmem:[#allocation2 + $0x228] sm:$0xff] %vm2472_vm6, %v2453_v20  ;;  %v2697_v31 = vsel %vm2472_vm6, %v2453_v20, 0.0  ;;  %v2808_v13 = vmul.f32 %v2453_v20, %v2453_v20  ;;  %v11802_v24 = vpop.f32.mrf.mxu1  ;;  %8941 = vmatmul.mubr.msk.bf16.gmra.mxu1 %vm416_vm4, %v4794_v7 }
 0x339   :  { %13549 = vst [vmem:[#allocation29_spill] sm:$0xff] %v11802_v24  ;;  %v2698_v32 = vadd.f32 %v2697_v31, %v2696_v4  ;;  %v2322_v40 = vpop.f32.mrf.mxu0  ;;  %8767 = vmatmul.mubr.msk.bf16.gmra.mxu0 %vm416_vm4, %v7341_v43  ;;  %8944 = vmatprep.mubr.msk.bf16.mxu1 %vm9369_vm2, %v13451_v35 }
 0x33a   :  { %v2961_v45 = vsel %vm2472_vm6, %v2808_v13, 0.0  ;;  %v2454_v60 = vadd.f32 %v2322_v40, %v13550_v3  ;;  %v8670_v59 = vpop.f32.mrf.mxu1  ;;  %8770 = vmatprep.mubr.msk.bf16.mxu0 %vm9369_vm2, %v13451_v35  ;;  %v9309_v13 = vld [vmem:[%s13434_s0 + $0x1f4] sm:$0xf] }
 0x33b   :  { %v2962_v20 = vadd.f32 %v2961_v45, %v2960_v53  ;;  %v8496_v28 = vpop.f32.mrf.mxu0  ;;  %v7342_v40 = vcombine.low %v9309_v13, %v9310_v39  ;;  %v4796_v53 = vsel %vm1790_vm5, %v4793_v12, %v4795_v49  ;;  %v11827_v45 = vld [vmem:[%s13434_s0 + $0x21c] sm:$0xff]  }
 0x33c   :  { %2543 = vst.msk [vmem:[#allocation2 + $0x230] sm:$0xff] %vm2472_vm6, %v2454_v60  ;;  %v2699_v31 = vsel %vm2472_vm6, %v2454_v60, 0.0  ;;  %v2809_v4 = vmul.f32 %v2454_v60, %v2454_v60  ;;  %v11815_v43 = vpop.f32.mrf.mxu1 }
 0x33d   :  { %13551 = vst [vmem:[#allocation30_spill] sm:$0xff] %v11815_v43  ;;  %v2700_v7 = vadd.f32 %v2699_v31, %v2698_v32  ;;  %v2325_v42 = vpop.f32.mrf.mxu0  ;;  %v13552_v32 = vld [vmem:[#allocation31_spill] sm:$0xff] }
 0x33e   :  { %v2963_v3 = vsel %vm2472_vm6, %v2809_v4, 0.0  ;;  %v2455_v60 = vadd.f32 %v2325_v42, %v13552_v32  ;;  %v8671_v59 = vpop.f32.mrf.mxu1  ;;  %v4797_v4 = vrot.slane %v11827_v45, 2  ;;  %v13554_v42 = vld [vmem:[#allocation32_spill] sm:$0xff]  ;;  %v9312_v45 = vld [vmem:[%s13434_s0 + $0x200] sm:$0xf] }
 0x33f   :  { %v2964_v28 = vadd.f32 %v2963_v3, %v2962_v20  ;;  %v8497_v31 = vpop.f32.mrf.mxu0 }
 0x340   :  { %2544 = vst.msk [vmem:[#allocation2 + $0x238] sm:$0xff] %vm2472_vm6, %v2455_v60  ;;  %v2701_v43 = vsel %vm2472_vm6, %v2455_v60, 0.0  ;;  %v2810_v24 = vmul.f32 %v2455_v60, %v2455_v60  ;;  %v11833_v13 = vpop.f32.mrf.mxu1  ;;  %8945 = vmatmul.mubr.msk.bf16.gmra.mxu1 %vm416_vm4, %v4796_v53 }
 0x341   :  { %13553 = vst [vmem:[#allocation31_spill] sm:$0xff] %v11833_v13  ;;  %v2702_v12 = vadd.f32 %v2701_v43, %v2700_v7  ;;  %v2330_v39 = vpop.f32.mrf.mxu0  ;;  %8771 = vmatmul.mubr.msk.bf16.gmra.mxu0 %vm416_vm4, %v7342_v40  ;;  %8948 = vmatprep.mubr.msk.bf16.mxu1 %vm9369_vm2, %v13451_v35 }
 0x342   :  { %v2965_v20 = vsel %vm2472_vm6, %v2810_v24, 0.0  ;;  %v2456_v3 = vadd.f32 %v2330_v39, %v13554_v42  ;;  %v8674_v32 = vpop.f32.mrf.mxu1  ;;  %8774 = vmatprep.mubr.msk.bf16.mxu0 %vm9369_vm2, %v13451_v35  ;;  %v9311_v24 = vld [vmem:[%s13434_s0 + $0x1fc] sm:$0xf] }
 0x343   :  { %v2966_v60 = vadd.f32 %v2965_v20, %v2964_v28  ;;  %v8500_v59 = vpop.f32.mrf.mxu0  ;;  %v7343_v39 = vcombine.low %v9311_v24, %v9312_v45  ;;  %v4798_v28 = vsel %vm1790_vm5, %v4795_v49, %v4797_v4  ;;  %v11858_v20 = vld [vmem:[%s13434_s0 + $0x224] sm:$0xff]  }
 0x344   :  { %2545 = vst.msk [vmem:[#allocation2 + $0x240] sm:$0xff] %vm2472_vm6, %v2456_v3  ;;  %v2703_v43 = vsel %vm2472_vm6, %v2456_v3, 0.0  ;;  %v2811_v7 = vmul.f32 %v2456_v3, %v2456_v3  ;;  %v11846_v40 = vpop.f32.mrf.mxu1 }
 0x345   :  { %13555 = vst [vmem:[#allocation32_spill] sm:$0xff] %v11846_v40  ;;  %v2704_v53 = vadd.f32 %v2703_v43, %v2702_v12  ;;  %v2333_v31 = vpop.f32.mrf.mxu0  ;;  %v13556_v12 = vld [vmem:[#allocation33_spill] sm:$0xff] }
 0x346   :  { %v2967_v42 = vsel %vm2472_vm6, %v2811_v7, 0.0  ;;  %v2457_v3 = vadd.f32 %v2333_v31, %v13556_v12  ;;  %v8675_v32 = vpop.f32.mrf.mxu1  ;;  %v4799_v7 = vrot.slane %v11858_v20, 2  ;;  %v13558_v31 = vld [vmem:[#allocation34_spill] sm:$0xff] }
 0x347   :  { %v2968_v59 = vadd.f32 %v2967_v42, %v2966_v60  ;;  %v8501_v43 = vpop.f32.mrf.mxu0  ;;  %v9314_v20 = vld [vmem:[%s13434_s0 + $0x208] sm:$0xf] }
 0x348   :  { %2546 = vst.msk [vmem:[#allocation2 + $0x248] sm:$0xff] %vm2472_vm6, %v2457_v3  ;;  %v2705_v40 = vsel %vm2472_vm6, %v2457_v3, 0.0  ;;  %v2812_v13 = vmul.f32 %v2457_v3, %v2457_v3  ;;  %v11864_v24 = vpop.f32.mrf.mxu1  ;;  %8949 = vmatmul.mubr.msk.bf16.gmra.mxu1 %vm416_vm4, %v4798_v28 }
 0x349   :  { %13557 = vst [vmem:[#allocation33_spill] sm:$0xff] %v11864_v24  ;;  %v2706_v49 = vadd.f32 %v2705_v40, %v2704_v53  ;;  %v2338_v45 = vpop.f32.mrf.mxu0  ;;  %8775 = vmatmul.mubr.msk.bf16.gmra.mxu0 %vm416_vm4, %v7343_v39  ;;  %8952 = vmatprep.mubr.msk.bf16.mxu1 %vm9369_vm2, %v13451_v35 }
 0x34a   :  { %v2969_v60 = vsel %vm2472_vm6, %v2812_v13, 0.0  ;;  %v2458_v42 = vadd.f32 %v2338_v45, %v13558_v31  ;;  %v8678_v12 = vpop.f32.mrf.mxu1  ;;  %8778 = vmatprep.mubr.msk.bf16.mxu0 %vm9369_vm2, %v13451_v35  ;;  %v9313_v13 = vld [vmem:[%s13434_s0 + $0x204] sm:$0xf] }
 0x34b   :  { %v2970_v3 = vadd.f32 %v2969_v60, %v2968_v59  ;;  %v8504_v32 = vpop.f32.mrf.mxu0  ;;  %v7344_v45 = vcombine.low %v9313_v13, %v9314_v20  ;;  %v4800_v59 = vsel %vm1790_vm5, %v4797_v4, %v4799_v7  ;;  %v11889_v60 = vld [vmem:[%s13434_s0 + $0x22c] sm:$0xff]  }
 0x34c   :  { %2547 = vst.msk [vmem:[#allocation2 + $0x250] sm:$0xff] %vm2472_vm6, %v2458_v42  ;;  %v2707_v40 = vsel %vm2472_vm6, %v2458_v42, 0.0  ;;  %v2813_v53 = vmul.f32 %v2458_v42, %v2458_v42  ;;  %v11877_v39 = vpop.f32.mrf.mxu1 }
 0x34d   :  { %13559 = vst [vmem:[#allocation34_spill] sm:$0xff] %v11877_v39  ;;  %v2708_v28 = vadd.f32 %v2707_v40, %v2706_v49  ;;  %v2341_v43 = vpop.f32.mrf.mxu0  ;;  %v13560_v49 = vld [vmem:[#allocation35_spill] sm:$0xff] }
 0x34e   :  { %v2971_v31 = vsel %vm2472_vm6, %v2813_v53, 0.0  ;;  %v2459_v42 = vadd.f32 %v2341_v43, %v13560_v49  ;;  %v8679_v12 = vpop.f32.mrf.mxu1  ;;  %v4801_v53 = vrot.slane %v11889_v60, 2  ;;  %v13562_v43 = vld [vmem:[#allocation36_spill] sm:$0xff] }
 0x34f   :  { %v2972_v32 = vadd.f32 %v2971_v31, %v2970_v3  ;;  %v8505_v40 = vpop.f32.mrf.mxu0  ;;  %v9316_v60 = vld [vmem:[%s13434_s0 + $0x210] sm:$0xf] }
 0x350   :  { %2548 = vst.msk [vmem:[#allocation2 + $0x258] sm:$0xff] %vm2472_vm6, %v2459_v42  ;;  %v2709_v39 = vsel %vm2472_vm6, %v2459_v42, 0.0  ;;  %v2814_v24 = vmul.f32 %v2459_v42, %v2459_v42  ;;  %v11895_v13 = vpop.f32.mrf.mxu1  ;;  %8953 = vmatmul.mubr.msk.bf16.gmra.mxu1 %vm416_vm4, %v4800_v59 }
 0x351   :  { %13561 = vst [vmem:[#allocation35_spill] sm:$0xff] %v11895_v13  ;;  %v2710_v4 = vadd.f32 %v2709_v39, %v2708_v28  ;;  %v2346_v20 = vpop.f32.mrf.mxu0  ;;  %8779 = vmatmul.mubr.msk.bf16.gmra.mxu0 %vm416_vm4, %v7344_v45  ;;  %8956 = vmatprep.mubr.msk.bf16.mxu1 %vm9369_vm2, %v13451_v35 }
 0x352   :  { %v2973_v3 = vsel %vm2472_vm6, %v2814_v24, 0.0  ;;  %v2460_v31 = vadd.f32 %v2346_v20, %v13562_v43  ;;  %v8682_v49 = vpop.f32.mrf.mxu1  ;;  %8782 = vmatprep.mubr.msk.bf16.mxu0 %vm9369_vm2, %v13451_v35  ;;  %v9315_v24 = vld [vmem:[%s13434_s0 + $0x20c] sm:$0xf] }
 0x353   :  { %v2974_v42 = vadd.f32 %v2973_v3, %v2972_v32  ;;  %v8508_v12 = vpop.f32.mrf.mxu0  ;;  %v7345_v20 = vcombine.low %v9315_v24, %v9316_v60  ;;  %v4802_v32 = vsel %vm1790_vm5, %v4799_v7, %v4801_v53  ;;  %v11920_v3 = vld [vmem:[%s13434_s0 + $0x234] sm:$0xff]  }
 0x354   :  { %2549 = vst.msk [vmem:[#allocation2 + $0x260] sm:$0xff] %vm2472_vm6, %v2460_v31  ;;  %v2711_v39 = vsel %vm2472_vm6, %v2460_v31, 0.0  ;;  %v2815_v28 = vmul.f32 %v2460_v31, %v2460_v31  ;;  %v11908_v45 = vpop.f32.mrf.mxu1 }
 0x355   :  { %13563 = vst [vmem:[#allocation36_spill] sm:$0xff] %v11908_v45  ;;  %v2712_v59 = vadd.f32 %v2711_v39, %v2710_v4  ;;  %v2349_v40 = vpop.f32.mrf.mxu0  ;;  %v13564_v4 = vld [vmem:[#allocation37_spill] sm:$0xff] }
 0x356   :  { %v2975_v43 = vsel %vm2472_vm6, %v2815_v28, 0.0  ;;  %v2461_v31 = vadd.f32 %v2349_v40, %v13564_v4  ;;  %v8683_v49 = vpop.f32.mrf.mxu1  ;;  %v4803_v28 = vrot.slane %v11920_v3, 2  ;;  %v13566_v40 = vld [vmem:[#allocation38_spill] sm:$0xff]  ;;  %v9318_v3 = vld [vmem:[%s13434_s0 + $0x218] sm:$0xf] }
 0x357   :  { %v2976_v12 = vadd.f32 %v2975_v43, %v2974_v42  ;;  %v8509_v39 = vpop.f32.mrf.mxu0 }
 0x358   :  { %2550 = vst.msk [vmem:[#allocation2 + $0x268] sm:$0xff] %vm2472_vm6, %v2461_v31  ;;  %v2713_v45 = vsel %vm2472_vm6, %v2461_v31, 0.0  ;;  %v2816_v13 = vmul.f32 %v2461_v31, %v2461_v31  ;;  %v11926_v24 = vpop.f32.mrf.mxu1  ;;  %8957 = vmatmul.mubr.msk.bf16.gmra.mxu1 %vm416_vm4, %v4802_v32 }
 0x359   :  { %13565 = vst [vmem:[#allocation37_spill] sm:$0xff] %v11926_v24  ;;  %v2714_v7 = vadd.f32 %v2713_v45, %v2712_v59  ;;  %v2354_v60 = vpop.f32.mrf.mxu0  ;;  %8783 = vmatmul.mubr.msk.bf16.gmra.mxu0 %vm416_vm4, %v7345_v20  ;;  %8960 = vmatprep.mubr.msk.bf16.mxu1 %vm9369_vm2, %v13451_v35 }
 0x35a   :  { %v2977_v42 = vsel %vm2472_vm6, %v2816_v13, 0.0  ;;  %v2462_v43 = vadd.f32 %v2354_v60, %v13566_v40  ;;  %v8686_v4 = vpop.f32.mrf.mxu1  ;;  %8786 = vmatprep.mubr.msk.bf16.mxu0 %vm9369_vm2, %v13451_v35  ;;  %v9317_v13 = vld [vmem:[%s13434_s0 + $0x214] sm:$0xf] }
 0x35b   :  { %v2978_v31 = vadd.f32 %v2977_v42, %v2976_v12  ;;  %v8512_v49 = vpop.f32.mrf.mxu0  ;;  %v7346_v60 = vcombine.low %v9317_v13, %v9318_v3  ;;  %v4804_v12 = vsel %vm1790_vm5, %v4801_v53, %v4803_v28  ;;  %v11951_v42 = vld [vmem:[%s13434_s0 + $0x23c] sm:$0xff]  }
 0x35c   :  { %2551 = vst.msk [vmem:[#allocation2 + $0x270] sm:$0xff] %vm2472_vm6, %v2462_v43  ;;  %v2715_v45 = vsel %vm2472_vm6, %v2462_v43, 0.0  ;;  %v2817_v59 = vmul.f32 %v2462_v43, %v2462_v43  ;;  %v11939_v20 = vpop.f32.mrf.mxu1 }
 0x35d   :  { %13567 = vst [vmem:[#allocation38_spill] sm:$0xff] %v11939_v20  ;;  %v2716_v32 = vadd.f32 %v2715_v45, %v2714_v7  ;;  %v2357_v39 = vpop.f32.mrf.mxu0  ;;  %v13568_v7 = vld [vmem:[#allocation39_spill] sm:$0xff] }
 0x35e   :  { %v2979_v40 = vsel %vm2472_vm6, %v2817_v59, 0.0  ;;  %v2463_v43 = vadd.f32 %v2357_v39, %v13568_v7  ;;  %v8687_v4 = vpop.f32.mrf.mxu1  ;;  %v4805_v59 = vrot.slane %v11951_v42, 2  ;;  %v13570_v39 = vld [vmem:[#allocation40_spill] sm:$0xff]  ;;  %v9320_v42 = vld [vmem:[%s13434_s0 + $0x220] sm:$0xf] }
 0x35f   :  { %v2980_v49 = vadd.f32 %v2979_v40, %v2978_v31  ;;  %v8513_v45 = vpop.f32.mrf.mxu0 }
 0x360   :  { %2552 = vst.msk [vmem:[#allocation2 + $0x278] sm:$0xff] %vm2472_vm6, %v2463_v43  ;;  %v2717_v20 = vsel %vm2472_vm6, %v2463_v43, 0.0  ;;  %v2818_v24 = vmul.f32 %v2463_v43, %v2463_v43  ;;  %v11957_v13 = vpop.f32.mrf.mxu1  ;;  %8961 = vmatmul.mubr.msk.bf16.gmra.mxu1 %vm416_vm4, %v4804_v12 }
 0x361   :  { %13569 = vst [vmem:[#allocation39_spill] sm:$0xff] %v11957_v13  ;;  %v2718_v53 = vadd.f32 %v2717_v20, %v2716_v32  ;;  %v2362_v3 = vpop.f32.mrf.mxu0  ;;  %8787 = vmatmul.mubr.msk.bf16.gmra.mxu0 %vm416_vm4, %v7346_v60  ;;  %8964 = vmatprep.mubr.msk.bf16.mxu1 %vm9369_vm2, %v13451_v35 }
 0x362   :  { %v2981_v31 = vsel %vm2472_vm6, %v2818_v24, 0.0  ;;  %v2464_v40 = vadd.f32 %v2362_v3, %v13570_v39  ;;  %v8690_v7 = vpop.f32.mrf.mxu1  ;;  %8790 = vmatprep.mubr.msk.bf16.mxu0 %vm9369_vm2, %v13451_v35  ;;  %v9319_v24 = vld [vmem:[%s13434_s0 + $0x21c] sm:$0xf] }
 0x363   :  { %v2982_v43 = vadd.f32 %v2981_v31, %v2980_v49  ;;  %v8516_v4 = vpop.f32.mrf.mxu0  ;;  %v7347_v3 = vcombine.low %v9319_v24, %v9320_v42  ;;  %v4806_v49 = vsel %vm1790_vm5, %v4803_v28, %v4805_v59  ;;  %v11982_v31 = vld [vmem:[%s13434_s0 + $0x244] sm:$0xff]  }
 0x364   :  { %2553 = vst.msk [vmem:[#allocation2 + $0x280] sm:$0xff] %vm2472_vm6, %v2464_v40  ;;  %v2719_v20 = vsel %vm2472_vm6, %v2464_v40, 0.0  ;;  %v2819_v32 = vmul.f32 %v2464_v40, %v2464_v40  ;;  %v11970_v60 = vpop.f32.mrf.mxu1 }
 0x365   :  { %13571 = vst [vmem:[#allocation40_spill] sm:$0xff] %v11970_v60  ;;  %v2720_v12 = vadd.f32 %v2719_v20, %v2718_v53  ;;  %v2365_v45 = vpop.f32.mrf.mxu0  ;;  %v13572_v53 = vld [vmem:[#allocation41_spill] sm:$0xff] }
 0x366   :  { %v2983_v39 = vsel %vm2472_vm6, %v2819_v32, 0.0  ;;  %v2465_v40 = vadd.f32 %v2365_v45, %v13572_v53  ;;  %v8691_v7 = vpop.f32.mrf.mxu1  ;;  %v4807_v32 = vrot.slane %v11982_v31, 2  ;;  %v13574_v45 = vld [vmem:[#allocation42_spill] sm:$0xff] }
 0x367   :  { %v2984_v4 = vadd.f32 %v2983_v39, %v2982_v43  ;;  %v8517_v20 = vpop.f32.mrf.mxu0  ;;  %v9322_v31 = vld [vmem:[%s13434_s0 + $0x228] sm:$0xf] }
 0x368   :  { %2554 = vst.msk [vmem:[#allocation2 + $0x288] sm:$0xff] %vm2472_vm6, %v2465_v40  ;;  %v2721_v60 = vsel %vm2472_vm6, %v2465_v40, 0.0  ;;  %v2820_v13 = vmul.f32 %v2465_v40, %v2465_v40  ;;  %v11988_v24 = vpop.f32.mrf.mxu1  ;;  %8965 = vmatmul.mubr.msk.bf16.gmra.mxu1 %vm416_vm4, %v4806_v49 }
 0x369   :  { %13573 = vst [vmem:[#allocation41_spill] sm:$0xff] %v11988_v24  ;;  %v2722_v28 = vadd.f32 %v2721_v60, %v2720_v12  ;;  %v2370_v42 = vpop.f32.mrf.mxu0  ;;  %8791 = vmatmul.mubr.msk.bf16.gmra.mxu0 %vm416_vm4, %v7347_v3  ;;  %8968 = vmatprep.mubr.msk.bf16.mxu1 %vm9369_vm2, %v13451_v35 }
 0x36a   :  { %v2985_v43 = vsel %vm2472_vm6, %v2820_v13, 0.0  ;;  %v2466_v39 = vadd.f32 %v2370_v42, %v13574_v45  ;;  %v8694_v53 = vpop.f32.mrf.mxu1  ;;  %8794 = vmatprep.mubr.msk.bf16.mxu0 %vm9369_vm2, %v13451_v35  ;;  %v9321_v13 = vld [vmem:[%s13434_s0 + $0x224] sm:$0xf] }
 0x36b   :  { %v2986_v40 = vadd.f32 %v2985_v43, %v2984_v4  ;;  %v8520_v7 = vpop.f32.mrf.mxu0  ;;  %v7348_v42 = vcombine.low %v9321_v13, %v9322_v31  ;;  %v4808_v4 = vsel %vm1790_vm5, %v4805_v59, %v4807_v32  ;;  %v12013_v43 = vld [vmem:[%s13434_s0 + $0x24c] sm:$0xff]  }
 0x36c   :  { %2555 = vst.msk [vmem:[#allocation2 + $0x290] sm:$0xff] %vm2472_vm6, %v2466_v39  ;;  %v2723_v60 = vsel %vm2472_vm6, %v2466_v39, 0.0  ;;  %v2821_v12 = vmul.f32 %v2466_v39, %v2466_v39  ;;  %v12001_v3 = vpop.f32.mrf.mxu1 }
 0x36d   :  { %13575 = vst [vmem:[#allocation42_spill] sm:$0xff] %v12001_v3  ;;  %v2724_v49 = vadd.f32 %v2723_v60, %v2722_v28  ;;  %v2373_v20 = vpop.f32.mrf.mxu0  ;;  %v13576_v28 = vld [vmem:[#allocation43_spill] sm:$0xff] }
 0x36e   :  { %v2987_v45 = vsel %vm2472_vm6, %v2821_v12, 0.0  ;;  %v2467_v39 = vadd.f32 %v2373_v20, %v13576_v28  ;;  %v8695_v53 = vpop.f32.mrf.mxu1  ;;  %v13578_v20 = vld [vmem:[#allocation44_spill] sm:$0xff] }
 0x36f   :  { %v2988_v7 = vadd.f32 %v2987_v45, %v2986_v40  ;;  %v8521_v60 = vpop.f32.mrf.mxu0  ;;  %v4809_v40 = vrot.slane %v12013_v43, 2  ;;  %v9324_v43 = vld [vmem:[%s13434_s0 + $0x230] sm:$0xf] }
 0x370   :  { %2556 = vst.msk [vmem:[#allocation2 + $0x298] sm:$0xff] %vm2472_vm6, %v2467_v39  ;;  %v2725_v3 = vsel %vm2472_vm6, %v2467_v39, 0.0  ;;  %v2822_v24 = vmul.f32 %v2467_v39, %v2467_v39  ;;  %v12019_v13 = vpop.f32.mrf.mxu1  ;;  %8969 = vmatmul.mubr.msk.bf16.gmra.mxu1 %vm416_vm4, %v4808_v4 }
 0x371   :  { %13577 = vst [vmem:[#allocation43_spill] sm:$0xff] %v12019_v13  ;;  %v2726_v59 = vadd.f32 %v2725_v3, %v2724_v49  ;;  %v2378_v31 = vpop.f32.mrf.mxu0  ;;  %8795 = vmatmul.mubr.msk.bf16.gmra.mxu0 %vm416_vm4, %v7348_v42  ;;  %8972 = vmatprep.mubr.msk.bf16.mxu1 %vm9369_vm2, %v13451_v35 }
 0x372   :  { %v2989_v12 = vsel %vm2472_vm6, %v2822_v24, 0.0  ;;  %v2468_v45 = vadd.f32 %v2378_v31, %v13578_v20  ;;  %v8698_v28 = vpop.f32.mrf.mxu1  ;;  %8798 = vmatprep.mubr.msk.bf16.mxu0 %vm9369_vm2, %v13451_v35  ;;  %v9323_v24 = vld [vmem:[%s13434_s0 + $0x22c] sm:$0xf] }
 0x373   :  { %v2990_v39 = vadd.f32 %v2989_v12, %v2988_v7  ;;  %v8524_v4 = vpop.f32.mrf.mxu0  ;;  %v7349_v31 = vcombine.low %v9323_v24, %v9324_v43  ;;  %v4810_v7 = vsel %vm1790_vm5, %v4807_v32, %v4809_v40  ;;  %v12042_v12 = vld [vmem:[%s13434_s0 + $0x254] sm:$0xff]  }
 0x374   :  { %2558 = vst.msk [vmem:[#allocation2 + $0x2a0] sm:$0xf] %vm2557_vm8, %v2468_v45  ;;  %v2727_v3 = vsel %vm2557_vm8, %v2468_v45, 0.0  ;;  %v2823_v49 = vmul.f32 %v2468_v45, %v2468_v45  ;;  %v3897_v42 = vpop.f32.mrf.mxu1  ;;  %v4811_v32 = vrot.slane %v12042_v12, 2  ;;  %v13579_v24 = vld [vmem:[#allocation45_spill] sm:$0xff] }
 0x375   :  { %v2728_v53 = vadd.f32 %v2727_v3, %v2726_v59  ;;  %v2381_v60 = vpop.f32.mrf.mxu0 }
 0x376   :  { %v2991_v20 = vsel %vm2557_vm8, %v2823_v49, 0.0  ;;  %v8699_v59 = vpop.f32.mrf.mxu1 }
 0x377   :  { %v2729_v45 = vrot.slane %v2728_v53, 4  ;;  %v2992_v28 = vadd.f32 %v2991_v20, %v2990_v39  ;;  %v8525_v4 = vpop.f32.mrf.mxu0 }
 0x378   :  { %v5011_v3 = vpop.f32.mrf.mxu1  ;;  %8973 = vmatmul.mubr.msk.bf16.gmra.mxu1 %vm416_vm4, %v4810_v7 }
 0x379   :  { %v2730_v42 = vadd.f32 %v2729_v45, %v2728_v53  ;;  %v2993_v60 = vrot.slane %v2992_v28, 4  ;;  %v4119_v13 = vpop.f32.mrf.mxu0  ;;  %8799 = vmatmul.mubr.msk.bf16.gmra.mxu0 %vm416_vm4, %v7349_v31  ;;  %8976 = vmatprep.mubr.msk.bf16.mxu1 %vm9369_vm2, %v13451_v35  ;;  %v9325_v31 = vld [vmem:[%s13434_s0 + $0x234] sm:$0xf] }
 0x37a   :  { %v4120_v43 = vadd.f32 %v4119_v13, %v13579_v24  ;;  %v8878_v49 = vpop.f32.mrf.mxu1  ;;  %8802 = vmatprep.mubr.msk.bf16.mxu0 %vm9369_vm2, %v13451_v35  ;;  %v9326_v13 = vld [vmem:[%s13434_s0 + $0x238] sm:$0xf]  ;;  %v4812_v24 = vsel %vm1790_vm5, %v4809_v40, %v4811_v32 }
 0x37b   :  { %v2731_v39 = vrot.slane %v2730_v42, 2  ;;  %v2994_v20 = vadd.f32 %v2993_v60, %v2992_v28  ;;  %v8704_v59 = vpop.f32.mrf.mxu0  ;;  %v7350_v12 = vcombine.low %v9325_v31, %v9326_v13  ;;  %v12063_v28 = vld [vmem:[%s13434_s0 + $0x25c] sm:$0xff]  }
 0x37c   :  { %v5353_v7 = vadd.f32 %v5011_v3, %v4120_v43  ;;  %v5014_v53 = vpop.f32.mrf.mxu1  ;;  %v13580_v3 = vld [vmem:[#allocation46_spill] sm:$0xff]  ;;  %v2559_v59 = vld [vmem:[#allocation3] sm:$0x1] }
 0x37d   :  { %v2732_v45 = vadd.f32 %v2731_v39, %v2730_v42  ;;  %v2995_v4 = vrot.slane %v2994_v20, 2  ;;  %v4122_v16 = vpop.f32.mrf.mxu0 }
 0x37e   :  { %5441 = vst.msk [vmem:[#allocation2 + $0x2a8] sm:$0xff] %vm2472_vm6, %v5353_v7  ;;  %v4123_v42 = vadd.f32 %v4122_v16, %v13580_v3  ;;  %v8879_v60 = vpop.f32.mrf.mxu1  ;;  %v5705_v8 = vmul.f32 %v5353_v7, %v5353_v7  ;;  %v4813_v16 = vrot.slane %v12063_v28, 2  ;;  %v2738_v3 = vld [vmem:[#allocation3 + $0x1] sm:$0x1] }
 0x37f   :  { %v2733_v43 = vrot.slane %v2732_v45, 1  ;;  %v2996_v49 = vadd.f32 %v2995_v4, %v2994_v20  ;;  %v8705_v39 = vpop.f32.mrf.mxu0  ;;  %v5527_v20 = vsel %vm2472_vm6, %v5353_v7, 0.0 }
 0x380   :  { %v5354_v30 = vadd.f32 %v5014_v53, %v4123_v42  ;;  %v5019_v26 = vpop.f32.mrf.mxu1  ;;  %8977 = vmatmul.mubr.msk.bf16.gmra.mxu1 %vm416_vm4, %v4812_v24  ;;  %v13581_v24 = vld [vmem:[#allocation47_spill] sm:$0xff]  ;;  %v5790_v28 = vsel %vm2472_vm6, %v5705_v8, 0.0  ;;  %v4814_v8 = vsel %vm1790_vm5, %v4811_v32, %v4813_v16 }
 0x381   :  { %v2734_v40 = vadd.f32 %v2733_v43, %v2732_v45  ;;  %v2997_v31 = vrot.slane %v2996_v49, 1  ;;  %v4127_v13 = vpop.f32.mrf.mxu0  ;;  %8803 = vmatmul.mubr.msk.bf16.gmra.mxu0 %vm416_vm4, %v7350_v12  ;;  %8980 = vmatprep.mubr.msk.bf16.mxu1 %vm9369_vm2, %v13451_v35 }
 0x382   :  { %5442 = vst.msk [vmem:[#allocation2 + $0x2b0] sm:$0xff] %vm2472_vm6, %v5354_v30  ;;  %v5528_v53 = vsel %vm2472_vm6, %v5354_v30, 0.0  ;;  %v5706_v4 = vmul.f32 %v5354_v30, %v5354_v30  ;;  %v4128_v45 = vadd.f32 %v4127_v13, %v13581_v24  ;;  %v8882_v42 = vpop.f32.mrf.mxu1  ;;  %8806 = vmatprep.mubr.msk.bf16.mxu0 %vm9369_vm2, %v13451_v35  ;;  %v9327_v13 = vld [vmem:[%s13434_s0 + $0x23c] sm:$0xf] }
 0x383   :  { %v2735_v12 = vadd.f32 %v2734_v40, %v2559_v59  ;;  %v2998_v60 = vadd.f32 %v2997_v31, %v2996_v49  ;;  %v5529_v43 = vadd.f32 %v5528_v53, %v5527_v20  ;;  %v8708_v39 = vpop.f32.mrf.mxu0  ;;  %v9328_v49 = vld [vmem:[%s13434_s0 + $0x240] sm:$0xf] }
 0x384   :  { %v5791_v18 = vsel %vm2472_vm6, %v5706_v4, 0.0  ;;  %v5355_v7 = vadd.f32 %v5019_v26, %v4128_v45  ;;  %v5022_v10 = vpop.f32.mrf.mxu1  ;;  %v7351_v59 = vcombine.low %v9327_v13, %v9328_v49  ;;  %v12091_v26 = vld [vmem:[%s13434_s0 + $0x264] sm:$0xff]  }
 0x385   :  { %2737 = vst.msk [vmem:[#allocation3] sm:$0x1] %vm13446_vm9, %v2735_v12  ;;  %v2999_v27 = vadd.f32 %v2998_v60, %v2738_v3  ;;  %v5792_v30 = vadd.f32 %v5791_v18, %v5790_v28  ;;  %v4130_v15 = vpop.f32.mrf.mxu0  ;;  %v9329_v49 = vld [vmem:[%s13434_s0 + $0x244] sm:$0xf] }
 0x386   :  { %5443 = vst.msk [vmem:[#allocation2 + $0x2b8] sm:$0xff] %vm2472_vm6, %v5355_v7  ;;  %v5530_v18 = vsel %vm2472_vm6, %v5355_v7, 0.0  ;;  %v5707_v40 = vmul.f32 %v5355_v7, %v5355_v7  ;;  %v4131_v31 = vadd.f32 %v4130_v15, %v10774_v63  ;;  %v8883_v3 = vpop.f32.mrf.mxu1  ;;  %v4815_v63 = vrot.slane %v12091_v26, 2  ;;  %v12119_v26 = vld [vmem:[%s13434_s0 + $0x26c] sm:$0xff]  }
 0x387   :  { %3000 = vst.msk [vmem:[#allocation3 + $0x1] sm:$0x1] %vm13446_vm9, %v2999_v27  ;;  %v5531_v20 = vadd.f32 %v5530_v18, %v5529_v43  ;;  %v8709_v53 = vpop.f32.mrf.mxu0 }
 0x388   :  { %v5793_v4 = vsel %vm2472_vm6, %v5707_v40, 0.0  ;;  %v5356_v32 = vadd.f32 %v5022_v10, %v4131_v31  ;;  %v5027_v24 = vpop.f32.mrf.mxu1  ;;  %8981 = vmatmul.mubr.msk.bf16.gmra.mxu1 %vm416_vm4, %v4814_v8  ;;  %v4816_v8 = vsel %vm1790_vm5, %v4813_v16, %v4815_v63 }
 0x389   :  { %v5794_v45 = vadd.f32 %v5793_v4, %v5792_v30  ;;  %v4135_v42 = vpop.f32.mrf.mxu0  ;;  %8807 = vmatmul.mubr.msk.bf16.gmra.mxu0 %vm416_vm4, %v7351_v59  ;;  %8984 = vmatprep.mubr.msk.bf16.mxu1 %vm9369_vm2, %v13451_v35 }
 0x38a   :  { %5444 = vst.msk [vmem:[#allocation2 + $0x2c0] sm:$0xff] %vm2472_vm6, %v5356_v32  ;;  %v5532_v15 = vsel %vm2472_vm6, %v5356_v32, 0.0  ;;  %v5708_v27 = vmul.f32 %v5356_v32, %v5356_v32  ;;  %v4136_v12 = vadd.f32 %v4135_v42, %v10787_v62  ;;  %v8886_v10 = vpop.f32.mrf.mxu1  ;;  %8810 = vmatprep.mubr.msk.bf16.mxu0 %vm9369_vm2, %v13451_v35  ;;  %v9330_v62 = vld [vmem:[%s13434_s0 + $0x248] sm:$0xf]  ;;  %v4817_v42 = vrot.slane %v12119_v26, 2 }
 0x38b   :  { %v5533_v60 = vadd.f32 %v5532_v15, %v5531_v20  ;;  %v8712_v43 = vpop.f32.mrf.mxu0  ;;  %v7352_v59 = vcombine.low %v9329_v49, %v9330_v62 }
 0x38c   :  { %v5795_v39 = vsel %vm2472_vm6, %v5708_v27, 0.0  ;;  %v5357_v28 = vadd.f32 %v5027_v24, %v4136_v12  ;;  %v5030_v7 = vpop.f32.mrf.mxu1  ;;  %v4818_v62 = vsel %vm1790_vm5, %v4815_v63, %v4817_v42 }
 0x38d   :  { %v5796_v30 = vadd.f32 %v5795_v39, %v5794_v45  ;;  %v4138_v13 = vpop.f32.mrf.mxu0 }
 0x38e   :  { %5445 = vst.msk [vmem:[#allocation2 + $0x2c8] sm:$0xff] %vm2472_vm6, %v5357_v28  ;;  %v5534_v18 = vsel %vm2472_vm6, %v5357_v28, 0.0  ;;  %v5709_v40 = vmul.f32 %v5357_v28, %v5357_v28  ;;  %v4139_v31 = vadd.f32 %v4138_v13, %v10806_v48  ;;  %v8887_v3 = vpop.f32.mrf.mxu1  ;;  %v9331_v13 = vld [vmem:[%s13434_s0 + $0x24c] sm:$0xf] }
 0x38f   :  { %v5535_v20 = vadd.f32 %v5534_v18, %v5533_v60  ;;  %v8713_v53 = vpop.f32.mrf.mxu0 }
 0x390   :  { %v5797_v4 = vsel %vm2472_vm6, %v5709_v40, 0.0  ;;  %v5358_v32 = vadd.f32 %v5030_v7, %v4139_v31  ;;  %v5035_v24 = vpop.f32.mrf.mxu1  ;;  %8985 = vmatmul.mubr.msk.bf16.gmra.mxu1 %vm416_vm4, %v4816_v8 }
 0x391   :  { %v5798_v16 = vadd.f32 %v5797_v4, %v5796_v30  ;;  %v4143_v45 = vpop.f32.mrf.mxu0  ;;  %8811 = vmatmul.mubr.msk.bf16.gmra.mxu0 %vm416_vm4, %v7352_v59  ;;  %8988 = vmatprep.mubr.msk.bf16.mxu1 %vm9369_vm2, %v13451_v35  ;;  %v12146_v59 = vld [vmem:[%s13434_s0 + $0x274] sm:$0xff]  }
 0x392   :  { %5446 = vst.msk [vmem:[#allocation2 + $0x2d0] sm:$0xff] %vm2472_vm6, %v5358_v32  ;;  %v5536_v48 = vsel %vm2472_vm6, %v5358_v32, 0.0  ;;  %v5710_v15 = vmul.f32 %v5358_v32, %v5358_v32  ;;  %v4144_v27 = vadd.f32 %v4143_v45, %v10819_v0  ;;  %v8890_v12 = vpop.f32.mrf.mxu1  ;;  %8814 = vmatprep.mubr.msk.bf16.mxu0 %vm9369_vm2, %v13451_v35  ;;  %v9332_v0 = vld [vmem:[%s13434_s0 + $0x250] sm:$0xf] }
 0x393   :  { %v5537_v10 = vadd.f32 %v5536_v48, %v5535_v20  ;;  %v8716_v60 = vpop.f32.mrf.mxu0  ;;  %v7353_v49 = vcombine.low %v9331_v13, %v9332_v0  ;;  %v12173_v13 = vld [vmem:[%s13434_s0 + $0x27c] sm:$0xff]  }
 0x394   :  { %v5799_v43 = vsel %vm2472_vm6, %v5710_v15, 0.0  ;;  %v5359_v39 = vadd.f32 %v5035_v24, %v4144_v27  ;;  %v5038_v28 = vpop.f32.mrf.mxu1  ;;  %v4819_v24 = vrot.slane %v12146_v59, 2 }
 0x395   :  { %v5800_v7 = vadd.f32 %v5799_v43, %v5798_v16  ;;  %v4146_v30 = vpop.f32.mrf.mxu0 }
 0x396   :  { %5447 = vst.msk [vmem:[#allocation2 + $0x2d8] sm:$0xff] %vm2472_vm6, %v5359_v39  ;;  %v5538_v8 = vsel %vm2472_vm6, %v5359_v39, 0.0  ;;  %v5711_v26 = vmul.f32 %v5359_v39, %v5359_v39  ;;  %v4147_v18 = vadd.f32 %v4146_v30, %v10838_v2  ;;  %v8891_v40 = vpop.f32.mrf.mxu1  ;;  %v4820_v30 = vsel %vm1790_vm5, %v4817_v42, %v4819_v24 }
 0x397   :  { %v5539_v31 = vadd.f32 %v5538_v8, %v5537_v10  ;;  %v8717_v3 = vpop.f32.mrf.mxu0 }
 0x398   :  { %v5801_v20 = vsel %vm2472_vm6, %v5711_v26, 0.0  ;;  %v5360_v53 = vadd.f32 %v5038_v28, %v4147_v18  ;;  %v5043_v4 = vpop.f32.mrf.mxu1  ;;  %8989 = vmatmul.mubr.msk.bf16.gmra.mxu1 %vm416_vm4, %v4818_v62  ;;  %v9333_v28 = vld [vmem:[%s13434_s0 + $0x254] sm:$0xf] }
 0x399   :  { %v5802_v63 = vadd.f32 %v5801_v20, %v5800_v7  ;;  %v4151_v32 = vpop.f32.mrf.mxu0  ;;  %8815 = vmatmul.mubr.msk.bf16.gmra.mxu0 %vm416_vm4, %v7353_v49  ;;  %8992 = vmatprep.mubr.msk.bf16.mxu1 %vm9369_vm2, %v13451_v35  ;;  %v4821_v20 = vrot.slane %v12173_v13, 2 }
 0x39a   :  { %5448 = vst.msk [vmem:[#allocation2 + $0x2e0] sm:$0xff] %vm2472_vm6, %v5360_v53  ;;  %v5540_v2 = vsel %vm2472_vm6, %v5360_v53, 0.0  ;;  %v5712_v16 = vmul.f32 %v5360_v53, %v5360_v53  ;;  %v4152_v45 = vadd.f32 %v4151_v32, %v10851_v29  ;;  %v8894_v48 = vpop.f32.mrf.mxu1  ;;  %8818 = vmatprep.mubr.msk.bf16.mxu0 %vm9369_vm2, %v13451_v35  ;;  %v9334_v29 = vld [vmem:[%s13434_s0 + $0x258] sm:$0xf] }
 0x39b   :  { %v5541_v15 = vadd.f32 %v5540_v2, %v5539_v31  ;;  %v8720_v27 = vpop.f32.mrf.mxu0  ;;  %v7354_v7 = vcombine.low %v9333_v28, %v9334_v29 }
 0x39c   :  { %v5803_v12 = vsel %vm2472_vm6, %v5712_v16, 0.0  ;;  %v5361_v10 = vadd.f32 %v5043_v4, %v4152_v45  ;;  %v5046_v60 = vpop.f32.mrf.mxu1 }
 0x39d   :  { %v5804_v43 = vadd.f32 %v5803_v12, %v5802_v63  ;;  %v4154_v39 = vpop.f32.mrf.mxu0  ;;  %v9335_v12 = vld [vmem:[%s13434_s0 + $0x25c] sm:$0xf] }
 0x39e   :  { %5449 = vst.msk [vmem:[#allocation2 + $0x2e8] sm:$0xff] %vm2472_vm6, %v5361_v10  ;;  %v5542_v0 = vsel %vm2472_vm6, %v5361_v10, 0.0  ;;  %v5713_v49 = vmul.f32 %v5361_v10, %v5361_v10  ;;  %v4155_v62 = vadd.f32 %v4154_v39, %v10870_v1  ;;  %v8895_v59 = vpop.f32.mrf.mxu1 }
 0x39f   :  { %v5543_v8 = vadd.f32 %v5542_v0, %v5541_v15  ;;  %v8721_v26 = vpop.f32.mrf.mxu0 }
 0x3a0   :  { %v5805_v18 = vsel %vm2472_vm6, %v5713_v49, 0.0  ;;  %v5362_v40 = vadd.f32 %v5046_v60, %v4155_v62  ;;  %v5051_v31 = vpop.f32.mrf.mxu1  ;;  %8993 = vmatmul.mubr.msk.bf16.gmra.mxu1 %vm416_vm4, %v4820_v30  ;;  %v4822_v60 = vsel %vm1790_vm5, %v4819_v24, %v4821_v20 }
 0x3a1   :  { %v5806_v42 = vadd.f32 %v5805_v18, %v5804_v43  ;;  %v4159_v3 = vpop.f32.mrf.mxu0  ;;  %8819 = vmatmul.mubr.msk.bf16.gmra.mxu0 %vm416_vm4, %v7354_v7  ;;  %8996 = vmatprep.mubr.msk.bf16.mxu1 %vm9369_vm2, %v13451_v35  ;;  %v12200_v43 = vld [vmem:[%s13434_s0 + $0x284] sm:$0xff]  }
 0x3a2   :  { %5450 = vst.msk [vmem:[#allocation2 + $0x2f0] sm:$0xff] %vm2472_vm6, %v5362_v40  ;;  %v5544_v1 = vsel %vm2472_vm6, %v5362_v40, 0.0  ;;  %v5714_v53 = vmul.f32 %v5362_v40, %v5362_v40  ;;  %v4160_v4 = vadd.f32 %v4159_v3, %v10883_v21  ;;  %v8898_v63 = vpop.f32.mrf.mxu1  ;;  %8822 = vmatprep.mubr.msk.bf16.mxu0 %vm9369_vm2, %v13451_v35  ;;  %v9336_v21 = vld [vmem:[%s13434_s0 + $0x260] sm:$0xf] }
 0x3a3   :  { %v5545_v32 = vadd.f32 %v5544_v1, %v5543_v8  ;;  %v8724_v2 = vpop.f32.mrf.mxu0  ;;  %v7355_v10 = vcombine.low %v9335_v12, %v9336_v21  ;;  %v4823_v8 = vrot.slane %v12200_v43, 2 }
 0x3a4   :  { %v5807_v16 = vsel %vm2472_vm6, %v5714_v53, 0.0  ;;  %v5363_v45 = vadd.f32 %v5051_v31, %v4160_v4  ;;  %v5054_v48 = vpop.f32.mrf.mxu1 }
 0x3a5   :  { %v5808_v15 = vadd.f32 %v5807_v16, %v5806_v42  ;;  %v4162_v27 = vpop.f32.mrf.mxu0  ;;  %v4824_v16 = vsel %vm1790_vm5, %v4821_v20, %v4823_v8 }
 0x3a6   :  { %5451 = vst.msk [vmem:[#allocation2 + $0x2f8] sm:$0xff] %vm2472_vm6, %v5363_v45  ;;  %v5546_v39 = vsel %vm2472_vm6, %v5363_v45, 0.0  ;;  %v5715_v28 = vmul.f32 %v5363_v45, %v5363_v45  ;;  %v4163_v29 = vadd.f32 %v4162_v27, %v10902_v23  ;;  %v8899_v7 = vpop.f32.mrf.mxu1  ;;  %v12227_v45 = vld [vmem:[%s13434_s0 + $0x28c] sm:$0xff]  }
 0x3a7   :  { %v5547_v30 = vadd.f32 %v5546_v39, %v5545_v32  ;;  %v8725_v13 = vpop.f32.mrf.mxu0  ;;  %v9337_v32 = vld [vmem:[%s13434_s0 + $0x264] sm:$0xf] }
 0x3a8   :  { %v5809_v0 = vsel %vm2472_vm6, %v5715_v28, 0.0  ;;  %v5364_v49 = vadd.f32 %v5054_v48, %v4163_v29  ;;  %v5059_v62 = vpop.f32.mrf.mxu1  ;;  %8997 = vmatmul.mubr.msk.bf16.gmra.mxu1 %vm416_vm4, %v4822_v60  ;;  %v4825_v29 = vrot.slane %v12227_v45, 2 }
 0x3a9   :  { %v5810_v24 = vadd.f32 %v5809_v0, %v5808_v15  ;;  %v4167_v59 = vpop.f32.mrf.mxu0  ;;  %8823 = vmatmul.mubr.msk.bf16.gmra.mxu0 %vm416_vm4, %v7355_v10  ;;  %9000 = vmatprep.mubr.msk.bf16.mxu1 %vm9369_vm2, %v13451_v35 }
 0x3aa   :  { %5452 = vst.msk [vmem:[#allocation2 + $0x300] sm:$0xff] %vm2472_vm6, %v5364_v49  ;;  %v5548_v23 = vsel %vm2472_vm6, %v5364_v49, 0.0  ;;  %v5716_v26 = vmul.f32 %v5364_v49, %v5364_v49  ;;  %v4168_v18 = vadd.f32 %v4167_v59, %v10915_v47  ;;  %v8902_v40 = vpop.f32.mrf.mxu1  ;;  %8826 = vmatprep.mubr.msk.bf16.mxu0 %vm9369_vm2, %v13451_v35  ;;  %v9338_v47 = vld [vmem:[%s13434_s0 + $0x268] sm:$0xf] }
 0x3ab   :  { %v5549_v31 = vadd.f32 %v5548_v23, %v5547_v30  ;;  %v8728_v42 = vpop.f32.mrf.mxu0  ;;  %v7356_v2 = vcombine.low %v9337_v32, %v9338_v47 }
 0x3ac   :  { %v5811_v3 = vsel %vm2472_vm6, %v5716_v26, 0.0  ;;  %v5365_v1 = vadd.f32 %v5059_v62, %v4168_v18  ;;  %v5062_v53 = vpop.f32.mrf.mxu1  ;;  %v9339_v18 = vld [vmem:[%s13434_s0 + $0x26c] sm:$0xf]  ;;  %v12254_v42 = vld [vmem:[%s13434_s0 + $0x294] sm:$0xff]  }
 0x3ad   :  { %v5812_v4 = vadd.f32 %v5811_v3, %v5810_v24  ;;  %v4170_v63 = vpop.f32.mrf.mxu0 }
 0x3ae   :  { %5453 = vst.msk [vmem:[#allocation2 + $0x308] sm:$0xff] %vm2472_vm6, %v5365_v1  ;;  %v5550_v48 = vsel %vm2472_vm6, %v5365_v1, 0.0  ;;  %v5717_v15 = vmul.f32 %v5365_v1, %v5365_v1  ;;  %v4171_v27 = vadd.f32 %v4170_v63, %v10934_v5  ;;  %v8903_v12 = vpop.f32.mrf.mxu1 }
 0x3af   :  { %v5551_v21 = vadd.f32 %v5550_v48, %v5549_v31  ;;  %v8729_v10 = vpop.f32.mrf.mxu0  ;;  %v4826_v31 = vsel %vm1790_vm5, %v4823_v8, %v4825_v29  ;;  %v4827_v48 = vrot.slane %v12254_v42, 2 }
 0x3b0   :  { %v5813_v60 = vsel %vm2472_vm6, %v5717_v15, 0.0  ;;  %v5366_v43 = vadd.f32 %v5062_v53, %v4171_v27  ;;  %v5067_v39 = vpop.f32.mrf.mxu1  ;;  %9001 = vmatmul.mubr.msk.bf16.gmra.mxu1 %vm416_vm4, %v4824_v16 }
 0x3b1   :  { %v5814_v20 = vadd.f32 %v5813_v60, %v5812_v4  ;;  %v4175_v28 = vpop.f32.mrf.mxu0  ;;  %8827 = vmatmul.mubr.msk.bf16.gmra.mxu0 %vm416_vm4, %v7356_v2  ;;  %9004 = vmatprep.mubr.msk.bf16.mxu1 %vm9369_vm2, %v13451_v35 }
 0x3b2   :  { %5454 = vst.msk [vmem:[#allocation2 + $0x310] sm:$0xff] %vm2472_vm6, %v5366_v43  ;;  %v5552_v5 = vsel %vm2472_vm6, %v5366_v43, 0.0  ;;  %v5718_v7 = vmul.f32 %v5366_v43, %v5366_v43  ;;  %v4176_v30 = vadd.f32 %v4175_v28, %v10947_v17  ;;  %v8906_v13 = vpop.f32.mrf.mxu1  ;;  %8830 = vmatprep.mubr.msk.bf16.mxu0 %vm9369_vm2, %v13451_v35  ;;  %v9340_v17 = vld [vmem:[%s13434_s0 + $0x270] sm:$0xf] }
 0x3b3   :  { %v5553_v0 = vadd.f32 %v5552_v5, %v5551_v21  ;;  %v8732_v49 = vpop.f32.mrf.mxu0  ;;  %v7357_v40 = vcombine.low %v9339_v18, %v9340_v17  ;;  %v9341_v5 = vld [vmem:[%s13434_s0 + $0x274] sm:$0xf]  ;;  %v12281_v13 = vld [vmem:[%s13434_s0 + $0x29c] sm:$0xff]  }
 0x3b4   :  { %v5815_v62 = vsel %vm2472_vm6, %v5718_v7, 0.0  ;;  %v5367_v24 = vadd.f32 %v5067_v39, %v4176_v30  ;;  %v5070_v59 = vpop.f32.mrf.mxu1  ;;  %v4828_v30 = vsel %vm1790_vm5, %v4825_v29, %v4827_v48 }
 0x3b5   :  { %v5816_v23 = vadd.f32 %v5815_v62, %v5814_v20  ;;  %v4178_v26 = vpop.f32.mrf.mxu0 }
 0x3b6   :  { %5455 = vst.msk [vmem:[#allocation2 + $0x318] sm:$0xff] %vm2472_vm6, %v5367_v24  ;;  %v5554_v3 = vsel %vm2472_vm6, %v5367_v24, 0.0  ;;  %v5719_v1 = vmul.f32 %v5367_v24, %v5367_v24  ;;  %v4179_v53 = vadd.f32 %v4178_v26, %v10966_v55  ;;  %v8907_v4 = vpop.f32.mrf.mxu1 }
 0x3b7   :  { %v5555_v63 = vadd.f32 %v5554_v3, %v5553_v0  ;;  %v8733_v32 = vpop.f32.mrf.mxu0 }
 0x3b8   :  { %v5817_v47 = vsel %vm2472_vm6, %v5719_v1, 0.0  ;;  %v5368_v2 = vadd.f32 %v5070_v59, %v4179_v53  ;;  %v5075_v16 = vpop.f32.mrf.mxu1  ;;  %9005 = vmatmul.mubr.msk.bf16.gmra.mxu1 %vm416_vm4, %v4826_v31  ;;  %v4829_v31 = vrot.slane %v12281_v13, 2 }
 0x3b9   :  { %v5818_v8 = vadd.f32 %v5817_v47, %v5816_v23  ;;  %v4183_v45 = vpop.f32.mrf.mxu0  ;;  %8831 = vmatmul.mubr.msk.bf16.gmra.mxu0 %vm416_vm4, %v7357_v40  ;;  %9008 = vmatprep.mubr.msk.bf16.mxu1 %vm9369_vm2, %v13451_v35 }
 0x3ba   :  { %5456 = vst.msk [vmem:[#allocation2 + $0x320] sm:$0xff] %vm2472_vm6, %v5368_v2  ;;  %v5556_v55 = vsel %vm2472_vm6, %v5368_v2, 0.0  ;;  %v5720_v15 = vmul.f32 %v5368_v2, %v5368_v2  ;;  %v4184_v27 = vadd.f32 %v4183_v45, %v10979_v33  ;;  %v8910_v12 = vpop.f32.mrf.mxu1  ;;  %8834 = vmatprep.mubr.msk.bf16.mxu0 %vm9369_vm2, %v13451_v35  ;;  %v9342_v33 = vld [vmem:[%s13434_s0 + $0x278] sm:$0xf] }
 0x3bb   :  { %v5557_v21 = vadd.f32 %v5556_v55, %v5555_v63  ;;  %v8736_v10 = vpop.f32.mrf.mxu0  ;;  %v7358_v7 = vcombine.low %v9341_v5, %v9342_v33  ;;  %v4830_v55 = vsel %vm1790_vm5, %v4827_v48, %v4829_v31 }
 0x3bc   :  { %v5819_v60 = vsel %vm2472_vm6, %v5720_v15, 0.0  ;;  %v5369_v43 = vadd.f32 %v5075_v16, %v4184_v27  ;;  %v5078_v39 = vpop.f32.mrf.mxu1  ;;  %v12308_v15 = vld [vmem:[%s13434_s0 + $0x2a4] sm:$0xff]  }
 0x3bd   :  { %v5820_v20 = vadd.f32 %v5819_v60, %v5818_v8  ;;  %v4186_v28 = vpop.f32.mrf.mxu0  ;;  %v9343_v8 = vld [vmem:[%s13434_s0 + $0x27c] sm:$0xf]  ;;  %v4831_v33 = vrot.slane %v12308_v15, 2 }
 0x3be   :  { %5457 = vst.msk [vmem:[#allocation2 + $0x328] sm:$0xff] %vm2472_vm6, %v5369_v43  ;;  %v5558_v0 = vsel %vm2472_vm6, %v5369_v43, 0.0  ;;  %v5721_v49 = vmul.f32 %v5369_v43, %v5369_v43  ;;  %v4187_v62 = vadd.f32 %v4186_v28, %v10998_v9  ;;  %v8911_v24 = vpop.f32.mrf.mxu1 }
 0x3bf   :  { %v5559_v59 = vadd.f32 %v5558_v0, %v5557_v21  ;;  %v8737_v23 = vpop.f32.mrf.mxu0 }
 0x3c0   :  { %v5821_v26 = vsel %vm2472_vm6, %v5721_v49, 0.0  ;;  %v5370_v18 = vadd.f32 %v5078_v39, %v4187_v62  ;;  %v5083_v17 = vpop.f32.mrf.mxu1  ;;  %9009 = vmatmul.mubr.msk.bf16.gmra.mxu1 %vm416_vm4, %v4828_v30 }
 0x3c1   :  { %v5822_v29 = vadd.f32 %v5821_v26, %v5820_v20  ;;  %v4191_v40 = vpop.f32.mrf.mxu0  ;;  %8835 = vmatmul.mubr.msk.bf16.gmra.mxu0 %vm416_vm4, %v7358_v7  ;;  %9012 = vmatprep.mubr.msk.bf16.mxu1 %vm9369_vm2, %v13451_v35 }
 0x3c2   :  { %5458 = vst.msk [vmem:[#allocation2 + $0x330] sm:$0xff] %vm2472_vm6, %v5370_v18  ;;  %v5560_v9 = vsel %vm2472_vm6, %v5370_v18, 0.0  ;;  %v5722_v42 = vmul.f32 %v5370_v18, %v5370_v18  ;;  %v4192_v3 = vadd.f32 %v4191_v40, %v11011_v41  ;;  %v8914_v1 = vpop.f32.mrf.mxu1  ;;  %8838 = vmatprep.mubr.msk.bf16.mxu0 %vm9369_vm2, %v13451_v35  ;;  %v9344_v41 = vld [vmem:[%s13434_s0 + $0x280] sm:$0xf]  ;;  %v9345_v18 = vld [vmem:[%s13434_s0 + $0x284] sm:$0xf] }
 0x3c3   :  { %v5561_v53 = vadd.f32 %v5560_v9, %v5559_v59  ;;  %v8740_v4 = vpop.f32.mrf.mxu0  ;;  %v7359_v45 = vcombine.low %v9343_v8, %v9344_v41  ;;  %v12335_v40 = vld [vmem:[%s13434_s0 + $0x2ac] sm:$0xff]  }
 0x3c4   :  { %v5823_v63 = vsel %vm2472_vm6, %v5722_v42, 0.0  ;;  %v5371_v32 = vadd.f32 %v5083_v17, %v4192_v3  ;;  %v5086_v47 = vpop.f32.mrf.mxu1 }
 0x3c5   :  { %v5824_v2 = vadd.f32 %v5823_v63, %v5822_v29  ;;  %v4194_v16 = vpop.f32.mrf.mxu0  ;;  %v4832_v29 = vsel %vm1790_vm5, %v4829_v31, %v4831_v33 }
 0x3c6   :  { %5459 = vst.msk [vmem:[#allocation2 + $0x338] sm:$0xff] %vm2472_vm6, %v5371_v32  ;;  %v5562_v27 = vsel %vm2472_vm6, %v5371_v32, 0.0  ;;  %v5723_v12 = vmul.f32 %v5371_v32, %v5371_v32  ;;  %v4195_v21 = vadd.f32 %v4194_v16, %v11030_v34  ;;  %v8915_v10 = vpop.f32.mrf.mxu1  ;;  %v4833_v16 = vrot.slane %v12335_v40, 2 }
 0x3c7   :  { %v5563_v60 = vadd.f32 %v5562_v27, %v5561_v53  ;;  %v8741_v43 = vpop.f32.mrf.mxu0 }
 0x3c8   :  { %v5825_v39 = vsel %vm2472_vm6, %v5723_v12, 0.0  ;;  %v5372_v20 = vadd.f32 %v5086_v47, %v4195_v21  ;;  %v5091_v28 = vpop.f32.mrf.mxu1  ;;  %9013 = vmatmul.mubr.msk.bf16.gmra.mxu1 %vm416_vm4, %v4830_v55  ;;  %v9347_v43 = vld [vmem:[%s13434_s0 + $0x28c] sm:$0xf] }
 0x3c9   :  { %v5826_v48 = vadd.f32 %v5825_v39, %v5824_v2  ;;  %v4199_v5 = vpop.f32.mrf.mxu0  ;;  %8839 = vmatmul.mubr.msk.bf16.gmra.mxu0 %vm416_vm4, %v7359_v45  ;;  %9016 = vmatprep.mubr.msk.bf16.mxu1 %vm9369_vm2, %v13451_v35 }
 0x3ca   :  { %5460 = vst.msk [vmem:[#allocation2 + $0x340] sm:$0xff] %vm2472_vm6, %v5372_v20  ;;  %v5564_v34 = vsel %vm2472_vm6, %v5372_v20, 0.0  ;;  %v5724_v7 = vmul.f32 %v5372_v20, %v5372_v20  ;;  %v4200_v30 = vadd.f32 %v4199_v5, %v11043_v52  ;;  %v8918_v13 = vpop.f32.mrf.mxu1  ;;  %8842 = vmatprep.mubr.msk.bf16.mxu0 %vm9369_vm2, %v13451_v35  ;;  %v9346_v52 = vld [vmem:[%s13434_s0 + $0x288] sm:$0xf]  ;;  %v4834_v20 = vsel %vm1790_vm5, %v4831_v33, %v4833_v16 }
 0x3cb   :  { %v5565_v0 = vadd.f32 %v5564_v34, %v5563_v60  ;;  %v8744_v49 = vpop.f32.mrf.mxu0  ;;  %v7360_v17 = vcombine.low %v9345_v18, %v9346_v52 }
 0x3cc   :  { %v5827_v62 = vsel %vm2472_vm6, %v5724_v7, 0.0  ;;  %v5373_v24 = vadd.f32 %v5091_v28, %v4200_v30  ;;  %v5094_v59 = vpop.f32.mrf.mxu1  ;;  %v12362_v28 = vld [vmem:[%s13434_s0 + $0x2b4] sm:$0xff]  }
 0x3cd   :  { %v5828_v23 = vadd.f32 %v5827_v62, %v5826_v48  ;;  %v4202_v26 = vpop.f32.mrf.mxu0 }
 0x3ce   :  { %5461 = vst.msk [vmem:[#allocation2 + $0x348] sm:$0xff] %vm2472_vm6, %v5373_v24  ;;  %v5566_v9 = vsel %vm2472_vm6, %v5373_v24, 0.0  ;;  %v5725_v42 = vmul.f32 %v5373_v24, %v5373_v24  ;;  %v4203_v3 = vadd.f32 %v4202_v26, %v11062_v37  ;;  %v8919_v1 = vpop.f32.mrf.mxu1 }
 0x3cf   :  { %v5567_v53 = vadd.f32 %v5566_v9, %v5565_v0  ;;  %v8745_v4 = vpop.f32.mrf.mxu0  ;;  %v9349_v1 = vld [vmem:[%s13434_s0 + $0x294] sm:$0xf] }
 0x3d0   :  { %v5829_v63 = vsel %vm2472_vm6, %v5725_v42, 0.0  ;;  %v5374_v32 = vadd.f32 %v5094_v59, %v4203_v3  ;;  %v5099_v47 = vpop.f32.mrf.mxu1  ;;  %9017 = vmatmul.mubr.msk.bf16.gmra.mxu1 %vm416_vm4, %v4832_v29  ;;  %v4835_v59 = vrot.slane %v12362_v28, 2 }
 0x3d1   :  { %v5830_v31 = vadd.f32 %v5829_v63, %v5828_v23  ;;  %v4207_v2 = vpop.f32.mrf.mxu0  ;;  %8843 = vmatmul.mubr.msk.bf16.gmra.mxu0 %vm416_vm4, %v7360_v17  ;;  %9020 = vmatprep.mubr.msk.bf16.mxu1 %vm9369_vm2, %v13451_v35  ;;  %v12389_v63 = vld [vmem:[%s13434_s0 + $0x2bc] sm:$0xff]  }
 0x3d2   :  { %5462 = vst.msk [vmem:[#allocation2 + $0x350] sm:$0xff] %vm2472_vm6, %v5374_v32  ;;  %v5568_v37 = vsel %vm2472_vm6, %v5374_v32, 0.0  ;;  %v5726_v8 = vmul.f32 %v5374_v32, %v5374_v32  ;;  %v4208_v41 = vadd.f32 %v4207_v2, %v11075_v6  ;;  %v8922_v45 = vpop.f32.mrf.mxu1  ;;  %8846 = vmatprep.mubr.msk.bf16.mxu0 %vm9369_vm2, %v13451_v35  ;;  %v9348_v6 = vld [vmem:[%s13434_s0 + $0x290] sm:$0xf]  ;;  %v4836_v4 = vsel %vm1790_vm5, %v4833_v16, %v4835_v59 }
 0x3d3   :  { %v5569_v55 = vadd.f32 %v5568_v37, %v5567_v53  ;;  %v8748_v15 = vpop.f32.mrf.mxu0  ;;  %v7361_v39 = vcombine.low %v9347_v43, %v9348_v6 }
 0x3d4   :  { %v5831_v27 = vsel %vm2472_vm6, %v5726_v8, 0.0  ;;  %v5375_v12 = vadd.f32 %v5099_v47, %v4208_v41  ;;  %v5102_v21 = vpop.f32.mrf.mxu1 }
 0x3d5   :  { %v5832_v10 = vadd.f32 %v5831_v27, %v5830_v31  ;;  %v4210_v60 = vpop.f32.mrf.mxu0  ;;  %v4837_v27 = vrot.slane %v12389_v63, 2  ;;  %v9353_v63 = vld [vmem:[%s13434_s0 + $0x2a4] sm:$0xf] }
 0x3d6   :  { %5463 = vst.msk [vmem:[#allocation2 + $0x358] sm:$0xff] %vm2472_vm6, %v5375_v12  ;;  %v5570_v48 = vsel %vm2472_vm6, %v5375_v12, 0.0  ;;  %v5727_v5 = vmul.f32 %v5375_v12, %v5375_v12  ;;  %v4211_v34 = vadd.f32 %v4210_v60, %v11094_v58  ;;  %v8923_v7 = vpop.f32.mrf.mxu1 }
 0x3d7   :  { %v5571_v30 = vadd.f32 %v5570_v48, %v5569_v55  ;;  %v8749_v13 = vpop.f32.mrf.mxu0  ;;  %v4838_v7 = vsel %vm1790_vm5, %v4835_v59, %v4837_v27 }
 0x3d8   :  { %v5833_v0 = vsel %vm2472_vm6, %v5727_v5, 0.0  ;;  %v5376_v49 = vadd.f32 %v5102_v21, %v4211_v34  ;;  %v5107_v62 = vpop.f32.mrf.mxu1  ;;  %9021 = vmatmul.mubr.msk.bf16.gmra.mxu1 %vm416_vm4, %v4834_v20  ;;  %v9351_v5 = vld [vmem:[%s13434_s0 + $0x29c] sm:$0xf] }
 0x3d9   :  { %v5834_v33 = vadd.f32 %v5833_v0, %v5832_v10  ;;  %v4215_v24 = vpop.f32.mrf.mxu0  ;;  %8847 = vmatmul.mubr.msk.bf16.gmra.mxu0 %vm416_vm4, %v7361_v39  ;;  %9024 = vmatprep.mubr.msk.bf16.mxu1 %vm9369_vm2, %v13451_v35 }
 0x3da   :  { %5464 = vst.msk [vmem:[#allocation2 + $0x360] sm:$0xff] %vm2472_vm6, %v5376_v49  ;;  %v5572_v58 = vsel %vm2472_vm6, %v5376_v49, 0.0  ;;  %v5728_v23 = vmul.f32 %v5376_v49, %v5376_v49  ;;  %v4216_v26 = vadd.f32 %v4215_v24, %v11107_v22  ;;  %v8926_v18 = vpop.f32.mrf.mxu1  ;;  %8850 = vmatprep.mubr.msk.bf16.mxu0 %vm9369_vm2, %v13451_v35  ;;  %v9350_v22 = vld [vmem:[%s13434_s0 + $0x298] sm:$0xf] }
 0x3db   :  { %v5573_v52 = vadd.f32 %v5572_v58, %v5571_v30  ;;  %v8752_v17 = vpop.f32.mrf.mxu0  ;;  %v7362_v53 = vcombine.low %v9349_v1, %v9350_v22  ;;  %v12416_v30 = vld [vmem:[%s13434_s0 + $0x2c4] sm:$0xff]  }
 0x3dc   :  { %v5835_v29 = vsel %vm2472_vm6, %v5728_v23, 0.0  ;;  %v5377_v40 = vadd.f32 %v5107_v62, %v4216_v26  ;;  %v5110_v9 = vpop.f32.mrf.mxu1 }
 0x3dd   :  { %v5836_v42 = vadd.f32 %v5835_v29, %v5834_v33  ;;  %v4218_v3 = vpop.f32.mrf.mxu0 }
 0x3de   :  { %5465 = vst.msk [vmem:[#allocation2 + $0x368] sm:$0xff] %vm2472_vm6, %v5377_v40  ;;  %v5574_v32 = vsel %vm2472_vm6, %v5377_v40, 0.0  ;;  %v5729_v47 = vmul.f32 %v5377_v40, %v5377_v40  ;;  %v4219_v31 = vadd.f32 %v4218_v3, %v11126_v50  ;;  %v8927_v2 = vpop.f32.mrf.mxu1 }
 0x3df   :  { %v5575_v37 = vadd.f32 %v5574_v32, %v5573_v52  ;;  %v8753_v8 = vpop.f32.mrf.mxu0  ;;  %v4839_v52 = vrot.slane %v12416_v30, 2 }
 0x3e0   :  { %v5837_v41 = vsel %vm2472_vm6, %v5729_v47, 0.0  ;;  %v5378_v45 = vadd.f32 %v5110_v9, %v4219_v31  ;;  %v5115_v55 = vpop.f32.mrf.mxu1  ;;  %9025 = vmatmul.mubr.msk.bf16.gmra.mxu1 %vm416_vm4, %v4836_v4  ;;  %v12443_v31 = vld [vmem:[%s13434_s0 + $0x2cc] sm:$0xff]  }
 0x3e1   :  { %v5838_v16 = vadd.f32 %v5837_v41, %v5836_v42  ;;  %v4223_v15 = vpop.f32.mrf.mxu0  ;;  %8851 = vmatmul.mubr.msk.bf16.gmra.mxu0 %vm416_vm4, %v7362_v53  ;;  %9028 = vmatprep.mubr.msk.bf16.mxu1 %vm9369_vm2, %v13451_v35  ;;  %v4840_v47 = vsel %vm1790_vm5, %v4837_v27, %v4839_v52 }
 0x3e2   :  { %5466 = vst.msk [vmem:[#allocation2 + $0x370] sm:$0xff] %vm2472_vm6, %v5378_v45  ;;  %v5576_v50 = vsel %vm2472_vm6, %v5378_v45, 0.0  ;;  %v5730_v12 = vmul.f32 %v5378_v45, %v5378_v45  ;;  %v4224_v21 = vadd.f32 %v4223_v15, %v11139_v38  ;;  %v8930_v10 = vpop.f32.mrf.mxu1  ;;  %8854 = vmatprep.mubr.msk.bf16.mxu0 %vm9369_vm2, %v13451_v35  ;;  %v9352_v38 = vld [vmem:[%s13434_s0 + $0x2a0] sm:$0xf] }
 0x3e3   :  { %v5577_v60 = vadd.f32 %v5576_v50, %v5575_v37  ;;  %v8756_v43 = vpop.f32.mrf.mxu0  ;;  %v7363_v34 = vcombine.low %v9351_v5, %v9352_v38 }
 0x3e4   :  { %v5839_v6 = vsel %vm2472_vm6, %v5730_v12, 0.0  ;;  %v5379_v39 = vadd.f32 %v5115_v55, %v4224_v21  ;;  %v5118_v20 = vpop.f32.mrf.mxu1  ;;  %v4841_v21 = vrot.slane %v12443_v31, 2 }
 0x3e5   :  { %v5840_v28 = vadd.f32 %v5839_v6, %v5838_v16  ;;  %v4226_v48 = vpop.f32.mrf.mxu0 }
 0x3e6   :  { %5467 = vst.msk [vmem:[#allocation2 + $0x378] sm:$0xff] %vm2472_vm6, %v5379_v39  ;;  %v5578_v13 = vsel %vm2472_vm6, %v5379_v39, 0.0  ;;  %v5731_v0 = vmul.f32 %v5379_v39, %v5379_v39  ;;  %v4227_v49 = vadd.f32 %v4226_v48, %v11158_v56  ;;  %v8931_v62 = vpop.f32.mrf.mxu1  ;;  %v4842_v30 = vsel %vm1790_vm5, %v4839_v52, %v4841_v21 }
 0x3e7   :  { %v5579_v33 = vadd.f32 %v5578_v13, %v5577_v60  ;;  %v8757_v24 = vpop.f32.mrf.mxu0  ;;  %v12470_v13 = vld [vmem:[%s13434_s0 + $0x2d4] ss:$0 sps:$4 sm:$0xff]  }
 0x3e8   :  { %v5841_v58 = vsel %vm2472_vm6, %v5731_v0, 0.0  ;;  %v5380_v23 = vadd.f32 %v5118_v20, %v4227_v49  ;;  %v5123_v26 = vpop.f32.mrf.mxu1  ;;  %9029 = vmatmul.mubr.msk.bf16.gmra.mxu1 %vm416_vm4, %v4838_v7 }
 0x3e9   :  { %v5842_v59 = vadd.f32 %v5841_v58, %v5840_v28  ;;  %v4231_v18 = vpop.f32.mrf.mxu0  ;;  %8855 = vmatmul.mubr.msk.bf16.gmra.mxu0 %vm416_vm4, %v7363_v34  ;;  %9032 = vmatprep.mubr.msk.bf16.mxu1 %vm9369_vm2, %v13451_v35  ;;  %v9355_v34 = vld [vmem:[%s13434_s0 + $0x2ac] sm:$0xf] }
 0x3ea   :  { %5468 = vst.msk [vmem:[#allocation2 + $0x380] sm:$0xff] %vm2472_vm6, %v5380_v23  ;;  %v5580_v56 = vsel %vm2472_vm6, %v5380_v23, 0.0  ;;  %v5732_v17 = vmul.f32 %v5380_v23, %v5380_v23  ;;  %v4232_v29 = vadd.f32 %v4231_v18, %v11171_v57  ;;  %v8934_v40 = vpop.f32.mrf.mxu1  ;;  %8858 = vmatprep.mubr.msk.bf16.mxu0 %vm9369_vm2, %v13451_v35  ;;  %v9354_v57 = vld [vmem:[%s13434_s0 + $0x2a8] sm:$0xf] }
 0x3eb   :  { %v5581_v9 = vadd.f32 %v5580_v56, %v5579_v33  ;;  %v8760_v42 = vpop.f32.mrf.mxu0  ;;  %v7364_v32 = vcombine.low %v9353_v63, %v9354_v57  ;;  %v4843_v56 = vrot.slane %v12470_v13, 2  ;;  %v9357_v63 = vld [vmem:[%s13434_s0 + $0x2b4] sm:$0xf] }
 0x3ec   :  { %v5843_v3 = vsel %vm2472_vm6, %v5732_v17, 0.0  ;;  %v5381_v1 = vadd.f32 %v5123_v26, %v4232_v29  ;;  %v5126_v22 = vpop.f32.mrf.mxu1 }
 0x3ed   :  { %v5844_v53 = vadd.f32 %v5843_v3, %v5842_v59  ;;  %v4234_v4 = vpop.f32.mrf.mxu0 }
 0x3ee   :  { %5469 = vst.msk [vmem:[#allocation2 + $0x388] sm:$0xff] %vm2472_vm6, %v5381_v1  ;;  %v5582_v2 = vsel %vm2472_vm6, %v5381_v1, 0.0  ;;  %v5733_v37 = vmul.f32 %v5381_v1, %v5381_v1  ;;  %v4235_v8 = vadd.f32 %v4234_v4, %v11184_v14  ;;  %v8935_v41 = vpop.f32.mrf.mxu1 }
 0x3ef   :  { %v5583_v45 = vadd.f32 %v5582_v2, %v5581_v9  ;;  %v8761_v55 = vpop.f32.mrf.mxu0 }
 0x3f0   :  { %v5845_v16 = vsel %vm2472_vm6, %v5733_v37, 0.0  ;;  %v5382_v15 = vadd.f32 %v5126_v22, %v4235_v8  ;;  %v5131_v50 = vpop.f32.mrf.mxu1  ;;  %9033 = vmatmul.mubr.msk.bf16.gmra.mxu1 %vm416_vm4, %v4840_v47 }
 0x3f1   :  { %v5846_v27 = vadd.f32 %v5845_v16, %v5844_v53  ;;  %v4239_v12 = vpop.f32.mrf.mxu0  ;;  %8859 = vmatmul.mubr.msk.bf16.gmra.mxu0 %vm416_vm4, %v7364_v32  ;;  %9036 = vmatprep.mubr.msk.bf16.mxu1 %vm9369_vm2, %v13451_v35  ;;  %v4844_v32 = vsel %vm1790_vm5, %v4841_v21, %v4843_v56 }
 0x3f2   :  { %5470 = vst.msk [vmem:[#allocation2 + $0x390] sm:$0xff] %vm2472_vm6, %v5382_v15  ;;  %v5584_v14 = vsel %vm2472_vm6, %v5382_v15, 0.0  ;;  %v5734_v10 = vmul.f32 %v5382_v15, %v5382_v15  ;;  %v4240_v60 = vadd.f32 %v4239_v12, %v11202_v25  ;;  %v8938_v43 = vpop.f32.mrf.mxu1  ;;  %8862 = vmatprep.mubr.msk.bf16.mxu0 %vm9369_vm2, %v13451_v35  ;;  %v9356_v25 = vld [vmem:[%s13434_s0 + $0x2b0] sm:$0xf] }
 0x3f3   :  { %v5585_v6 = vadd.f32 %v5584_v14, %v5583_v45  ;;  %v8764_v39 = vpop.f32.mrf.mxu0  ;;  %v7365_v7 = vcombine.low %v9355_v34, %v9356_v25 }
 0x3f4   :  { %v5847_v20 = vsel %vm2472_vm6, %v5734_v10, 0.0  ;;  %v5383_v28 = vadd.f32 %v5131_v50, %v4240_v60  ;;  %v5134_v48 = vpop.f32.mrf.mxu1 }
 0x3f5   :  { %v5848_v5 = vadd.f32 %v5847_v20, %v5846_v27  ;;  %v4242_v38 = vpop.f32.mrf.mxu0 }
 0x3f6   :  { %5471 = vst.msk [vmem:[#allocation2 + $0x398] sm:$0xff] %vm2472_vm6, %v5383_v28  ;;  %v5586_v0 = vsel %vm2472_vm6, %v5383_v28, 0.0  ;;  %v5735_v49 = vmul.f32 %v5383_v28, %v5383_v28  ;;  %v4243_v62 = vadd.f32 %v4242_v38, %v11216_v54  ;;  %v8939_v33 = vpop.f32.mrf.mxu1  ;;  %v9276_v28 = vld [vmem:[%s13434_s0 + $0x2bc] ss:$0 sps:$4 sm:$0x33]  }
 0x3f7   :  { %v5587_v24 = vadd.f32 %v5586_v0, %v5585_v6  ;;  %v8765_v58 = vpop.f32.mrf.mxu0 }
 0x3f8   :  { %v5849_v23 = vsel %vm2472_vm6, %v5735_v49, 0.0  ;;  %v5384_v26 = vadd.f32 %v5134_v48, %v4243_v62  ;;  %v5139_v59 = vpop.f32.mrf.mxu1  ;;  %9037 = vmatmul.mubr.msk.bf16.gmra.mxu1 %vm416_vm4, %v4842_v30 }
 0x3f9   :  { %v5850_v18 = vadd.f32 %v5849_v23, %v5848_v5  ;;  %v4247_v52 = vpop.f32.mrf.mxu0  ;;  %8863 = vmatmul.mubr.msk.bf16.gmra.mxu0 %vm416_vm4, %v7365_v7  ;;  %9040 = vmatprep.mubr.msk.bf16.mxu1 %vm9369_vm2, %v13451_v35 }
 0x3fa   :  { %5472 = vst.msk [vmem:[#allocation2 + $0x3a0] sm:$0xff] %vm2472_vm6, %v5384_v26  ;;  %v5588_v54 = vsel %vm2472_vm6, %v5384_v26, 0.0  ;;  %v5736_v17 = vmul.f32 %v5384_v26, %v5384_v26  ;;  %v4248_v29 = vadd.f32 %v4247_v52, %v11234_v46  ;;  %v8942_v40 = vpop.f32.mrf.mxu1  ;;  %8866 = vmatprep.mubr.msk.bf16.mxu0 %vm9369_vm2, %v13451_v35  ;;  %v9358_v46 = vld [vmem:[%s13434_s0 + $0x2b8] sm:$0xf] }
 0x3fb   :  { %v5589_v9 = vadd.f32 %v5588_v54, %v5587_v24  ;;  %v8768_v42 = vpop.f32.mrf.mxu0  ;;  %v7366_v57 = vcombine.low %v9357_v63, %v9358_v46 }
 0x3fc   :  { %v5851_v3 = vsel %vm2472_vm6, %v5736_v17, 0.0  ;;  %v5385_v1 = vadd.f32 %v5139_v59, %v4248_v29  ;;  %v5142_v22 = vpop.f32.mrf.mxu1 }
 0x3fd   :  { %v5852_v53 = vadd.f32 %v5851_v3, %v5850_v18  ;;  %v4250_v4 = vpop.f32.mrf.mxu0 }
 0x3fe   :  { %5473 = vst.msk [vmem:[#allocation2 + $0x3a8] sm:$0xff] %vm2472_vm6, %v5385_v1  ;;  %v5590_v47 = vsel %vm2472_vm6, %v5385_v1, 0.0  ;;  %v5737_v31 = vmul.f32 %v5385_v1, %v5385_v1  ;;  %v4251_v2 = vadd.f32 %v4250_v4, %v11248_v36  ;;  %v8943_v37 = vpop.f32.mrf.mxu1 }
 0x3ff   :  { %v5591_v8 = vadd.f32 %v5590_v47, %v5589_v9  ;;  %v8769_v41 = vpop.f32.mrf.mxu0 }
 0x400   :  { %v5853_v45 = vsel %vm2472_vm6, %v5737_v31, 0.0  ;;  %v5386_v55 = vadd.f32 %v5142_v22, %v4251_v2  ;;  %v5147_v16 = vpop.f32.mrf.mxu1  ;;  %9041 = vmatmul.mubr.msk.bf16.gmra.mxu1 %vm416_vm4, %v4844_v32 }
 0x401   :  { %v5854_v15 = vadd.f32 %v5853_v45, %v5852_v53  ;;  %v4255_v50 = vpop.f32.mrf.mxu0  ;;  %8867 = vmatmul.mubr.msk.bf16.gmra.mxu0 %vm416_vm4, %v7366_v57  ;;  %9044 = vmatprep.mubr.msk.bf16.mxu1 %vm9369_vm2, %v13451_v35  ;;  %v13582_v45 = vld [vmem:[#allocation48_spill] sm:$0xff] }
 0x402   :  { %5474 = vst.msk [vmem:[#allocation2 + $0x3b0] sm:$0xff] %vm2472_vm6, %v5386_v55  ;;  %v5592_v36 = vsel %vm2472_vm6, %v5386_v55, 0.0  ;;  %v5738_v27 = vmul.f32 %v5386_v55, %v5386_v55  ;;  %v4256_v12 = vadd.f32 %v4255_v50, %v11256_v51  ;;  %v8946_v21 = vpop.f32.mrf.mxu1  ;;  %8870 = vmatprep.mubr.msk.bf16.mxu0 %vm9369_vm2, %v13451_v35 }
 0x403   :  { %v5593_v14 = vadd.f32 %v5592_v36, %v5591_v8  ;;  %v8772_v10 = vpop.f32.mrf.mxu0 }
 0x404   :  { %v5855_v60 = vsel %vm2472_vm6, %v5738_v27, 0.0  ;;  %v5387_v43 = vadd.f32 %v5147_v16, %v4256_v12  ;;  %v5150_v6 = vpop.f32.mrf.mxu1 }
 0x405   :  { %v5856_v39 = vadd.f32 %v5855_v60, %v5854_v15  ;;  %v4258_v20 = vpop.f32.mrf.mxu0  ;;  %v13583_v60 = vld [vmem:[#allocation49_spill] sm:$0xff] }
 0x406   :  { %5475 = vst.msk [vmem:[#allocation2 + $0x3b8] sm:$0xff] %vm2472_vm6, %v5387_v43  ;;  %v5594_v51 = vsel %vm2472_vm6, %v5387_v43, 0.0  ;;  %v5739_v48 = vmul.f32 %v5387_v43, %v5387_v43  ;;  %v4259_v5 = vadd.f32 %v4258_v20, %v11268_v11  ;;  %v8947_v35 = vpop.f32.mrf.mxu1 }
 0x407   :  { %v5595_v38 = vadd.f32 %v5594_v51, %v5593_v14  ;;  %v8773_v34 = vpop.f32.mrf.mxu0 }
 0x408   :  { %v5857_v25 = vsel %vm2472_vm6, %v5739_v48, 0.0  ;;  %v5388_v7 = vadd.f32 %v5150_v6, %v4259_v5  ;;  %v5155_v30 = vpop.f32.mrf.mxu1  ;;  %9045 = vmatmul.mubr.msk.bf16.gmra.mxu1 %vm416_vm4, %v4843_v56 }
 0x409   :  { %v5858_v13 = vadd.f32 %v5857_v25, %v5856_v39  ;;  %v4263_v0 = vpop.f32.mrf.mxu0  ;;  %8871 = vmatmul.mubr.msk.bf16.gmra.mxu0 %vm416_vm4, %v9276_v28  ;;  %v13584_v25 = vld [vmem:[#allocation50_spill] sm:$0xff] }
 0x40a   :  { %5476 = vst.msk [vmem:[#allocation2 + $0x3c0] sm:$0xff] %vm2472_vm6, %v5388_v7  ;;  %v5596_v49 = vsel %vm2472_vm6, %v5388_v7, 0.0  ;;  %v5740_v62 = vmul.f32 %v5388_v7, %v5388_v7  ;;  %v4264_v11 = vadd.f32 %v4263_v0, %v11280_v19  ;;  %v8950_v33 = vpop.f32.mrf.mxu1 }
 0x40b   :  { %v5597_v24 = vadd.f32 %v5596_v49, %v5595_v38  ;;  %v8776_v58 = vpop.f32.mrf.mxu0 }
 0x40c   :  { %v5859_v23 = vsel %vm2472_vm6, %v5740_v62, 0.0  ;;  %v5389_v26 = vadd.f32 %v5155_v30, %v4264_v11  ;;  %v5158_v59 = vpop.f32.mrf.mxu1 }
 0x40d   :  { %v5860_v18 = vadd.f32 %v5859_v23, %v5858_v13  ;;  %v4266_v52 = vpop.f32.mrf.mxu0 }
 0x40e   :  { %5477 = vst.msk [vmem:[#allocation2 + $0x3c8] sm:$0xff] %vm2472_vm6, %v5389_v26  ;;  %v5598_v56 = vsel %vm2472_vm6, %v5389_v26, 0.0  ;;  %v5741_v54 = vmul.f32 %v5389_v26, %v5389_v26  ;;  %v4267_v17 = vadd.f32 %v4266_v52, %v11292_v61  ;;  %v8951_v29 = vpop.f32.mrf.mxu1  ;;  %v13585_v26 = vld [vmem:[#allocation51_spill] sm:$0xff] }
 0x40f   :  { %v5599_v40 = vadd.f32 %v5598_v56, %v5597_v24  ;;  %v8777_v9 = vpop.f32.mrf.mxu0 }
 0x410   :  { %v5861_v19 = vsel %vm2472_vm6, %v5741_v54, 0.0  ;;  %v5390_v42 = vadd.f32 %v5158_v59, %v4267_v17  ;;  %v5163_v3 = vpop.f32.mrf.mxu1 }
 0x411   :  { %v5862_v1 = vadd.f32 %v5861_v19, %v5860_v18  ;;  %v4271_v22 = vpop.f32.mrf.mxu0 }
 0x412   :  { %5478 = vst.msk [vmem:[#allocation2 + $0x3d0] sm:$0xff] %vm2472_vm6, %v5390_v42  ;;  %v5600_v53 = vsel %vm2472_vm6, %v5390_v42, 0.0  ;;  %v5742_v4 = vmul.f32 %v5390_v42, %v5390_v42  ;;  %v4272_v63 = vadd.f32 %v4271_v22, %v11307_v44  ;;  %v8954_v46 = vpop.f32.mrf.mxu1 }
 0x413   :  { %v5601_v57 = vadd.f32 %v5600_v53, %v5599_v40  ;;  %v8780_v32 = vpop.f32.mrf.mxu0 }
 0x414   :  { %v5863_v61 = vsel %vm2472_vm6, %v5742_v4, 0.0  ;;  %v5391_v47 = vadd.f32 %v5163_v3, %v4272_v63  ;;  %v5166_v31 = vpop.f32.mrf.mxu1  ;;  %v13586_v3 = vld [vmem:[#allocation52_spill] sm:$0xff] }
 0x415   :  { %v5864_v2 = vadd.f32 %v5863_v61, %v5862_v1  ;;  %v4274_v37 = vpop.f32.mrf.mxu0 }
 0x416   :  { %5479 = vst.msk [vmem:[#allocation2 + $0x3d8] sm:$0xff] %vm2472_vm6, %v5391_v47  ;;  %v5602_v8 = vsel %vm2472_vm6, %v5391_v47, 0.0  ;;  %v5743_v41 = vmul.f32 %v5391_v47, %v5391_v47  ;;  %v4275_v55 = vadd.f32 %v4274_v37, %v13582_v45  ;;  %v8955_v16 = vpop.f32.mrf.mxu1 }
 0x417   :  { %v5603_v15 = vadd.f32 %v5602_v8, %v5601_v57  ;;  %v8781_v50 = vpop.f32.mrf.mxu0 }
 0x418   :  { %v5865_v44 = vsel %vm2472_vm6, %v5743_v41, 0.0  ;;  %v5392_v36 = vadd.f32 %v5166_v31, %v4275_v55  ;;  %v5171_v27 = vpop.f32.mrf.mxu1 }
 0x419   :  { %v5866_v12 = vadd.f32 %v5865_v44, %v5864_v2  ;;  %v4279_v21 = vpop.f32.mrf.mxu0  ;;  %v13587_v2 = vld [vmem:[#allocation53_spill] sm:$0xff] }
 0x41a   :  { %5480 = vst.msk [vmem:[#allocation2 + $0x3e0] sm:$0xff] %vm2472_vm6, %v5392_v36  ;;  %v5604_v14 = vsel %vm2472_vm6, %v5392_v36, 0.0  ;;  %v5744_v10 = vmul.f32 %v5392_v36, %v5392_v36  ;;  %v4280_v43 = vadd.f32 %v4279_v21, %v13583_v60  ;;  %v8958_v6 = vpop.f32.mrf.mxu1 }
 0x41b   :  { %v5605_v39 = vadd.f32 %v5604_v14, %v5603_v15  ;;  %v8784_v20 = vpop.f32.mrf.mxu0 }
 0x41c   :  { %v5867_v28 = vsel %vm2472_vm6, %v5744_v10, 0.0  ;;  %v5393_v51 = vadd.f32 %v5171_v27, %v4280_v43  ;;  %v5174_v48 = vpop.f32.mrf.mxu1 }
 0x41d   :  { %v5868_v5 = vadd.f32 %v5867_v28, %v5866_v12  ;;  %v4282_v35 = vpop.f32.mrf.mxu0  ;;  %v13588_v12 = vld [vmem:[#allocation4_spill] sm:$0xff] }
 0x41e   :  { %5481 = vst.msk [vmem:[#allocation2 + $0x3e8] sm:$0xff] %vm2472_vm6, %v5393_v51  ;;  %v5606_v38 = vsel %vm2472_vm6, %v5393_v51, 0.0  ;;  %v5745_v34 = vmul.f32 %v5393_v51, %v5393_v51  ;;  %v4283_v7 = vadd.f32 %v4282_v35, %v13584_v25  ;;  %v8959_v30 = vpop.f32.mrf.mxu1 }
 0x41f   :  { %v5607_v13 = vadd.f32 %v5606_v38, %v5605_v39  ;;  %v8785_v0 = vpop.f32.mrf.mxu0 }
 0x420   :  { %v5869_v49 = vsel %vm2472_vm6, %v5745_v34, 0.0  ;;  %v5394_v62 = vadd.f32 %v5174_v48, %v4283_v7  ;;  %v5179_v11 = vpop.f32.mrf.mxu1 }
 0x421   :  { %v5870_v33 = vadd.f32 %v5869_v49, %v5868_v5  ;;  %v4287_v24 = vpop.f32.mrf.mxu0  ;;  %v13589_v5 = vld [vmem:[#allocation5_spill] sm:$0xff] }
 0x422   :  { %5482 = vst.msk [vmem:[#allocation2 + $0x3f0] sm:$0xff] %vm2472_vm6, %v5394_v62  ;;  %v5608_v58 = vsel %vm2472_vm6, %v5394_v62, 0.0  ;;  %v5746_v23 = vmul.f32 %v5394_v62, %v5394_v62  ;;  %v4288_v59 = vadd.f32 %v4287_v24, %v13585_v26  ;;  %v8962_v18 = vpop.f32.mrf.mxu1 }
 0x423   :  { %v5609_v52 = vadd.f32 %v5608_v58, %v5607_v13  ;;  %v8788_v56 = vpop.f32.mrf.mxu0 }
 0x424   :  { %v5871_v54 = vsel %vm2472_vm6, %v5746_v23, 0.0  ;;  %v5395_v17 = vadd.f32 %v5179_v11, %v4288_v59  ;;  %v5182_v29 = vpop.f32.mrf.mxu1 }
 0x425   :  { %v5872_v40 = vadd.f32 %v5871_v54, %v5870_v33  ;;  %v4290_v9 = vpop.f32.mrf.mxu0  ;;  %v13590_v33 = vld [vmem:[#allocation6_spill] sm:$0xff] }
 0x426   :  { %5483 = vst.msk [vmem:[#allocation2 + $0x3f8] sm:$0xff] %vm2472_vm6, %v5395_v17  ;;  %v5610_v19 = vsel %vm2472_vm6, %v5395_v17, 0.0  ;;  %v5747_v42 = vmul.f32 %v5395_v17, %v5395_v17  ;;  %v4291_v1 = vadd.f32 %v4290_v9, %v13586_v3  ;;  %v8963_v22 = vpop.f32.mrf.mxu1 }
 0x427   :  { %v5611_v53 = vadd.f32 %v5610_v19, %v5609_v52  ;;  %v8789_v4 = vpop.f32.mrf.mxu0 }
 0x428   :  { %v5873_v63 = vsel %vm2472_vm6, %v5747_v42, 0.0  ;;  %v5396_v46 = vadd.f32 %v5182_v29, %v4291_v1  ;;  %v5187_v57 = vpop.f32.mrf.mxu1 }
 0x429   :  { %v5874_v32 = vadd.f32 %v5873_v63, %v5872_v40  ;;  %v4295_v61 = vpop.f32.mrf.mxu0  ;;  %v13591_v40 = vld [vmem:[#allocation7_spill] sm:$0xff] }
 0x42a   :  { %5484 = vst.msk [vmem:[#allocation2 + $0x400] sm:$0xff] %vm2472_vm6, %v5396_v46  ;;  %v5612_v47 = vsel %vm2472_vm6, %v5396_v46, 0.0  ;;  %v5748_v31 = vmul.f32 %v5396_v46, %v5396_v46  ;;  %v4296_v37 = vadd.f32 %v4295_v61, %v13587_v2  ;;  %v8966_v8 = vpop.f32.mrf.mxu1 }
 0x42b   :  { %v5613_v41 = vadd.f32 %v5612_v47, %v5611_v53  ;;  %v8792_v45 = vpop.f32.mrf.mxu0 }
 0x42c   :  { %v5875_v55 = vsel %vm2472_vm6, %v5748_v31, 0.0  ;;  %v5397_v16 = vadd.f32 %v5187_v57, %v4296_v37  ;;  %v5190_v15 = vpop.f32.mrf.mxu1 }
 0x42d   :  { %v5876_v50 = vadd.f32 %v5875_v55, %v5874_v32  ;;  %v4298_v44 = vpop.f32.mrf.mxu0  ;;  %v13592_v32 = vld [vmem:[#allocation8_spill] sm:$0xff] }
 0x42e   :  { %5485 = vst.msk [vmem:[#allocation2 + $0x408] sm:$0xff] %vm2472_vm6, %v5397_v16  ;;  %v5614_v36 = vsel %vm2472_vm6, %v5397_v16, 0.0  ;;  %v5749_v27 = vmul.f32 %v5397_v16, %v5397_v16  ;;  %v4299_v21 = vadd.f32 %v4298_v44, %v13588_v12  ;;  %v8967_v14 = vpop.f32.mrf.mxu1 }
 0x42f   :  { %v5615_v10 = vadd.f32 %v5614_v36, %v5613_v41  ;;  %v8793_v60 = vpop.f32.mrf.mxu0 }
 0x430   :  { %v5877_v43 = vsel %vm2472_vm6, %v5749_v27, 0.0  ;;  %v5398_v6 = vadd.f32 %v5190_v15, %v4299_v21  ;;  %v5195_v39 = vpop.f32.mrf.mxu1 }
 0x431   :  { %v5878_v20 = vadd.f32 %v5877_v43, %v5876_v50  ;;  %v4303_v28 = vpop.f32.mrf.mxu0  ;;  %v13593_v50 = vld [vmem:[#allocation9_spill] sm:$0xff] }
 0x432   :  { %5486 = vst.msk [vmem:[#allocation2 + $0x410] sm:$0xff] %vm2472_vm6, %v5398_v6  ;;  %v5616_v51 = vsel %vm2472_vm6, %v5398_v6, 0.0  ;;  %v5750_v48 = vmul.f32 %v5398_v6, %v5398_v6  ;;  %v4304_v35 = vadd.f32 %v4303_v28, %v13589_v5  ;;  %v8970_v38 = vpop.f32.mrf.mxu1 }
 0x433   :  { %v5617_v34 = vadd.f32 %v5616_v51, %v5615_v10  ;;  %v8796_v25 = vpop.f32.mrf.mxu0 }
 0x434   :  { %v5879_v7 = vsel %vm2472_vm6, %v5750_v48, 0.0  ;;  %v5399_v30 = vadd.f32 %v5195_v39, %v4304_v35  ;;  %v5198_v13 = vpop.f32.mrf.mxu1 }
 0x435   :  { %v5880_v0 = vadd.f32 %v5879_v7, %v5878_v20  ;;  %v4306_v49 = vpop.f32.mrf.mxu0  ;;  %v13594_v20 = vld [vmem:[#allocation10_spill] sm:$0xff] }
 0x436   :  { %5487 = vst.msk [vmem:[#allocation2 + $0x418] sm:$0xff] %vm2472_vm6, %v5399_v30  ;;  %v5618_v62 = vsel %vm2472_vm6, %v5399_v30, 0.0  ;;  %v5751_v11 = vmul.f32 %v5399_v30, %v5399_v30  ;;  %v4307_v24 = vadd.f32 %v4306_v49, %v13590_v33  ;;  %v8971_v58 = vpop.f32.mrf.mxu1 }
 0x437   :  { %v5619_v23 = vadd.f32 %v5618_v62, %v5617_v34  ;;  %v8797_v26 = vpop.f32.mrf.mxu0 }
 0x438   :  { %v5881_v59 = vsel %vm2472_vm6, %v5751_v11, 0.0  ;;  %v5400_v18 = vadd.f32 %v5198_v13, %v4307_v24  ;;  %v5203_v52 = vpop.f32.mrf.mxu1 }
 0x439   :  { %v5882_v56 = vadd.f32 %v5881_v59, %v5880_v0  ;;  %v4311_v54 = vpop.f32.mrf.mxu0  ;;  %v13595_v0 = vld [vmem:[#allocation11_spill] sm:$0xff] }
 0x43a   :  { %5488 = vst.msk [vmem:[#allocation2 + $0x420] sm:$0xff] %vm2472_vm6, %v5400_v18  ;;  %v5620_v17 = vsel %vm2472_vm6, %v5400_v18, 0.0  ;;  %v5752_v29 = vmul.f32 %v5400_v18, %v5400_v18  ;;  %v4312_v9 = vadd.f32 %v4311_v54, %v13591_v40  ;;  %v8974_v19 = vpop.f32.mrf.mxu1 }
 0x43b   :  { %v5621_v42 = vadd.f32 %v5620_v17, %v5619_v23  ;;  %v8800_v3 = vpop.f32.mrf.mxu0 }
 0x43c   :  { %v5883_v1 = vsel %vm2472_vm6, %v5752_v29, 0.0  ;;  %v5401_v22 = vadd.f32 %v5203_v52, %v4312_v9  ;;  %v5206_v53 = vpop.f32.mrf.mxu1 }
 0x43d   :  { %v5884_v4 = vadd.f32 %v5883_v1, %v5882_v56  ;;  %v4314_v63 = vpop.f32.mrf.mxu0  ;;  %v13596_v56 = vld [vmem:[#allocation12_spill] sm:$0xff] }
 0x43e   :  { %5489 = vst.msk [vmem:[#allocation2 + $0x428] sm:$0xff] %vm2472_vm6, %v5401_v22  ;;  %v5622_v46 = vsel %vm2472_vm6, %v5401_v22, 0.0  ;;  %v5753_v57 = vmul.f32 %v5401_v22, %v5401_v22  ;;  %v4315_v61 = vadd.f32 %v4314_v63, %v13592_v32  ;;  %v8975_v47 = vpop.f32.mrf.mxu1  ;;  %v13597_v22 = vld [vmem:[#allocation13_spill] sm:$0xff] }
 0x43f   :  { %v5623_v31 = vadd.f32 %v5622_v46, %v5621_v42  ;;  %v8801_v2 = vpop.f32.mrf.mxu0 }
 0x440   :  { %v5885_v37 = vsel %vm2472_vm6, %v5753_v57, 0.0  ;;  %v5402_v8 = vadd.f32 %v5206_v53, %v4315_v61  ;;  %v5211_v41 = vpop.f32.mrf.mxu1  ;;  %v13598_v61 = vld [vmem:[#allocation14_spill] sm:$0xff] }
 0x441   :  { %v5886_v45 = vadd.f32 %v5885_v37, %v5884_v4  ;;  %v4319_v55 = vpop.f32.mrf.mxu0 }
 0x442   :  { %5490 = vst.msk [vmem:[#allocation2 + $0x430] sm:$0xff] %vm2472_vm6, %v5402_v8  ;;  %v5624_v16 = vsel %vm2472_vm6, %v5402_v8, 0.0  ;;  %v5754_v15 = vmul.f32 %v5402_v8, %v5402_v8  ;;  %v4320_v44 = vadd.f32 %v4319_v55, %v13593_v50  ;;  %v8978_v36 = vpop.f32.mrf.mxu1 }
 0x443   :  { %v5625_v27 = vadd.f32 %v5624_v16, %v5623_v31  ;;  %v8804_v12 = vpop.f32.mrf.mxu0 }
 0x444   :  { %v5887_v21 = vsel %vm2472_vm6, %v5754_v15, 0.0  ;;  %v5403_v14 = vadd.f32 %v5211_v41, %v4320_v44  ;;  %v5214_v10 = vpop.f32.mrf.mxu1 }
 0x445   :  { %v5888_v60 = vadd.f32 %v5887_v21, %v5886_v45  ;;  %v4322_v43 = vpop.f32.mrf.mxu0  ;;  %v13599_v45 = vld [vmem:[#allocation15_spill] sm:$0xff] }
 0x446   :  { %5491 = vst.msk [vmem:[#allocation2 + $0x438] sm:$0xff] %vm2472_vm6, %v5403_v14  ;;  %v5626_v6 = vsel %vm2472_vm6, %v5403_v14, 0.0  ;;  %v5755_v39 = vmul.f32 %v5403_v14, %v5403_v14  ;;  %v4323_v28 = vadd.f32 %v4322_v43, %v13594_v20  ;;  %v8979_v51 = vpop.f32.mrf.mxu1 }
 0x447   :  { %v5627_v48 = vadd.f32 %v5626_v6, %v5625_v27  ;;  %v8805_v5 = vpop.f32.mrf.mxu0  ;;  %v13600_v27 = vld [vmem:[#allocation16_spill] sm:$0xff]  ;;  %v13601_v6 = vld [vmem:[#allocation17_spill] sm:$0xff] }
 0x448   :  { %v5889_v35 = vsel %vm2472_vm6, %v5755_v39, 0.0  ;;  %v5404_v38 = vadd.f32 %v5214_v10, %v4323_v28  ;;  %v5219_v34 = vpop.f32.mrf.mxu1 }
 0x449   :  { %v5890_v25 = vadd.f32 %v5889_v35, %v5888_v60  ;;  %v4327_v7 = vpop.f32.mrf.mxu0  ;;  %v13602_v35 = vld [vmem:[#allocation18_spill] sm:$0xff] }
 0x44a   :  { %5492 = vst.msk [vmem:[#allocation2 + $0x440] sm:$0xff] %vm2472_vm6, %v5404_v38  ;;  %v5628_v30 = vsel %vm2472_vm6, %v5404_v38, 0.0  ;;  %v5756_v13 = vmul.f32 %v5404_v38, %v5404_v38  ;;  %v4328_v49 = vadd.f32 %v4327_v7, %v13595_v0  ;;  %v8982_v62 = vpop.f32.mrf.mxu1  ;;  %v13603_v0 = vld [vmem:[#allocation19_spill] sm:$0xff] }
 0x44b   :  { %v5629_v11 = vadd.f32 %v5628_v30, %v5627_v48  ;;  %v8808_v33 = vpop.f32.mrf.mxu0 }
 0x44c   :  { %v5891_v24 = vsel %vm2472_vm6, %v5756_v13, 0.0  ;;  %v5405_v58 = vadd.f32 %v5219_v34, %v4328_v49  ;;  %v5222_v23 = vpop.f32.mrf.mxu1 }
 0x44d   :  { %v5892_v26 = vadd.f32 %v5891_v24, %v5890_v25  ;;  %v4330_v59 = vpop.f32.mrf.mxu0 }
 0x44e   :  { %5493 = vst.msk [vmem:[#allocation2 + $0x448] sm:$0xff] %vm2472_vm6, %v5405_v58  ;;  %v5630_v18 = vsel %vm2472_vm6, %v5405_v58, 0.0  ;;  %v5757_v52 = vmul.f32 %v5405_v58, %v5405_v58  ;;  %v4331_v54 = vadd.f32 %v4330_v59, %v13596_v56  ;;  %v8983_v17 = vpop.f32.mrf.mxu1 }
 0x44f   :  { %v12588_v29 = vadd.f32 %v5630_v18, %v5629_v11  ;;  %v8809_v40 = vpop.f32.mrf.mxu0  ;;  %v13605_v17 = vld [vmem:[#allocation21_spill] sm:$0xff] }
 0x450   :  { %v5893_v9 = vsel %vm2472_vm6, %v5757_v52, 0.0  ;;  %v12591_v19 = vadd.f32 %v5222_v23, %v4331_v54  ;;  %v5227_v42 = vpop.f32.mrf.mxu1  ;;  %v13604_v23 = vld [vmem:[#allocation20_spill] sm:$0xff] }
 0x451   :  { %v12593_v3 = vadd.f32 %v5893_v9, %v5892_v26  ;;  %v4335_v1 = vpop.f32.mrf.mxu0 }
 0x452   :  { %5494 = vst.msk [vmem:[#allocation2 + $0x450] sm:$0xff] %vm2472_vm6, %v12591_v19  ;;  %v4336_v53 = vadd.f32 %v4335_v1, %v13597_v22  ;;  %v8986_v4 = vpop.f32.mrf.mxu1 }
 0x453   :  { %v8812_v63 = vpop.f32.mrf.mxu0  ;;  %v13606_v4 = vld [vmem:[#allocation22_spill] sm:$0xff] }
 0x454   :  { %v12598_v46 = vadd.f32 %v5227_v42, %v4336_v53  ;;  %v5230_v57 = vpop.f32.mrf.mxu1 }
 0x455   :  { %v4338_v32 = vpop.f32.mrf.mxu0 }
 0x456   :  { %5495 = vst.msk [vmem:[#allocation2 + $0x458] sm:$0xff] %vm2472_vm6, %v12598_v46  ;;  %v4339_v47 = vadd.f32 %v4338_v32, %v13598_v61  ;;  %v8987_v31 = vpop.f32.mrf.mxu1 }
 0x457   :  { %v8813_v2 = vpop.f32.mrf.mxu0 }
 0x458   :  { %v12603_v37 = vadd.f32 %v5230_v57, %v4339_v47  ;;  %v5235_v8 = vpop.f32.mrf.mxu1  ;;  %v13607_v2 = vld [vmem:[#allocation23_spill] sm:$0xff] }
 0x459   :  { %v4343_v41 = vpop.f32.mrf.mxu0 }
 0x45a   :  { %5496 = vst.msk [vmem:[#allocation2 + $0x460] sm:$0xff] %vm2472_vm6, %v12603_v37  ;;  %v4344_v55 = vadd.f32 %v4343_v41, %v13599_v45  ;;  %v8990_v16 = vpop.f32.mrf.mxu1 }
 0x45b   :  { %v8816_v15 = vpop.f32.mrf.mxu0 }
 0x45c   :  { %v12608_v50 = vadd.f32 %v5235_v8, %v4344_v55  ;;  %v5238_v44 = vpop.f32.mrf.mxu1 }
 0x45d   :  { %v4346_v36 = vpop.f32.mrf.mxu0 }
 0x45e   :  { %5497 = vst.msk [vmem:[#allocation2 + $0x468] sm:$0xff] %vm2472_vm6, %v12608_v50  ;;  %v4347_v12 = vadd.f32 %v4346_v36, %v13600_v27  ;;  %v8991_v21 = vpop.f32.mrf.mxu1 }
 0x45f   :  { %v8817_v14 = vpop.f32.mrf.mxu0 }
 0x460   :  { %v12613_v10 = vadd.f32 %v5238_v44, %v4347_v12  ;;  %v5243_v60 = vpop.f32.mrf.mxu1  ;;  %v13608_v44 = vld [vmem:[#allocation24_spill] sm:$0xff] }
 0x461   :  { %v4351_v43 = vpop.f32.mrf.mxu0 }
 0x462   :  { %5498 = vst.msk [vmem:[#allocation2 + $0x470] sm:$0xff] %vm2472_vm6, %v12613_v10  ;;  %v4352_v39 = vadd.f32 %v4351_v43, %v13601_v6  ;;  %v8994_v20 = vpop.f32.mrf.mxu1  ;;  %v13609_v43 = vld [vmem:[#allocation25_spill] sm:$0xff] }
 0x463   :  { %v8820_v28 = vpop.f32.mrf.mxu0 }
 0x464   :  { %v12618_v51 = vadd.f32 %v5243_v60, %v4352_v39  ;;  %v5246_v48 = vpop.f32.mrf.mxu1 }
 0x465   :  { %v4354_v5 = vpop.f32.mrf.mxu0 }
 0x466   :  { %5499 = vst.msk [vmem:[#allocation2 + $0x478] sm:$0xff] %vm2472_vm6, %v12618_v51  ;;  %v4355_v38 = vadd.f32 %v4354_v5, %v13602_v35  ;;  %v8995_v34 = vpop.f32.mrf.mxu1  ;;  %v13610_v35 = vld [vmem:[#allocation26_spill] sm:$0xff] }
 0x467   :  { %v8821_v25 = vpop.f32.mrf.mxu0 }
 0x468   :  { %v12623_v7 = vadd.f32 %v5246_v48, %v4355_v38  ;;  %v5251_v30 = vpop.f32.mrf.mxu1 }
 0x469   :  { %v4359_v13 = vpop.f32.mrf.mxu0 }
 0x46a   :  { %5500 = vst.msk [vmem:[#allocation2 + $0x480] sm:$0xff] %vm2472_vm6, %v12623_v7  ;;  %v4360_v49 = vadd.f32 %v4359_v13, %v13603_v0  ;;  %v8998_v62 = vpop.f32.mrf.mxu1 }
 0x46b   :  { %v8824_v11 = vpop.f32.mrf.mxu0 }
 0x46c   :  { %v12628_v33 = vadd.f32 %v5251_v30, %v4360_v49  ;;  %v5254_v24 = vpop.f32.mrf.mxu1  ;;  %v13611_v49 = vld [vmem:[#allocation27_spill] sm:$0xff] }
 0x46d   :  { %v4362_v58 = vpop.f32.mrf.mxu0 }
 0x46e   :  { %5501 = vst.msk [vmem:[#allocation2 + $0x488] sm:$0xff] %vm2472_vm6, %v12628_v33  ;;  %v4363_v26 = vadd.f32 %v4362_v58, %v13604_v23  ;;  %v8999_v59 = vpop.f32.mrf.mxu1  ;;  %v5758_v58 = vmul.f32 %v12591_v19, %v12591_v19 }
 0x46f   :  { %v8825_v18 = vpop.f32.mrf.mxu0 }
 0x470   :  { %v12633_v52 = vadd.f32 %v5254_v24, %v4363_v26  ;;  %v5259_v56 = vpop.f32.mrf.mxu1  ;;  %v5632_v18 = vsel %vm2472_vm6, %v12591_v19, 0.0 }
 0x471   :  { %v4367_v54 = vpop.f32.mrf.mxu0 }
 0x472   :  { %5502 = vst.msk [vmem:[#allocation2 + $0x490] sm:$0xff] %vm2472_vm6, %v12633_v52  ;;  %v4368_v40 = vadd.f32 %v4367_v54, %v13605_v17  ;;  %v9002_v9 = vpop.f32.mrf.mxu1  ;;  %v13612_v54 = vld [vmem:[#allocation28_spill] sm:$0xff] }
 0x473   :  { %v8828_v42 = vpop.f32.mrf.mxu0 }
 0x474   :  { %v12638_v1 = vadd.f32 %v5259_v56, %v4368_v40  ;;  %v5262_v22 = vpop.f32.mrf.mxu1  ;;  %v5759_v56 = vmul.f32 %v12598_v46, %v12598_v46  ;;  %v5895_v42 = vsel %vm2472_vm6, %v5758_v58, 0.0 }
 0x475   :  { %v4370_v53 = vpop.f32.mrf.mxu0 }
 0x476   :  { %5503 = vst.msk [vmem:[#allocation2 + $0x498] sm:$0xff] %vm2472_vm6, %v12638_v1  ;;  %v4371_v63 = vadd.f32 %v4370_v53, %v13606_v4  ;;  %v9003_v57 = vpop.f32.mrf.mxu1  ;;  %v5760_v53 = vmul.f32 %v12603_v37, %v12603_v37 }
 0x477   :  { %v8829_v32 = vpop.f32.mrf.mxu0 }
 0x478   :  { %v12643_v61 = vadd.f32 %v5262_v22, %v4371_v63  ;;  %v5267_v47 = vpop.f32.mrf.mxu1  ;;  %v5634_v22 = vsel %vm2472_vm6, %v12598_v46, 0.0  ;;  %v5633_v63 = vadd.f32 %v5632_v18, %v12588_v29  ;;  %v5897_v32 = vsel %vm2472_vm6, %v5759_v56, 0.0  ;;  %v13613_v46 = vld [vmem:[#allocation29_spill] sm:$0xff] }
 0x479   :  { %v4375_v31 = vpop.f32.mrf.mxu0  ;;  %v5899_v29 = vsel %vm2472_vm6, %v5760_v53, 0.0 }
 0x47a   :  { %5504 = vst.msk [vmem:[#allocation2 + $0x4a0] sm:$0xff] %vm2472_vm6, %v12643_v61  ;;  %v4376_v8 = vadd.f32 %v4375_v31, %v13607_v2  ;;  %v9006_v41 = vpop.f32.mrf.mxu1  ;;  %v5761_v31 = vmul.f32 %v12608_v50, %v12608_v50 }
 0x47b   :  { %v8832_v45 = vpop.f32.mrf.mxu0  ;;  %v5896_v41 = vadd.f32 %v5895_v42, %v12593_v3  ;;  %v5640_v3 = vsel %vm2472_vm6, %v12613_v10, 0.0 }
 0x47c   :  { %v12648_v55 = vadd.f32 %v5267_v47, %v4376_v8  ;;  %v5270_v16 = vpop.f32.mrf.mxu1  ;;  %v5636_v47 = vsel %vm2472_vm6, %v12603_v37, 0.0  ;;  %v5635_v45 = vadd.f32 %v5634_v22, %v5633_v63  ;;  %v5762_v37 = vmul.f32 %v12613_v10, %v12613_v10 }
 0x47d   :  { %v4378_v15 = vpop.f32.mrf.mxu0  ;;  %v5764_v10 = vmul.f32 %v12623_v7, %v12623_v7  ;;  %v5648_v63 = vsel %vm2472_vm6, %v12633_v52, 0.0 }
 0x47e   :  { %5505 = vst.msk [vmem:[#allocation2 + $0x4a8] sm:$0xff] %vm2472_vm6, %v12648_v55  ;;  %v4379_v36 = vadd.f32 %v4378_v15, %v13608_v44  ;;  %v9007_v27 = vpop.f32.mrf.mxu1  ;;  %v5638_v15 = vsel %vm2472_vm6, %v12608_v50, 0.0  ;;  %v13614_v50 = vld [vmem:[#allocation30_spill] sm:$0xff] }
 0x47f   :  { %v8833_v12 = vpop.f32.mrf.mxu0  ;;  %v5898_v27 = vadd.f32 %v5897_v32, %v5896_v41  ;;  %v5650_v41 = vsel %vm2472_vm6, %v12638_v1, 0.0 }
 0x480   :  { %v12653_v21 = vadd.f32 %v5270_v16, %v4379_v36  ;;  %v5275_v14 = vpop.f32.mrf.mxu1  ;;  %v5637_v12 = vadd.f32 %v5636_v47, %v5635_v45 }
 0x481   :  { %v4383_v60 = vpop.f32.mrf.mxu0 }
 0x482   :  { %5506 = vst.msk [vmem:[#allocation2 + $0x4b0] sm:$0xff] %vm2472_vm6, %v12653_v21  ;;  %v4384_v6 = vadd.f32 %v4383_v60, %v13609_v43  ;;  %v9010_v39 = vpop.f32.mrf.mxu1  ;;  %v5901_v60 = vsel %vm2472_vm6, %v5761_v31, 0.0  ;;  %v5763_v43 = vmul.f32 %v12618_v51, %v12618_v51 }
 0x483   :  { %v8836_v20 = vpop.f32.mrf.mxu0 }
 0x484   :  { %v12658_v28 = vadd.f32 %v5275_v14, %v4384_v6  ;;  %v5278_v48 = vpop.f32.mrf.mxu1  ;;  %v5900_v20 = vadd.f32 %v5899_v29, %v5898_v27  ;;  %v5652_v27 = vsel %vm2472_vm6, %v12643_v61, 0.0 }
 0x485   :  { %v4386_v5 = vpop.f32.mrf.mxu0 }
 0x486   :  { %5507 = vst.msk [vmem:[#allocation2 + $0x4b8] sm:$0xff] %vm2472_vm6, %v12658_v28  ;;  %v4387_v38 = vadd.f32 %v4386_v5, %v13610_v35  ;;  %v9011_v34 = vpop.f32.mrf.mxu1  ;;  %v5903_v35 = vsel %vm2472_vm6, %v5762_v37, 0.0 }
 0x487   :  { %v8837_v25 = vpop.f32.mrf.mxu0 }
 0x488   :  { %v12663_v30 = vadd.f32 %v5278_v48, %v4387_v38  ;;  %v5283_v13 = vpop.f32.mrf.mxu1  ;;  %v5639_v48 = vadd.f32 %v5638_v15, %v5637_v12  ;;  %v5642_v38 = vsel %vm2472_vm6, %v12618_v51, 0.0  ;;  %v13615_v51 = vld [vmem:[#allocation31_spill] sm:$0xff]  ;;  %v5769_v12 = vmul.f32 %v12648_v55, %v12648_v55 }
 0x489   :  { %v4391_v0 = vpop.f32.mrf.mxu0 }
 0x48a   :  { %5508 = vst.msk [vmem:[#allocation2 + $0x4c0] sm:$0xff] %vm2472_vm6, %v12663_v30  ;;  %v4392_v62 = vadd.f32 %v4391_v0, %v13611_v49  ;;  %v9014_v11 = vpop.f32.mrf.mxu1  ;;  %v5641_v0 = vadd.f32 %v5640_v3, %v5639_v48 }
 0x48b   :  { %v8840_v24 = vpop.f32.mrf.mxu0  ;;  %v5644_v11 = vsel %vm2472_vm6, %v12623_v7, 0.0  ;;  %v5766_v7 = vmul.f32 %v12633_v52, %v12633_v52  ;;  %v5768_v52 = vmul.f32 %v12643_v61, %v12643_v61  ;;  %v5770_v61 = vmul.f32 %v12653_v21, %v12653_v21 }
 0x48c   :  { %v12670_v23 = vadd.f32 %v5283_v13, %v4392_v62  ;;  %v5286_v26 = vpop.f32.mrf.mxu1  ;;  %v5902_v13 = vadd.f32 %v5901_v60, %v5900_v20  ;;  %v5905_v62 = vsel %vm2472_vm6, %v5763_v43, 0.0  ;;  %v5765_v24 = vmul.f32 %v12628_v33, %v12628_v33 }
 0x48d   :  { %v4394_v59 = vpop.f32.mrf.mxu0  ;;  %v5643_v18 = vadd.f32 %v5642_v38, %v5641_v0 }
 0x48e   :  { %5509 = vst.msk [vmem:[#allocation2 + $0x4c8] sm:$0xff] %vm2472_vm6, %v12670_v23  ;;  %v4395_v17 = vadd.f32 %v4394_v59, %v13612_v54  ;;  %v9015_v40 = vpop.f32.mrf.mxu1  ;;  %v5904_v59 = vadd.f32 %v5903_v35, %v5902_v13  ;;  %v5907_v54 = vsel %vm2472_vm6, %v5764_v10, 0.0  ;;  %v5917_v10 = vsel %vm2472_vm6, %v5769_v12, 0.0 }
 0x48f   :  { %v8841_v9 = vpop.f32.mrf.mxu0  ;;  %v5645_v22 = vadd.f32 %v5644_v11, %v5643_v18  ;;  %v5771_v13 = vmul.f32 %v12658_v28, %v12658_v28 }
 0x490   :  { %v12684_v4 = vadd.f32 %v5286_v26, %v4395_v17  ;;  %v5291_v19 = vpop.f32.mrf.mxu1  ;;  %v5646_v17 = vsel %vm2472_vm6, %v12628_v33, 0.0  ;;  %v5906_v42 = vadd.f32 %v5905_v62, %v5904_v59  ;;  %v13616_v33 = vld [vmem:[#allocation32_spill] sm:$0xff] }
 0x491   :  { %v4399_v57 = vpop.f32.mrf.mxu0 }
 0x492   :  { %5510 = vst.msk [vmem:[#allocation2 + $0x4d0] sm:$0xff] %vm2472_vm6, %v12684_v4  ;;  %v4400_v2 = vadd.f32 %v4399_v57, %v13613_v46  ;;  %v9018_v8 = vpop.f32.mrf.mxu1  ;;  %v5767_v57 = vmul.f32 %v12638_v1, %v12638_v1  ;;  %v5908_v31 = vadd.f32 %v5907_v54, %v5906_v42  ;;  %v5647_v46 = vadd.f32 %v5646_v17, %v5645_v22  ;;  %v13617_v1 = vld [vmem:[#allocation33_spill] sm:$0xff] }
 0x493   :  { %v8844_v16 = vpop.f32.mrf.mxu0  ;;  %v5911_v8 = vsel %vm2472_vm6, %v5766_v7, 0.0  ;;  %v5921_v17 = vsel %vm2472_vm6, %v5771_v13, 0.0  ;;  %v5660_v7 = vsel %vm2472_vm6, %v12663_v30, 0.0 }
 0x494   :  { %v12701_v44 = vadd.f32 %v5291_v19, %v4400_v2  ;;  %v5294_v36 = vpop.f32.mrf.mxu1  ;;  %v5909_v19 = vsel %vm2472_vm6, %v5765_v24, 0.0  ;;  %v5649_v15 = vadd.f32 %v5648_v63, %v5647_v46 }
 0x495   :  { %v4402_v14 = vpop.f32.mrf.mxu0  ;;  %v5910_v29 = vadd.f32 %v5909_v19, %v5908_v31 }
 0x496   :  { %5511 = vst.msk [vmem:[#allocation2 + $0x4d8] sm:$0xff] %vm2472_vm6, %v12701_v44  ;;  %v4403_v6 = vadd.f32 %v4402_v14, %v13614_v50  ;;  %v9019_v39 = vpop.f32.mrf.mxu1  ;;  %v5651_v43 = vadd.f32 %v5650_v41, %v5649_v15  ;;  %v5664_v41 = vsel %vm2472_vm6, %v12684_v4, 0.0  ;;  %v5666_v12 = vsel %vm2472_vm6, %v12701_v44, 0.0 }
 0x497   :  { %v8845_v5 = vpop.f32.mrf.mxu0  ;;  %v5912_v3 = vadd.f32 %v5911_v8, %v5910_v29  ;;  %v5654_v39 = vsel %vm2472_vm6, %v12648_v55, 0.0  ;;  %v13618_v55 = vld [vmem:[#allocation34_spill] sm:$0xff] }
 0x498   :  { %v12716_v34 = vadd.f32 %v5294_v36, %v4403_v6  ;;  %v5299_v25 = vpop.f32.mrf.mxu1  ;;  %v5913_v36 = vsel %vm2472_vm6, %v5767_v57, 0.0  ;;  %v5915_v6 = vsel %vm2472_vm6, %v5768_v52, 0.0  ;;  %v5653_v35 = vadd.f32 %v5652_v27, %v5651_v43 }
 0x499   :  { %v4407_v49 = vpop.f32.mrf.mxu0  ;;  %v5914_v5 = vadd.f32 %v5913_v36, %v5912_v3  ;;  %v5775_v52 = vmul.f32 %v12701_v44, %v12701_v44 }
 0x49a   :  { %5512 = vst.msk [vmem:[#allocation2 + $0x4e0] sm:$0xff] %vm2472_vm6, %v12716_v34  ;;  %v4408_v58 = vadd.f32 %v4407_v49, %v13615_v51  ;;  %v9022_v26 = vpop.f32.mrf.mxu1  ;;  %v5655_v11 = vadd.f32 %v5654_v39, %v5653_v35  ;;  %v5919_v51 = vsel %vm2472_vm6, %v5770_v61, 0.0  ;;  %v13621_v61 = vld [vmem:[#allocation37_spill] sm:$0xff] }
 0x49b   :  { %v8848_v56 = vpop.f32.mrf.mxu0  ;;  %v5916_v62 = vadd.f32 %v5915_v6, %v5914_v5  ;;  %v5668_v6 = vsel %vm2472_vm6, %v12716_v34, 0.0 }
 0x49c   :  { %v12731_v40 = vadd.f32 %v5299_v25, %v4408_v58  ;;  %v5302_v9 = vpop.f32.mrf.mxu1  ;;  %v5656_v25 = vsel %vm2472_vm6, %v12653_v21, 0.0  ;;  %v5658_v58 = vsel %vm2472_vm6, %v12658_v28, 0.0  ;;  %v5772_v21 = vmul.f32 %v12663_v30, %v12663_v30  ;;  %v13619_v28 = vld [vmem:[#allocation35_spill] sm:$0xff] }
 0x49d   :  { %v4410_v53 = vpop.f32.mrf.mxu0  ;;  %v5918_v18 = vadd.f32 %v5917_v10, %v5916_v62  ;;  %v5657_v56 = vadd.f32 %v5656_v25, %v5655_v11  ;;  %v5774_v30 = vmul.f32 %v12684_v4, %v12684_v4  ;;  %v5776_v4 = vmul.f32 %v12716_v34, %v12716_v34 }
 0x49e   :  { %5513 = vst.msk [vmem:[#allocation2 + $0x4e8] sm:$0xff] %vm2472_vm6, %v12731_v40  ;;  %v4411_v32 = vadd.f32 %v4410_v53, %v13616_v33  ;;  %v9023_v47 = vpop.f32.mrf.mxu1  ;;  %v5923_v57 = vsel %vm2472_vm6, %v5772_v21, 0.0  ;;  %v5662_v33 = vsel %vm2472_vm6, %v12670_v23, 0.0  ;;  %v5777_v39 = vmul.f32 %v12731_v40, %v12731_v40 }
 0x49f   :  { %v8849_v2 = vpop.f32.mrf.mxu0  ;;  %v5920_v53 = vadd.f32 %v5919_v51, %v5918_v18  ;;  %v5659_v19 = vadd.f32 %v5658_v58, %v5657_v56  ;;  %v5927_v27 = vsel %vm2472_vm6, %v5774_v30, 0.0  ;;  %v5931_v10 = vsel %vm2472_vm6, %v5776_v4, 0.0  ;;  %v13622_v58 = vld [vmem:[#allocation38_spill] sm:$0xff] }
 0x4a0   :  { %v12746_v45 = vadd.f32 %v5302_v9, %v4411_v32  ;;  %v5307_v16 = vpop.f32.mrf.mxu1  ;;  %v5773_v9 = vmul.f32 %v12670_v23, %v12670_v23  ;;  %v13620_v23 = vld [vmem:[#allocation36_spill] sm:$0xff]  ;;  %v5670_v25 = vsel %vm2472_vm6, %v12731_v40, 0.0  ;;  %v5933_v11 = vsel %vm2472_vm6, %v5777_v39, 0.0 }
 0x4a1   :  { %v4415_v37 = vpop.f32.mrf.mxu0  ;;  %v5922_v31 = vadd.f32 %v5921_v17, %v5920_v53  ;;  %v5661_v46 = vadd.f32 %v5660_v7, %v5659_v19 }
 0x4a2   :  { %5514 = vst.msk [vmem:[#allocation2 + $0x4f0] sm:$0xff] %vm2472_vm6, %v12746_v45  ;;  %v4416_v14 = vadd.f32 %v4415_v37, %v13617_v1  ;;  %v9026_v60 = vpop.f32.mrf.mxu1  ;;  %v5925_v8 = vsel %vm2472_vm6, %v5773_v9, 0.0  ;;  %v5778_v13 = vmul.f32 %v12746_v45, %v12746_v45 }
 0x4a3   :  { %v8852_v50 = vpop.f32.mrf.mxu0  ;;  %v5924_v15 = vadd.f32 %v5923_v57, %v5922_v31  ;;  %v5663_v37 = vadd.f32 %v5662_v33, %v5661_v46  ;;  %v13623_v57 = vld [vmem:[#allocation39_spill] sm:$0xff] }
 0x4a4   :  { %v12761_v20 = vadd.f32 %v5307_v16, %v4416_v14  ;;  %v5310_v48 = vpop.f32.mrf.mxu1  ;;  %v5929_v50 = vsel %vm2472_vm6, %v5775_v52, 0.0 }
 0x4a5   :  { %v4418_v38 = vpop.f32.mrf.mxu0  ;;  %v5926_v60 = vadd.f32 %v5925_v8, %v5924_v15  ;;  %v5665_v3 = vadd.f32 %v5664_v41, %v5663_v37 }
 0x4a6   :  { %5515 = vst.msk [vmem:[#allocation2 + $0x4f8] sm:$0xff] %vm2472_vm6, %v12761_v20  ;;  %v4419_v0 = vadd.f32 %v4418_v38, %v13618_v55  ;;  %v9027_v49 = vpop.f32.mrf.mxu1  ;;  %v5779_v51 = vmul.f32 %v12761_v20, %v12761_v20  ;;  %v5674_v17 = vsel %vm2472_vm6, %v12761_v20, 0.0 }
 0x4a7   :  { %v8853_v24 = vpop.f32.mrf.mxu0  ;;  %v5928_v5 = vadd.f32 %v5927_v27, %v5926_v60  ;;  %v5667_v35 = vadd.f32 %v5666_v12, %v5665_v3 }
 0x4a8   :  { %v12776_v26 = vadd.f32 %v5310_v48, %v4419_v0  ;;  %v5315_v59 = vpop.f32.mrf.mxu1  ;;  %v5672_v24 = vsel %vm2472_vm6, %v12746_v45, 0.0  ;;  %v5937_v53 = vsel %vm2472_vm6, %v5779_v51, 0.0 }
 0x4a9   :  { %v4423_v54 = vpop.f32.mrf.mxu0  ;;  %v5930_v0 = vadd.f32 %v5929_v50, %v5928_v5  ;;  %v5669_v49 = vadd.f32 %v5668_v6, %v5667_v35  ;;  %v13625_v35 = vld [vmem:[#allocation41_spill] sm:$0xff] }
 0x4aa   :  { %5516 = vst.msk [vmem:[#allocation2 + $0x500] sm:$0xff] %vm2472_vm6, %v12776_v26  ;;  %v4424_v42 = vadd.f32 %v4423_v54, %v13619_v28  ;;  %v9030_v22 = vpop.f32.mrf.mxu1  ;;  %v5935_v54 = vsel %vm2472_vm6, %v5778_v13, 0.0  ;;  %v5780_v7 = vmul.f32 %v12776_v26, %v12776_v26  ;;  %v5676_v19 = vsel %vm2472_vm6, %v12776_v26, 0.0 }
 0x4ab   :  { %v8856_v63 = vpop.f32.mrf.mxu0  ;;  %v5671_v18 = vadd.f32 %v5670_v25, %v5669_v49 }
 0x4ac   :  { %v12791_v32 = vadd.f32 %v5315_v59, %v4424_v42  ;;  %v5318_v47 = vpop.f32.mrf.mxu1  ;;  %v5932_v59 = vadd.f32 %v5931_v10, %v5930_v0  ;;  %v5939_v46 = vsel %vm2472_vm6, %v5780_v7, 0.0 }
 0x4ad   :  { %v4426_v2 = vpop.f32.mrf.mxu0  ;;  %v5673_v42 = vadd.f32 %v5672_v24, %v5671_v18  ;;  %v13626_v18 = vld [vmem:[#allocation42_spill] sm:$0xff] }
 0x4ae   :  { %5517 = vst.msk [vmem:[#allocation2 + $0x508] sm:$0xff] %vm2472_vm6, %v12791_v32  ;;  %v4427_v16 = vadd.f32 %v4426_v2, %v13620_v23  ;;  %v9031_v29 = vpop.f32.mrf.mxu1  ;;  %v5934_v28 = vadd.f32 %v5933_v11, %v5932_v59  ;;  %v5781_v63 = vmul.f32 %v12791_v32, %v12791_v32  ;;  %v5678_v2 = vsel %vm2472_vm6, %v12791_v32, 0.0 }
 0x4af   :  { %v8857_v36 = vpop.f32.mrf.mxu0 }
 0x4b0   :  { %v5430_v1 = vadd.f32 %v5318_v47, %v4427_v16  ;;  %v5323_v14 = vpop.f32.mrf.mxu1  ;;  %v5936_v30 = vadd.f32 %v5935_v54, %v5934_v28  ;;  %v5675_v47 = vadd.f32 %v5674_v17, %v5673_v42  ;;  %v5941_v29 = vsel %vm2472_vm6, %v5781_v63, 0.0  ;;  %v13624_v36 = vld [vmem:[#allocation40_spill] sm:$0xff] }
 0x4b1   :  { %v4431_v43 = vpop.f32.mrf.mxu0 }
 0x4b2   :  { %5518 = vst.msk [vmem:[#allocation2 + $0x510] sm:$0xff] %vm2472_vm6, %v5430_v1  ;;  %v4432_v44 = vadd.f32 %v4431_v43, %v13621_v61  ;;  %v9034_v48 = vpop.f32.mrf.mxu1  ;;  %v5782_v8 = vmul.f32 %v5430_v1, %v5430_v1  ;;  %v5938_v26 = vadd.f32 %v5937_v53, %v5936_v30  ;;  %v5677_v23 = vadd.f32 %v5676_v19, %v5675_v47  ;;  %v13627_v30 = vld [vmem:[#allocation43_spill] sm:$0xff] }
 0x4b3   :  { %v8860_v38 = vpop.f32.mrf.mxu0  ;;  %v5680_v15 = vsel %vm2472_vm6, %v5430_v1, 0.0 }
 0x4b4   :  { %v5431_v34 = vadd.f32 %v5323_v14, %v4432_v44  ;;  %v5326_v55 = vpop.f32.mrf.mxu1  ;;  %v5940_v4 = vadd.f32 %v5939_v46, %v5938_v26  ;;  %v5679_v14 = vadd.f32 %v5678_v2, %v5677_v23  ;;  %v5943_v32 = vsel %vm2472_vm6, %v5782_v8, 0.0 }
 0x4b5   :  { %v4434_v62 = vpop.f32.mrf.mxu0 }
 0x4b6   :  { %5519 = vst.msk [vmem:[#allocation2 + $0x518] sm:$0xff] %vm2472_vm6, %v5431_v34  ;;  %v4435_v40 = vadd.f32 %v4434_v62, %v13622_v58  ;;  %v9035_v21 = vpop.f32.mrf.mxu1  ;;  %v5783_v37 = vmul.f32 %v5431_v34, %v5431_v34  ;;  %v5682_v3 = vsel %vm2472_vm6, %v5431_v34, 0.0  ;;  %v5942_v39 = vadd.f32 %v5941_v29, %v5940_v4 }
 0x4b7   :  { %v8861_v56 = vpop.f32.mrf.mxu0  ;;  %v5681_v61 = vadd.f32 %v5680_v15, %v5679_v14 }
 0x4b8   :  { %v5432_v45 = vadd.f32 %v5326_v55, %v4435_v40  ;;  %v5331_v9 = vpop.f32.mrf.mxu1  ;;  %v5945_v1 = vsel %vm2472_vm6, %v5783_v37, 0.0  ;;  %v5944_v25 = vadd.f32 %v5943_v32, %v5942_v39 }
 0x4b9   :  { %v4439_v22 = vpop.f32.mrf.mxu0  ;;  %v5683_v13 = vadd.f32 %v5682_v3, %v5681_v61 }
 0x4ba   :  { %5520 = vst.msk [vmem:[#allocation2 + $0x520] sm:$0xff] %vm2472_vm6, %v5432_v45  ;;  %v4440_v20 = vadd.f32 %v4439_v22, %v13623_v57  ;;  %v9038_v33 = vpop.f32.mrf.mxu1  ;;  %v5784_v43 = vmul.f32 %v5432_v45, %v5432_v45  ;;  %v5684_v48 = vsel %vm2472_vm6, %v5432_v45, 0.0  ;;  %v5946_v24 = vadd.f32 %v5945_v1, %v5944_v25  ;;  %v5704_v25 = vld [vmem:[#allocation3 + $0x1] sm:$0x1] }
 0x4bb   :  { %v8864_v31 = vpop.f32.mrf.mxu0  ;;  %v5685_v51 = vadd.f32 %v5684_v48, %v5683_v13 }
 0x4bc   :  { %v5433_v41 = vadd.f32 %v5331_v9, %v4440_v20  ;;  %v5334_v52 = vpop.f32.mrf.mxu1  ;;  %v5947_v34 = vsel %vm2472_vm6, %v5784_v43, 0.0 }
 0x4bd   :  { %v4442_v16 = vpop.f32.mrf.mxu0  ;;  %v5948_v17 = vadd.f32 %v5947_v34, %v5946_v24 }
 0x4be   :  { %5521 = vst.msk [vmem:[#allocation2 + $0x528] sm:$0xff] %vm2472_vm6, %v5433_v41  ;;  %v4443_v27 = vadd.f32 %v4442_v16, %v13624_v36  ;;  %v9039_v12 = vpop.f32.mrf.mxu1  ;;  %v5785_v5 = vmul.f32 %v5433_v41, %v5433_v41  ;;  %v5686_v0 = vsel %vm2472_vm6, %v5433_v41, 0.0 }
 0x4bf   :  { %v8865_v60 = vpop.f32.mrf.mxu0  ;;  %v5687_v7 = vadd.f32 %v5686_v0, %v5685_v51 }
 0x4c0   :  { %v5434_v50 = vadd.f32 %v5334_v52, %v4443_v27  ;;  %v5339_v6 = vpop.f32.mrf.mxu1  ;;  %v5949_v40 = vsel %vm2472_vm6, %v5785_v5, 0.0 }
 0x4c1   :  { %v4447_v44 = vpop.f32.mrf.mxu0  ;;  %v5950_v53 = vadd.f32 %v5949_v40, %v5948_v17 }
 0x4c2   :  { %5522 = vst.msk [vmem:[#allocation2 + $0x530] sm:$0xff] %vm2472_vm6, %v5434_v50  ;;  %v4448_v38 = vadd.f32 %v4447_v44, %v13625_v35  ;;  %v9042_v10 = vpop.f32.mrf.mxu1  ;;  %v5786_v49 = vmul.f32 %v5434_v50, %v5434_v50  ;;  %v5688_v21 = vsel %vm2472_vm6, %v5434_v50, 0.0  ;;  %v5526_v35 = vld [vmem:[#allocation3] sm:$0x1] }
 0x4c3   :  { %v8868_v55 = vpop.f32.mrf.mxu0  ;;  %v5689_v19 = vadd.f32 %v5688_v21, %v5687_v7 }
 0x4c4   :  { %v5435_v62 = vadd.f32 %v5339_v6, %v4448_v38  ;;  %v5342_v11 = vpop.f32.mrf.mxu1  ;;  %v5951_v9 = vsel %vm2472_vm6, %v5786_v49, 0.0 }
 0x4c5   :  { %v4450_v58 = vpop.f32.mrf.mxu0  ;;  %v5952_v46 = vadd.f32 %v5951_v9, %v5950_v53 }
 0x4c6   :  { %5523 = vst.msk [vmem:[#allocation2 + $0x538] sm:$0xff] %vm2472_vm6, %v5435_v62  ;;  %v5787_v59 = vmul.f32 %v5435_v62, %v5435_v62  ;;  %v4451_v56 = vadd.f32 %v4450_v58, %v13626_v18  ;;  %v9043_v54 = vpop.f32.mrf.mxu1  ;;  %v5690_v28 = vsel %vm2472_vm6, %v5435_v62, 0.0  ;;  %v5977_v58 = vld [vmem:[%s13435_s2] sm:$0x1] }
 0x4c7   :  { %v8869_v45 = vpop.f32.mrf.mxu0  ;;  %v5691_v2 = vadd.f32 %v5690_v28, %v5689_v19 }
 0x4c8   :  { %v5436_v42 = vadd.f32 %v5342_v11, %v4451_v56  ;;  %v5347_v22 = vpop.f32.mrf.mxu1  ;;  %v5953_v57 = vsel %vm2472_vm6, %v5787_v59, 0.0  ;;  %v12876_v59 = vld [vmem:[%s13436_s3] sm:$0x1] }
 0x4c9   :  { %v4455_v63 = vpop.f32.mrf.mxu0  ;;  %v5954_v23 = vadd.f32 %v5953_v57, %v5952_v46 }
 0x4ca   :  { %5524 = vst.msk [vmem:[#allocation2 + $0x540] sm:$0xff] %vm2472_vm6, %v5436_v42  ;;  %v5692_v20 = vsel %vm2472_vm6, %v5436_v42, 0.0  ;;  %v5788_v33 = vmul.f32 %v5436_v42, %v5436_v42  ;;  %v4456_v47 = vadd.f32 %v4455_v63, %v13627_v30  ;;  %v9046_v31 = vpop.f32.mrf.mxu1 }
 0x4cb   :  { %v8872_v8 = vpop.f32.mrf.mxu0  ;;  %v5693_v16 = vadd.f32 %v5692_v20, %v5691_v2 }
 0x4cc   :  { %v5955_v41 = vsel %vm2472_vm6, %v5788_v33, 0.0  ;;  %v5437_v52 = vadd.f32 %v5347_v22, %v4456_v47  ;;  %v5350_v26 = vpop.f32.mrf.mxu1 }
 0x4cd   :  { %v4458_v29 = vpop.f32.mrf.mxu0  ;;  %v5956_v27 = vadd.f32 %v5955_v41, %v5954_v23 }
 0x4ce   :  { %5525 = vst.msk [vmem:[#allocation2 + $0x548] sm:$0xf] %vm2557_vm8, %v5437_v52  ;;  %v5694_v15 = vsel %vm2557_vm8, %v5437_v52, 0.0  ;;  %v5789_v37 = vmul.f32 %v5437_v52, %v5437_v52  ;;  %v9047_v36 = vpop.f32.mrf.mxu1 }
 0x4cf   :  { %v5695_v12 = vadd.f32 %v5694_v15, %v5693_v16  ;;  %v8873_v4 = vpop.f32.mrf.mxu0 }
 0x4d0   :  { %v5957_v14 = vsel %vm2557_vm8, %v5789_v37, 0.0 }
 0x4d1   :  { %v5696_v60 = vrot.slane %v5695_v12, 4  ;;  %v5958_v32 = vadd.f32 %v5957_v14, %v5956_v27 }
 0x4d3   :  { %v5697_v3 = vadd.f32 %v5696_v60, %v5695_v12  ;;  %v5959_v43 = vrot.slane %v5958_v32, 4 }
 0x4d5   :  { %v5698_v50 = vrot.slane %v5697_v3, 2  ;;  %v5960_v6 = vadd.f32 %v5959_v43, %v5958_v32 }
 0x4d7   :  { %v5699_v39 = vadd.f32 %v5698_v50, %v5697_v3  ;;  %v5961_v61 = vrot.slane %v5960_v6, 2 }
 0x4d9   :  { %v5700_v44 = vrot.slane %v5699_v39, 1  ;;  %v5962_v1 = vadd.f32 %v5961_v61, %v5960_v6 }
 0x4db   :  { %v5701_v48 = vadd.f32 %v5700_v44, %v5699_v39  ;;  %v5963_v5 = vrot.slane %v5962_v1, 1 }
 0x4dd   :  { %v5702_v38 = vadd.f32 %v5701_v48, %v5526_v35  ;;  %v5964_v10 = vadd.f32 %v5963_v5, %v5962_v1 }
 0x4df   :  { %5703 = vst.msk [vmem:[#allocation3] sm:$0x1] %vm13446_vm9, %v5702_v38  ;;  %v5965_v13 = vadd.f32 %v5964_v10, %v5704_v25 }
 0x4e1   :  { %5966 = vst.msk [vmem:[#allocation3 + $0x1] sm:$0x1] %vm13446_vm9, %v5965_v13 }
 0x4e6   :  { %v5970_v55 = vld [vmem:[#allocation3] sm:$0x1] }
 0x4e7   :  { %v5971_v34 = vmul.f32 0.000739645, %v5970_v55 }
 0x4e8   :  { %v5972_v0 = vld [vmem:[#allocation3 + $0x1] sm:$0x1] }
 0x4e9   :  { %v5973_v49 = vmul.f32 0.000739645, %v5972_v0  ;;  %v5974_v62 = vmul.f32 %v5971_v34, %v5971_v34 }
 0x4eb   :  { %v5975_v11 = vsub.f32 %v5973_v49, %v5974_v62 }
 0x4ed   :  { %v5976_v24 = vmax.f32 %v5975_v11, 0.0 }
 0x4ef   :  { %v5978_v51 = vadd.f32 1e-05, %v5976_v24 }
 0x4f1   :  { %9277 = vrsqrt.f32 %v5978_v51 }
 0x4fe   :  { %v9278_v40 = vpop.eup %9277 }
 0x4ff   :  { %v12871_v21 = vmul.f32 %v9278_v40, %v5977_v58 }
 0x501   :  { %v12879_v18 = vmul.f32 %v12871_v21, %v5971_v34 }
 0x503   :  { %v5983_v56 = vsub.f32 %v12876_v59, %v12879_v18 }
 0x504 LB: > { %v5996_v54 = vlaneseq  ;;  %s5990_s2 = smul.u32 680, %s9365_s15  ;;  %vm13442_vm10 = vcmask 256000   ;;  %vm6056_vm11 = vsmask.f32 2304  ;;  %vm6186_vm12 = vcmask 1044484   ;;  %s9365_s15 = sphi %s12883_s15, %s5989_s15  }
 0x505   : > { %s7715_s16 = smul.u32 88, %s9365_s15  ;;  %vm6197_vm13 = vsmask.f32 3328  ;;  %vm12956_vm14 = vmand %vm13442_vm10, %vm6056_vm11  ;;  %vm6342_vm15 = vsmask.f32 256  ;;  %vm13441_vm2 = vcmask 257025  }
 0x506   : > { %v5997_v17 = vshrl.u32 %v5996_v54, 7  ;;  %s12889_s3 = scalar_lea.vmem [#allocation2], %s5990_s2  ;;  %vm13440_vm3 = vsmask.f32 1280  ;;  %vm13630_vm0 = vcmask 1040384   ;;  %vm13003_vm5 = vmand %vm2557_vm8, %vm6197_vm13  ;;  %vm13635_vm9 = vcmask 253952  }
 0x507   : > { %v7583_v45 = vld [vmem:[%s12889_s3 + $0x10] ss:$2 sm:$0x1f]  ;;  %v7585_v9 = vld [vmem:[%s12889_s3 + $0x11] ss:$2 sm:$0x1f]  ;;  %s12939_s19 = scalar_lea.vmem %s13432_s4, %s7715_s16  ;;  %vm12993_vm4 = vmor %vm13630_vm0, %vm6186_vm12 }
 0x508   : > { %v5998_v7 = vsub.s32 0, %v5997_v17  ;;  %v7587_v42 = vld [vmem:[%s12889_s3 + $0x2a] ss:$2 sm:$0x1f]  ;;  %v7605_v63 = vld [vmem:[%s12889_s3 + $0x69] ss:$2 sm:$0xff]  ;;  %vm13021_vm6 = vmand %vm13635_vm9, %vm6342_vm15 }
 0x509   : > { %v7589_v22 = vld [vmem:[%s12889_s3 + $0x2b] ss:$2 sm:$0x1f]  ;;  %v7603_v19 = vld [vmem:[%s12889_s3 + $0x68] ss:$2 sm:$0xff]  ;;  %vm13638_vm7 = vcmask 254976  }
 0x50a   : > { %v12894_v28 = vrot.slane %v12871_v21, %v5998_v7  ;;  %v12901_v53 = vrot.slane %v5983_v56, %v5998_v7  ;;  %v7604_v47 = vld [vmem:[%s12889_s3 + $0x78] ss:$2 sm:$0x1f]  ;;  %v7606_v31 = vld [vmem:[%s12889_s3 + $0x79] ss:$2 sm:$0x1f]  ;;  %vm13052_vm12 = vmand %vm13638_vm7, %vm13440_vm3 }
 0x50b   : > { %v7607_v52 = vld [vmem:[%s12889_s3 + $0x82] ss:$2 sm:$0xff]  ;;  %v7608_v26 = vld [vmem:[%s12889_s3 + $0x92] ss:$2 sm:$0x1f]  ;;  %vm13649_vm1 = vcmask 1041408  }
 0x50c   : > { %v6002_v57 = vmul.f32 %v7583_v45, %v12894_v28  ;;  %v6016_v20 = vmul.f32 %v7585_v9, %v12894_v28  ;;  %v6024_v33 = vmul.f32 %v7587_v42, %v12894_v28  ;;  %v6032_v30 = vmul.f32 %v7589_v22, %v12894_v28  ;;  %v7609_v37 = vld [vmem:[%s12889_s3 + $0x83] ss:$2 sm:$0xff]  ;;  %v7610_v36 = vld [vmem:[%s12889_s3 + $0x93] ss:$2 sm:$0x1f]  ;;  %s5989_s15 = sadd.s32 1, %s9365_s15  }
 0x50d   : > { %v6143_v46 = vmul.f32 %v7603_v19, %v12894_v28  ;;  %v6144_v2 = vmul.f32 %v7604_v47, %v12894_v28  ;;  %v6151_v8 = vmul.f32 %v7605_v63, %v12894_v28  ;;  %v6152_v41 = vmul.f32 %v7606_v31, %v12894_v28  ;;  %v7624_v60 = vld [vmem:[%s12889_s3 + $0xe0] ss:$2 sm:$0x1f]  ;;  %v7626_v6 = vld [vmem:[%s12889_s3 + $0xe1] ss:$2 sm:$0x1f] }
 0x50e   : > { %v6010_v23 = vadd.f32 %v12901_v53, %v6002_v57  ;;  %v6018_v16 = vadd.f32 %v6016_v20, %v12901_v53  ;;  %v6026_v29 = vadd.f32 %v6024_v33, %v12901_v53  ;;  %v6034_v15 = vadd.f32 %v6032_v30, %v12901_v53  ;;  %v7628_v39 = vld [vmem:[%s12889_s3 + $0xfa] ss:$2 sm:$0x1f]  ;;  %v7630_v5 = vld [vmem:[%s12889_s3 + $0xfb] ss:$2 sm:$0x1f] }
 0x50f   : > { %v6145_v27 = vadd.f32 %v6143_v46, %v12901_v53  ;;  %v6146_v12 = vadd.f32 %v6144_v2, %v12901_v53  ;;  %v6153_v4 = vadd.f32 %v6151_v8, %v12901_v53  ;;  %v6154_v14 = vadd.f32 %v6152_v41, %v12901_v53  ;;  %v7644_v13 = vld [vmem:[%s12889_s3 + $0x148] ss:$2 sm:$0x1f]  ;;  %v7646_v62 = vld [vmem:[%s12889_s3 + $0x149] ss:$2 sm:$0x1f] }
 0x510   : > { %v6036_v32 = vmax.f32 %v6010_v23, %v6018_v16  ;;  %v6038_v3 = vmax.f32 %v6026_v29, %v6034_v15  ;;  %v6159_v43 = vmul.f32 %v7607_v52, %v12894_v28  ;;  %v6160_v50 = vmul.f32 %v7608_v26, %v12894_v28  ;;  %v7648_v40 = vld [vmem:[%s12889_s3 + $0x162] ss:$2 sm:$0x1f]  ;;  %v7650_v22 = vld [vmem:[%s12889_s3 + $0x163] ss:$2 sm:$0x1f] }
 0x511   : > { %v6167_v61 = vmul.f32 %v7609_v37, %v12894_v28  ;;  %v6168_v44 = vmul.f32 %v7610_v36, %v12894_v28  ;;  %v6171_v1 = vmax.f32 %v6145_v27, %v6153_v4  ;;  %v6172_v48 = vmax.f32 %v6146_v12, %v6154_v14  ;;  %v6058_v17 = vld [vmem:[%s12939_s19 + $0x4] sm:$0x7]  ;;  %v7664_v33 = vld [vmem:[%s12889_s3 + $0x1b0] ss:$2 sm:$0x1f]  ;;  %p5986_p0 = scmp.ge.s32.totalorder %s5989_s15, 2  }
 0x512   : > { %v6040_v35 = vmax.f32 %v6036_v32, %v6038_v3  ;;  %v6161_v38 = vadd.f32 %v6159_v43, %v12901_v53  ;;  %v6162_v10 = vadd.f32 %v6160_v50, %v12901_v53  ;;  %v6286_v25 = vmul.f32 %v7624_v60, %v12894_v28  ;;  %v7666_v2 = vld [vmem:[%s12889_s3 + $0x1b1] ss:$2 sm:$0x1f]  ;;  %v7668_v23 = vld [vmem:[%s12889_s3 + $0x1ca] ss:$2 sm:$0x1f] }
 0x513   : > { %v6169_v55 = vadd.f32 %v6167_v61, %v12901_v53  ;;  %v6170_v34 = vadd.f32 %v6168_v44, %v12901_v53  ;;  %v6294_v0 = vmul.f32 %v7626_v6, %v12894_v28  ;;  %v6302_v49 = vmul.f32 %v7628_v39, %v12894_v28  ;;  %v7670_v36 = vld [vmem:[%s12889_s3 + $0x1cb] ss:$2 sm:$0x1f]  ;;  %v7683_v60 = vld [vmem:[%s12889_s3 + $0x208] ss:$2 sm:$0xff] }
 0x514   : > { %v6042_v11 = vmax.f32 %v6040_v35, 0.0  ;;  %v6288_v24 = vadd.f32 %v6286_v25, %v12901_v53  ;;  %v6310_v51 = vmul.f32 %v7630_v5, %v12894_v28  ;;  %v6425_v58 = vmul.f32 %v7644_v13, %v12894_v28  ;;  %v7686_v25 = vld [vmem:[%s12889_s3 + $0x219] ss:$2 sm:$0x1f] }
 0x515   : > { %v6173_v7 = vmax.f32 %v6161_v38, %v6169_v55  ;;  %v6174_v45 = vmax.f32 %v6162_v10, %v6170_v34  ;;  %v6296_v9 = vadd.f32 %v6294_v0, %v12901_v53  ;;  %v6304_v42 = vadd.f32 %v6302_v49, %v12901_v53 }
 0x516   : > { %v7714_v19 = vpack.c.bf16 %v6042_v11, %v6042_v11  ;;  %v6312_v63 = vadd.f32 %v6310_v51, %v12901_v53  ;;  %v6427_v57 = vadd.f32 %v6425_v58, %v12901_v53  ;;  %v6433_v20 = vmul.f32 %v7646_v62, %v12894_v28  ;;  %v7687_v62 = vld [vmem:[%s12889_s3 + $0x222] ss:$2 sm:$0xff] }
 0x517   : > { %v6175_v30 = vmax.f32 %v6171_v1, %v6173_v7  ;;  %v6176_v47 = vmax.f32 %v6172_v48, %v6174_v45  ;;  %v6314_v31 = vmax.f32 %v6288_v24, %v6296_v9  ;;  %v6441_v46 = vmul.f32 %v7648_v40, %v12894_v28  ;;  %v7684_v1 = vld [vmem:[%s12889_s3 + $0x218] ss:$2 sm:$0x1f]  ;;  %v7685_v48 = vld [vmem:[%s12889_s3 + $0x209] ss:$2 sm:$0xff] }
 0x518   : > { %v6059_v8 = vsel %vm12956_vm14, %v7714_v19, %v6058_v17  ;;  %v6316_v41 = vmax.f32 %v6304_v42, %v6312_v63  ;;  %v6435_v52 = vadd.f32 %v6433_v20, %v12901_v53  ;;  %v6449_v26 = vmul.f32 %v7650_v22, %v12894_v28  ;;  %v6199_v51 = vld [vmem:[%s12939_s19 + $0x10] sm:$0xf]  ;;  %v6344_v20 = vld [vmem:[%s12939_s19 + $0x20] sm:$0x1] }
 0x519   : > { %6060 = vst [vmem:[%s12939_s19 + $0x4] sm:$0x7] %v6059_v8  ;;  %v6177_v16 = vmax.f32 %v6175_v30, 0.0  ;;  %v6178_v29 = vmax.f32 %v6176_v47, 0.0  ;;  %v6443_v15 = vadd.f32 %v6441_v46, %v12901_v53  ;;  %v6566_v37 = vmul.f32 %v7664_v33, %v12894_v28  ;;  %v7689_v7 = vld [vmem:[%s12889_s3 + $0x223] ss:$2 sm:$0xff] }
 0x51a   : > { %v6318_v27 = vmax.f32 %v6314_v31, %v6316_v41  ;;  %v6451_v12 = vadd.f32 %v6449_v26, %v12901_v53  ;;  %v6453_v4 = vmax.f32 %v6427_v57, %v6435_v52  ;;  %v6574_v14 = vmul.f32 %v7666_v2, %v12894_v28  ;;  %v7688_v19 = vld [vmem:[%s12889_s3 + $0x232] ss:$2 sm:$0x1f]  ;;  %v7690_v31 = vld [vmem:[%s12889_s3 + $0x233] ss:$2 sm:$0x1f] }
 0x51b   : > { %v7718_v32 = vpack.c.bf16 %v6177_v16, %v6177_v16  ;;  %v7719_v3 = vpack.c.bf16 %v6178_v29, %v6178_v29  ;;  %v6568_v43 = vadd.f32 %v6566_v37, %v12901_v53  ;;  %v6582_v50 = vmul.f32 %v7668_v23, %v12894_v28  ;;  %v5992_v29 = vld [vmem:[%s12889_s3] ss:$2 sm:$0xff] }
 0x51c   : > { %v6320_v6 = vmax.f32 %v6318_v27, 0.0  ;;  %v6455_v39 = vmax.f32 %v6443_v15, %v6451_v12  ;;  %v6576_v61 = vadd.f32 %v6574_v14, %v12901_v53  ;;  %v6590_v44 = vmul.f32 %v7670_v36, %v12894_v28  ;;  %v7584_v15 = vld [vmem:[%s12889_s3 + $0x1] ss:$2 sm:$0xff] }
 0x51d   : > { %v6188_v5 = vrot.slane %v7718_v32, 7  ;;  %v6190_v35 = vrot.slane %v7719_v3, 7  ;;  %v6584_v38 = vadd.f32 %v6582_v50, %v12901_v53  ;;  %v6690_v10 = vmul.f32 %v7683_v60, %v12894_v28  ;;  %v7588_v14 = vld [vmem:[%s12889_s3 + $0x1b] ss:$2 sm:$0xff]  ;;  %v6483_v32 = vld [vmem:[%s12939_s19 + $0x2c] sm:$0x3] }
 0x51e   : > { %v12997_v55 = vpack.c.bf16 %v6320_v6, %v6320_v6  ;;  %v6457_v34 = vmax.f32 %v6453_v4, %v6455_v39  ;;  %v6592_v0 = vadd.f32 %v6590_v44, %v12901_v53  ;;  %v6594_v49 = vmax.f32 %v6568_v43, %v6576_v61  ;;  %v7586_v4 = vld [vmem:[%s12889_s3 + $0x1a] ss:$2 sm:$0xff] }
 0x51f   : > { %v6189_v11 = vrot.slane %v6188_v5, 4  ;;  %v6691_v58 = vmul.f32 %v7684_v1, %v12894_v28  ;;  %v6692_v40 = vadd.f32 %v6690_v10, %v12901_v53  ;;  %v6698_v17 = vmul.f32 %v7685_v48, %v12894_v28  ;;  %6195 = vst.msk [vmem:[%s12939_s19 + $0xc] sm:$0xe] %vm13441_vm2, %v6188_v5  ;;  %v6610_v3 = vld [vmem:[%s12939_s19 + $0x38] sm:$0x7] }
 0x520   : > { %v6332_v45 = vrot.slane %v12997_v55, 6  ;;  %v6459_v9 = vmax.f32 %v6457_v34, 0.0  ;;  %v6596_v42 = vmax.f32 %v6584_v38, %v6592_v0  ;;  %v6699_v22 = vmul.f32 %v7686_v25, %v12894_v28  ;;  %v7593_v25 = vld [vmem:[%s12889_s3 + $0x34] ss:$2 sm:$0xff]  ;;  %v7595_v34 = vld [vmem:[%s12889_s3 + $0x35] ss:$2 sm:$0xff] }
 0x521   : > { %v6191_v63 = vsel %vm12993_vm4, %v6189_v11, %v6190_v35  ;;  %v6693_v33 = vadd.f32 %v6691_v58, %v12901_v53  ;;  %v6700_v30 = vadd.f32 %v6698_v17, %v12901_v53  ;;  %v6706_v47 = vmul.f32 %v7687_v62, %v12894_v28  ;;  %v7597_v0 = vld [vmem:[%s12889_s3 + $0x4e] ss:$2 sm:$0xff]  ;;  %v7599_v58 = vld [vmem:[%s12889_s3 + $0x4f] ss:$2 sm:$0xff] }
 0x522   : > { %v6200_v46 = vsel %vm13003_vm5, %v6191_v63, %v6199_v51  ;;  %v6334_v2 = vrot.slane %v6332_v45, 4  ;;  %v13034_v8 = vpack.c.bf16 %v6459_v9, %v6459_v9  ;;  %v6598_v41 = vmax.f32 %v6594_v49, %v6596_v42  ;;  %v7594_v63 = vld [vmem:[%s12889_s3 + $0x44] ss:$2 sm:$0x1f] }
 0x523   : > { %6201 = vst [vmem:[%s12939_s19 + $0x10] sm:$0xf] %v6200_v46  ;;  %v6701_v52 = vadd.f32 %v6699_v22, %v12901_v53  ;;  %v6707_v26 = vmul.f32 %v7688_v19, %v12894_v28  ;;  %v6708_v23 = vadd.f32 %v6706_v47, %v12901_v53  ;;  %v6714_v16 = vmul.f32 %v7689_v7, %v12894_v28  ;;  %v7598_v46 = vld [vmem:[%s12889_s3 + $0x5e] ss:$2 sm:$0x1f] }
 0x524   : > { %v6345_v37 = vsel %vm13021_vm6, %v6334_v2, %v6344_v20  ;;  %v6471_v36 = vrot.slane %v13034_v8, 5  ;;  %v6600_v27 = vmax.f32 %v6598_v41, 0.0  ;;  %v6715_v12 = vmul.f32 %v7690_v31, %v12894_v28  ;;  %v7596_v20 = vld [vmem:[%s12889_s3 + $0x45] ss:$2 sm:$0x1f] }
 0x525   : > { %6346 = vst [vmem:[%s12939_s19 + $0x20] sm:$0x1] %v6345_v37  ;;  %v6709_v43 = vadd.f32 %v6707_v26, %v12901_v53  ;;  %v6716_v50 = vadd.f32 %v6714_v16, %v12901_v53  ;;  %v6718_v6 = vmax.f32 %v6692_v40, %v6700_v30  ;;  %v6719_v39 = vmax.f32 %v6693_v33, %v6701_v52  ;;  %v7600_v37 = vld [vmem:[%s12889_s3 + $0x5f] ss:$2 sm:$0x1f] }
 0x526   : > { %v6473_v61 = vrot.slane %v6471_v36, 4  ;;  %v7731_v44 = vpack.c.bf16 %v6600_v27, %v6600_v27  ;;  %v6717_v1 = vadd.f32 %v6715_v12, %v12901_v53  ;;  %v6001_v48 = vmul.f32 %v12894_v28, %v5992_v29  ;;  %v7613_v60 = vld [vmem:[%s12889_s3 + $0x9c] ss:$2 sm:$0xff]  ;;  %v7656_v55 = vld [vmem:[%s12889_s3 + $0x17d] ss:$2 sm:$0x1f] }
 0x527   : > { %v6720_v5 = vmax.f32 %v6708_v23, %v6716_v50  ;;  %v6015_v35 = vmul.f32 %v7584_v15, %v12894_v28  ;;  %v6023_v38 = vmul.f32 %v7586_v4, %v12894_v28  ;;  %v6031_v10 = vmul.f32 %v7588_v14, %v12894_v28  ;;  %v7679_v8 = vld [vmem:[%s12889_s3 + $0x1ef] ss:$2 sm:$0xff] }
 0x528   : > { %v6484_v49 = vsel %vm13052_vm12, %v6473_v61, %v6483_v32  ;;  %v6611_v62 = vsel %vm12956_vm14, %v7731_v44, %v6610_v3  ;;  %v6721_v11 = vmax.f32 %v6709_v43, %v6717_v1  ;;  %v6009_v51 = vadd.f32 %v12901_v53, %v6001_v48 }
 0x529   : > { %6485 = vst [vmem:[%s12939_s19 + $0x2c] sm:$0x3] %v6484_v49  ;;  %6612 = vst [vmem:[%s12939_s19 + $0x38] sm:$0x7] %v6611_v62  ;;  %v6722_v40 = vmax.f32 %v6718_v6, %v6720_v5  ;;  %v6017_v17 = vadd.f32 %v6015_v35, %v12901_v53  ;;  %v6025_v7 = vadd.f32 %v6023_v38, %v12901_v53  ;;  %vm13444_vm14 = vcmask 257026  }
 0x52a   : > { %v6033_v9 = vadd.f32 %v6031_v10, %v12901_v53  ;;  %v6723_v42 = vmax.f32 %v6719_v39, %v6721_v11  ;;  %v6065_v22 = vmul.f32 %v7593_v25, %v12894_v28  ;;  %v6073_v54 = vmul.f32 %v7595_v34, %v12894_v28  ;;  %v7615_v6 = vld [vmem:[%s12889_s3 + $0x9d] ss:$2 sm:$0xff]  ;;  %v7617_v39 = vld [vmem:[%s12889_s3 + $0xb6] ss:$2 sm:$0xff] }
 0x52b   : > { %v6081_v19 = vmul.f32 %v7597_v0, %v12894_v28  ;;  %v6724_v33 = vmax.f32 %v6722_v40, 0.0  ;;  %v6035_v30 = vmax.f32 %v6009_v51, %v6017_v17  ;;  %v6089_v31 = vmul.f32 %v7599_v58, %v12894_v28  ;;  %v7619_v5 = vld [vmem:[%s12889_s3 + $0xb7] ss:$2 sm:$0xff]  ;;  %v7614_v0 = vld [vmem:[%s12889_s3 + $0xac] ss:$2 sm:$0x1f] }
 0x52c   : > { %v6037_v47 = vmax.f32 %v6025_v7, %v6033_v9  ;;  %v6725_v2 = vmax.f32 %v6723_v42, 0.0  ;;  %v6067_v41 = vadd.f32 %v6065_v22, %v12901_v53  ;;  %v6075_v52 = vadd.f32 %v6073_v54, %v12901_v53  ;;  %v6739_v38 = vld [vmem:[%s12939_s19 + $0x44] sm:$0xf]  ;;  %v7616_v58 = vld [vmem:[%s12889_s3 + $0xad] ss:$2 sm:$0x1f] }
 0x52d   : > { %v6083_v26 = vadd.f32 %v6081_v19, %v12901_v53  ;;  %v7734_v23 = vpack.c.bf16 %v6724_v33, %v6724_v33  ;;  %v6091_v29 = vadd.f32 %v6089_v31, %v12901_v53  ;;  %v6066_v15 = vmul.f32 %v7594_v63, %v12894_v28  ;;  %v7618_v40 = vld [vmem:[%s12889_s3 + $0xc6] ss:$2 sm:$0x1f]  ;;  %v7620_v22 = vld [vmem:[%s12889_s3 + $0xc7] ss:$2 sm:$0x1f] }
 0x52e   : > { %v6039_v16 = vmax.f32 %v6035_v30, %v6037_v47  ;;  %v7735_v27 = vpack.c.bf16 %v6725_v2, %v6725_v2  ;;  %v6093_v12 = vmax.f32 %v6067_v41, %v6075_v52  ;;  %v6074_v4 = vmul.f32 %v7596_v20, %v12894_v28  ;;  %v7623_v41 = vld [vmem:[%s12889_s3 + $0xd0] ss:$2 sm:$0xff] }
 0x52f   : > { %v6082_v14 = vmul.f32 %v7598_v46, %v12894_v28  ;;  %v6732_v32 = vrot.slane %v7734_v23, 7  ;;  %v6095_v43 = vmax.f32 %v6083_v26, %v6091_v29  ;;  %vm6132_vm12 = vsmask.f32 7946  ;;  %v7625_v29 = vld [vmem:[%s12889_s3 + $0xd1] ss:$2 sm:$0xff] }
 0x530   : > { %v6041_v3 = vmax.f32 %v6039_v16, 0.0  ;;  %v6068_v50 = vadd.f32 %v6066_v15, %v12901_v53  ;;  %v6734_v61 = vrot.slane %v7735_v27, 7  ;;  %v6076_v44 = vadd.f32 %v6074_v4, %v12901_v53  ;;  %v7627_v4 = vld [vmem:[%s12889_s3 + $0xea] ss:$2 sm:$0xff]  ;;  %vm13141_vm3 = vmand %vm13444_vm14, %vm6132_vm12 }
 0x531   : > { %v6084_v1 = vadd.f32 %v6082_v14, %v12901_v53  ;;  %v6090_v48 = vmul.f32 %v7600_v37, %v12894_v28  ;;  %v6733_v35 = vrot.slane %v6732_v32, 4  ;;  %v6097_v25 = vmax.f32 %v6093_v12, %v6095_v43  ;;  %6738 = vst.msk [vmem:[%s12939_s19 + $0x40] sm:$0xe] %vm13441_vm2, %v6732_v32 }
 0x532   : > { %v7713_v10 = vpack.c.bf16 %v6041_v3, %v6041_v3  ;;  %v6206_v34 = vmul.f32 %v7613_v60, %v12894_v28  ;;  %v6094_v62 = vmax.f32 %v6068_v50, %v6076_v44  ;;  %v6214_v11 = vmul.f32 %v7615_v6, %v12894_v28  ;;  %v6134_v50 = vld [vmem:[%s12939_s19 + $0x4] sm:$0xc] }
 0x533   : > { %v6092_v49 = vadd.f32 %v6090_v48, %v12901_v53  ;;  %v6222_v51 = vmul.f32 %v7617_v39, %v12894_v28  ;;  %v6735_v17 = vsel %vm12993_vm4, %v6733_v35, %v6734_v61  ;;  %v6099_v7 = vmax.f32 %v6097_v25, 0.0 }
 0x534   : > { %6054 = vst.msk [vmem:[%s12939_s19] sm:$0xf] %vm2557_vm8, %v7713_v10  ;;  %v6208_v9 = vadd.f32 %v6206_v34, %v12901_v53  ;;  %v6230_v42 = vmul.f32 %v7619_v5, %v12894_v28  ;;  %v6740_v54 = vsel %vm13003_vm5, %v6735_v17, %v6739_v38  ;;  %vm6107_vm0 = vsmask.f32 6416  ;;  %v7629_v38 = vld [vmem:[%s12889_s3 + $0xeb] ss:$2 sm:$0xff] }
 0x535   : > { %v6096_v19 = vmax.f32 %v6084_v1, %v6092_v49  ;;  %v6216_v63 = vadd.f32 %v6214_v11, %v12901_v53  ;;  %v6224_v20 = vadd.f32 %v6222_v51, %v12901_v53  ;;  %6741 = vst [vmem:[%s12939_s19 + $0x44] sm:$0xf] %v6740_v54  ;;  %v7716_v13 = vpack.c.bf16 %v6099_v7, %v6099_v7  ;;  %v7633_v51 = vld [vmem:[%s12889_s3 + $0x104] ss:$2 sm:$0xff]  ;;  %vm13160_vm2 = vmor %vm6056_vm11, %vm6107_vm0 }
 0x536   : > { %v6232_v33 = vadd.f32 %v6230_v42, %v12901_v53  ;;  %vm6273_vm4 = vsmask.f32 7950  ;;  %v6207_v30 = vmul.f32 %v7614_v0, %v12894_v28  ;;  %v6215_v47 = vmul.f32 %v7616_v58, %v12894_v28  ;;  %v7635_v58 = vld [vmem:[%s12889_s3 + $0x105] ss:$2 sm:$0xff]  ;;  %v7637_v42 = vld [vmem:[%s12889_s3 + $0x11e] ss:$2 sm:$0xff] }
 0x537   : > { %v6098_v24 = vmax.f32 %v6094_v62, %v6096_v19  ;;  %v6234_v31 = vmax.f32 %v6208_v9, %v6216_v63  ;;  %v6223_v46 = vmul.f32 %v7618_v40, %v12894_v28  ;;  %v6231_v2 = vmul.f32 %v7620_v22, %v12894_v28 }
 0x538   : > { %v6110_v52 = vshrl.u32 %v7716_v13, 16  ;;  %v6113_v26 = vshll.u32 %v7716_v13, 16  ;;  %v6236_v23 = vmax.f32 %v6224_v20, %v6232_v33  ;;  %v6209_v16 = vadd.f32 %v6207_v30, %v12901_v53  ;;  %v6275_v30 = vld [vmem:[%s12939_s19 + $0x10] sm:$0x8] }
 0x539   : > { %v6100_v15 = vmax.f32 %v6098_v24, 0.0  ;;  %v6217_v37 = vadd.f32 %v6215_v47, %v12901_v53  ;;  %v6225_v27 = vadd.f32 %v6223_v46, %v12901_v53  ;;  %v6233_v12 = vadd.f32 %v6231_v2, %v12901_v53 }
 0x53a   : > { %v6112_v14 = vrot.slane %v6110_v52, 5  ;;  %v6115_v60 = vrot.slane %v6113_v26, 6  ;;  %v6238_v32 = vmax.f32 %v6234_v31, %v6236_v23  ;;  %vm6248_vm5 = vsmask.f32 7440 }
 0x53b   : > { %v6285_v3 = vmul.f32 %v7623_v41, %v12894_v28  ;;  %v7717_v6 = vpack.c.bf16 %v6100_v15, %v6100_v15  ;;  %v6235_v39 = vmax.f32 %v6209_v16, %v6217_v37  ;;  %v6237_v61 = vmax.f32 %v6225_v27, %v6233_v12  ;;  %v7639_v15 = vld [vmem:[%s12889_s3 + $0x11f] ss:$2 sm:$0xff]  ;;  %vm13191_vm0 = vmor %vm6197_vm13, %vm6248_vm5 }
 0x53c   : > { %v6293_v44 = vmul.f32 %v7625_v29, %v12894_v28  ;;  %v6116_v1 = vor.u32 %v6115_v60, %v6112_v14  ;;  %v6240_v48 = vmax.f32 %v6238_v32, 0.0  ;;  %v6301_v35 = vmul.f32 %v7627_v4, %v12894_v28  ;;  %v7634_v14 = vld [vmem:[%s12889_s3 + $0x114] ss:$2 sm:$0x1f] }
 0x53d   : > { %v6287_v5 = vadd.f32 %v6285_v3, %v12901_v53  ;;  %v6119_v10 = vshrl.u32 %v7717_v6, 16  ;;  %v6122_v25 = vshll.u32 %v7717_v6, 16  ;;  %v6239_v34 = vmax.f32 %v6235_v39, %v6237_v61  ;;  %v7636_v60 = vld [vmem:[%s12889_s3 + $0x115] ss:$2 sm:$0x1f] }
 0x53e   : > { %v6295_v0 = vadd.f32 %v6293_v44, %v12901_v53  ;;  %v6135_v49 = vsel %vm13141_vm3, %v6116_v1, %v6134_v50  ;;  %v6117_v62 = vrot.slane %v6116_v1, 4  ;;  %v7720_v11 = vpack.c.bf16 %v6240_v48, %v6240_v48  ;;  %v7638_v39 = vld [vmem:[%s12889_s3 + $0x12e] ss:$2 sm:$0x1f] }
 0x53f   : > { %vm6272_vm12 = vcmask 257027   ;;  %6136 = vst [vmem:[%s12939_s19 + $0x4] sm:$0xc] %v6135_v49  ;;  %v6121_v40 = vrot.slane %v6119_v10, 5  ;;  %v6124_v17 = vrot.slane %v6122_v25, 6  ;;  %v6241_v7 = vmax.f32 %v6239_v34, 0.0 }
 0x540   : > { %v6309_v9 = vmul.f32 %v7629_v38, %v12894_v28  ;;  %v6251_v54 = vshll.u32 %v7720_v11, 16  ;;  %v6254_v19 = vshrl.u32 %v7720_v11, 16  ;;  %v6303_v63 = vadd.f32 %v6301_v35, %v12901_v53  ;;  %vm13167_vm10 = vmand %vm6272_vm12, %vm6273_vm4  ;;  %v7643_v11 = vld [vmem:[%s12889_s3 + $0x138] ss:$2 sm:$0xff] }
 0x541   : > { %v6313_v20 = vmax.f32 %v6287_v5, %v6295_v0  ;;  %v6125_v13 = vor.u32 %v6124_v17, %v6121_v40  ;;  %v7721_v47 = vpack.c.bf16 %v6241_v7, %v6241_v7  ;;  %v6351_v31 = vmul.f32 %v7633_v51, %v12894_v28  ;;  %v7640_v5 = vld [vmem:[%s12889_s3 + $0x12f] ss:$2 sm:$0x1f]  ;;  %v7645_v51 = vld [vmem:[%s12889_s3 + $0x139] ss:$2 sm:$0xff] }
 0x542   : > { %v6311_v24 = vadd.f32 %v6309_v9, %v12901_v53  ;;  %v6253_v46 = vrot.slane %v6251_v54, 5  ;;  %v6256_v2 = vrot.slane %v6254_v19, 4  ;;  %v6359_v41 = vmul.f32 %v7635_v58, %v12894_v28  ;;  %v7647_v9 = vld [vmem:[%s12889_s3 + $0x152] ss:$2 sm:$0xff] }
 0x543   : > { %v6367_v52 = vmul.f32 %v7637_v42, %v12894_v28  ;;  %v6126_v26 = vsel %vm13160_vm2, %v6117_v62, %v6125_v13  ;;  %v6127_v23 = vrot.slane %v6125_v13, 4  ;;  %v6260_v16 = vshll.u32 %v7721_v47, 16  ;;  %v7649_v42 = vld [vmem:[%s12889_s3 + $0x153] ss:$2 sm:$0xff] }
 0x544   : > { %v6264_v29 = vshrl.u32 %v7721_v47, 16  ;;  %6137 = vst.msk [vmem:[%s12939_s19 + $0x8] sm:$0xf] %vm2557_vm8, %v6126_v26  ;;  %v6276_v37 = vsel %vm13167_vm10, %v6253_v46, %v6275_v30  ;;  %v6257_v27 = vor.u32 %v6256_v2, %v6253_v46  ;;  %v6315_v12 = vmax.f32 %v6303_v63, %v6311_v24 }
 0x545   : > { %v6353_v4 = vadd.f32 %v6351_v31, %v12901_v53  ;;  %6138 = vst.msk [vmem:[%s12939_s19 + $0xc] sm:$0x1] %vm13635_vm9, %v6127_v23  ;;  %6277 = vst [vmem:[%s12939_s19 + $0x10] sm:$0x8] %v6276_v37  ;;  %v6262_v3 = vrot.slane %v6260_v16, 5  ;;  %vm6328_vm11 = vcmask 1045508   ;;  %v6361_v6 = vadd.f32 %v6359_v41, %v12901_v53 }
 0x546   : > { %v6266_v50 = vrot.slane %v6264_v29, 4  ;;  %v6258_v61 = vrot.slane %v6257_v27, 4  ;;  %v6317_v44 = vmax.f32 %v6313_v20, %v6315_v12  ;;  %v6369_v1 = vadd.f32 %v6367_v52, %v12901_v53  ;;  %v7653_v41 = vld [vmem:[%s12889_s3 + $0x16c] ss:$2 sm:$0xff]  ;;  %vm13226_vm4 = vmor %vm13649_vm1, %vm6328_vm11  ;;  %v7655_v29 = vld [vmem:[%s12889_s3 + $0x16d] ss:$2 sm:$0xff] }
 0x547   : > { %v6375_v48 = vmul.f32 %v7639_v15, %v12894_v28  ;;  %v6379_v38 = vmax.f32 %v6353_v4, %v6361_v6  ;;  %v6352_v10 = vmul.f32 %v7634_v14, %v12894_v28  ;;  %v6360_v25 = vmul.f32 %v7636_v60, %v12894_v28  ;;  %v7657_v4 = vld [vmem:[%s12889_s3 + $0x186] ss:$2 sm:$0xff]  ;;  %v7659_v14 = vld [vmem:[%s12889_s3 + $0x187] ss:$2 sm:$0xff] }
 0x548   : > { %v6267_v35 = vor.u32 %v6266_v50, %v6262_v3  ;;  %v6263_v34 = vsel %vm13191_vm0, %v6258_v61, %v6262_v3  ;;  %v6319_v0 = vmax.f32 %v6317_v44, 0.0  ;;  %v6368_v62 = vmul.f32 %v7638_v39, %v12894_v28 }
 0x549   : > { %v6377_v49 = vadd.f32 %v6375_v48, %v12901_v53  ;;  %6278 = vst.msk [vmem:[%s12939_s19 + $0x14] sm:$0xf] %vm2557_vm8, %v6263_v34  ;;  %v6354_v40 = vadd.f32 %v6352_v10, %v12901_v53  ;;  %v6362_v17 = vadd.f32 %v6360_v25, %v12901_v53  ;;  %v6376_v7 = vmul.f32 %v7640_v5, %v12894_v28 }
 0x54a   : > { %v6268_v58 = vrot.slane %v6267_v35, 4  ;;  %v7722_v54 = vpack.c.bf16 %v6319_v0, %v6319_v0  ;;  %vm6413_vm13 = vsmask.f32 7938  ;;  %v6370_v63 = vadd.f32 %v6368_v62, %v12901_v53 }
 0x54b   : > { %v6381_v19 = vmax.f32 %v6369_v1, %v6377_v49  ;;  %v6378_v20 = vadd.f32 %v6376_v7, %v12901_v53  ;;  %v6380_v13 = vmax.f32 %v6354_v40, %v6362_v17  ;;  %v6424_v30 = vmul.f32 %v7643_v11, %v12894_v28  ;;  %v7654_v1 = vld [vmem:[%s12889_s3 + $0x17c] ss:$2 sm:$0x1f] }
 0x54c   : > { %6280 = vst.msk [vmem:[%s12939_s19 + $0x18] sm:$0x3] %vm13638_vm7, %v6268_v58  ;;  %v6432_v47 = vmul.f32 %v7645_v51, %v12894_v28  ;;  %v6330_v24 = vrot.slane %v7722_v54, 6  ;;  %v6440_v46 = vmul.f32 %v7647_v9, %v12894_v28  ;;  %v6448_v2 = vmul.f32 %v7649_v42, %v12894_v28  ;;  %v7658_v51 = vld [vmem:[%s12889_s3 + $0x196] ss:$2 sm:$0x1f] }
 0x54d   : > { %v6383_v31 = vmax.f32 %v6379_v38, %v6381_v19  ;;  %v6382_v26 = vmax.f32 %v6370_v63, %v6378_v20  ;;  %vm6393_vm5 = vsmask.f32 4368  ;;  %v6426_v23 = vadd.f32 %v6424_v30, %v12901_v53  ;;  %v7660_v9 = vld [vmem:[%s12889_s3 + $0x197] ss:$2 sm:$0x1f] }
 0x54e   : > { %v6434_v16 = vadd.f32 %v6432_v47, %v12901_v53  ;;  %6339 = vst.msk [vmem:[%s12939_s19 + $0x18] sm:$0xc] %vm13444_vm14, %v6330_v24  ;;  %v6331_v15 = vrot.slane %v6330_v24, 4  ;;  %v6442_v27 = vadd.f32 %v6440_v46, %v12901_v53  ;;  %v6450_v12 = vadd.f32 %v6448_v2, %v12901_v53  ;;  %vm13261_vm14 = vmand %vm2557_vm8, %vm6413_vm13  ;;  %v6415_v54 = vld [vmem:[%s12939_s19 + $0x20] sm:$0xf] }
 0x54f   : > { %v6385_v37 = vmax.f32 %v6383_v31, 0.0  ;;  %vm6466_vm11 = vcmask 1042432   ;;  %v6384_v60 = vmax.f32 %v6380_v13, %v6382_v26  ;;  %vm6467_vm1 = vcmask 1046532   ;;  %v7663_v46 = vld [vmem:[%s12889_s3 + $0x1a0] ss:$2 sm:$0xff]  ;;  %vm6394_vm7 = vmor %vm6342_vm15, %vm6393_vm5 }
 0x550   : > { %v6452_v3 = vmax.f32 %v6426_v23, %v6434_v16  ;;  %v6490_v50 = vmul.f32 %v7653_v41, %v12894_v28  ;;  %v6333_v6 = vsel %vm13226_vm4, %v6331_v15, %v6332_v45  ;;  %v6454_v61 = vmax.f32 %v6442_v27, %v6450_v12  ;;  %v7665_v16 = vld [vmem:[%s12889_s3 + $0x1a1] ss:$2 sm:$0xff]  ;;  %vm13281_vm9 = vmor %vm6466_vm11, %vm6467_vm1 }
 0x551   : > { %v7724_v39 = vpack.c.bf16 %v6385_v37, %v6385_v37  ;;  %v6498_v44 = vmul.f32 %v7655_v29, %v12894_v28  ;;  %6340 = vst.msk [vmem:[%s12939_s19 + $0x1c] sm:$0xf] %vm2557_vm8, %v6333_v6  ;;  %v6386_v48 = vmax.f32 %v6384_v60, 0.0  ;;  %v6506_v35 = vmul.f32 %v7657_v4, %v12894_v28  ;;  %v7667_v29 = vld [vmem:[%s12889_s3 + $0x1ba] ss:$2 sm:$0xff] }
 0x552   : > { %v6492_v5 = vadd.f32 %v6490_v50, %v12901_v53  ;;  %v6514_v38 = vmul.f32 %v7659_v14, %v12894_v28  ;;  %v6456_v25 = vmax.f32 %v6452_v3, %v6454_v61  ;;  %v6491_v11 = vmul.f32 %v7654_v1, %v12894_v28  ;;  %v7669_v12 = vld [vmem:[%s12889_s3 + $0x1bb] ss:$2 sm:$0xff] }
 0x553   : > { %v6396_v10 = vshrl.u32 %v7724_v39, 16  ;;  %v6399_v45 = vshll.u32 %v7724_v39, 16  ;;  %v6500_v34 = vadd.f32 %v6498_v44, %v12901_v53  ;;  %v7725_v0 = vpack.c.bf16 %v6386_v48, %v6386_v48 }
 0x554   : > { %v6508_v49 = vadd.f32 %v6506_v35, %v12901_v53  ;;  %v6516_v62 = vadd.f32 %v6514_v38, %v12901_v53  ;;  %v6458_v40 = vmax.f32 %v6456_v25, 0.0  ;;  %v6499_v7 = vmul.f32 %v7656_v55, %v12894_v28  ;;  %v7673_v38 = vld [vmem:[%s12889_s3 + $0x1d4] ss:$2 sm:$0xff]  ;;  %v7675_v55 = vld [vmem:[%s12889_s3 + $0x1d5] ss:$2 sm:$0xff] }
 0x555   : > { %v6398_v58 = vrot.slane %v6396_v10, 7  ;;  %v6518_v17 = vmax.f32 %v6492_v5, %v6500_v34  ;;  %v6404_v19 = vshrl.u32 %v7725_v0, 16  ;;  %v6407_v63 = vshll.u32 %v7725_v0, 16  ;;  %v7677_v10 = vld [vmem:[%s12889_s3 + $0x1ee] ss:$2 sm:$0xff] }
 0x556   : > { %v6520_v20 = vmax.f32 %v6508_v49, %v6516_v62  ;;  %v6493_v13 = vadd.f32 %v6491_v11, %v12901_v53  ;;  %v7726_v24 = vpack.c.bf16 %v6458_v40, %v6458_v40  ;;  %v6501_v31 = vadd.f32 %v6499_v7, %v12901_v53  ;;  %v7674_v7 = vld [vmem:[%s12889_s3 + $0x1e4] ss:$2 sm:$0x1f] }
 0x557   : > { %v6401_v30 = vor.u32 %v6399_v45, %v6398_v58  ;;  %v6402_v47 = vrot.slane %v6398_v58, 4  ;;  %v6406_v2 = vrot.slane %v6404_v19, 7  ;;  %v6507_v26 = vmul.f32 %v7658_v51, %v12894_v28 }
 0x558   : > { %v6522_v41 = vmax.f32 %v6518_v17, %v6520_v20  ;;  %v6515_v23 = vmul.f32 %v7660_v9, %v12894_v28  ;;  %vm6555_vm13 = vsmask.f32 7942  ;;  %v6469_v37 = vrot.slane %v7726_v24, 5  ;;  %v7676_v9 = vld [vmem:[%s12889_s3 + $0x1e5] ss:$2 sm:$0x1f] }
 0x559   : > { %v6416_v15 = vsel %vm13261_vm14, %v6401_v30, %v6415_v54  ;;  %v6519_v27 = vmax.f32 %v6493_v13, %v6501_v31  ;;  %v6409_v4 = vor.u32 %v6407_v63, %v6406_v2  ;;  %v6509_v3 = vadd.f32 %v6507_v26, %v12901_v53  ;;  %v7678_v20 = vld [vmem:[%s12889_s3 + $0x1fe] ss:$2 sm:$0x1f]  ;;  %v6557_v30 = vld [vmem:[%s12939_s19 + $0x2c] sm:$0xe] }
 0x55a   : > { %6417 = vst [vmem:[%s12939_s19 + $0x20] sm:$0xf] %v6416_v15  ;;  %v6524_v60 = vmax.f32 %v6522_v41, 0.0  ;;  %v6517_v50 = vadd.f32 %v6515_v23, %v12901_v53  ;;  %6478 = vst.msk [vmem:[%s12939_s19 + $0x24] sm:$0x8] %vm6272_vm12, %v6469_v37  ;;  %v6470_v6 = vrot.slane %v6469_v37, 4  ;;  %v6565_v39 = vmul.f32 %v7663_v46, %v12894_v28 }
 0x55b   : > { %v6573_v61 = vmul.f32 %v7665_v16, %v12894_v28  ;;  %v6581_v44 = vmul.f32 %v7667_v29, %v12894_v28  ;;  %v6410_v1 = vsel %vm6394_vm7, %v6402_v47, %v6409_v4  ;;  %vm6532_vm1 = vsmask.f32 5392 }
 0x55c   : > { %v7728_v48 = vpack.c.bf16 %v6524_v60, %v6524_v60  ;;  %v6521_v5 = vmax.f32 %v6509_v3, %v6517_v50  ;;  %v6589_v35 = vmul.f32 %v7669_v12, %v12894_v28  ;;  %vm13656_vm15 = vcmask 256000   ;;  %v7693_v12 = vld [vmem:[%s12889_s3 + $0x23c] ss:$2 sm:$0xff]  ;;  %v7695_v50 = vld [vmem:[%s12889_s3 + $0x23d] ss:$2 sm:$0xff] }
 0x55d   : > { %6419 = vst.msk [vmem:[%s12939_s19 + $0x24] sm:$0x7] %vm13656_vm15, %v6410_v1  ;;  %v6472_v45 = vsel %vm13281_vm9, %v6470_v6, %v6471_v36  ;;  %v6567_v25 = vadd.f32 %v6565_v39, %v12901_v53  ;;  %v6575_v34 = vadd.f32 %v6573_v61, %v12901_v53  ;;  %v6583_v0 = vadd.f32 %v6581_v44, %v12901_v53  ;;  %v7697_v1 = vld [vmem:[%s12889_s3 + $0x256] ss:$2 sm:$0xff] }
 0x55e   : > { %6479 = vst.msk [vmem:[%s12939_s19 + $0x28] sm:$0xf] %vm2557_vm8, %v6472_v45  ;;  %v6535_v49 = vshrl.u32 %v7728_v48, 16  ;;  %v6538_v62 = vshll.u32 %v7728_v48, 16  ;;  %v6523_v11 = vmax.f32 %v6519_v27, %v6521_v5  ;;  %v6591_v51 = vadd.f32 %v6589_v35, %v12901_v53  ;;  %v7699_v48 = vld [vmem:[%s12889_s3 + $0x257] ss:$2 sm:$0xff] }
 0x55f   : > { %v6593_v58 = vmax.f32 %v6567_v25, %v6575_v34  ;;  %v6617_v40 = vmul.f32 %v7673_v38, %v12894_v28  ;;  %v6625_v36 = vmul.f32 %v7675_v55, %v12894_v28  ;;  %v6633_v17 = vmul.f32 %v7677_v10, %v12894_v28  ;;  %v7680_v27 = vld [vmem:[%s12889_s3 + $0x1ff] ss:$2 sm:$0x1f]  ;;  %v7694_v10 = vld [vmem:[%s12889_s3 + $0x24c] ss:$2 sm:$0x1f] }
 0x560   : > { %v6537_v42 = vrot.slane %v6535_v49, 6  ;;  %v6540_v54 = vrot.slane %v6538_v62, 7  ;;  %v6525_v19 = vmax.f32 %v6523_v11, 0.0  ;;  %v6595_v63 = vmax.f32 %v6583_v0, %v6591_v51 }
 0x561   : > { %vm13657_vm7 = vcmask 257025   ;;  %v6619_v47 = vadd.f32 %v6617_v40, %v12901_v53  ;;  %v6627_v24 = vadd.f32 %v6625_v36, %v12901_v53  ;;  %v6635_v31 = vadd.f32 %v6633_v17, %v12901_v53  ;;  %v7698_v40 = vld [vmem:[%s12889_s3 + $0x266] ss:$2 sm:$0x1f] }
 0x562   : > { %vm13317_vm9 = vmand %vm13657_vm7, %vm6555_vm13  ;;  %v6641_v46 = vmul.f32 %v7679_v8, %v12894_v28  ;;  %v6541_v2 = vor.u32 %v6540_v54, %v6537_v42  ;;  %v7729_v41 = vpack.c.bf16 %v6525_v19, %v6525_v19  ;;  %v6597_v26 = vmax.f32 %v6593_v58, %v6595_v63  ;;  %v7696_v58 = vld [vmem:[%s12889_s3 + $0x24d] ss:$2 sm:$0x1f] }
 0x563   : > { %v6618_v23 = vmul.f32 %v7674_v7, %v12894_v28  ;;  %v6645_v29 = vmax.f32 %v6619_v47, %v6627_v24  ;;  %v6626_v15 = vmul.f32 %v7676_v9, %v12894_v28  ;;  %v6634_v37 = vmul.f32 %v7678_v20, %v12894_v28  ;;  %v7700_v42 = vld [vmem:[%s12889_s3 + $0x267] ss:$2 sm:$0x1f] }
 0x564   : > { %v6643_v16 = vadd.f32 %v6641_v46, %v12901_v53  ;;  %v6558_v4 = vsel %vm13317_vm9, %v6541_v2, %v6557_v30  ;;  %v6542_v14 = vrot.slane %v6541_v2, 4  ;;  %v6544_v60 = vshrl.u32 %v7729_v41, 16 }
 0x565   : > { %v6547_v3 = vshll.u32 %v7729_v41, 16  ;;  %6559 = vst [vmem:[%s12939_s19 + $0x2c] sm:$0xe] %v6558_v4  ;;  %v6599_v6 = vmax.f32 %v6597_v26, 0.0  ;;  %v6620_v61 = vadd.f32 %v6618_v23, %v12901_v53  ;;  %v6628_v44 = vadd.f32 %v6626_v15, %v12901_v53 }
 0x566   : > { %v6647_v39 = vmax.f32 %v6635_v31, %v6643_v16  ;;  %v6546_v5 = vrot.slane %v6544_v60, 6  ;;  %v6636_v38 = vadd.f32 %v6634_v37, %v12901_v53  ;;  %v6642_v55 = vmul.f32 %v7680_v27, %v12894_v28  ;;  %v7703_v31 = vld [vmem:[%s12889_s3 + $0x270] ss:$2 sm:$0xff]  ;;  %v7705_v37 = vld [vmem:[%s12889_s3 + $0x271] ss:$2 sm:$0xff] }
 0x567   : > { %v6549_v35 = vrot.slane %v6547_v3, 7  ;;  %vm13660_vm14 = vsmask.f32 1280  ;;  %v7730_v25 = vpack.c.bf16 %v6599_v6, %v6599_v6  ;;  %v6646_v0 = vmax.f32 %v6620_v61, %v6628_v44  ;;  %v7707_v60 = vld [vmem:[%s12889_s3 + $0x28a] ss:$2 sm:$0xff] }
 0x568   : > { %vm13345_vm12 = vmor %vm13660_vm14, %vm6532_vm1  ;;  %v6649_v34 = vmax.f32 %v6645_v29, %v6647_v39  ;;  %v6746_v49 = vmul.f32 %v7693_v12, %v12894_v28  ;;  %v6644_v11 = vadd.f32 %v6642_v55, %v12901_v53  ;;  %v6754_v51 = vmul.f32 %v7695_v50, %v12894_v28  ;;  %v7709_v3 = vld [vmem:[%s12889_s3 + $0x28b] ss:$2 sm:$0xff]  ;;  %v6681_v44 = vld [vmem:[%s12939_s19 + $0x38] sm:$0xc] }
 0x569   : > { %v6550_v62 = vor.u32 %v6549_v35, %v6546_v5  ;;  %v6762_v8 = vmul.f32 %v7697_v1, %v12894_v28  ;;  %6609 = vst.msk [vmem:[%s12939_s19 + $0x34] sm:$0xf] %vm2557_vm8, %v7730_v25  ;;  %v6770_v7 = vmul.f32 %v7699_v48, %v12894_v28  ;;  %v6747_v9 = vmul.f32 %v7694_v10, %v12894_v28 }
 0x56a   : > { %v6651_v36 = vmax.f32 %v6649_v34, 0.0  ;;  %v6748_v17 = vadd.f32 %v6746_v49, %v12901_v53  ;;  %v6648_v19 = vmax.f32 %v6636_v38, %v6644_v11  ;;  %v6756_v63 = vadd.f32 %v6754_v51, %v12901_v53 }
 0x56b   : > { %v6551_v54 = vsel %vm13345_vm12, %v6542_v14, %v6550_v62  ;;  %v6764_v20 = vadd.f32 %v6762_v8, %v12901_v53  ;;  %v6772_v30 = vadd.f32 %v6770_v7, %v12901_v53  ;;  %v6749_v47 = vadd.f32 %v6747_v9, %v12901_v53  ;;  %v7704_v62 = vld [vmem:[%s12889_s3 + $0x280] ss:$2 sm:$0x1f] }
 0x56c   : > { %6560 = vst.msk [vmem:[%s12939_s19 + $0x30] sm:$0xf] %vm2557_vm8, %v6551_v54  ;;  %v7732_v13 = vpack.c.bf16 %v6651_v36, %v6651_v36  ;;  %v6755_v24 = vmul.f32 %v7696_v58, %v12894_v28  ;;  %v6650_v46 = vmax.f32 %v6646_v0, %v6648_v19  ;;  %v6774_v2 = vmax.f32 %v6748_v17, %v6756_v63 }
 0x56d   : > { %v6763_v41 = vmul.f32 %v7698_v40, %v12894_v28  ;;  %v6771_v26 = vmul.f32 %v7700_v42, %v12894_v28  ;;  %v6776_v29 = vmax.f32 %v6764_v20, %v6772_v30  ;;  %v6819_v14 = vmul.f32 %v7703_v31, %v12894_v28  ;;  %v7706_v40 = vld [vmem:[%s12889_s3 + $0x281] ss:$2 sm:$0x1f]  ;;  %v7708_v42 = vld [vmem:[%s12889_s3 + $0x29a] ss:$2 sm:$0x1f] }
 0x56e   : > { %v6660_v23 = vshrl.u32 %v7732_v13, 16  ;;  %v6663_v16 = vshll.u32 %v7732_v13, 16  ;;  %v6757_v15 = vadd.f32 %v6755_v24, %v12901_v53  ;;  %v6652_v27 = vmax.f32 %v6650_v46, 0.0  ;;  %v6810_v13 = vld [vmem:[%s12939_s19 + $0x44] sm:$0x8] }
 0x56f   : > { %v6765_v12 = vadd.f32 %v6763_v41, %v12901_v53  ;;  %v6773_v4 = vadd.f32 %v6771_v26, %v12901_v53  ;;  %v6778_v39 = vmax.f32 %v6774_v2, %v6776_v29  ;;  %v6821_v5 = vadd.f32 %v6819_v14, %v12901_v53  ;;  %v7710_v26 = vld [vmem:[%s12889_s3 + $0x29b] ss:$2 sm:$0x1f] }
 0x570   : > { %v6662_v50 = vrot.slane %v6660_v23, 5  ;;  %v6665_v6 = vrot.slane %v6663_v16, 6  ;;  %v6775_v61 = vmax.f32 %v6749_v47, %v6757_v15  ;;  %v7733_v1 = vpack.c.bf16 %v6652_v27, %v6652_v27 }
 0x571   : > { %v6777_v48 = vmax.f32 %v6765_v12, %v6773_v4  ;;  %v6827_v35 = vmul.f32 %v7705_v37, %v12894_v28  ;;  %v6780_v55 = vmax.f32 %v6778_v39, 0.0  ;;  %v6835_v10 = vmul.f32 %v7707_v60, %v12894_v28 }
 0x572   : > { %v6666_v38 = vor.u32 %v6665_v6, %v6662_v50  ;;  %v6843_v45 = vmul.f32 %v7709_v3, %v12894_v28  ;;  %v6669_v25 = vshrl.u32 %v7733_v1, 16  ;;  %v6672_v34 = vshll.u32 %v7733_v1, 16 }
 0x573   : > { %v6779_v0 = vmax.f32 %v6775_v61, %v6777_v48  ;;  %v6829_v49 = vadd.f32 %v6827_v35, %v12901_v53  ;;  %v7736_v8 = vpack.c.bf16 %v6780_v55, %v6780_v55  ;;  %v6837_v58 = vadd.f32 %v6835_v10, %v12901_v53 }
 0x574   : > { %v6682_v11 = vsel %vm13141_vm3, %v6666_v38, %v6681_v44  ;;  %v6667_v51 = vrot.slane %v6666_v38, 4  ;;  %v6671_v36 = vrot.slane %v6669_v25, 5  ;;  %v6674_v17 = vrot.slane %v6672_v34, 6 }
 0x575   : > { %6683 = vst [vmem:[%s12939_s19 + $0x38] sm:$0xc] %v6682_v11  ;;  %v6781_v7 = vmax.f32 %v6779_v0, 0.0  ;;  %v6845_v9 = vadd.f32 %v6843_v45, %v12901_v53  ;;  %v6789_v54 = vshll.u32 %v7736_v8, 16  ;;  %v6792_v19 = vshrl.u32 %v7736_v8, 16 }
 0x576   : > { %v6847_v63 = vmax.f32 %v6821_v5, %v6829_v49  ;;  %v6820_v43 = vmul.f32 %v7704_v62, %v12894_v28  ;;  %v6675_v20 = vor.u32 %v6674_v17, %v6671_v36  ;;  %v6828_v24 = vmul.f32 %v7706_v40, %v12894_v28  ;;  %v6871_v45 = vld [vmem:[%s12939_s19 + $0x54] sm:$0x1] }
 0x577   : > { %v7737_v30 = vpack.c.bf16 %v6781_v7, %v6781_v7  ;;  %v6849_v47 = vmax.f32 %v6837_v58, %v6845_v9  ;;  %v6791_v31 = vrot.slane %v6789_v54, 5  ;;  %v6794_v46 = vrot.slane %v6792_v19, 4 }
 0x578   : > { %v6822_v2 = vadd.f32 %v6820_v43, %v12901_v53  ;;  %v6836_v41 = vmul.f32 %v7708_v42, %v12894_v28  ;;  %v6676_v23 = vsel %vm13160_vm2, %v6667_v51, %v6675_v20  ;;  %v6677_v16 = vrot.slane %v6675_v20, 4 }
 0x579   : > { %v6798_v29 = vshll.u32 %v7737_v30, 16  ;;  %v6802_v15 = vshrl.u32 %v7737_v30, 16  ;;  %6684 = vst.msk [vmem:[%s12939_s19 + $0x3c] sm:$0xf] %vm2557_vm8, %v6676_v23  ;;  %v6811_v37 = vsel %vm13167_vm10, %v6791_v31, %v6810_v13  ;;  %v6795_v27 = vor.u32 %v6794_v46, %v6791_v31 }
 0x57a   : > { %v6851_v12 = vmax.f32 %v6847_v63, %v6849_v47  ;;  %v6830_v4 = vadd.f32 %v6828_v24, %v12901_v53  ;;  %vm13663_vm3 = vcmask 253952   ;;  %6812 = vst [vmem:[%s12939_s19 + $0x44] sm:$0x8] %v6811_v37  ;;  %v6838_v60 = vadd.f32 %v6836_v41, %v12901_v53 }
 0x57b   : > { %6685 = vst.msk [vmem:[%s12939_s19 + $0x40] sm:$0x1] %vm13663_vm3, %v6677_v16  ;;  %v6800_v14 = vrot.slane %v6798_v29, 5  ;;  %v6804_v22 = vrot.slane %v6802_v15, 4  ;;  %v6844_v3 = vmul.f32 %v7710_v26, %v12894_v28  ;;  %v6796_v50 = vrot.slane %v6795_v27, 4 }
 0x57c   : > { %v6853_v6 = vmax.f32 %v6851_v12, 0.0  ;;  %v6848_v61 = vmax.f32 %v6822_v2, %v6830_v4  ;;  %vm13664_vm10 = vcmask 254976   ;;  %vm13665_vm2 = vcmask 257026  }
 0x57d   : > { %v6805_v33 = vor.u32 %v6804_v22, %v6800_v14  ;;  %v6846_v39 = vadd.f32 %v6844_v3, %v12901_v53  ;;  %v6801_v44 = vsel %vm13191_vm0, %v6796_v50, %v6800_v14 }
 0x57e   : > { %v7738_v1 = vpack.c.bf16 %v6853_v6, %v6853_v6  ;;  %6813 = vst.msk [vmem:[%s12939_s19 + $0x48] sm:$0xf] %vm2557_vm8, %v6801_v44 }
 0x57f   : > { %v6806_v48 = vrot.slane %v6805_v33, 4  ;;  %v6850_v5 = vmax.f32 %v6838_v60, %v6846_v39 }
 0x580   : > { %v6861_v35 = vrot.slane %v7738_v1, 6 }
 0x581   : > { %6814 = vst.msk [vmem:[%s12939_s19 + $0x4c] sm:$0x3] %vm13664_vm10, %v6806_v48  ;;  %v6852_v28 = vmax.f32 %v6848_v61, %v6850_v5 }
 0x582   : > { %6869 = vst.msk [vmem:[%s12939_s19 + $0x4c] sm:$0xc] %vm13665_vm2, %v6861_v35  ;;  %v6862_v53 = vrot.slane %v6861_v35, 4 }
 0x583   : > { %v6854_v38 = vmax.f32 %v6852_v28, 0.0 }
 0x585   : > { %v7739_v55 = vpack.c.bf16 %v6854_v38, %v6854_v38 }
 0x587   : > { %v6863_v10 = vrot.slane %v7739_v55, 6 }
 0x588   :  { %5988 = sbr.rel (!%p5986_p0) target bundleno = 1284 (0x504), region = 161 }
 0x589   : > { %v6864_v32 = vsel %vm13226_vm4, %v6862_v53, %v6863_v10  ;;  %v6865_v25 = vrot.slane %v6863_v10, 4 }
 0x58a   : > { %6870 = vst.msk [vmem:[%s12939_s19 + $0x50] sm:$0xf] %vm2557_vm8, %v6864_v32 }
 0x58b   : > { %v6872_v34 = vsel %vm13021_vm6, %v6865_v25, %v6871_v45 }
 0x58c   : > { %6873 = vst [vmem:[%s12939_s19 + $0x54] sm:$0x1] %v6872_v34 }

</bundles_post_ra>
